<compile_context>
chip_gen: v6e
topology: v6e:2x2x1
jax: 0.10.0
libtpu: 0.0.40
codegen_flags: <defaults>
</compile_context>

<pallas_src>
import math
from functools import partial

import jax
import jax.numpy as jnp
from jax.experimental import pallas as pl
from jax.experimental.pallas import tpu as pltpu

# -----------------------------------------------------------------------------
# Small hyper-parameters consistent with DecoderSentenceRNN.__init__
# -----------------------------------------------------------------------------
VOCAB = 48        # vocab_size
MAX_LEN = 8       # max_len  -> decode loop runs MAX_LEN - 1 = 7 steps
DIM_H = 32        # dim_hidden (bidirectional=False)
DIM_W = 16        # dim_word
N_LAYERS = 2
CHUNK = 8         # ON-LSTM chunk size (DIM_H % CHUNK == 0)
N_CHUNK = DIM_H // CHUNK
GATES = 4 * DIM_H + 2 * N_CHUNK   # 136 gate columns per cell
STEPS = MAX_LEN - 1
VPAD = 128        # lane-dense padded vocab width for the output store

BATCH = 2
ENC_SEQ = 6       # encoder_outputs_parse sequence length

# ---- packed weight-slab layout (all blocks start on 128-lane boundaries) ----
GB = 256                      # padded width of each 136-wide gate block
O_W0VID = 0 * GB              # (H, G) video-context columns of w_ih0
O_W0H = 1 * GB                # (H, G) layer-0 recurrent
O_W0C = 2 * GB                # (H, G) layer-0 control
O_W1I = 3 * GB                # (H, G) layer-1 input (h0)
O_W1H = 4 * GB                # (H, G) layer-1 recurrent
O_W1C = 5 * GB                # (H, G) layer-1 control
O_WAH0 = 6 * GB               # (H, H) attention hidden proj (h0 half)
O_WAH1 = 6 * GB + 128         # (H, H) attention hidden proj (h1 half)
O_WENC = 6 * GB + 256         # (H, H) attention encoder proj
O_WOUT = 6 * GB + 384         # (H, 128) padded output projection
WH_COLS = 6 * GB + 512        # = 2048

# ---- packed small-slab layout (8 rows x 256 lanes) --------------------------
ROW_UE = 0                    # rows 0..N_CHUNK-1 : UE_ext (nc, H+1)
ROW_B1 = N_CHUNK              # fused layer-1 bias (1, G)
ROW_BATT = N_CHUNK + 1        # attention bias (1, H)
ROW_W2 = N_CHUNK + 2          # attention score vector (1, H)
ROW_BOUT = N_CHUNK + 3        # padded output bias (1, 128), pad lanes = -1e9
SM_COLS = 256


# -----------------------------------------------------------------------------
# Pallas kernel: single invocation, fully unrolled decode loop
# -----------------------------------------------------------------------------
def _decoder_kernel(tgt_ref,   # SMEM (B*steps,) int32 target ids (scalar prefetch)
                    ew0_ref,   # (V, 1, G)  embedding @ W0_word + b0 (reordered)
                    ctx_ref,   # (B, H)     video context
                    enc_ref,   # (B, S, H)  encoder_outputs_parse
                    wh_ref,    # (H, 2048)  packed weight slab
                    sm_ref,    # (8, 256)   packed small slab
                    out_ref):  # (B*steps, 128) batch-major padded log-probs
    B, S, H = enc_ref.shape
    G = ew0_ref.shape[2]
    nc = (G - 4 * H) // 2
    steps = out_ref.shape[0] // B
    VP = out_ref.shape[1]

    def dot(a, b):
        return jnp.dot(a, b, preferred_element_type=jnp.float32)

    # ---- prologue: time-invariant terms (one MXU pass each, outside loop) ---
    ctx_vid = dot(ctx_ref[...], wh_ref[:, O_W0VID:O_W0VID + G])          # (B, G)
    enc_flat = enc_ref[...].reshape(B * S, H)
    enc_proj = (dot(enc_flat, wh_ref[:, O_WENC:O_WENC + H])
                + sm_ref[ROW_BATT:ROW_BATT + 1, 0:H]).reshape(B, S, H)   # b_att1 folded

    def onlstm_gates(g, c_prev):
        # one EUP sigmoid issue for the three contiguous sigmoid gates
        sig = jax.nn.sigmoid(g[:, 0:3 * H])
        og = sig[:, 0:H]
        ig = sig[:, H:2 * H]
        fg = sig[:, 2 * H:3 * H]
        cg = jnp.tanh(g[:, 3 * H:4 * H])
        # joint master-gate cumax: one max/exp over (2B, nc); cumsum, chunk
        # expansion AND the softmax denominator come from one MXU pass.
        p = g[:, 4 * H:4 * H + 2 * nc]                                   # (B, 2nc)
        pz = jnp.concatenate([p[:, 0:nc], p[:, nc:2 * nc]], axis=0)      # (2B, nc)
        pz = jnp.exp(pz - jnp.max(pz, axis=-1, keepdims=True))
        r = dot(pz, sm_ref[ROW_UE:ROW_UE + nc, 0:H + 1])                 # (2B, H+1)
        cum = r[:, 0:H] / r[:, H:H + 1]                                  # expanded cumax
        cin_e = 1.0 - cum[0:B, :]
        cf_e = cum[B:2 * B, :]
        ov = cf_e * cin_e
        f_hat = fg * ov + (cf_e - ov)
        i_hat = ig * ov + (cin_e - ov)
        cy = f_hat * c_prev + i_hat * cg
        return og * jnp.tanh(cy), cy

    h0 = jnp.zeros((B, H), jnp.float32)
    c0 = jnp.zeros((B, H), jnp.float32)
    h1 = jnp.zeros((B, H), jnp.float32)
    c1 = jnp.zeros((B, H), jnp.float32)

    h1_rows = []
    for t in range(steps):                     # static & tiny -> fully unrolled
        # ---- additive attention over encoder_outputs_parse (batched) -------
        hid_proj = (dot(h0, wh_ref[:, O_WAH0:O_WAH0 + H])
                    + dot(h1, wh_ref[:, O_WAH1:O_WAH1 + H]))             # (B, H)
        z = jnp.tanh(enc_proj + hid_proj[:, None, :])                    # (B, S, H)
        e = jnp.sum(z * sm_ref[ROW_W2:ROW_W2 + 1, 0:H][None, :, :], axis=-1)
        e = jnp.exp(e - jnp.max(e, axis=-1, keepdims=True))
        alpha = e / jnp.sum(e, axis=-1, keepdims=True)                   # (B, S)
        ctrl = jnp.sum(alpha[:, :, None] * enc_ref[...], axis=1)         # (B, H)

        # ---- layer 0: word/video/bias terms precomputed; only [h0 | ctrl]
        #      projections stay on the recurrent critical path ---------------
        base = jnp.concatenate(
            [ew0_ref[tgt_ref[b * steps + t]] for b in range(B)], axis=0)  # (B, G)
        g0 = (base + ctx_vid
              + dot(h0, wh_ref[:, O_W0H:O_W0H + G])
              + dot(ctrl, wh_ref[:, O_W0C:O_W0C + G]))
        h0, c0 = onlstm_gates(g0, c0)

        # ---- layer 1 --------------------------------------------------------
        g1 = (sm_ref[ROW_B1:ROW_B1 + 1, 0:G]
              + dot(h0, wh_ref[:, O_W1I:O_W1I + G])
              + dot(h1, wh_ref[:, O_W1H:O_W1H + G])
              + dot(ctrl, wh_ref[:, O_W1C:O_W1C + G]))
        h1, c1 = onlstm_gates(g1, c1)
        h1_rows.append(h1)

    # ---- batch-major hidden slab -> lane-dense (B*steps, 128) store ---------
    h_slab = jnp.concatenate([h1_rows[t][b:b + 1, :]
                              for b in range(B) for t in range(steps)], axis=0)
    logits = (dot(h_slab, wh_ref[:, O_WOUT:O_WOUT + VP])
              + sm_ref[ROW_BOUT:ROW_BOUT + 1, 0:VP])    # pad lanes get -1e9 bias
    mx = jnp.max(logits, axis=-1, keepdims=True)
    sh = logits - mx
    out_ref[...] = sh - jnp.log(jnp.sum(jnp.exp(sh), axis=-1, keepdims=True))


# -----------------------------------------------------------------------------
# One-time (init) weight fusion / reordering / packing
# -----------------------------------------------------------------------------
def prepare_kernel_params(params):
    HI = jax.lax.Precision.HIGHEST
    H, W, nc, G, V = DIM_H, DIM_W, N_CHUNK, GATES, VOCAB

    def reorder(w):
        # old gate order: [out | cell | in | forget | masters]
        # new gate order: [out | in | forget | cell | masters]  (sigmoids first)
        return jnp.concatenate([w[:, 0:H], w[:, 2 * H:3 * H], w[:, 3 * H:4 * H],
                                w[:, H:2 * H], w[:, 4 * H:]], axis=1)

    w_ih0 = reorder(params["w_ih0"])
    W0_word, W0_vid = w_ih0[:W], w_ih0[W:]
    W0_h = reorder(params["w_hh0"])
    W0_c = reorder(params["w_ch0"])
    b0 = reorder(params["b_ih0"] + params["b_hh0"] + params["b_ch0"])
    W1_i = reorder(params["w_ih1"])
    W1_h = reorder(params["w_hh1"])
    W1_c = reorder(params["w_ch1"])
    b1 = reorder(params["b_ih1"] + params["b_hh1"] + params["b_ch1"])

    # embedding lookup + word projection + fused bias -> single (V, 1, G) table
    ew0 = (jnp.dot(params["embedding"], W0_word, precision=HI) + b0)[:, None, :]

    Wah0 = params["w_att_hid"][:H]
    Wah1 = params["w_att_hid"][H:]
    Wenc = params["w_att_enc"]

    w_out_pad = jnp.zeros((H, VPAD), jnp.float32).at[:, :V].set(params["w_out"])
    b_out_pad = jnp.full((1, VPAD), -1e9, jnp.float32).at[:, :V].set(params["b_out"])

    # fused cumsum (upper-tri) + chunk-expansion, with an extra ones column so
    # the master-gate softmax denominator falls out of the same matmul.
    UE = jnp.repeat(jnp.triu(jnp.ones((nc, nc), jnp.float32)), CHUNK, axis=1)
    UE_ext = jnp.concatenate([UE, jnp.ones((nc, 1), jnp.float32)], axis=1)

    def padc(w, width):
        return jnp.pad(w, ((0, 0), (0, width - w.shape[1])))

    wh = jnp.concatenate(
        [padc(W0_vid, GB), padc(W0_h, GB), padc(W0_c, GB),
         padc(W1_i, GB), padc(W1_h, GB), padc(W1_c, GB),
         padc(Wah0, 128), padc(Wah1, 128), padc(Wenc, 128), w_out_pad],
        axis=1)                                                   # (H, 2048)
    assert wh.shape == (H, WH_COLS)

    sm = jnp.concatenate(
        [padc(UE_ext, SM_COLS), padc(b1, SM_COLS),
         padc(params["b_att1"], SM_COLS), padc(params["w_att2"], SM_COLS),
         padc(b_out_pad, SM_COLS)], axis=0)                       # (8, 256)
    assert sm.shape == (8, SM_COLS)

    return {"ew0": ew0, "wh": wh, "sm": sm}


# -----------------------------------------------------------------------------
# Per-call wrapper (mode='train'): only id flattening + one pallas_call +
# reshape/slice of the padded output remain here.
# -----------------------------------------------------------------------------
@jax.jit
def decoder_sentence_rnn_forward(kparams, targets, context, encoder_outputs_parse):
    B, T = targets.shape
    steps = T - 1
    tgt = targets[:, :steps].astype(jnp.int32).reshape(B * steps)   # b-major ids

    def fullspec(shape):
        nd = len(shape)
        return pl.BlockSpec(shape, lambda i, t, nd=nd: (0,) * nd)

    out = pl.pallas_call(
        _decoder_kernel,
        out_shape=jax.ShapeDtypeStruct((B * steps, VPAD), jnp.float32),
        grid_spec=pltpu.PrefetchScalarGridSpec(
            num_scalar_prefetch=1,
            grid=(1,),
            in_specs=[fullspec(kparams["ew0"].shape),
                      fullspec(context.shape),
                      fullspec(encoder_outputs_parse.shape),
                      fullspec(kparams["wh"].shape),
                      fullspec(kparams["sm"].shape)],
            out_specs=pl.BlockSpec((B * steps, VPAD), lambda i, t: (0, 0)),
        ),
        compiler_params=pltpu.CompilerParams(
            dimension_semantics=("arbitrary",)),
    )(tgt, kparams["ew0"], context, encoder_outputs_parse,
      kparams["wh"], kparams["sm"])

    # (B*steps, 128) batch-major padded -> (B, steps, V)
    return out.reshape(B, steps, VPAD)[:, :, :VOCAB]


# -----------------------------------------------------------------------------
# Pure-JAX reference (same math, no Pallas) for correctness checking
# -----------------------------------------------------------------------------
def _reference_forward(params, targets, context, enc):
    HI = jax.lax.Precision.HIGHEST
    mm = lambda a, b: jnp.dot(a, b, precision=HI)
    B, T = targets.shape
    H = DIM_H
    nc, ch = N_CHUNK, CHUNK
    emb = params["embedding"][targets]
    h = [jnp.zeros((B, H), jnp.float32) for _ in range(2)]
    c = [jnp.zeros((B, H), jnp.float32) for _ in range(2)]

    def cumsoftmax(x):
        return jnp.cumsum(jax.nn.softmax(x, axis=-1), axis=-1)

    def cell(x, ctrl, hp, cp, wi, bi, wh, bh, wc, bc):
        g = mm(x, wi) + bi + mm(hp, wh) + bh + mm(ctrl, wc) + bc
        og = jax.nn.sigmoid(g[:, 0:H])
        cg = jnp.tanh(g[:, H:2 * H])
        ig = jax.nn.sigmoid(g[:, 2 * H:3 * H])
        fg = jax.nn.sigmoid(g[:, 3 * H:4 * H])
        cin = 1.0 - cumsoftmax(g[:, 4 * H:4 * H + nc])
        cf = cumsoftmax(g[:, 4 * H + nc:4 * H + 2 * nc])
        cin_e = jnp.repeat(cin, ch, axis=1)
        cf_e = jnp.repeat(cf, ch, axis=1)
        ov = cf_e * cin_e
        fg = fg * ov + (cf_e - ov)
        ig = ig * ov + (cin_e - ov)
        cy = fg * cp + ig * cg
        return og * jnp.tanh(cy), cy

    outs = []
    for t in range(T - 1):
        att_h = jnp.concatenate([h[0], h[1]], -1)
        hid_proj = mm(att_h, params["w_att_hid"]) + params["b_att1"]
        z = jnp.tanh(jnp.einsum("bsh,hk->bsk", enc, params["w_att_enc"],
                                precision=HI) + hid_proj[:, None, :])
        e = jnp.sum(z * params["w_att2"][None, :, :], axis=-1)
        a = jax.nn.softmax(e, axis=-1)
        ctx_parse = jnp.einsum("bs,bsh->bh", a, enc, precision=HI)
        dec_in = jnp.concatenate([emb[:, t, :], context], -1)
        h0n, c0n = cell(dec_in, ctx_parse, h[0], c[0], params["w_ih0"],
                        params["b_ih0"], params["w_hh0"], params["b_hh0"],
                        params["w_ch0"], params["b_ch0"])
        h1n, c1n = cell(h0n, ctx_parse, h[1], c[1], params["w_ih1"],
                        params["b_ih1"], params["w_hh1"], params["b_hh1"],
                        params["w_ch1"], params["b_ch1"])
        logits = mm(h1n, params["w_out"]) + params["b_out"]
        outs.append(jax.nn.log_softmax(logits, axis=-1))
        h = [h0n, h1n]
        c = [c0n, c1n]
    return jnp.stack(outs, axis=1)


# -----------------------------------------------------------------------------
# Deterministic parameter init (shapes follow the module's __init__)
# -----------------------------------------------------------------------------
def init_params(key):
    ks = jax.random.split(key, 20)
    G = GATES

    def nrm(k, shape, scale):
        return (scale * jax.random.normal(k, shape)).astype(jnp.float32)

    return {
        "embedding": nrm(ks[0], (VOCAB, DIM_W), 0.5),
        "w_att_enc": nrm(ks[1], (DIM_H, DIM_H), 0.2),
        "w_att_hid": nrm(ks[2], (N_LAYERS * DIM_H, DIM_H), 0.2),
        "b_att1":    nrm(ks[3], (1, DIM_H), 0.1),
        "w_att2":    nrm(ks[4], (1, DIM_H), 0.3),
        "w_ih0": nrm(ks[5], (DIM_W + DIM_H, G), 0.15),
        "b_ih0": nrm(ks[6], (1, G), 0.05),
        "w_hh0": nrm(ks[7], (DIM_H, G), 0.15),
        "b_hh0": nrm(ks[8], (1, G), 0.05),
        "w_ch0": nrm(ks[9], (DIM_H, G), 0.15),
        "b_ch0": nrm(ks[10], (1, G), 0.05),
        "w_ih1": nrm(ks[11], (DIM_H, G), 0.15),
        "b_ih1": nrm(ks[12], (1, G), 0.05),
        "w_hh1": nrm(ks[13], (DIM_H, G), 0.15),
        "b_hh1": nrm(ks[14], (1, G), 0.05),
        "w_ch1": nrm(ks[15], (DIM_H, G), 0.15),
        "b_ch1": nrm(ks[16], (1, G), 0.05),
        "w_out": nrm(ks[17], (DIM_H, VOCAB), math.sqrt(2.0 / (DIM_H + VOCAB))),  # xavier_normal_
        "b_out": jnp.zeros((1, VOCAB), jnp.float32),
    }


if __name__ == "__main__":
    key = jax.random.PRNGKey(0)
    kp, kt, kc, ke = jax.random.split(key, 4)
    params = init_params(kp)
    kparams = prepare_kernel_params(params)   # one-time weight fusion/packing

    targets = jax.random.randint(kt, (BATCH, MAX_LEN), 0, VOCAB)                      # (B, max_len)
    context = (0.5 * jax.random.normal(kc, (BATCH, DIM_H))).astype(jnp.float32)       # (B, H)
    enc_parse = (0.5 * jax.random.normal(ke, (BATCH, ENC_SEQ, DIM_H))).astype(jnp.float32)  # (B, S, H)
    # encoder_hidden_parse is unused on the ON-LSTM path (decoder starts from zeros).

    seq_logprobs = decoder_sentence_rnn_forward(kparams, targets, context, enc_parse)
    seq_logprobs = jax.block_until_ready(seq_logprobs)

    ref = _reference_forward(params, targets, context, enc_parse)
    assert seq_logprobs.shape == (BATCH, MAX_LEN - 1, VOCAB)
    max_diff = float(jnp.max(jnp.abs(seq_logprobs - ref)))
    # kernel matmuls run at Mosaic's default f32 precision vs HIGHEST reference
    assert max_diff < 2e-3, f"kernel/reference mismatch: {max_diff}"
    print("KERNEL_OK")
</pallas_src>

<mosaic_0001>
module attributes {stable_mosaic.version = 11 : i64} {
  func.func @_decoder_kernel(%arg0: i32, %arg1: memref<14xi32, #tpu.memory_space<smem>>, %arg2: memref<48x1x136xf32, #tpu.memory_space<vmem>>, %arg3: memref<2x32xf32, #tpu.memory_space<vmem>>, %arg4: memref<2x6x32xf32, #tpu.memory_space<vmem>>, %arg5: memref<32x2048xf32, #tpu.memory_space<vmem>>, %arg6: memref<8x256xf32, #tpu.memory_space<vmem>>, %arg7: memref<14x128xf32, #tpu.memory_space<vmem>>) attributes {dimension_semantics = [#tpu.dimension_semantics<arbitrary>], iteration_bounds = array<i64: 1>, scalar_prefetch = 1 : i64, scratch_operands = 0 : i64, tpu.core_type = #tpu.core_type<tc>, window_params = [{pipeline_mode = #tpu.pipeline_mode<synchronous>, transform_indices = @transform_0, window_bounds = array<i64: 48, 1, 136>}, {pipeline_mode = #tpu.pipeline_mode<synchronous>, transform_indices = @transform_1, window_bounds = array<i64: 2, 32>}, {pipeline_mode = #tpu.pipeline_mode<synchronous>, transform_indices = @transform_2, window_bounds = array<i64: 2, 6, 32>}, {pipeline_mode = #tpu.pipeline_mode<synchronous>, transform_indices = @transform_3, window_bounds = array<i64: 32, 2048>}, {pipeline_mode = #tpu.pipeline_mode<synchronous>, transform_indices = @transform_4, window_bounds = array<i64: 8, 256>}, {pipeline_mode = #tpu.pipeline_mode<synchronous>, transform_indices = @transform_5, window_bounds = array<i64: 14, 128>}]} {
    %c0 = arith.constant 0 : index
    %c0_0 = arith.constant 0 : index
    %0 = vector.load %arg3[%c0, %c0_0] : memref<2x32xf32, #tpu.memory_space<vmem>>, vector<2x32xf32>
    %c0_1 = arith.constant 0 : index
    %c0_2 = arith.constant 0 : index
    %1 = vector.load %arg5[%c0_1, %c0_2] : memref<32x2048xf32, #tpu.memory_space<vmem>>, vector<32x136xf32>
    %cst = arith.constant dense<0.000000e+00> : vector<2x136xf32>
    %2 = tpu.matmul %0, %1, %cst {dimension_numbers = #tpu.dot_dimension_numbers<[1], [0], [0], [1], [0, 0, 1, 1], [], []>} : vector<2x32xf32>, vector<32x136xf32>, vector<2x136xf32> -> vector<2x136xf32>
    %c0_3 = arith.constant 0 : index
    %c0_4 = arith.constant 0 : index
    %c0_5 = arith.constant 0 : index
    %3 = vector.load %arg4[%c0_3, %c0_4, %c0_5] : memref<2x6x32xf32, #tpu.memory_space<vmem>>, vector<2x6x32xf32>
    %4 = vector.shape_cast %3 : vector<2x6x32xf32> to vector<12x32xf32>
    %c0_6 = arith.constant 0 : index
    %c1792 = arith.constant 1792 : index
    %5 = vector.load %arg5[%c0_6, %c1792] : memref<32x2048xf32, #tpu.memory_space<vmem>>, vector<32x32xf32>
    %cst_7 = arith.constant dense<0.000000e+00> : vector<12x32xf32>
    %6 = tpu.matmul %4, %5, %cst_7 {dimension_numbers = #tpu.dot_dimension_numbers<[1], [0], [0], [1], [0, 0, 1, 1], [], []>} : vector<12x32xf32>, vector<32x32xf32>, vector<12x32xf32> -> vector<12x32xf32>
    %c5 = arith.constant 5 : index
    %c0_8 = arith.constant 0 : index
    %7 = vector.load %arg6[%c5, %c0_8] : memref<8x256xf32, #tpu.memory_space<vmem>>, vector<1x32xf32>
    %8 = vector.broadcast %7 : vector<1x32xf32> to vector<12x32xf32>
    %9 = arith.addf %6, %8 : vector<12x32xf32>
    %10 = vector.shape_cast %9 : vector<12x32xf32> to vector<2x6x32xf32>
    %cst_9 = arith.constant 0.000000e+00 : f32
    %11 = vector.broadcast %cst_9 : f32 to vector<2x32xf32>
    %cst_10 = arith.constant 0.000000e+00 : f32
    %12 = vector.broadcast %cst_10 : f32 to vector<2x32xf32>
    %cst_11 = arith.constant 0.000000e+00 : f32
    %13 = vector.broadcast %cst_11 : f32 to vector<2x32xf32>
    %cst_12 = arith.constant 0.000000e+00 : f32
    %14 = vector.broadcast %cst_12 : f32 to vector<2x32xf32>
    %c0_13 = arith.constant 0 : index
    %c1536 = arith.constant 1536 : index
    %15 = vector.load %arg5[%c0_13, %c1536] : memref<32x2048xf32, #tpu.memory_space<vmem>>, vector<32x32xf32>
    %cst_14 = arith.constant dense<0.000000e+00> : vector<2x32xf32>
    %16 = tpu.matmul %11, %15, %cst_14 {dimension_numbers = #tpu.dot_dimension_numbers<[1], [0], [0], [1], [0, 0, 1, 1], [], []>} : vector<2x32xf32>, vector<32x32xf32>, vector<2x32xf32> -> vector<2x32xf32>
    %c0_15 = arith.constant 0 : index
    %c1664 = arith.constant 1664 : index
    %17 = vector.load %arg5[%c0_15, %c1664] : memref<32x2048xf32, #tpu.memory_space<vmem>>, vector<32x32xf32>
    %cst_16 = arith.constant dense<0.000000e+00> : vector<2x32xf32>
    %18 = tpu.matmul %13, %17, %cst_16 {dimension_numbers = #tpu.dot_dimension_numbers<[1], [0], [0], [1], [0, 0, 1, 1], [], []>} : vector<2x32xf32>, vector<32x32xf32>, vector<2x32xf32> -> vector<2x32xf32>
    %19 = arith.addf %16, %18 : vector<2x32xf32>
    %20 = vector.shape_cast %19 : vector<2x32xf32> to vector<2x1x32xf32>
    %21 = vector.broadcast %20 : vector<2x1x32xf32> to vector<2x6x32xf32>
    %22 = arith.addf %10, %21 : vector<2x6x32xf32>
    %23 = math.tanh %22 : vector<2x6x32xf32>
    %c6 = arith.constant 6 : index
    %c0_17 = arith.constant 0 : index
    %24 = vector.load %arg6[%c6, %c0_17] : memref<8x256xf32, #tpu.memory_space<vmem>>, vector<1x32xf32>
    %25 = vector.shape_cast %24 : vector<1x32xf32> to vector<1x1x32xf32>
    %26 = vector.broadcast %25 : vector<1x1x32xf32> to vector<2x6x32xf32>
    %27 = arith.mulf %23, %26 : vector<2x6x32xf32>
    %cst_18 = arith.constant dense<0.000000e+00> : vector<2x6xf32>
    %28 = vector.multi_reduction <add>, %27, %cst_18 [2] : vector<2x6x32xf32> to vector<2x6xf32>
    %cst_19 = arith.constant dense<0xFF800000> : vector<2xf32>
    %29 = vector.multi_reduction <maximumf>, %28, %cst_19 [1] : vector<2x6xf32> to vector<2xf32>
    %30 = vector.shape_cast %29 : vector<2xf32> to vector<2x1xf32>
    %31 = vector.broadcast %30 : vector<2x1xf32> to vector<2x6xf32>
    %32 = arith.subf %28, %31 : vector<2x6xf32>
    %33 = math.exp %32 : vector<2x6xf32>
    %cst_20 = arith.constant dense<0.000000e+00> : vector<2xf32>
    %34 = vector.multi_reduction <add>, %33, %cst_20 [1] : vector<2x6xf32> to vector<2xf32>
    %35 = vector.shape_cast %34 : vector<2xf32> to vector<2x1xf32>
    %36 = vector.broadcast %35 : vector<2x1xf32> to vector<2x6xf32>
    %37 = arith.divf %33, %36 : vector<2x6xf32>
    %38 = vector.shape_cast %37 : vector<2x6xf32> to vector<2x6x1xf32>
    %c0_21 = arith.constant 0 : index
    %c0_22 = arith.constant 0 : index
    %c0_23 = arith.constant 0 : index
    %39 = vector.load %arg4[%c0_21, %c0_22, %c0_23] : memref<2x6x32xf32, #tpu.memory_space<vmem>>, vector<2x6x32xf32>
    %40 = vector.broadcast %38 : vector<2x6x1xf32> to vector<2x6x32xf32>
    %41 = arith.mulf %40, %39 : vector<2x6x32xf32>
    %cst_24 = arith.constant dense<0.000000e+00> : vector<2x32xf32>
    %42 = vector.multi_reduction <add>, %41, %cst_24 [1] : vector<2x6x32xf32> to vector<2x32xf32>
    %c0_25 = arith.constant 0 : index
    %43 = memref.load %arg1[%c0_25] : memref<14xi32, #tpu.memory_space<smem>>
    %44 = arith.index_cast %43 : i32 to index
    %c0_26 = arith.constant 0 : index
    %c0_27 = arith.constant 0 : index
    %45 = vector.load %arg2[%44, %c0_26, %c0_27] : memref<48x1x136xf32, #tpu.memory_space<vmem>>, vector<1x1x136xf32>
    %46 = vector.shape_cast %45 : vector<1x1x136xf32> to vector<1x136xf32>
    %c7 = arith.constant 7 : index
    %47 = memref.load %arg1[%c7] : memref<14xi32, #tpu.memory_space<smem>>
    %48 = arith.index_cast %47 : i32 to index
    %c0_28 = arith.constant 0 : index
    %c0_29 = arith.constant 0 : index
    %49 = vector.load %arg2[%48, %c0_28, %c0_29] : memref<48x1x136xf32, #tpu.memory_space<vmem>>, vector<1x1x136xf32>
    %50 = vector.shape_cast %49 : vector<1x1x136xf32> to vector<1x136xf32>
    %51 = tpu.concatenate %46, %50 in 0 : vector<1x136xf32>, vector<1x136xf32> -> vector<2x136xf32>
    %52 = arith.addf %51, %2 : vector<2x136xf32>
    %c0_30 = arith.constant 0 : index
    %c256 = arith.constant 256 : index
    %53 = vector.load %arg5[%c0_30, %c256] : memref<32x2048xf32, #tpu.memory_space<vmem>>, vector<32x136xf32>
    %cst_31 = arith.constant dense<0.000000e+00> : vector<2x136xf32>
    %54 = tpu.matmul %11, %53, %cst_31 {dimension_numbers = #tpu.dot_dimension_numbers<[1], [0], [0], [1], [0, 0, 1, 1], [], []>} : vector<2x32xf32>, vector<32x136xf32>, vector<2x136xf32> -> vector<2x136xf32>
    %55 = arith.addf %52, %54 : vector<2x136xf32>
    %c0_32 = arith.constant 0 : index
    %c512 = arith.constant 512 : index
    %56 = vector.load %arg5[%c0_32, %c512] : memref<32x2048xf32, #tpu.memory_space<vmem>>, vector<32x136xf32>
    %cst_33 = arith.constant dense<0.000000e+00> : vector<2x136xf32>
    %57 = tpu.matmul %42, %56, %cst_33 {dimension_numbers = #tpu.dot_dimension_numbers<[1], [0], [0], [1], [0, 0, 1, 1], [], []>} : vector<2x32xf32>, vector<32x136xf32>, vector<2x136xf32> -> vector<2x136xf32>
    %58 = arith.addf %55, %57 : vector<2x136xf32>
    %59 = vector.extract_strided_slice %58 {offsets = [0, 0], sizes = [2, 96], strides = [1, 1]} : vector<2x136xf32> to vector<2x96xf32>
    %60 = arith.negf %59 : vector<2x96xf32>
    %61 = math.exp %60 : vector<2x96xf32>
    %cst_34 = arith.constant 1.000000e+00 : f32
    %62 = vector.broadcast %cst_34 : f32 to vector<2x96xf32>
    %63 = arith.addf %62, %61 : vector<2x96xf32>
    %64 = arith.divf %62, %63 : vector<2x96xf32>
    %65 = vector.extract_strided_slice %64 {offsets = [0, 0], sizes = [2, 32], strides = [1, 1]} : vector<2x96xf32> to vector<2x32xf32>
    %66 = vector.extract_strided_slice %64 {offsets = [0, 32], sizes = [2, 32], strides = [1, 1]} : vector<2x96xf32> to vector<2x32xf32>
    %67 = vector.extract_strided_slice %64 {offsets = [0, 64], sizes = [2, 32], strides = [1, 1]} : vector<2x96xf32> to vector<2x32xf32>
    %68 = vector.extract_strided_slice %58 {offsets = [0, 96], sizes = [2, 32], strides = [1, 1]} : vector<2x136xf32> to vector<2x32xf32>
    %69 = math.tanh %68 : vector<2x32xf32>
    %70 = vector.extract_strided_slice %58 {offsets = [0, 128], sizes = [2, 8], strides = [1, 1]} : vector<2x136xf32> to vector<2x8xf32>
    %71 = vector.extract_strided_slice %70 {offsets = [0, 0], sizes = [2, 4], strides = [1, 1]} : vector<2x8xf32> to vector<2x4xf32>
    %72 = vector.extract_strided_slice %70 {offsets = [0, 4], sizes = [2, 4], strides = [1, 1]} : vector<2x8xf32> to vector<2x4xf32>
    %73 = tpu.concatenate %71, %72 in 0 : vector<2x4xf32>, vector<2x4xf32> -> vector<4x4xf32>
    %cst_35 = arith.constant dense<0xFF800000> : vector<4xf32>
    %74 = vector.multi_reduction <maximumf>, %73, %cst_35 [1] : vector<4x4xf32> to vector<4xf32>
    %75 = vector.shape_cast %74 : vector<4xf32> to vector<4x1xf32>
    %76 = vector.broadcast %75 : vector<4x1xf32> to vector<4x4xf32>
    %77 = arith.subf %73, %76 : vector<4x4xf32>
    %78 = math.exp %77 : vector<4x4xf32>
    %c0_36 = arith.constant 0 : index
    %c0_37 = arith.constant 0 : index
    %79 = vector.load %arg6[%c0_36, %c0_37] : memref<8x256xf32, #tpu.memory_space<vmem>>, vector<4x33xf32>
    %cst_38 = arith.constant dense<0.000000e+00> : vector<4x33xf32>
    %80 = tpu.matmul %78, %79, %cst_38 {dimension_numbers = #tpu.dot_dimension_numbers<[1], [0], [0], [1], [0, 0, 1, 1], [], []>} : vector<4x4xf32>, vector<4x33xf32>, vector<4x33xf32> -> vector<4x33xf32>
    %81 = vector.extract_strided_slice %80 {offsets = [0, 0], sizes = [4, 32], strides = [1, 1]} : vector<4x33xf32> to vector<4x32xf32>
    %82 = vector.extract_strided_slice %80 {offsets = [0, 32], sizes = [4, 1], strides = [1, 1]} : vector<4x33xf32> to vector<4x1xf32>
    %83 = vector.broadcast %82 : vector<4x1xf32> to vector<4x32xf32>
    %84 = arith.divf %81, %83 : vector<4x32xf32>
    %85 = vector.extract_strided_slice %84 {offsets = [0, 0], sizes = [2, 32], strides = [1, 1]} : vector<4x32xf32> to vector<2x32xf32>
    %cst_39 = arith.constant 1.000000e+00 : f32
    %86 = vector.broadcast %cst_39 : f32 to vector<2x32xf32>
    %87 = arith.subf %86, %85 : vector<2x32xf32>
    %88 = vector.extract_strided_slice %84 {offsets = [2, 0], sizes = [2, 32], strides = [1, 1]} : vector<4x32xf32> to vector<2x32xf32>
    %89 = arith.mulf %88, %87 : vector<2x32xf32>
    %90 = arith.mulf %67, %89 : vector<2x32xf32>
    %91 = arith.subf %88, %89 : vector<2x32xf32>
    %92 = arith.addf %90, %91 : vector<2x32xf32>
    %93 = arith.mulf %66, %89 : vector<2x32xf32>
    %94 = arith.subf %87, %89 : vector<2x32xf32>
    %95 = arith.addf %93, %94 : vector<2x32xf32>
    %96 = arith.mulf %92, %12 : vector<2x32xf32>
    %97 = arith.mulf %95, %69 : vector<2x32xf32>
    %98 = arith.addf %96, %97 : vector<2x32xf32>
    %99 = math.tanh %98 : vector<2x32xf32>
    %100 = arith.mulf %65, %99 : vector<2x32xf32>
    %c4 = arith.constant 4 : index
    %c0_40 = arith.constant 0 : index
    %101 = vector.load %arg6[%c4, %c0_40] : memref<8x256xf32, #tpu.memory_space<vmem>>, vector<1x136xf32>
    %c0_41 = arith.constant 0 : index
    %c768 = arith.constant 768 : index
    %102 = vector.load %arg5[%c0_41, %c768] : memref<32x2048xf32, #tpu.memory_space<vmem>>, vector<32x136xf32>
    %cst_42 = arith.constant dense<0.000000e+00> : vector<2x136xf32>
    %103 = tpu.matmul %100, %102, %cst_42 {dimension_numbers = #tpu.dot_dimension_numbers<[1], [0], [0], [1], [0, 0, 1, 1], [], []>} : vector<2x32xf32>, vector<32x136xf32>, vector<2x136xf32> -> vector<2x136xf32>
    %104 = vector.broadcast %101 : vector<1x136xf32> to vector<2x136xf32>
    %105 = arith.addf %104, %103 : vector<2x136xf32>
    %c0_43 = arith.constant 0 : index
    %c1024 = arith.constant 1024 : index
    %106 = vector.load %arg5[%c0_43, %c1024] : memref<32x2048xf32, #tpu.memory_space<vmem>>, vector<32x136xf32>
    %cst_44 = arith.constant dense<0.000000e+00> : vector<2x136xf32>
    %107 = tpu.matmul %13, %106, %cst_44 {dimension_numbers = #tpu.dot_dimension_numbers<[1], [0], [0], [1], [0, 0, 1, 1], [], []>} : vector<2x32xf32>, vector<32x136xf32>, vector<2x136xf32> -> vector<2x136xf32>
    %108 = arith.addf %105, %107 : vector<2x136xf32>
    %c0_45 = arith.constant 0 : index
    %c1280 = arith.constant 1280 : index
    %109 = vector.load %arg5[%c0_45, %c1280] : memref<32x2048xf32, #tpu.memory_space<vmem>>, vector<32x136xf32>
    %cst_46 = arith.constant dense<0.000000e+00> : vector<2x136xf32>
    %110 = tpu.matmul %42, %109, %cst_46 {dimension_numbers = #tpu.dot_dimension_numbers<[1], [0], [0], [1], [0, 0, 1, 1], [], []>} : vector<2x32xf32>, vector<32x136xf32>, vector<2x136xf32> -> vector<2x136xf32>
    %111 = arith.addf %108, %110 : vector<2x136xf32>
    %112 = vector.extract_strided_slice %111 {offsets = [0, 0], sizes = [2, 96], strides = [1, 1]} : vector<2x136xf32> to vector<2x96xf32>
    %113 = arith.negf %112 : vector<2x96xf32>
    %114 = math.exp %113 : vector<2x96xf32>
    %cst_47 = arith.constant 1.000000e+00 : f32
    %115 = vector.broadcast %cst_47 : f32 to vector<2x96xf32>
    %116 = arith.addf %115, %114 : vector<2x96xf32>
    %117 = arith.divf %115, %116 : vector<2x96xf32>
    %118 = vector.extract_strided_slice %117 {offsets = [0, 0], sizes = [2, 32], strides = [1, 1]} : vector<2x96xf32> to vector<2x32xf32>
    %119 = vector.extract_strided_slice %117 {offsets = [0, 32], sizes = [2, 32], strides = [1, 1]} : vector<2x96xf32> to vector<2x32xf32>
    %120 = vector.extract_strided_slice %117 {offsets = [0, 64], sizes = [2, 32], strides = [1, 1]} : vector<2x96xf32> to vector<2x32xf32>
    %121 = vector.extract_strided_slice %111 {offsets = [0, 96], sizes = [2, 32], strides = [1, 1]} : vector<2x136xf32> to vector<2x32xf32>
    %122 = math.tanh %121 : vector<2x32xf32>
    %123 = vector.extract_strided_slice %111 {offsets = [0, 128], sizes = [2, 8], strides = [1, 1]} : vector<2x136xf32> to vector<2x8xf32>
    %124 = vector.extract_strided_slice %123 {offsets = [0, 0], sizes = [2, 4], strides = [1, 1]} : vector<2x8xf32> to vector<2x4xf32>
    %125 = vector.extract_strided_slice %123 {offsets = [0, 4], sizes = [2, 4], strides = [1, 1]} : vector<2x8xf32> to vector<2x4xf32>
    %126 = tpu.concatenate %124, %125 in 0 : vector<2x4xf32>, vector<2x4xf32> -> vector<4x4xf32>
    %cst_48 = arith.constant dense<0xFF800000> : vector<4xf32>
    %127 = vector.multi_reduction <maximumf>, %126, %cst_48 [1] : vector<4x4xf32> to vector<4xf32>
    %128 = vector.shape_cast %127 : vector<4xf32> to vector<4x1xf32>
    %129 = vector.broadcast %128 : vector<4x1xf32> to vector<4x4xf32>
    %130 = arith.subf %126, %129 : vector<4x4xf32>
    %131 = math.exp %130 : vector<4x4xf32>
    %c0_49 = arith.constant 0 : index
    %c0_50 = arith.constant 0 : index
    %132 = vector.load %arg6[%c0_49, %c0_50] : memref<8x256xf32, #tpu.memory_space<vmem>>, vector<4x33xf32>
    %cst_51 = arith.constant dense<0.000000e+00> : vector<4x33xf32>
    %133 = tpu.matmul %131, %132, %cst_51 {dimension_numbers = #tpu.dot_dimension_numbers<[1], [0], [0], [1], [0, 0, 1, 1], [], []>} : vector<4x4xf32>, vector<4x33xf32>, vector<4x33xf32> -> vector<4x33xf32>
    %134 = vector.extract_strided_slice %133 {offsets = [0, 0], sizes = [4, 32], strides = [1, 1]} : vector<4x33xf32> to vector<4x32xf32>
    %135 = vector.extract_strided_slice %133 {offsets = [0, 32], sizes = [4, 1], strides = [1, 1]} : vector<4x33xf32> to vector<4x1xf32>
    %136 = vector.broadcast %135 : vector<4x1xf32> to vector<4x32xf32>
    %137 = arith.divf %134, %136 : vector<4x32xf32>
    %138 = vector.extract_strided_slice %137 {offsets = [0, 0], sizes = [2, 32], strides = [1, 1]} : vector<4x32xf32> to vector<2x32xf32>
    %cst_52 = arith.constant 1.000000e+00 : f32
    %139 = vector.broadcast %cst_52 : f32 to vector<2x32xf32>
    %140 = arith.subf %139, %138 : vector<2x32xf32>
    %141 = vector.extract_strided_slice %137 {offsets = [2, 0], sizes = [2, 32], strides = [1, 1]} : vector<4x32xf32> to vector<2x32xf32>
    %142 = arith.mulf %141, %140 : vector<2x32xf32>
    %143 = arith.mulf %120, %142 : vector<2x32xf32>
    %144 = arith.subf %141, %142 : vector<2x32xf32>
    %145 = arith.addf %143, %144 : vector<2x32xf32>
    %146 = arith.mulf %119, %142 : vector<2x32xf32>
    %147 = arith.subf %140, %142 : vector<2x32xf32>
    %148 = arith.addf %146, %147 : vector<2x32xf32>
    %149 = arith.mulf %145, %14 : vector<2x32xf32>
    %150 = arith.mulf %148, %122 : vector<2x32xf32>
    %151 = arith.addf %149, %150 : vector<2x32xf32>
    %152 = math.tanh %151 : vector<2x32xf32>
    %153 = arith.mulf %118, %152 : vector<2x32xf32>
    %c0_53 = arith.constant 0 : index
    %c1536_54 = arith.constant 1536 : index
    %154 = vector.load %arg5[%c0_53, %c1536_54] : memref<32x2048xf32, #tpu.memory_space<vmem>>, vector<32x32xf32>
    %cst_55 = arith.constant dense<0.000000e+00> : vector<2x32xf32>
    %155 = tpu.matmul %100, %154, %cst_55 {dimension_numbers = #tpu.dot_dimension_numbers<[1], [0], [0], [1], [0, 0, 1, 1], [], []>} : vector<2x32xf32>, vector<32x32xf32>, vector<2x32xf32> -> vector<2x32xf32>
    %c0_56 = arith.constant 0 : index
    %c1664_57 = arith.constant 1664 : index
    %156 = vector.load %arg5[%c0_56, %c1664_57] : memref<32x2048xf32, #tpu.memory_space<vmem>>, vector<32x32xf32>
    %cst_58 = arith.constant dense<0.000000e+00> : vector<2x32xf32>
    %157 = tpu.matmul %153, %156, %cst_58 {dimension_numbers = #tpu.dot_dimension_numbers<[1], [0], [0], [1], [0, 0, 1, 1], [], []>} : vector<2x32xf32>, vector<32x32xf32>, vector<2x32xf32> -> vector<2x32xf32>
    %158 = arith.addf %155, %157 : vector<2x32xf32>
    %159 = vector.shape_cast %158 : vector<2x32xf32> to vector<2x1x32xf32>
    %160 = vector.broadcast %159 : vector<2x1x32xf32> to vector<2x6x32xf32>
    %161 = arith.addf %10, %160 : vector<2x6x32xf32>
    %162 = math.tanh %161 : vector<2x6x32xf32>
    %c6_59 = arith.constant 6 : index
    %c0_60 = arith.constant 0 : index
    %163 = vector.load %arg6[%c6_59, %c0_60] : memref<8x256xf32, #tpu.memory_space<vmem>>, vector<1x32xf32>
    %164 = vector.shape_cast %163 : vector<1x32xf32> to vector<1x1x32xf32>
    %165 = vector.broadcast %164 : vector<1x1x32xf32> to vector<2x6x32xf32>
    %166 = arith.mulf %162, %165 : vector<2x6x32xf32>
    %cst_61 = arith.constant dense<0.000000e+00> : vector<2x6xf32>
    %167 = vector.multi_reduction <add>, %166, %cst_61 [2] : vector<2x6x32xf32> to vector<2x6xf32>
    %cst_62 = arith.constant dense<0xFF800000> : vector<2xf32>
    %168 = vector.multi_reduction <maximumf>, %167, %cst_62 [1] : vector<2x6xf32> to vector<2xf32>
    %169 = vector.shape_cast %168 : vector<2xf32> to vector<2x1xf32>
    %170 = vector.broadcast %169 : vector<2x1xf32> to vector<2x6xf32>
    %171 = arith.subf %167, %170 : vector<2x6xf32>
    %172 = math.exp %171 : vector<2x6xf32>
    %cst_63 = arith.constant dense<0.000000e+00> : vector<2xf32>
    %173 = vector.multi_reduction <add>, %172, %cst_63 [1] : vector<2x6xf32> to vector<2xf32>
    %174 = vector.shape_cast %173 : vector<2xf32> to vector<2x1xf32>
    %175 = vector.broadcast %174 : vector<2x1xf32> to vector<2x6xf32>
    %176 = arith.divf %172, %175 : vector<2x6xf32>
    %177 = vector.shape_cast %176 : vector<2x6xf32> to vector<2x6x1xf32>
    %c0_64 = arith.constant 0 : index
    %c0_65 = arith.constant 0 : index
    %c0_66 = arith.constant 0 : index
    %178 = vector.load %arg4[%c0_64, %c0_65, %c0_66] : memref<2x6x32xf32, #tpu.memory_space<vmem>>, vector<2x6x32xf32>
    %179 = vector.broadcast %177 : vector<2x6x1xf32> to vector<2x6x32xf32>
    %180 = arith.mulf %179, %178 : vector<2x6x32xf32>
    %cst_67 = arith.constant dense<0.000000e+00> : vector<2x32xf32>
    %181 = vector.multi_reduction <add>, %180, %cst_67 [1] : vector<2x6x32xf32> to vector<2x32xf32>
    %c1 = arith.constant 1 : index
    %182 = memref.load %arg1[%c1] : memref<14xi32, #tpu.memory_space<smem>>
    %183 = arith.index_cast %182 : i32 to index
    %c0_68 = arith.constant 0 : index
    %c0_69 = arith.constant 0 : index
    %184 = vector.load %arg2[%183, %c0_68, %c0_69] : memref<48x1x136xf32, #tpu.memory_space<vmem>>, vector<1x1x136xf32>
    %185 = vector.shape_cast %184 : vector<1x1x136xf32> to vector<1x136xf32>
    %c8 = arith.constant 8 : index
    %186 = memref.load %arg1[%c8] : memref<14xi32, #tpu.memory_space<smem>>
    %187 = arith.index_cast %186 : i32 to index
    %c0_70 = arith.constant 0 : index
    %c0_71 = arith.constant 0 : index
    %188 = vector.load %arg2[%187, %c0_70, %c0_71] : memref<48x1x136xf32, #tpu.memory_space<vmem>>, vector<1x1x136xf32>
    %189 = vector.shape_cast %188 : vector<1x1x136xf32> to vector<1x136xf32>
    %190 = tpu.concatenate %185, %189 in 0 : vector<1x136xf32>, vector<1x136xf32> -> vector<2x136xf32>
    %191 = arith.addf %190, %2 : vector<2x136xf32>
    %c0_72 = arith.constant 0 : index
    %c256_73 = arith.constant 256 : index
    %192 = vector.load %arg5[%c0_72, %c256_73] : memref<32x2048xf32, #tpu.memory_space<vmem>>, vector<32x136xf32>
    %cst_74 = arith.constant dense<0.000000e+00> : vector<2x136xf32>
    %193 = tpu.matmul %100, %192, %cst_74 {dimension_numbers = #tpu.dot_dimension_numbers<[1], [0], [0], [1], [0, 0, 1, 1], [], []>} : vector<2x32xf32>, vector<32x136xf32>, vector<2x136xf32> -> vector<2x136xf32>
    %194 = arith.addf %191, %193 : vector<2x136xf32>
    %c0_75 = arith.constant 0 : index
    %c512_76 = arith.constant 512 : index
    %195 = vector.load %arg5[%c0_75, %c512_76] : memref<32x2048xf32, #tpu.memory_space<vmem>>, vector<32x136xf32>
    %cst_77 = arith.constant dense<0.000000e+00> : vector<2x136xf32>
    %196 = tpu.matmul %181, %195, %cst_77 {dimension_numbers = #tpu.dot_dimension_numbers<[1], [0], [0], [1], [0, 0, 1, 1], [], []>} : vector<2x32xf32>, vector<32x136xf32>, vector<2x136xf32> -> vector<2x136xf32>
    %197 = arith.addf %194, %196 : vector<2x136xf32>
    %198 = vector.extract_strided_slice %197 {offsets = [0, 0], sizes = [2, 96], strides = [1, 1]} : vector<2x136xf32> to vector<2x96xf32>
    %199 = arith.negf %198 : vector<2x96xf32>
    %200 = math.exp %199 : vector<2x96xf32>
    %cst_78 = arith.constant 1.000000e+00 : f32
    %201 = vector.broadcast %cst_78 : f32 to vector<2x96xf32>
    %202 = arith.addf %201, %200 : vector<2x96xf32>
    %203 = arith.divf %201, %202 : vector<2x96xf32>
    %204 = vector.extract_strided_slice %203 {offsets = [0, 0], sizes = [2, 32], strides = [1, 1]} : vector<2x96xf32> to vector<2x32xf32>
    %205 = vector.extract_strided_slice %203 {offsets = [0, 32], sizes = [2, 32], strides = [1, 1]} : vector<2x96xf32> to vector<2x32xf32>
    %206 = vector.extract_strided_slice %203 {offsets = [0, 64], sizes = [2, 32], strides = [1, 1]} : vector<2x96xf32> to vector<2x32xf32>
    %207 = vector.extract_strided_slice %197 {offsets = [0, 96], sizes = [2, 32], strides = [1, 1]} : vector<2x136xf32> to vector<2x32xf32>
    %208 = math.tanh %207 : vector<2x32xf32>
    %209 = vector.extract_strided_slice %197 {offsets = [0, 128], sizes = [2, 8], strides = [1, 1]} : vector<2x136xf32> to vector<2x8xf32>
    %210 = vector.extract_strided_slice %209 {offsets = [0, 0], sizes = [2, 4], strides = [1, 1]} : vector<2x8xf32> to vector<2x4xf32>
    %211 = vector.extract_strided_slice %209 {offsets = [0, 4], sizes = [2, 4], strides = [1, 1]} : vector<2x8xf32> to vector<2x4xf32>
    %212 = tpu.concatenate %210, %211 in 0 : vector<2x4xf32>, vector<2x4xf32> -> vector<4x4xf32>
    %cst_79 = arith.constant dense<0xFF800000> : vector<4xf32>
    %213 = vector.multi_reduction <maximumf>, %212, %cst_79 [1] : vector<4x4xf32> to vector<4xf32>
    %214 = vector.shape_cast %213 : vector<4xf32> to vector<4x1xf32>
    %215 = vector.broadcast %214 : vector<4x1xf32> to vector<4x4xf32>
    %216 = arith.subf %212, %215 : vector<4x4xf32>
    %217 = math.exp %216 : vector<4x4xf32>
    %c0_80 = arith.constant 0 : index
    %c0_81 = arith.constant 0 : index
    %218 = vector.load %arg6[%c0_80, %c0_81] : memref<8x256xf32, #tpu.memory_space<vmem>>, vector<4x33xf32>
    %cst_82 = arith.constant dense<0.000000e+00> : vector<4x33xf32>
    %219 = tpu.matmul %217, %218, %cst_82 {dimension_numbers = #tpu.dot_dimension_numbers<[1], [0], [0], [1], [0, 0, 1, 1], [], []>} : vector<4x4xf32>, vector<4x33xf32>, vector<4x33xf32> -> vector<4x33xf32>
    %220 = vector.extract_strided_slice %219 {offsets = [0, 0], sizes = [4, 32], strides = [1, 1]} : vector<4x33xf32> to vector<4x32xf32>
    %221 = vector.extract_strided_slice %219 {offsets = [0, 32], sizes = [4, 1], strides = [1, 1]} : vector<4x33xf32> to vector<4x1xf32>
    %222 = vector.broadcast %221 : vector<4x1xf32> to vector<4x32xf32>
    %223 = arith.divf %220, %222 : vector<4x32xf32>
    %224 = vector.extract_strided_slice %223 {offsets = [0, 0], sizes = [2, 32], strides = [1, 1]} : vector<4x32xf32> to vector<2x32xf32>
    %cst_83 = arith.constant 1.000000e+00 : f32
    %225 = vector.broadcast %cst_83 : f32 to vector<2x32xf32>
    %226 = arith.subf %225, %224 : vector<2x32xf32>
    %227 = vector.extract_strided_slice %223 {offsets = [2, 0], sizes = [2, 32], strides = [1, 1]} : vector<4x32xf32> to vector<2x32xf32>
    %228 = arith.mulf %227, %226 : vector<2x32xf32>
    %229 = arith.mulf %206, %228 : vector<2x32xf32>
    %230 = arith.subf %227, %228 : vector<2x32xf32>
    %231 = arith.addf %229, %230 : vector<2x32xf32>
    %232 = arith.mulf %205, %228 : vector<2x32xf32>
    %233 = arith.subf %226, %228 : vector<2x32xf32>
    %234 = arith.addf %232, %233 : vector<2x32xf32>
    %235 = arith.mulf %231, %98 : vector<2x32xf32>
    %236 = arith.mulf %234, %208 : vector<2x32xf32>
    %237 = arith.addf %235, %236 : vector<2x32xf32>
    %238 = math.tanh %237 : vector<2x32xf32>
    %239 = arith.mulf %204, %238 : vector<2x32xf32>
    %c4_84 = arith.constant 4 : index
    %c0_85 = arith.constant 0 : index
    %240 = vector.load %arg6[%c4_84, %c0_85] : memref<8x256xf32, #tpu.memory_space<vmem>>, vector<1x136xf32>
    %c0_86 = arith.constant 0 : index
    %c768_87 = arith.constant 768 : index
    %241 = vector.load %arg5[%c0_86, %c768_87] : memref<32x2048xf32, #tpu.memory_space<vmem>>, vector<32x136xf32>
    %cst_88 = arith.constant dense<0.000000e+00> : vector<2x136xf32>
    %242 = tpu.matmul %239, %241, %cst_88 {dimension_numbers = #tpu.dot_dimension_numbers<[1], [0], [0], [1], [0, 0, 1, 1], [], []>} : vector<2x32xf32>, vector<32x136xf32>, vector<2x136xf32> -> vector<2x136xf32>
    %243 = vector.broadcast %240 : vector<1x136xf32> to vector<2x136xf32>
    %244 = arith.addf %243, %242 : vector<2x136xf32>
    %c0_89 = arith.constant 0 : index
    %c1024_90 = arith.constant 1024 : index
    %245 = vector.load %arg5[%c0_89, %c1024_90] : memref<32x2048xf32, #tpu.memory_space<vmem>>, vector<32x136xf32>
    %cst_91 = arith.constant dense<0.000000e+00> : vector<2x136xf32>
    %246 = tpu.matmul %153, %245, %cst_91 {dimension_numbers = #tpu.dot_dimension_numbers<[1], [0], [0], [1], [0, 0, 1, 1], [], []>} : vector<2x32xf32>, vector<32x136xf32>, vector<2x136xf32> -> vector<2x136xf32>
    %247 = arith.addf %244, %246 : vector<2x136xf32>
    %c0_92 = arith.constant 0 : index
    %c1280_93 = arith.constant 1280 : index
    %248 = vector.load %arg5[%c0_92, %c1280_93] : memref<32x2048xf32, #tpu.memory_space<vmem>>, vector<32x136xf32>
    %cst_94 = arith.constant dense<0.000000e+00> : vector<2x136xf32>
    %249 = tpu.matmul %181, %248, %cst_94 {dimension_numbers = #tpu.dot_dimension_numbers<[1], [0], [0], [1], [0, 0, 1, 1], [], []>} : vector<2x32xf32>, vector<32x136xf32>, vector<2x136xf32> -> vector<2x136xf32>
    %250 = arith.addf %247, %249 : vector<2x136xf32>
    %251 = vector.extract_strided_slice %250 {offsets = [0, 0], sizes = [2, 96], strides = [1, 1]} : vector<2x136xf32> to vector<2x96xf32>
    %252 = arith.negf %251 : vector<2x96xf32>
    %253 = math.exp %252 : vector<2x96xf32>
    %cst_95 = arith.constant 1.000000e+00 : f32
    %254 = vector.broadcast %cst_95 : f32 to vector<2x96xf32>
    %255 = arith.addf %254, %253 : vector<2x96xf32>
    %256 = arith.divf %254, %255 : vector<2x96xf32>
    %257 = vector.extract_strided_slice %256 {offsets = [0, 0], sizes = [2, 32], strides = [1, 1]} : vector<2x96xf32> to vector<2x32xf32>
    %258 = vector.extract_strided_slice %256 {offsets = [0, 32], sizes = [2, 32], strides = [1, 1]} : vector<2x96xf32> to vector<2x32xf32>
    %259 = vector.extract_strided_slice %256 {offsets = [0, 64], sizes = [2, 32], strides = [1, 1]} : vector<2x96xf32> to vector<2x32xf32>
    %260 = vector.extract_strided_slice %250 {offsets = [0, 96], sizes = [2, 32], strides = [1, 1]} : vector<2x136xf32> to vector<2x32xf32>
    %261 = math.tanh %260 : vector<2x32xf32>
    %262 = vector.extract_strided_slice %250 {offsets = [0, 128], sizes = [2, 8], strides = [1, 1]} : vector<2x136xf32> to vector<2x8xf32>
    %263 = vector.extract_strided_slice %262 {offsets = [0, 0], sizes = [2, 4], strides = [1, 1]} : vector<2x8xf32> to vector<2x4xf32>
    %264 = vector.extract_strided_slice %262 {offsets = [0, 4], sizes = [2, 4], strides = [1, 1]} : vector<2x8xf32> to vector<2x4xf32>
    %265 = tpu.concatenate %263, %264 in 0 : vector<2x4xf32>, vector<2x4xf32> -> vector<4x4xf32>
    %cst_96 = arith.constant dense<0xFF800000> : vector<4xf32>
    %266 = vector.multi_reduction <maximumf>, %265, %cst_96 [1] : vector<4x4xf32> to vector<4xf32>
    %267 = vector.shape_cast %266 : vector<4xf32> to vector<4x1xf32>
    %268 = vector.broadcast %267 : vector<4x1xf32> to vector<4x4xf32>
    %269 = arith.subf %265, %268 : vector<4x4xf32>
    %270 = math.exp %269 : vector<4x4xf32>
    %c0_97 = arith.constant 0 : index
    %c0_98 = arith.constant 0 : index
    %271 = vector.load %arg6[%c0_97, %c0_98] : memref<8x256xf32, #tpu.memory_space<vmem>>, vector<4x33xf32>
    %cst_99 = arith.constant dense<0.000000e+00> : vector<4x33xf32>
    %272 = tpu.matmul %270, %271, %cst_99 {dimension_numbers = #tpu.dot_dimension_numbers<[1], [0], [0], [1], [0, 0, 1, 1], [], []>} : vector<4x4xf32>, vector<4x33xf32>, vector<4x33xf32> -> vector<4x33xf32>
    %273 = vector.extract_strided_slice %272 {offsets = [0, 0], sizes = [4, 32], strides = [1, 1]} : vector<4x33xf32> to vector<4x32xf32>
    %274 = vector.extract_strided_slice %272 {offsets = [0, 32], sizes = [4, 1], strides = [1, 1]} : vector<4x33xf32> to vector<4x1xf32>
    %275 = vector.broadcast %274 : vector<4x1xf32> to vector<4x32xf32>
    %276 = arith.divf %273, %275 : vector<4x32xf32>
    %277 = vector.extract_strided_slice %276 {offsets = [0, 0], sizes = [2, 32], strides = [1, 1]} : vector<4x32xf32> to vector<2x32xf32>
    %cst_100 = arith.constant 1.000000e+00 : f32
    %278 = vector.broadcast %cst_100 : f32 to vector<2x32xf32>
    %279 = arith.subf %278, %277 : vector<2x32xf32>
    %280 = vector.extract_strided_slice %276 {offsets = [2, 0], sizes = [2, 32], strides = [1, 1]} : vector<4x32xf32> to vector<2x32xf32>
    %281 = arith.mulf %280, %279 : vector<2x32xf32>
    %282 = arith.mulf %259, %281 : vector<2x32xf32>
    %283 = arith.subf %280, %281 : vector<2x32xf32>
    %284 = arith.addf %282, %283 : vector<2x32xf32>
    %285 = arith.mulf %258, %281 : vector<2x32xf32>
    %286 = arith.subf %279, %281 : vector<2x32xf32>
    %287 = arith.addf %285, %286 : vector<2x32xf32>
    %288 = arith.mulf %284, %151 : vector<2x32xf32>
    %289 = arith.mulf %287, %261 : vector<2x32xf32>
    %290 = arith.addf %288, %289 : vector<2x32xf32>
    %291 = math.tanh %290 : vector<2x32xf32>
    %292 = arith.mulf %257, %291 : vector<2x32xf32>
    %c0_101 = arith.constant 0 : index
    %c1536_102 = arith.constant 1536 : index
    %293 = vector.load %arg5[%c0_101, %c1536_102] : memref<32x2048xf32, #tpu.memory_space<vmem>>, vector<32x32xf32>
    %cst_103 = arith.constant dense<0.000000e+00> : vector<2x32xf32>
    %294 = tpu.matmul %239, %293, %cst_103 {dimension_numbers = #tpu.dot_dimension_numbers<[1], [0], [0], [1], [0, 0, 1, 1], [], []>} : vector<2x32xf32>, vector<32x32xf32>, vector<2x32xf32> -> vector<2x32xf32>
    %c0_104 = arith.constant 0 : index
    %c1664_105 = arith.constant 1664 : index
    %295 = vector.load %arg5[%c0_104, %c1664_105] : memref<32x2048xf32, #tpu.memory_space<vmem>>, vector<32x32xf32>
    %cst_106 = arith.constant dense<0.000000e+00> : vector<2x32xf32>
    %296 = tpu.matmul %292, %295, %cst_106 {dimension_numbers = #tpu.dot_dimension_numbers<[1], [0], [0], [1], [0, 0, 1, 1], [], []>} : vector<2x32xf32>, vector<32x32xf32>, vector<2x32xf32> -> vector<2x32xf32>
    %297 = arith.addf %294, %296 : vector<2x32xf32>
    %298 = vector.shape_cast %297 : vector<2x32xf32> to vector<2x1x32xf32>
    %299 = vector.broadcast %298 : vector<2x1x32xf32> to vector<2x6x32xf32>
    %300 = arith.addf %10, %299 : vector<2x6x32xf32>
    %301 = math.tanh %300 : vector<2x6x32xf32>
    %c6_107 = arith.constant 6 : index
    %c0_108 = arith.constant 0 : index
    %302 = vector.load %arg6[%c6_107, %c0_108] : memref<8x256xf32, #tpu.memory_space<vmem>>, vector<1x32xf32>
    %303 = vector.shape_cast %302 : vector<1x32xf32> to vector<1x1x32xf32>
    %304 = vector.broadcast %303 : vector<1x1x32xf32> to vector<2x6x32xf32>
    %305 = arith.mulf %301, %304 : vector<2x6x32xf32>
    %cst_109 = arith.constant dense<0.000000e+00> : vector<2x6xf32>
    %306 = vector.multi_reduction <add>, %305, %cst_109 [2] : vector<2x6x32xf32> to vector<2x6xf32>
    %cst_110 = arith.constant dense<0xFF800000> : vector<2xf32>
    %307 = vector.multi_reduction <maximumf>, %306, %cst_110 [1] : vector<2x6xf32> to vector<2xf32>
    %308 = vector.shape_cast %307 : vector<2xf32> to vector<2x1xf32>
    %309 = vector.broadcast %308 : vector<2x1xf32> to vector<2x6xf32>
    %310 = arith.subf %306, %309 : vector<2x6xf32>
    %311 = math.exp %310 : vector<2x6xf32>
    %cst_111 = arith.constant dense<0.000000e+00> : vector<2xf32>
    %312 = vector.multi_reduction <add>, %311, %cst_111 [1] : vector<2x6xf32> to vector<2xf32>
    %313 = vector.shape_cast %312 : vector<2xf32> to vector<2x1xf32>
    %314 = vector.broadcast %313 : vector<2x1xf32> to vector<2x6xf32>
    %315 = arith.divf %311, %314 : vector<2x6xf32>
    %316 = vector.shape_cast %315 : vector<2x6xf32> to vector<2x6x1xf32>
    %c0_112 = arith.constant 0 : index
    %c0_113 = arith.constant 0 : index
    %c0_114 = arith.constant 0 : index
    %317 = vector.load %arg4[%c0_112, %c0_113, %c0_114] : memref<2x6x32xf32, #tpu.memory_space<vmem>>, vector<2x6x32xf32>
    %318 = vector.broadcast %316 : vector<2x6x1xf32> to vector<2x6x32xf32>
    %319 = arith.mulf %318, %317 : vector<2x6x32xf32>
    %cst_115 = arith.constant dense<0.000000e+00> : vector<2x32xf32>
    %320 = vector.multi_reduction <add>, %319, %cst_115 [1] : vector<2x6x32xf32> to vector<2x32xf32>
    %c2 = arith.constant 2 : index
    %321 = memref.load %arg1[%c2] : memref<14xi32, #tpu.memory_space<smem>>
    %322 = arith.index_cast %321 : i32 to index
    %c0_116 = arith.constant 0 : index
    %c0_117 = arith.constant 0 : index
    %323 = vector.load %arg2[%322, %c0_116, %c0_117] : memref<48x1x136xf32, #tpu.memory_space<vmem>>, vector<1x1x136xf32>
    %324 = vector.shape_cast %323 : vector<1x1x136xf32> to vector<1x136xf32>
    %c9 = arith.constant 9 : index
    %325 = memref.load %arg1[%c9] : memref<14xi32, #tpu.memory_space<smem>>
    %326 = arith.index_cast %325 : i32 to index
    %c0_118 = arith.constant 0 : index
    %c0_119 = arith.constant 0 : index
    %327 = vector.load %arg2[%326, %c0_118, %c0_119] : memref<48x1x136xf32, #tpu.memory_space<vmem>>, vector<1x1x136xf32>
    %328 = vector.shape_cast %327 : vector<1x1x136xf32> to vector<1x136xf32>
    %329 = tpu.concatenate %324, %328 in 0 : vector<1x136xf32>, vector<1x136xf32> -> vector<2x136xf32>
    %330 = arith.addf %329, %2 : vector<2x136xf32>
    %c0_120 = arith.constant 0 : index
    %c256_121 = arith.constant 256 : index
    %331 = vector.load %arg5[%c0_120, %c256_121] : memref<32x2048xf32, #tpu.memory_space<vmem>>, vector<32x136xf32>
    %cst_122 = arith.constant dense<0.000000e+00> : vector<2x136xf32>
    %332 = tpu.matmul %239, %331, %cst_122 {dimension_numbers = #tpu.dot_dimension_numbers<[1], [0], [0], [1], [0, 0, 1, 1], [], []>} : vector<2x32xf32>, vector<32x136xf32>, vector<2x136xf32> -> vector<2x136xf32>
    %333 = arith.addf %330, %332 : vector<2x136xf32>
    %c0_123 = arith.constant 0 : index
    %c512_124 = arith.constant 512 : index
    %334 = vector.load %arg5[%c0_123, %c512_124] : memref<32x2048xf32, #tpu.memory_space<vmem>>, vector<32x136xf32>
    %cst_125 = arith.constant dense<0.000000e+00> : vector<2x136xf32>
    %335 = tpu.matmul %320, %334, %cst_125 {dimension_numbers = #tpu.dot_dimension_numbers<[1], [0], [0], [1], [0, 0, 1, 1], [], []>} : vector<2x32xf32>, vector<32x136xf32>, vector<2x136xf32> -> vector<2x136xf32>
    %336 = arith.addf %333, %335 : vector<2x136xf32>
    %337 = vector.extract_strided_slice %336 {offsets = [0, 0], sizes = [2, 96], strides = [1, 1]} : vector<2x136xf32> to vector<2x96xf32>
    %338 = arith.negf %337 : vector<2x96xf32>
    %339 = math.exp %338 : vector<2x96xf32>
    %cst_126 = arith.constant 1.000000e+00 : f32
    %340 = vector.broadcast %cst_126 : f32 to vector<2x96xf32>
    %341 = arith.addf %340, %339 : vector<2x96xf32>
    %342 = arith.divf %340, %341 : vector<2x96xf32>
    %343 = vector.extract_strided_slice %342 {offsets = [0, 0], sizes = [2, 32], strides = [1, 1]} : vector<2x96xf32> to vector<2x32xf32>
    %344 = vector.extract_strided_slice %342 {offsets = [0, 32], sizes = [2, 32], strides = [1, 1]} : vector<2x96xf32> to vector<2x32xf32>
    %345 = vector.extract_strided_slice %342 {offsets = [0, 64], sizes = [2, 32], strides = [1, 1]} : vector<2x96xf32> to vector<2x32xf32>
    %346 = vector.extract_strided_slice %336 {offsets = [0, 96], sizes = [2, 32], strides = [1, 1]} : vector<2x136xf32> to vector<2x32xf32>
    %347 = math.tanh %346 : vector<2x32xf32>
    %348 = vector.extract_strided_slice %336 {offsets = [0, 128], sizes = [2, 8], strides = [1, 1]} : vector<2x136xf32> to vector<2x8xf32>
    %349 = vector.extract_strided_slice %348 {offsets = [0, 0], sizes = [2, 4], strides = [1, 1]} : vector<2x8xf32> to vector<2x4xf32>
    %350 = vector.extract_strided_slice %348 {offsets = [0, 4], sizes = [2, 4], strides = [1, 1]} : vector<2x8xf32> to vector<2x4xf32>
    %351 = tpu.concatenate %349, %350 in 0 : vector<2x4xf32>, vector<2x4xf32> -> vector<4x4xf32>
    %cst_127 = arith.constant dense<0xFF800000> : vector<4xf32>
    %352 = vector.multi_reduction <maximumf>, %351, %cst_127 [1] : vector<4x4xf32> to vector<4xf32>
    %353 = vector.shape_cast %352 : vector<4xf32> to vector<4x1xf32>
    %354 = vector.broadcast %353 : vector<4x1xf32> to vector<4x4xf32>
    %355 = arith.subf %351, %354 : vector<4x4xf32>
    %356 = math.exp %355 : vector<4x4xf32>
    %c0_128 = arith.constant 0 : index
    %c0_129 = arith.constant 0 : index
    %357 = vector.load %arg6[%c0_128, %c0_129] : memref<8x256xf32, #tpu.memory_space<vmem>>, vector<4x33xf32>
    %cst_130 = arith.constant dense<0.000000e+00> : vector<4x33xf32>
    %358 = tpu.matmul %356, %357, %cst_130 {dimension_numbers = #tpu.dot_dimension_numbers<[1], [0], [0], [1], [0, 0, 1, 1], [], []>} : vector<4x4xf32>, vector<4x33xf32>, vector<4x33xf32> -> vector<4x33xf32>
    %359 = vector.extract_strided_slice %358 {offsets = [0, 0], sizes = [4, 32], strides = [1, 1]} : vector<4x33xf32> to vector<4x32xf32>
    %360 = vector.extract_strided_slice %358 {offsets = [0, 32], sizes = [4, 1], strides = [1, 1]} : vector<4x33xf32> to vector<4x1xf32>
    %361 = vector.broadcast %360 : vector<4x1xf32> to vector<4x32xf32>
    %362 = arith.divf %359, %361 : vector<4x32xf32>
    %363 = vector.extract_strided_slice %362 {offsets = [0, 0], sizes = [2, 32], strides = [1, 1]} : vector<4x32xf32> to vector<2x32xf32>
    %cst_131 = arith.constant 1.000000e+00 : f32
    %364 = vector.broadcast %cst_131 : f32 to vector<2x32xf32>
    %365 = arith.subf %364, %363 : vector<2x32xf32>
    %366 = vector.extract_strided_slice %362 {offsets = [2, 0], sizes = [2, 32], strides = [1, 1]} : vector<4x32xf32> to vector<2x32xf32>
    %367 = arith.mulf %366, %365 : vector<2x32xf32>
    %368 = arith.mulf %345, %367 : vector<2x32xf32>
    %369 = arith.subf %366, %367 : vector<2x32xf32>
    %370 = arith.addf %368, %369 : vector<2x32xf32>
    %371 = arith.mulf %344, %367 : vector<2x32xf32>
    %372 = arith.subf %365, %367 : vector<2x32xf32>
    %373 = arith.addf %371, %372 : vector<2x32xf32>
    %374 = arith.mulf %370, %237 : vector<2x32xf32>
    %375 = arith.mulf %373, %347 : vector<2x32xf32>
    %376 = arith.addf %374, %375 : vector<2x32xf32>
    %377 = math.tanh %376 : vector<2x32xf32>
    %378 = arith.mulf %343, %377 : vector<2x32xf32>
    %c4_132 = arith.constant 4 : index
    %c0_133 = arith.constant 0 : index
    %379 = vector.load %arg6[%c4_132, %c0_133] : memref<8x256xf32, #tpu.memory_space<vmem>>, vector<1x136xf32>
    %c0_134 = arith.constant 0 : index
    %c768_135 = arith.constant 768 : index
    %380 = vector.load %arg5[%c0_134, %c768_135] : memref<32x2048xf32, #tpu.memory_space<vmem>>, vector<32x136xf32>
    %cst_136 = arith.constant dense<0.000000e+00> : vector<2x136xf32>
    %381 = tpu.matmul %378, %380, %cst_136 {dimension_numbers = #tpu.dot_dimension_numbers<[1], [0], [0], [1], [0, 0, 1, 1], [], []>} : vector<2x32xf32>, vector<32x136xf32>, vector<2x136xf32> -> vector<2x136xf32>
    %382 = vector.broadcast %379 : vector<1x136xf32> to vector<2x136xf32>
    %383 = arith.addf %382, %381 : vector<2x136xf32>
    %c0_137 = arith.constant 0 : index
    %c1024_138 = arith.constant 1024 : index
    %384 = vector.load %arg5[%c0_137, %c1024_138] : memref<32x2048xf32, #tpu.memory_space<vmem>>, vector<32x136xf32>
    %cst_139 = arith.constant dense<0.000000e+00> : vector<2x136xf32>
    %385 = tpu.matmul %292, %384, %cst_139 {dimension_numbers = #tpu.dot_dimension_numbers<[1], [0], [0], [1], [0, 0, 1, 1], [], []>} : vector<2x32xf32>, vector<32x136xf32>, vector<2x136xf32> -> vector<2x136xf32>
    %386 = arith.addf %383, %385 : vector<2x136xf32>
    %c0_140 = arith.constant 0 : index
    %c1280_141 = arith.constant 1280 : index
    %387 = vector.load %arg5[%c0_140, %c1280_141] : memref<32x2048xf32, #tpu.memory_space<vmem>>, vector<32x136xf32>
    %cst_142 = arith.constant dense<0.000000e+00> : vector<2x136xf32>
    %388 = tpu.matmul %320, %387, %cst_142 {dimension_numbers = #tpu.dot_dimension_numbers<[1], [0], [0], [1], [0, 0, 1, 1], [], []>} : vector<2x32xf32>, vector<32x136xf32>, vector<2x136xf32> -> vector<2x136xf32>
    %389 = arith.addf %386, %388 : vector<2x136xf32>
    %390 = vector.extract_strided_slice %389 {offsets = [0, 0], sizes = [2, 96], strides = [1, 1]} : vector<2x136xf32> to vector<2x96xf32>
    %391 = arith.negf %390 : vector<2x96xf32>
    %392 = math.exp %391 : vector<2x96xf32>
    %cst_143 = arith.constant 1.000000e+00 : f32
    %393 = vector.broadcast %cst_143 : f32 to vector<2x96xf32>
    %394 = arith.addf %393, %392 : vector<2x96xf32>
    %395 = arith.divf %393, %394 : vector<2x96xf32>
    %396 = vector.extract_strided_slice %395 {offsets = [0, 0], sizes = [2, 32], strides = [1, 1]} : vector<2x96xf32> to vector<2x32xf32>
    %397 = vector.extract_strided_slice %395 {offsets = [0, 32], sizes = [2, 32], strides = [1, 1]} : vector<2x96xf32> to vector<2x32xf32>
    %398 = vector.extract_strided_slice %395 {offsets = [0, 64], sizes = [2, 32], strides = [1, 1]} : vector<2x96xf32> to vector<2x32xf32>
    %399 = vector.extract_strided_slice %389 {offsets = [0, 96], sizes = [2, 32], strides = [1, 1]} : vector<2x136xf32> to vector<2x32xf32>
    %400 = math.tanh %399 : vector<2x32xf32>
    %401 = vector.extract_strided_slice %389 {offsets = [0, 128], sizes = [2, 8], strides = [1, 1]} : vector<2x136xf32> to vector<2x8xf32>
    %402 = vector.extract_strided_slice %401 {offsets = [0, 0], sizes = [2, 4], strides = [1, 1]} : vector<2x8xf32> to vector<2x4xf32>
    %403 = vector.extract_strided_slice %401 {offsets = [0, 4], sizes = [2, 4], strides = [1, 1]} : vector<2x8xf32> to vector<2x4xf32>
    %404 = tpu.concatenate %402, %403 in 0 : vector<2x4xf32>, vector<2x4xf32> -> vector<4x4xf32>
    %cst_144 = arith.constant dense<0xFF800000> : vector<4xf32>
    %405 = vector.multi_reduction <maximumf>, %404, %cst_144 [1] : vector<4x4xf32> to vector<4xf32>
    %406 = vector.shape_cast %405 : vector<4xf32> to vector<4x1xf32>
    %407 = vector.broadcast %406 : vector<4x1xf32> to vector<4x4xf32>
    %408 = arith.subf %404, %407 : vector<4x4xf32>
    %409 = math.exp %408 : vector<4x4xf32>
    %c0_145 = arith.constant 0 : index
    %c0_146 = arith.constant 0 : index
    %410 = vector.load %arg6[%c0_145, %c0_146] : memref<8x256xf32, #tpu.memory_space<vmem>>, vector<4x33xf32>
    %cst_147 = arith.constant dense<0.000000e+00> : vector<4x33xf32>
    %411 = tpu.matmul %409, %410, %cst_147 {dimension_numbers = #tpu.dot_dimension_numbers<[1], [0], [0], [1], [0, 0, 1, 1], [], []>} : vector<4x4xf32>, vector<4x33xf32>, vector<4x33xf32> -> vector<4x33xf32>
    %412 = vector.extract_strided_slice %411 {offsets = [0, 0], sizes = [4, 32], strides = [1, 1]} : vector<4x33xf32> to vector<4x32xf32>
    %413 = vector.extract_strided_slice %411 {offsets = [0, 32], sizes = [4, 1], strides = [1, 1]} : vector<4x33xf32> to vector<4x1xf32>
    %414 = vector.broadcast %413 : vector<4x1xf32> to vector<4x32xf32>
    %415 = arith.divf %412, %414 : vector<4x32xf32>
    %416 = vector.extract_strided_slice %415 {offsets = [0, 0], sizes = [2, 32], strides = [1, 1]} : vector<4x32xf32> to vector<2x32xf32>
    %cst_148 = arith.constant 1.000000e+00 : f32
    %417 = vector.broadcast %cst_148 : f32 to vector<2x32xf32>
    %418 = arith.subf %417, %416 : vector<2x32xf32>
    %419 = vector.extract_strided_slice %415 {offsets = [2, 0], sizes = [2, 32], strides = [1, 1]} : vector<4x32xf32> to vector<2x32xf32>
    %420 = arith.mulf %419, %418 : vector<2x32xf32>
    %421 = arith.mulf %398, %420 : vector<2x32xf32>
    %422 = arith.subf %419, %420 : vector<2x32xf32>
    %423 = arith.addf %421, %422 : vector<2x32xf32>
    %424 = arith.mulf %397, %420 : vector<2x32xf32>
    %425 = arith.subf %418, %420 : vector<2x32xf32>
    %426 = arith.addf %424, %425 : vector<2x32xf32>
    %427 = arith.mulf %423, %290 : vector<2x32xf32>
    %428 = arith.mulf %426, %400 : vector<2x32xf32>
    %429 = arith.addf %427, %428 : vector<2x32xf32>
    %430 = math.tanh %429 : vector<2x32xf32>
    %431 = arith.mulf %396, %430 : vector<2x32xf32>
    %c0_149 = arith.constant 0 : index
    %c1536_150 = arith.constant 1536 : index
    %432 = vector.load %arg5[%c0_149, %c1536_150] : memref<32x2048xf32, #tpu.memory_space<vmem>>, vector<32x32xf32>
    %cst_151 = arith.constant dense<0.000000e+00> : vector<2x32xf32>
    %433 = tpu.matmul %378, %432, %cst_151 {dimension_numbers = #tpu.dot_dimension_numbers<[1], [0], [0], [1], [0, 0, 1, 1], [], []>} : vector<2x32xf32>, vector<32x32xf32>, vector<2x32xf32> -> vector<2x32xf32>
    %c0_152 = arith.constant 0 : index
    %c1664_153 = arith.constant 1664 : index
    %434 = vector.load %arg5[%c0_152, %c1664_153] : memref<32x2048xf32, #tpu.memory_space<vmem>>, vector<32x32xf32>
    %cst_154 = arith.constant dense<0.000000e+00> : vector<2x32xf32>
    %435 = tpu.matmul %431, %434, %cst_154 {dimension_numbers = #tpu.dot_dimension_numbers<[1], [0], [0], [1], [0, 0, 1, 1], [], []>} : vector<2x32xf32>, vector<32x32xf32>, vector<2x32xf32> -> vector<2x32xf32>
    %436 = arith.addf %433, %435 : vector<2x32xf32>
    %437 = vector.shape_cast %436 : vector<2x32xf32> to vector<2x1x32xf32>
    %438 = vector.broadcast %437 : vector<2x1x32xf32> to vector<2x6x32xf32>
    %439 = arith.addf %10, %438 : vector<2x6x32xf32>
    %440 = math.tanh %439 : vector<2x6x32xf32>
    %c6_155 = arith.constant 6 : index
    %c0_156 = arith.constant 0 : index
    %441 = vector.load %arg6[%c6_155, %c0_156] : memref<8x256xf32, #tpu.memory_space<vmem>>, vector<1x32xf32>
    %442 = vector.shape_cast %441 : vector<1x32xf32> to vector<1x1x32xf32>
    %443 = vector.broadcast %442 : vector<1x1x32xf32> to vector<2x6x32xf32>
    %444 = arith.mulf %440, %443 : vector<2x6x32xf32>
    %cst_157 = arith.constant dense<0.000000e+00> : vector<2x6xf32>
    %445 = vector.multi_reduction <add>, %444, %cst_157 [2] : vector<2x6x32xf32> to vector<2x6xf32>
    %cst_158 = arith.constant dense<0xFF800000> : vector<2xf32>
    %446 = vector.multi_reduction <maximumf>, %445, %cst_158 [1] : vector<2x6xf32> to vector<2xf32>
    %447 = vector.shape_cast %446 : vector<2xf32> to vector<2x1xf32>
    %448 = vector.broadcast %447 : vector<2x1xf32> to vector<2x6xf32>
    %449 = arith.subf %445, %448 : vector<2x6xf32>
    %450 = math.exp %449 : vector<2x6xf32>
    %cst_159 = arith.constant dense<0.000000e+00> : vector<2xf32>
    %451 = vector.multi_reduction <add>, %450, %cst_159 [1] : vector<2x6xf32> to vector<2xf32>
    %452 = vector.shape_cast %451 : vector<2xf32> to vector<2x1xf32>
    %453 = vector.broadcast %452 : vector<2x1xf32> to vector<2x6xf32>
    %454 = arith.divf %450, %453 : vector<2x6xf32>
    %455 = vector.shape_cast %454 : vector<2x6xf32> to vector<2x6x1xf32>
    %c0_160 = arith.constant 0 : index
    %c0_161 = arith.constant 0 : index
    %c0_162 = arith.constant 0 : index
    %456 = vector.load %arg4[%c0_160, %c0_161, %c0_162] : memref<2x6x32xf32, #tpu.memory_space<vmem>>, vector<2x6x32xf32>
    %457 = vector.broadcast %455 : vector<2x6x1xf32> to vector<2x6x32xf32>
    %458 = arith.mulf %457, %456 : vector<2x6x32xf32>
    %cst_163 = arith.constant dense<0.000000e+00> : vector<2x32xf32>
    %459 = vector.multi_reduction <add>, %458, %cst_163 [1] : vector<2x6x32xf32> to vector<2x32xf32>
    %c3 = arith.constant 3 : index
    %460 = memref.load %arg1[%c3] : memref<14xi32, #tpu.memory_space<smem>>
    %461 = arith.index_cast %460 : i32 to index
    %c0_164 = arith.constant 0 : index
    %c0_165 = arith.constant 0 : index
    %462 = vector.load %arg2[%461, %c0_164, %c0_165] : memref<48x1x136xf32, #tpu.memory_space<vmem>>, vector<1x1x136xf32>
    %463 = vector.shape_cast %462 : vector<1x1x136xf32> to vector<1x136xf32>
    %c10 = arith.constant 10 : index
    %464 = memref.load %arg1[%c10] : memref<14xi32, #tpu.memory_space<smem>>
    %465 = arith.index_cast %464 : i32 to index
    %c0_166 = arith.constant 0 : index
    %c0_167 = arith.constant 0 : index
    %466 = vector.load %arg2[%465, %c0_166, %c0_167] : memref<48x1x136xf32, #tpu.memory_space<vmem>>, vector<1x1x136xf32>
    %467 = vector.shape_cast %466 : vector<1x1x136xf32> to vector<1x136xf32>
    %468 = tpu.concatenate %463, %467 in 0 : vector<1x136xf32>, vector<1x136xf32> -> vector<2x136xf32>
    %469 = arith.addf %468, %2 : vector<2x136xf32>
    %c0_168 = arith.constant 0 : index
    %c256_169 = arith.constant 256 : index
    %470 = vector.load %arg5[%c0_168, %c256_169] : memref<32x2048xf32, #tpu.memory_space<vmem>>, vector<32x136xf32>
    %cst_170 = arith.constant dense<0.000000e+00> : vector<2x136xf32>
    %471 = tpu.matmul %378, %470, %cst_170 {dimension_numbers = #tpu.dot_dimension_numbers<[1], [0], [0], [1], [0, 0, 1, 1], [], []>} : vector<2x32xf32>, vector<32x136xf32>, vector<2x136xf32> -> vector<2x136xf32>
    %472 = arith.addf %469, %471 : vector<2x136xf32>
    %c0_171 = arith.constant 0 : index
    %c512_172 = arith.constant 512 : index
    %473 = vector.load %arg5[%c0_171, %c512_172] : memref<32x2048xf32, #tpu.memory_space<vmem>>, vector<32x136xf32>
    %cst_173 = arith.constant dense<0.000000e+00> : vector<2x136xf32>
    %474 = tpu.matmul %459, %473, %cst_173 {dimension_numbers = #tpu.dot_dimension_numbers<[1], [0], [0], [1], [0, 0, 1, 1], [], []>} : vector<2x32xf32>, vector<32x136xf32>, vector<2x136xf32> -> vector<2x136xf32>
    %475 = arith.addf %472, %474 : vector<2x136xf32>
    %476 = vector.extract_strided_slice %475 {offsets = [0, 0], sizes = [2, 96], strides = [1, 1]} : vector<2x136xf32> to vector<2x96xf32>
    %477 = arith.negf %476 : vector<2x96xf32>
    %478 = math.exp %477 : vector<2x96xf32>
    %cst_174 = arith.constant 1.000000e+00 : f32
    %479 = vector.broadcast %cst_174 : f32 to vector<2x96xf32>
    %480 = arith.addf %479, %478 : vector<2x96xf32>
    %481 = arith.divf %479, %480 : vector<2x96xf32>
    %482 = vector.extract_strided_slice %481 {offsets = [0, 0], sizes = [2, 32], strides = [1, 1]} : vector<2x96xf32> to vector<2x32xf32>
    %483 = vector.extract_strided_slice %481 {offsets = [0, 32], sizes = [2, 32], strides = [1, 1]} : vector<2x96xf32> to vector<2x32xf32>
    %484 = vector.extract_strided_slice %481 {offsets = [0, 64], sizes = [2, 32], strides = [1, 1]} : vector<2x96xf32> to vector<2x32xf32>
    %485 = vector.extract_strided_slice %475 {offsets = [0, 96], sizes = [2, 32], strides = [1, 1]} : vector<2x136xf32> to vector<2x32xf32>
    %486 = math.tanh %485 : vector<2x32xf32>
    %487 = vector.extract_strided_slice %475 {offsets = [0, 128], sizes = [2, 8], strides = [1, 1]} : vector<2x136xf32> to vector<2x8xf32>
    %488 = vector.extract_strided_slice %487 {offsets = [0, 0], sizes = [2, 4], strides = [1, 1]} : vector<2x8xf32> to vector<2x4xf32>
    %489 = vector.extract_strided_slice %487 {offsets = [0, 4], sizes = [2, 4], strides = [1, 1]} : vector<2x8xf32> to vector<2x4xf32>
    %490 = tpu.concatenate %488, %489 in 0 : vector<2x4xf32>, vector<2x4xf32> -> vector<4x4xf32>
    %cst_175 = arith.constant dense<0xFF800000> : vector<4xf32>
    %491 = vector.multi_reduction <maximumf>, %490, %cst_175 [1] : vector<4x4xf32> to vector<4xf32>
    %492 = vector.shape_cast %491 : vector<4xf32> to vector<4x1xf32>
    %493 = vector.broadcast %492 : vector<4x1xf32> to vector<4x4xf32>
    %494 = arith.subf %490, %493 : vector<4x4xf32>
    %495 = math.exp %494 : vector<4x4xf32>
    %c0_176 = arith.constant 0 : index
    %c0_177 = arith.constant 0 : index
    %496 = vector.load %arg6[%c0_176, %c0_177] : memref<8x256xf32, #tpu.memory_space<vmem>>, vector<4x33xf32>
    %cst_178 = arith.constant dense<0.000000e+00> : vector<4x33xf32>
    %497 = tpu.matmul %495, %496, %cst_178 {dimension_numbers = #tpu.dot_dimension_numbers<[1], [0], [0], [1], [0, 0, 1, 1], [], []>} : vector<4x4xf32>, vector<4x33xf32>, vector<4x33xf32> -> vector<4x33xf32>
    %498 = vector.extract_strided_slice %497 {offsets = [0, 0], sizes = [4, 32], strides = [1, 1]} : vector<4x33xf32> to vector<4x32xf32>
    %499 = vector.extract_strided_slice %497 {offsets = [0, 32], sizes = [4, 1], strides = [1, 1]} : vector<4x33xf32> to vector<4x1xf32>
    %500 = vector.broadcast %499 : vector<4x1xf32> to vector<4x32xf32>
    %501 = arith.divf %498, %500 : vector<4x32xf32>
    %502 = vector.extract_strided_slice %501 {offsets = [0, 0], sizes = [2, 32], strides = [1, 1]} : vector<4x32xf32> to vector<2x32xf32>
    %cst_179 = arith.constant 1.000000e+00 : f32
    %503 = vector.broadcast %cst_179 : f32 to vector<2x32xf32>
    %504 = arith.subf %503, %502 : vector<2x32xf32>
    %505 = vector.extract_strided_slice %501 {offsets = [2, 0], sizes = [2, 32], strides = [1, 1]} : vector<4x32xf32> to vector<2x32xf32>
    %506 = arith.mulf %505, %504 : vector<2x32xf32>
    %507 = arith.mulf %484, %506 : vector<2x32xf32>
    %508 = arith.subf %505, %506 : vector<2x32xf32>
    %509 = arith.addf %507, %508 : vector<2x32xf32>
    %510 = arith.mulf %483, %506 : vector<2x32xf32>
    %511 = arith.subf %504, %506 : vector<2x32xf32>
    %512 = arith.addf %510, %511 : vector<2x32xf32>
    %513 = arith.mulf %509, %376 : vector<2x32xf32>
    %514 = arith.mulf %512, %486 : vector<2x32xf32>
    %515 = arith.addf %513, %514 : vector<2x32xf32>
    %516 = math.tanh %515 : vector<2x32xf32>
    %517 = arith.mulf %482, %516 : vector<2x32xf32>
    %c4_180 = arith.constant 4 : index
    %c0_181 = arith.constant 0 : index
    %518 = vector.load %arg6[%c4_180, %c0_181] : memref<8x256xf32, #tpu.memory_space<vmem>>, vector<1x136xf32>
    %c0_182 = arith.constant 0 : index
    %c768_183 = arith.constant 768 : index
    %519 = vector.load %arg5[%c0_182, %c768_183] : memref<32x2048xf32, #tpu.memory_space<vmem>>, vector<32x136xf32>
    %cst_184 = arith.constant dense<0.000000e+00> : vector<2x136xf32>
    %520 = tpu.matmul %517, %519, %cst_184 {dimension_numbers = #tpu.dot_dimension_numbers<[1], [0], [0], [1], [0, 0, 1, 1], [], []>} : vector<2x32xf32>, vector<32x136xf32>, vector<2x136xf32> -> vector<2x136xf32>
    %521 = vector.broadcast %518 : vector<1x136xf32> to vector<2x136xf32>
    %522 = arith.addf %521, %520 : vector<2x136xf32>
    %c0_185 = arith.constant 0 : index
    %c1024_186 = arith.constant 1024 : index
    %523 = vector.load %arg5[%c0_185, %c1024_186] : memref<32x2048xf32, #tpu.memory_space<vmem>>, vector<32x136xf32>
    %cst_187 = arith.constant dense<0.000000e+00> : vector<2x136xf32>
    %524 = tpu.matmul %431, %523, %cst_187 {dimension_numbers = #tpu.dot_dimension_numbers<[1], [0], [0], [1], [0, 0, 1, 1], [], []>} : vector<2x32xf32>, vector<32x136xf32>, vector<2x136xf32> -> vector<2x136xf32>
    %525 = arith.addf %522, %524 : vector<2x136xf32>
    %c0_188 = arith.constant 0 : index
    %c1280_189 = arith.constant 1280 : index
    %526 = vector.load %arg5[%c0_188, %c1280_189] : memref<32x2048xf32, #tpu.memory_space<vmem>>, vector<32x136xf32>
    %cst_190 = arith.constant dense<0.000000e+00> : vector<2x136xf32>
    %527 = tpu.matmul %459, %526, %cst_190 {dimension_numbers = #tpu.dot_dimension_numbers<[1], [0], [0], [1], [0, 0, 1, 1], [], []>} : vector<2x32xf32>, vector<32x136xf32>, vector<2x136xf32> -> vector<2x136xf32>
    %528 = arith.addf %525, %527 : vector<2x136xf32>
    %529 = vector.extract_strided_slice %528 {offsets = [0, 0], sizes = [2, 96], strides = [1, 1]} : vector<2x136xf32> to vector<2x96xf32>
    %530 = arith.negf %529 : vector<2x96xf32>
    %531 = math.exp %530 : vector<2x96xf32>
    %cst_191 = arith.constant 1.000000e+00 : f32
    %532 = vector.broadcast %cst_191 : f32 to vector<2x96xf32>
    %533 = arith.addf %532, %531 : vector<2x96xf32>
    %534 = arith.divf %532, %533 : vector<2x96xf32>
    %535 = vector.extract_strided_slice %534 {offsets = [0, 0], sizes = [2, 32], strides = [1, 1]} : vector<2x96xf32> to vector<2x32xf32>
    %536 = vector.extract_strided_slice %534 {offsets = [0, 32], sizes = [2, 32], strides = [1, 1]} : vector<2x96xf32> to vector<2x32xf32>
    %537 = vector.extract_strided_slice %534 {offsets = [0, 64], sizes = [2, 32], strides = [1, 1]} : vector<2x96xf32> to vector<2x32xf32>
    %538 = vector.extract_strided_slice %528 {offsets = [0, 96], sizes = [2, 32], strides = [1, 1]} : vector<2x136xf32> to vector<2x32xf32>
    %539 = math.tanh %538 : vector<2x32xf32>
    %540 = vector.extract_strided_slice %528 {offsets = [0, 128], sizes = [2, 8], strides = [1, 1]} : vector<2x136xf32> to vector<2x8xf32>
    %541 = vector.extract_strided_slice %540 {offsets = [0, 0], sizes = [2, 4], strides = [1, 1]} : vector<2x8xf32> to vector<2x4xf32>
    %542 = vector.extract_strided_slice %540 {offsets = [0, 4], sizes = [2, 4], strides = [1, 1]} : vector<2x8xf32> to vector<2x4xf32>
    %543 = tpu.concatenate %541, %542 in 0 : vector<2x4xf32>, vector<2x4xf32> -> vector<4x4xf32>
    %cst_192 = arith.constant dense<0xFF800000> : vector<4xf32>
    %544 = vector.multi_reduction <maximumf>, %543, %cst_192 [1] : vector<4x4xf32> to vector<4xf32>
    %545 = vector.shape_cast %544 : vector<4xf32> to vector<4x1xf32>
    %546 = vector.broadcast %545 : vector<4x1xf32> to vector<4x4xf32>
    %547 = arith.subf %543, %546 : vector<4x4xf32>
    %548 = math.exp %547 : vector<4x4xf32>
    %c0_193 = arith.constant 0 : index
    %c0_194 = arith.constant 0 : index
    %549 = vector.load %arg6[%c0_193, %c0_194] : memref<8x256xf32, #tpu.memory_space<vmem>>, vector<4x33xf32>
    %cst_195 = arith.constant dense<0.000000e+00> : vector<4x33xf32>
    %550 = tpu.matmul %548, %549, %cst_195 {dimension_numbers = #tpu.dot_dimension_numbers<[1], [0], [0], [1], [0, 0, 1, 1], [], []>} : vector<4x4xf32>, vector<4x33xf32>, vector<4x33xf32> -> vector<4x33xf32>
    %551 = vector.extract_strided_slice %550 {offsets = [0, 0], sizes = [4, 32], strides = [1, 1]} : vector<4x33xf32> to vector<4x32xf32>
    %552 = vector.extract_strided_slice %550 {offsets = [0, 32], sizes = [4, 1], strides = [1, 1]} : vector<4x33xf32> to vector<4x1xf32>
    %553 = vector.broadcast %552 : vector<4x1xf32> to vector<4x32xf32>
    %554 = arith.divf %551, %553 : vector<4x32xf32>
    %555 = vector.extract_strided_slice %554 {offsets = [0, 0], sizes = [2, 32], strides = [1, 1]} : vector<4x32xf32> to vector<2x32xf32>
    %cst_196 = arith.constant 1.000000e+00 : f32
    %556 = vector.broadcast %cst_196 : f32 to vector<2x32xf32>
    %557 = arith.subf %556, %555 : vector<2x32xf32>
    %558 = vector.extract_strided_slice %554 {offsets = [2, 0], sizes = [2, 32], strides = [1, 1]} : vector<4x32xf32> to vector<2x32xf32>
    %559 = arith.mulf %558, %557 : vector<2x32xf32>
    %560 = arith.mulf %537, %559 : vector<2x32xf32>
    %561 = arith.subf %558, %559 : vector<2x32xf32>
    %562 = arith.addf %560, %561 : vector<2x32xf32>
    %563 = arith.mulf %536, %559 : vector<2x32xf32>
    %564 = arith.subf %557, %559 : vector<2x32xf32>
    %565 = arith.addf %563, %564 : vector<2x32xf32>
    %566 = arith.mulf %562, %429 : vector<2x32xf32>
    %567 = arith.mulf %565, %539 : vector<2x32xf32>
    %568 = arith.addf %566, %567 : vector<2x32xf32>
    %569 = math.tanh %568 : vector<2x32xf32>
    %570 = arith.mulf %535, %569 : vector<2x32xf32>
    %c0_197 = arith.constant 0 : index
    %c1536_198 = arith.constant 1536 : index
    %571 = vector.load %arg5[%c0_197, %c1536_198] : memref<32x2048xf32, #tpu.memory_space<vmem>>, vector<32x32xf32>
    %cst_199 = arith.constant dense<0.000000e+00> : vector<2x32xf32>
    %572 = tpu.matmul %517, %571, %cst_199 {dimension_numbers = #tpu.dot_dimension_numbers<[1], [0], [0], [1], [0, 0, 1, 1], [], []>} : vector<2x32xf32>, vector<32x32xf32>, vector<2x32xf32> -> vector<2x32xf32>
    %c0_200 = arith.constant 0 : index
    %c1664_201 = arith.constant 1664 : index
    %573 = vector.load %arg5[%c0_200, %c1664_201] : memref<32x2048xf32, #tpu.memory_space<vmem>>, vector<32x32xf32>
    %cst_202 = arith.constant dense<0.000000e+00> : vector<2x32xf32>
    %574 = tpu.matmul %570, %573, %cst_202 {dimension_numbers = #tpu.dot_dimension_numbers<[1], [0], [0], [1], [0, 0, 1, 1], [], []>} : vector<2x32xf32>, vector<32x32xf32>, vector<2x32xf32> -> vector<2x32xf32>
    %575 = arith.addf %572, %574 : vector<2x32xf32>
    %576 = vector.shape_cast %575 : vector<2x32xf32> to vector<2x1x32xf32>
    %577 = vector.broadcast %576 : vector<2x1x32xf32> to vector<2x6x32xf32>
    %578 = arith.addf %10, %577 : vector<2x6x32xf32>
    %579 = math.tanh %578 : vector<2x6x32xf32>
    %c6_203 = arith.constant 6 : index
    %c0_204 = arith.constant 0 : index
    %580 = vector.load %arg6[%c6_203, %c0_204] : memref<8x256xf32, #tpu.memory_space<vmem>>, vector<1x32xf32>
    %581 = vector.shape_cast %580 : vector<1x32xf32> to vector<1x1x32xf32>
    %582 = vector.broadcast %581 : vector<1x1x32xf32> to vector<2x6x32xf32>
    %583 = arith.mulf %579, %582 : vector<2x6x32xf32>
    %cst_205 = arith.constant dense<0.000000e+00> : vector<2x6xf32>
    %584 = vector.multi_reduction <add>, %583, %cst_205 [2] : vector<2x6x32xf32> to vector<2x6xf32>
    %cst_206 = arith.constant dense<0xFF800000> : vector<2xf32>
    %585 = vector.multi_reduction <maximumf>, %584, %cst_206 [1] : vector<2x6xf32> to vector<2xf32>
    %586 = vector.shape_cast %585 : vector<2xf32> to vector<2x1xf32>
    %587 = vector.broadcast %586 : vector<2x1xf32> to vector<2x6xf32>
    %588 = arith.subf %584, %587 : vector<2x6xf32>
    %589 = math.exp %588 : vector<2x6xf32>
    %cst_207 = arith.constant dense<0.000000e+00> : vector<2xf32>
    %590 = vector.multi_reduction <add>, %589, %cst_207 [1] : vector<2x6xf32> to vector<2xf32>
    %591 = vector.shape_cast %590 : vector<2xf32> to vector<2x1xf32>
    %592 = vector.broadcast %591 : vector<2x1xf32> to vector<2x6xf32>
    %593 = arith.divf %589, %592 : vector<2x6xf32>
    %594 = vector.shape_cast %593 : vector<2x6xf32> to vector<2x6x1xf32>
    %c0_208 = arith.constant 0 : index
    %c0_209 = arith.constant 0 : index
    %c0_210 = arith.constant 0 : index
    %595 = vector.load %arg4[%c0_208, %c0_209, %c0_210] : memref<2x6x32xf32, #tpu.memory_space<vmem>>, vector<2x6x32xf32>
    %596 = vector.broadcast %594 : vector<2x6x1xf32> to vector<2x6x32xf32>
    %597 = arith.mulf %596, %595 : vector<2x6x32xf32>
    %cst_211 = arith.constant dense<0.000000e+00> : vector<2x32xf32>
    %598 = vector.multi_reduction <add>, %597, %cst_211 [1] : vector<2x6x32xf32> to vector<2x32xf32>
    %c4_212 = arith.constant 4 : index
    %599 = memref.load %arg1[%c4_212] : memref<14xi32, #tpu.memory_space<smem>>
    %600 = arith.index_cast %599 : i32 to index
    %c0_213 = arith.constant 0 : index
    %c0_214 = arith.constant 0 : index
    %601 = vector.load %arg2[%600, %c0_213, %c0_214] : memref<48x1x136xf32, #tpu.memory_space<vmem>>, vector<1x1x136xf32>
    %602 = vector.shape_cast %601 : vector<1x1x136xf32> to vector<1x136xf32>
    %c11 = arith.constant 11 : index
    %603 = memref.load %arg1[%c11] : memref<14xi32, #tpu.memory_space<smem>>
    %604 = arith.index_cast %603 : i32 to index
    %c0_215 = arith.constant 0 : index
    %c0_216 = arith.constant 0 : index
    %605 = vector.load %arg2[%604, %c0_215, %c0_216] : memref<48x1x136xf32, #tpu.memory_space<vmem>>, vector<1x1x136xf32>
    %606 = vector.shape_cast %605 : vector<1x1x136xf32> to vector<1x136xf32>
    %607 = tpu.concatenate %602, %606 in 0 : vector<1x136xf32>, vector<1x136xf32> -> vector<2x136xf32>
    %608 = arith.addf %607, %2 : vector<2x136xf32>
    %c0_217 = arith.constant 0 : index
    %c256_218 = arith.constant 256 : index
    %609 = vector.load %arg5[%c0_217, %c256_218] : memref<32x2048xf32, #tpu.memory_space<vmem>>, vector<32x136xf32>
    %cst_219 = arith.constant dense<0.000000e+00> : vector<2x136xf32>
    %610 = tpu.matmul %517, %609, %cst_219 {dimension_numbers = #tpu.dot_dimension_numbers<[1], [0], [0], [1], [0, 0, 1, 1], [], []>} : vector<2x32xf32>, vector<32x136xf32>, vector<2x136xf32> -> vector<2x136xf32>
    %611 = arith.addf %608, %610 : vector<2x136xf32>
    %c0_220 = arith.constant 0 : index
    %c512_221 = arith.constant 512 : index
    %612 = vector.load %arg5[%c0_220, %c512_221] : memref<32x2048xf32, #tpu.memory_space<vmem>>, vector<32x136xf32>
    %cst_222 = arith.constant dense<0.000000e+00> : vector<2x136xf32>
    %613 = tpu.matmul %598, %612, %cst_222 {dimension_numbers = #tpu.dot_dimension_numbers<[1], [0], [0], [1], [0, 0, 1, 1], [], []>} : vector<2x32xf32>, vector<32x136xf32>, vector<2x136xf32> -> vector<2x136xf32>
    %614 = arith.addf %611, %613 : vector<2x136xf32>
    %615 = vector.extract_strided_slice %614 {offsets = [0, 0], sizes = [2, 96], strides = [1, 1]} : vector<2x136xf32> to vector<2x96xf32>
    %616 = arith.negf %615 : vector<2x96xf32>
    %617 = math.exp %616 : vector<2x96xf32>
    %cst_223 = arith.constant 1.000000e+00 : f32
    %618 = vector.broadcast %cst_223 : f32 to vector<2x96xf32>
    %619 = arith.addf %618, %617 : vector<2x96xf32>
    %620 = arith.divf %618, %619 : vector<2x96xf32>
    %621 = vector.extract_strided_slice %620 {offsets = [0, 0], sizes = [2, 32], strides = [1, 1]} : vector<2x96xf32> to vector<2x32xf32>
    %622 = vector.extract_strided_slice %620 {offsets = [0, 32], sizes = [2, 32], strides = [1, 1]} : vector<2x96xf32> to vector<2x32xf32>
    %623 = vector.extract_strided_slice %620 {offsets = [0, 64], sizes = [2, 32], strides = [1, 1]} : vector<2x96xf32> to vector<2x32xf32>
    %624 = vector.extract_strided_slice %614 {offsets = [0, 96], sizes = [2, 32], strides = [1, 1]} : vector<2x136xf32> to vector<2x32xf32>
    %625 = math.tanh %624 : vector<2x32xf32>
    %626 = vector.extract_strided_slice %614 {offsets = [0, 128], sizes = [2, 8], strides = [1, 1]} : vector<2x136xf32> to vector<2x8xf32>
    %627 = vector.extract_strided_slice %626 {offsets = [0, 0], sizes = [2, 4], strides = [1, 1]} : vector<2x8xf32> to vector<2x4xf32>
    %628 = vector.extract_strided_slice %626 {offsets = [0, 4], sizes = [2, 4], strides = [1, 1]} : vector<2x8xf32> to vector<2x4xf32>
    %629 = tpu.concatenate %627, %628 in 0 : vector<2x4xf32>, vector<2x4xf32> -> vector<4x4xf32>
    %cst_224 = arith.constant dense<0xFF800000> : vector<4xf32>
    %630 = vector.multi_reduction <maximumf>, %629, %cst_224 [1] : vector<4x4xf32> to vector<4xf32>
    %631 = vector.shape_cast %630 : vector<4xf32> to vector<4x1xf32>
    %632 = vector.broadcast %631 : vector<4x1xf32> to vector<4x4xf32>
    %633 = arith.subf %629, %632 : vector<4x4xf32>
    %634 = math.exp %633 : vector<4x4xf32>
    %c0_225 = arith.constant 0 : index
    %c0_226 = arith.constant 0 : index
    %635 = vector.load %arg6[%c0_225, %c0_226] : memref<8x256xf32, #tpu.memory_space<vmem>>, vector<4x33xf32>
    %cst_227 = arith.constant dense<0.000000e+00> : vector<4x33xf32>
    %636 = tpu.matmul %634, %635, %cst_227 {dimension_numbers = #tpu.dot_dimension_numbers<[1], [0], [0], [1], [0, 0, 1, 1], [], []>} : vector<4x4xf32>, vector<4x33xf32>, vector<4x33xf32> -> vector<4x33xf32>
    %637 = vector.extract_strided_slice %636 {offsets = [0, 0], sizes = [4, 32], strides = [1, 1]} : vector<4x33xf32> to vector<4x32xf32>
    %638 = vector.extract_strided_slice %636 {offsets = [0, 32], sizes = [4, 1], strides = [1, 1]} : vector<4x33xf32> to vector<4x1xf32>
    %639 = vector.broadcast %638 : vector<4x1xf32> to vector<4x32xf32>
    %640 = arith.divf %637, %639 : vector<4x32xf32>
    %641 = vector.extract_strided_slice %640 {offsets = [0, 0], sizes = [2, 32], strides = [1, 1]} : vector<4x32xf32> to vector<2x32xf32>
    %cst_228 = arith.constant 1.000000e+00 : f32
    %642 = vector.broadcast %cst_228 : f32 to vector<2x32xf32>
    %643 = arith.subf %642, %641 : vector<2x32xf32>
    %644 = vector.extract_strided_slice %640 {offsets = [2, 0], sizes = [2, 32], strides = [1, 1]} : vector<4x32xf32> to vector<2x32xf32>
    %645 = arith.mulf %644, %643 : vector<2x32xf32>
    %646 = arith.mulf %623, %645 : vector<2x32xf32>
    %647 = arith.subf %644, %645 : vector<2x32xf32>
    %648 = arith.addf %646, %647 : vector<2x32xf32>
    %649 = arith.mulf %622, %645 : vector<2x32xf32>
    %650 = arith.subf %643, %645 : vector<2x32xf32>
    %651 = arith.addf %649, %650 : vector<2x32xf32>
    %652 = arith.mulf %648, %515 : vector<2x32xf32>
    %653 = arith.mulf %651, %625 : vector<2x32xf32>
    %654 = arith.addf %652, %653 : vector<2x32xf32>
    %655 = math.tanh %654 : vector<2x32xf32>
    %656 = arith.mulf %621, %655 : vector<2x32xf32>
    %c4_229 = arith.constant 4 : index
    %c0_230 = arith.constant 0 : index
    %657 = vector.load %arg6[%c4_229, %c0_230] : memref<8x256xf32, #tpu.memory_space<vmem>>, vector<1x136xf32>
    %c0_231 = arith.constant 0 : index
    %c768_232 = arith.constant 768 : index
    %658 = vector.load %arg5[%c0_231, %c768_232] : memref<32x2048xf32, #tpu.memory_space<vmem>>, vector<32x136xf32>
    %cst_233 = arith.constant dense<0.000000e+00> : vector<2x136xf32>
    %659 = tpu.matmul %656, %658, %cst_233 {dimension_numbers = #tpu.dot_dimension_numbers<[1], [0], [0], [1], [0, 0, 1, 1], [], []>} : vector<2x32xf32>, vector<32x136xf32>, vector<2x136xf32> -> vector<2x136xf32>
    %660 = vector.broadcast %657 : vector<1x136xf32> to vector<2x136xf32>
    %661 = arith.addf %660, %659 : vector<2x136xf32>
    %c0_234 = arith.constant 0 : index
    %c1024_235 = arith.constant 1024 : index
    %662 = vector.load %arg5[%c0_234, %c1024_235] : memref<32x2048xf32, #tpu.memory_space<vmem>>, vector<32x136xf32>
    %cst_236 = arith.constant dense<0.000000e+00> : vector<2x136xf32>
    %663 = tpu.matmul %570, %662, %cst_236 {dimension_numbers = #tpu.dot_dimension_numbers<[1], [0], [0], [1], [0, 0, 1, 1], [], []>} : vector<2x32xf32>, vector<32x136xf32>, vector<2x136xf32> -> vector<2x136xf32>
    %664 = arith.addf %661, %663 : vector<2x136xf32>
    %c0_237 = arith.constant 0 : index
    %c1280_238 = arith.constant 1280 : index
    %665 = vector.load %arg5[%c0_237, %c1280_238] : memref<32x2048xf32, #tpu.memory_space<vmem>>, vector<32x136xf32>
    %cst_239 = arith.constant dense<0.000000e+00> : vector<2x136xf32>
    %666 = tpu.matmul %598, %665, %cst_239 {dimension_numbers = #tpu.dot_dimension_numbers<[1], [0], [0], [1], [0, 0, 1, 1], [], []>} : vector<2x32xf32>, vector<32x136xf32>, vector<2x136xf32> -> vector<2x136xf32>
    %667 = arith.addf %664, %666 : vector<2x136xf32>
    %668 = vector.extract_strided_slice %667 {offsets = [0, 0], sizes = [2, 96], strides = [1, 1]} : vector<2x136xf32> to vector<2x96xf32>
    %669 = arith.negf %668 : vector<2x96xf32>
    %670 = math.exp %669 : vector<2x96xf32>
    %cst_240 = arith.constant 1.000000e+00 : f32
    %671 = vector.broadcast %cst_240 : f32 to vector<2x96xf32>
    %672 = arith.addf %671, %670 : vector<2x96xf32>
    %673 = arith.divf %671, %672 : vector<2x96xf32>
    %674 = vector.extract_strided_slice %673 {offsets = [0, 0], sizes = [2, 32], strides = [1, 1]} : vector<2x96xf32> to vector<2x32xf32>
    %675 = vector.extract_strided_slice %673 {offsets = [0, 32], sizes = [2, 32], strides = [1, 1]} : vector<2x96xf32> to vector<2x32xf32>
    %676 = vector.extract_strided_slice %673 {offsets = [0, 64], sizes = [2, 32], strides = [1, 1]} : vector<2x96xf32> to vector<2x32xf32>
    %677 = vector.extract_strided_slice %667 {offsets = [0, 96], sizes = [2, 32], strides = [1, 1]} : vector<2x136xf32> to vector<2x32xf32>
    %678 = math.tanh %677 : vector<2x32xf32>
    %679 = vector.extract_strided_slice %667 {offsets = [0, 128], sizes = [2, 8], strides = [1, 1]} : vector<2x136xf32> to vector<2x8xf32>
    %680 = vector.extract_strided_slice %679 {offsets = [0, 0], sizes = [2, 4], strides = [1, 1]} : vector<2x8xf32> to vector<2x4xf32>
    %681 = vector.extract_strided_slice %679 {offsets = [0, 4], sizes = [2, 4], strides = [1, 1]} : vector<2x8xf32> to vector<2x4xf32>
    %682 = tpu.concatenate %680, %681 in 0 : vector<2x4xf32>, vector<2x4xf32> -> vector<4x4xf32>
    %cst_241 = arith.constant dense<0xFF800000> : vector<4xf32>
    %683 = vector.multi_reduction <maximumf>, %682, %cst_241 [1] : vector<4x4xf32> to vector<4xf32>
    %684 = vector.shape_cast %683 : vector<4xf32> to vector<4x1xf32>
    %685 = vector.broadcast %684 : vector<4x1xf32> to vector<4x4xf32>
    %686 = arith.subf %682, %685 : vector<4x4xf32>
    %687 = math.exp %686 : vector<4x4xf32>
    %c0_242 = arith.constant 0 : index
    %c0_243 = arith.constant 0 : index
    %688 = vector.load %arg6[%c0_242, %c0_243] : memref<8x256xf32, #tpu.memory_space<vmem>>, vector<4x33xf32>
    %cst_244 = arith.constant dense<0.000000e+00> : vector<4x33xf32>
    %689 = tpu.matmul %687, %688, %cst_244 {dimension_numbers = #tpu.dot_dimension_numbers<[1], [0], [0], [1], [0, 0, 1, 1], [], []>} : vector<4x4xf32>, vector<4x33xf32>, vector<4x33xf32> -> vector<4x33xf32>
    %690 = vector.extract_strided_slice %689 {offsets = [0, 0], sizes = [4, 32], strides = [1, 1]} : vector<4x33xf32> to vector<4x32xf32>
    %691 = vector.extract_strided_slice %689 {offsets = [0, 32], sizes = [4, 1], strides = [1, 1]} : vector<4x33xf32> to vector<4x1xf32>
    %692 = vector.broadcast %691 : vector<4x1xf32> to vector<4x32xf32>
    %693 = arith.divf %690, %692 : vector<4x32xf32>
    %694 = vector.extract_strided_slice %693 {offsets = [0, 0], sizes = [2, 32], strides = [1, 1]} : vector<4x32xf32> to vector<2x32xf32>
    %cst_245 = arith.constant 1.000000e+00 : f32
    %695 = vector.broadcast %cst_245 : f32 to vector<2x32xf32>
    %696 = arith.subf %695, %694 : vector<2x32xf32>
    %697 = vector.extract_strided_slice %693 {offsets = [2, 0], sizes = [2, 32], strides = [1, 1]} : vector<4x32xf32> to vector<2x32xf32>
    %698 = arith.mulf %697, %696 : vector<2x32xf32>
    %699 = arith.mulf %676, %698 : vector<2x32xf32>
    %700 = arith.subf %697, %698 : vector<2x32xf32>
    %701 = arith.addf %699, %700 : vector<2x32xf32>
    %702 = arith.mulf %675, %698 : vector<2x32xf32>
    %703 = arith.subf %696, %698 : vector<2x32xf32>
    %704 = arith.addf %702, %703 : vector<2x32xf32>
    %705 = arith.mulf %701, %568 : vector<2x32xf32>
    %706 = arith.mulf %704, %678 : vector<2x32xf32>
    %707 = arith.addf %705, %706 : vector<2x32xf32>
    %708 = math.tanh %707 : vector<2x32xf32>
    %709 = arith.mulf %674, %708 : vector<2x32xf32>
    %c0_246 = arith.constant 0 : index
    %c1536_247 = arith.constant 1536 : index
    %710 = vector.load %arg5[%c0_246, %c1536_247] : memref<32x2048xf32, #tpu.memory_space<vmem>>, vector<32x32xf32>
    %cst_248 = arith.constant dense<0.000000e+00> : vector<2x32xf32>
    %711 = tpu.matmul %656, %710, %cst_248 {dimension_numbers = #tpu.dot_dimension_numbers<[1], [0], [0], [1], [0, 0, 1, 1], [], []>} : vector<2x32xf32>, vector<32x32xf32>, vector<2x32xf32> -> vector<2x32xf32>
    %c0_249 = arith.constant 0 : index
    %c1664_250 = arith.constant 1664 : index
    %712 = vector.load %arg5[%c0_249, %c1664_250] : memref<32x2048xf32, #tpu.memory_space<vmem>>, vector<32x32xf32>
    %cst_251 = arith.constant dense<0.000000e+00> : vector<2x32xf32>
    %713 = tpu.matmul %709, %712, %cst_251 {dimension_numbers = #tpu.dot_dimension_numbers<[1], [0], [0], [1], [0, 0, 1, 1], [], []>} : vector<2x32xf32>, vector<32x32xf32>, vector<2x32xf32> -> vector<2x32xf32>
    %714 = arith.addf %711, %713 : vector<2x32xf32>
    %715 = vector.shape_cast %714 : vector<2x32xf32> to vector<2x1x32xf32>
    %716 = vector.broadcast %715 : vector<2x1x32xf32> to vector<2x6x32xf32>
    %717 = arith.addf %10, %716 : vector<2x6x32xf32>
    %718 = math.tanh %717 : vector<2x6x32xf32>
    %c6_252 = arith.constant 6 : index
    %c0_253 = arith.constant 0 : index
    %719 = vector.load %arg6[%c6_252, %c0_253] : memref<8x256xf32, #tpu.memory_space<vmem>>, vector<1x32xf32>
    %720 = vector.shape_cast %719 : vector<1x32xf32> to vector<1x1x32xf32>
    %721 = vector.broadcast %720 : vector<1x1x32xf32> to vector<2x6x32xf32>
    %722 = arith.mulf %718, %721 : vector<2x6x32xf32>
    %cst_254 = arith.constant dense<0.000000e+00> : vector<2x6xf32>
    %723 = vector.multi_reduction <add>, %722, %cst_254 [2] : vector<2x6x32xf32> to vector<2x6xf32>
    %cst_255 = arith.constant dense<0xFF800000> : vector<2xf32>
    %724 = vector.multi_reduction <maximumf>, %723, %cst_255 [1] : vector<2x6xf32> to vector<2xf32>
    %725 = vector.shape_cast %724 : vector<2xf32> to vector<2x1xf32>
    %726 = vector.broadcast %725 : vector<2x1xf32> to vector<2x6xf32>
    %727 = arith.subf %723, %726 : vector<2x6xf32>
    %728 = math.exp %727 : vector<2x6xf32>
    %cst_256 = arith.constant dense<0.000000e+00> : vector<2xf32>
    %729 = vector.multi_reduction <add>, %728, %cst_256 [1] : vector<2x6xf32> to vector<2xf32>
    %730 = vector.shape_cast %729 : vector<2xf32> to vector<2x1xf32>
    %731 = vector.broadcast %730 : vector<2x1xf32> to vector<2x6xf32>
    %732 = arith.divf %728, %731 : vector<2x6xf32>
    %733 = vector.shape_cast %732 : vector<2x6xf32> to vector<2x6x1xf32>
    %c0_257 = arith.constant 0 : index
    %c0_258 = arith.constant 0 : index
    %c0_259 = arith.constant 0 : index
    %734 = vector.load %arg4[%c0_257, %c0_258, %c0_259] : memref<2x6x32xf32, #tpu.memory_space<vmem>>, vector<2x6x32xf32>
    %735 = vector.broadcast %733 : vector<2x6x1xf32> to vector<2x6x32xf32>
    %736 = arith.mulf %735, %734 : vector<2x6x32xf32>
    %cst_260 = arith.constant dense<0.000000e+00> : vector<2x32xf32>
    %737 = vector.multi_reduction <add>, %736, %cst_260 [1] : vector<2x6x32xf32> to vector<2x32xf32>
    %c5_261 = arith.constant 5 : index
    %738 = memref.load %arg1[%c5_261] : memref<14xi32, #tpu.memory_space<smem>>
    %739 = arith.index_cast %738 : i32 to index
    %c0_262 = arith.constant 0 : index
    %c0_263 = arith.constant 0 : index
    %740 = vector.load %arg2[%739, %c0_262, %c0_263] : memref<48x1x136xf32, #tpu.memory_space<vmem>>, vector<1x1x136xf32>
    %741 = vector.shape_cast %740 : vector<1x1x136xf32> to vector<1x136xf32>
    %c12 = arith.constant 12 : index
    %742 = memref.load %arg1[%c12] : memref<14xi32, #tpu.memory_space<smem>>
    %743 = arith.index_cast %742 : i32 to index
    %c0_264 = arith.constant 0 : index
    %c0_265 = arith.constant 0 : index
    %744 = vector.load %arg2[%743, %c0_264, %c0_265] : memref<48x1x136xf32, #tpu.memory_space<vmem>>, vector<1x1x136xf32>
    %745 = vector.shape_cast %744 : vector<1x1x136xf32> to vector<1x136xf32>
    %746 = tpu.concatenate %741, %745 in 0 : vector<1x136xf32>, vector<1x136xf32> -> vector<2x136xf32>
    %747 = arith.addf %746, %2 : vector<2x136xf32>
    %c0_266 = arith.constant 0 : index
    %c256_267 = arith.constant 256 : index
    %748 = vector.load %arg5[%c0_266, %c256_267] : memref<32x2048xf32, #tpu.memory_space<vmem>>, vector<32x136xf32>
    %cst_268 = arith.constant dense<0.000000e+00> : vector<2x136xf32>
    %749 = tpu.matmul %656, %748, %cst_268 {dimension_numbers = #tpu.dot_dimension_numbers<[1], [0], [0], [1], [0, 0, 1, 1], [], []>} : vector<2x32xf32>, vector<32x136xf32>, vector<2x136xf32> -> vector<2x136xf32>
    %750 = arith.addf %747, %749 : vector<2x136xf32>
    %c0_269 = arith.constant 0 : index
    %c512_270 = arith.constant 512 : index
    %751 = vector.load %arg5[%c0_269, %c512_270] : memref<32x2048xf32, #tpu.memory_space<vmem>>, vector<32x136xf32>
    %cst_271 = arith.constant dense<0.000000e+00> : vector<2x136xf32>
    %752 = tpu.matmul %737, %751, %cst_271 {dimension_numbers = #tpu.dot_dimension_numbers<[1], [0], [0], [1], [0, 0, 1, 1], [], []>} : vector<2x32xf32>, vector<32x136xf32>, vector<2x136xf32> -> vector<2x136xf32>
    %753 = arith.addf %750, %752 : vector<2x136xf32>
    %754 = vector.extract_strided_slice %753 {offsets = [0, 0], sizes = [2, 96], strides = [1, 1]} : vector<2x136xf32> to vector<2x96xf32>
    %755 = arith.negf %754 : vector<2x96xf32>
    %756 = math.exp %755 : vector<2x96xf32>
    %cst_272 = arith.constant 1.000000e+00 : f32
    %757 = vector.broadcast %cst_272 : f32 to vector<2x96xf32>
    %758 = arith.addf %757, %756 : vector<2x96xf32>
    %759 = arith.divf %757, %758 : vector<2x96xf32>
    %760 = vector.extract_strided_slice %759 {offsets = [0, 0], sizes = [2, 32], strides = [1, 1]} : vector<2x96xf32> to vector<2x32xf32>
    %761 = vector.extract_strided_slice %759 {offsets = [0, 32], sizes = [2, 32], strides = [1, 1]} : vector<2x96xf32> to vector<2x32xf32>
    %762 = vector.extract_strided_slice %759 {offsets = [0, 64], sizes = [2, 32], strides = [1, 1]} : vector<2x96xf32> to vector<2x32xf32>
    %763 = vector.extract_strided_slice %753 {offsets = [0, 96], sizes = [2, 32], strides = [1, 1]} : vector<2x136xf32> to vector<2x32xf32>
    %764 = math.tanh %763 : vector<2x32xf32>
    %765 = vector.extract_strided_slice %753 {offsets = [0, 128], sizes = [2, 8], strides = [1, 1]} : vector<2x136xf32> to vector<2x8xf32>
    %766 = vector.extract_strided_slice %765 {offsets = [0, 0], sizes = [2, 4], strides = [1, 1]} : vector<2x8xf32> to vector<2x4xf32>
    %767 = vector.extract_strided_slice %765 {offsets = [0, 4], sizes = [2, 4], strides = [1, 1]} : vector<2x8xf32> to vector<2x4xf32>
    %768 = tpu.concatenate %766, %767 in 0 : vector<2x4xf32>, vector<2x4xf32> -> vector<4x4xf32>
    %cst_273 = arith.constant dense<0xFF800000> : vector<4xf32>
    %769 = vector.multi_reduction <maximumf>, %768, %cst_273 [1] : vector<4x4xf32> to vector<4xf32>
    %770 = vector.shape_cast %769 : vector<4xf32> to vector<4x1xf32>
    %771 = vector.broadcast %770 : vector<4x1xf32> to vector<4x4xf32>
    %772 = arith.subf %768, %771 : vector<4x4xf32>
    %773 = math.exp %772 : vector<4x4xf32>
    %c0_274 = arith.constant 0 : index
    %c0_275 = arith.constant 0 : index
    %774 = vector.load %arg6[%c0_274, %c0_275] : memref<8x256xf32, #tpu.memory_space<vmem>>, vector<4x33xf32>
    %cst_276 = arith.constant dense<0.000000e+00> : vector<4x33xf32>
    %775 = tpu.matmul %773, %774, %cst_276 {dimension_numbers = #tpu.dot_dimension_numbers<[1], [0], [0], [1], [0, 0, 1, 1], [], []>} : vector<4x4xf32>, vector<4x33xf32>, vector<4x33xf32> -> vector<4x33xf32>
    %776 = vector.extract_strided_slice %775 {offsets = [0, 0], sizes = [4, 32], strides = [1, 1]} : vector<4x33xf32> to vector<4x32xf32>
    %777 = vector.extract_strided_slice %775 {offsets = [0, 32], sizes = [4, 1], strides = [1, 1]} : vector<4x33xf32> to vector<4x1xf32>
    %778 = vector.broadcast %777 : vector<4x1xf32> to vector<4x32xf32>
    %779 = arith.divf %776, %778 : vector<4x32xf32>
    %780 = vector.extract_strided_slice %779 {offsets = [0, 0], sizes = [2, 32], strides = [1, 1]} : vector<4x32xf32> to vector<2x32xf32>
    %cst_277 = arith.constant 1.000000e+00 : f32
    %781 = vector.broadcast %cst_277 : f32 to vector<2x32xf32>
    %782 = arith.subf %781, %780 : vector<2x32xf32>
    %783 = vector.extract_strided_slice %779 {offsets = [2, 0], sizes = [2, 32], strides = [1, 1]} : vector<4x32xf32> to vector<2x32xf32>
    %784 = arith.mulf %783, %782 : vector<2x32xf32>
    %785 = arith.mulf %762, %784 : vector<2x32xf32>
    %786 = arith.subf %783, %784 : vector<2x32xf32>
    %787 = arith.addf %785, %786 : vector<2x32xf32>
    %788 = arith.mulf %761, %784 : vector<2x32xf32>
    %789 = arith.subf %782, %784 : vector<2x32xf32>
    %790 = arith.addf %788, %789 : vector<2x32xf32>
    %791 = arith.mulf %787, %654 : vector<2x32xf32>
    %792 = arith.mulf %790, %764 : vector<2x32xf32>
    %793 = arith.addf %791, %792 : vector<2x32xf32>
    %794 = math.tanh %793 : vector<2x32xf32>
    %795 = arith.mulf %760, %794 : vector<2x32xf32>
    %c4_278 = arith.constant 4 : index
    %c0_279 = arith.constant 0 : index
    %796 = vector.load %arg6[%c4_278, %c0_279] : memref<8x256xf32, #tpu.memory_space<vmem>>, vector<1x136xf32>
    %c0_280 = arith.constant 0 : index
    %c768_281 = arith.constant 768 : index
    %797 = vector.load %arg5[%c0_280, %c768_281] : memref<32x2048xf32, #tpu.memory_space<vmem>>, vector<32x136xf32>
    %cst_282 = arith.constant dense<0.000000e+00> : vector<2x136xf32>
    %798 = tpu.matmul %795, %797, %cst_282 {dimension_numbers = #tpu.dot_dimension_numbers<[1], [0], [0], [1], [0, 0, 1, 1], [], []>} : vector<2x32xf32>, vector<32x136xf32>, vector<2x136xf32> -> vector<2x136xf32>
    %799 = vector.broadcast %796 : vector<1x136xf32> to vector<2x136xf32>
    %800 = arith.addf %799, %798 : vector<2x136xf32>
    %c0_283 = arith.constant 0 : index
    %c1024_284 = arith.constant 1024 : index
    %801 = vector.load %arg5[%c0_283, %c1024_284] : memref<32x2048xf32, #tpu.memory_space<vmem>>, vector<32x136xf32>
    %cst_285 = arith.constant dense<0.000000e+00> : vector<2x136xf32>
    %802 = tpu.matmul %709, %801, %cst_285 {dimension_numbers = #tpu.dot_dimension_numbers<[1], [0], [0], [1], [0, 0, 1, 1], [], []>} : vector<2x32xf32>, vector<32x136xf32>, vector<2x136xf32> -> vector<2x136xf32>
    %803 = arith.addf %800, %802 : vector<2x136xf32>
    %c0_286 = arith.constant 0 : index
    %c1280_287 = arith.constant 1280 : index
    %804 = vector.load %arg5[%c0_286, %c1280_287] : memref<32x2048xf32, #tpu.memory_space<vmem>>, vector<32x136xf32>
    %cst_288 = arith.constant dense<0.000000e+00> : vector<2x136xf32>
    %805 = tpu.matmul %737, %804, %cst_288 {dimension_numbers = #tpu.dot_dimension_numbers<[1], [0], [0], [1], [0, 0, 1, 1], [], []>} : vector<2x32xf32>, vector<32x136xf32>, vector<2x136xf32> -> vector<2x136xf32>
    %806 = arith.addf %803, %805 : vector<2x136xf32>
    %807 = vector.extract_strided_slice %806 {offsets = [0, 0], sizes = [2, 96], strides = [1, 1]} : vector<2x136xf32> to vector<2x96xf32>
    %808 = arith.negf %807 : vector<2x96xf32>
    %809 = math.exp %808 : vector<2x96xf32>
    %cst_289 = arith.constant 1.000000e+00 : f32
    %810 = vector.broadcast %cst_289 : f32 to vector<2x96xf32>
    %811 = arith.addf %810, %809 : vector<2x96xf32>
    %812 = arith.divf %810, %811 : vector<2x96xf32>
    %813 = vector.extract_strided_slice %812 {offsets = [0, 0], sizes = [2, 32], strides = [1, 1]} : vector<2x96xf32> to vector<2x32xf32>
    %814 = vector.extract_strided_slice %812 {offsets = [0, 32], sizes = [2, 32], strides = [1, 1]} : vector<2x96xf32> to vector<2x32xf32>
    %815 = vector.extract_strided_slice %812 {offsets = [0, 64], sizes = [2, 32], strides = [1, 1]} : vector<2x96xf32> to vector<2x32xf32>
    %816 = vector.extract_strided_slice %806 {offsets = [0, 96], sizes = [2, 32], strides = [1, 1]} : vector<2x136xf32> to vector<2x32xf32>
    %817 = math.tanh %816 : vector<2x32xf32>
    %818 = vector.extract_strided_slice %806 {offsets = [0, 128], sizes = [2, 8], strides = [1, 1]} : vector<2x136xf32> to vector<2x8xf32>
    %819 = vector.extract_strided_slice %818 {offsets = [0, 0], sizes = [2, 4], strides = [1, 1]} : vector<2x8xf32> to vector<2x4xf32>
    %820 = vector.extract_strided_slice %818 {offsets = [0, 4], sizes = [2, 4], strides = [1, 1]} : vector<2x8xf32> to vector<2x4xf32>
    %821 = tpu.concatenate %819, %820 in 0 : vector<2x4xf32>, vector<2x4xf32> -> vector<4x4xf32>
    %cst_290 = arith.constant dense<0xFF800000> : vector<4xf32>
    %822 = vector.multi_reduction <maximumf>, %821, %cst_290 [1] : vector<4x4xf32> to vector<4xf32>
    %823 = vector.shape_cast %822 : vector<4xf32> to vector<4x1xf32>
    %824 = vector.broadcast %823 : vector<4x1xf32> to vector<4x4xf32>
    %825 = arith.subf %821, %824 : vector<4x4xf32>
    %826 = math.exp %825 : vector<4x4xf32>
    %c0_291 = arith.constant 0 : index
    %c0_292 = arith.constant 0 : index
    %827 = vector.load %arg6[%c0_291, %c0_292] : memref<8x256xf32, #tpu.memory_space<vmem>>, vector<4x33xf32>
    %cst_293 = arith.constant dense<0.000000e+00> : vector<4x33xf32>
    %828 = tpu.matmul %826, %827, %cst_293 {dimension_numbers = #tpu.dot_dimension_numbers<[1], [0], [0], [1], [0, 0, 1, 1], [], []>} : vector<4x4xf32>, vector<4x33xf32>, vector<4x33xf32> -> vector<4x33xf32>
    %829 = vector.extract_strided_slice %828 {offsets = [0, 0], sizes = [4, 32], strides = [1, 1]} : vector<4x33xf32> to vector<4x32xf32>
    %830 = vector.extract_strided_slice %828 {offsets = [0, 32], sizes = [4, 1], strides = [1, 1]} : vector<4x33xf32> to vector<4x1xf32>
    %831 = vector.broadcast %830 : vector<4x1xf32> to vector<4x32xf32>
    %832 = arith.divf %829, %831 : vector<4x32xf32>
    %833 = vector.extract_strided_slice %832 {offsets = [0, 0], sizes = [2, 32], strides = [1, 1]} : vector<4x32xf32> to vector<2x32xf32>
    %cst_294 = arith.constant 1.000000e+00 : f32
    %834 = vector.broadcast %cst_294 : f32 to vector<2x32xf32>
    %835 = arith.subf %834, %833 : vector<2x32xf32>
    %836 = vector.extract_strided_slice %832 {offsets = [2, 0], sizes = [2, 32], strides = [1, 1]} : vector<4x32xf32> to vector<2x32xf32>
    %837 = arith.mulf %836, %835 : vector<2x32xf32>
    %838 = arith.mulf %815, %837 : vector<2x32xf32>
    %839 = arith.subf %836, %837 : vector<2x32xf32>
    %840 = arith.addf %838, %839 : vector<2x32xf32>
    %841 = arith.mulf %814, %837 : vector<2x32xf32>
    %842 = arith.subf %835, %837 : vector<2x32xf32>
    %843 = arith.addf %841, %842 : vector<2x32xf32>
    %844 = arith.mulf %840, %707 : vector<2x32xf32>
    %845 = arith.mulf %843, %817 : vector<2x32xf32>
    %846 = arith.addf %844, %845 : vector<2x32xf32>
    %847 = math.tanh %846 : vector<2x32xf32>
    %848 = arith.mulf %813, %847 : vector<2x32xf32>
    %c0_295 = arith.constant 0 : index
    %c1536_296 = arith.constant 1536 : index
    %849 = vector.load %arg5[%c0_295, %c1536_296] : memref<32x2048xf32, #tpu.memory_space<vmem>>, vector<32x32xf32>
    %cst_297 = arith.constant dense<0.000000e+00> : vector<2x32xf32>
    %850 = tpu.matmul %795, %849, %cst_297 {dimension_numbers = #tpu.dot_dimension_numbers<[1], [0], [0], [1], [0, 0, 1, 1], [], []>} : vector<2x32xf32>, vector<32x32xf32>, vector<2x32xf32> -> vector<2x32xf32>
    %c0_298 = arith.constant 0 : index
    %c1664_299 = arith.constant 1664 : index
    %851 = vector.load %arg5[%c0_298, %c1664_299] : memref<32x2048xf32, #tpu.memory_space<vmem>>, vector<32x32xf32>
    %cst_300 = arith.constant dense<0.000000e+00> : vector<2x32xf32>
    %852 = tpu.matmul %848, %851, %cst_300 {dimension_numbers = #tpu.dot_dimension_numbers<[1], [0], [0], [1], [0, 0, 1, 1], [], []>} : vector<2x32xf32>, vector<32x32xf32>, vector<2x32xf32> -> vector<2x32xf32>
    %853 = arith.addf %850, %852 : vector<2x32xf32>
    %854 = vector.shape_cast %853 : vector<2x32xf32> to vector<2x1x32xf32>
    %855 = vector.broadcast %854 : vector<2x1x32xf32> to vector<2x6x32xf32>
    %856 = arith.addf %10, %855 : vector<2x6x32xf32>
    %857 = math.tanh %856 : vector<2x6x32xf32>
    %c6_301 = arith.constant 6 : index
    %c0_302 = arith.constant 0 : index
    %858 = vector.load %arg6[%c6_301, %c0_302] : memref<8x256xf32, #tpu.memory_space<vmem>>, vector<1x32xf32>
    %859 = vector.shape_cast %858 : vector<1x32xf32> to vector<1x1x32xf32>
    %860 = vector.broadcast %859 : vector<1x1x32xf32> to vector<2x6x32xf32>
    %861 = arith.mulf %857, %860 : vector<2x6x32xf32>
    %cst_303 = arith.constant dense<0.000000e+00> : vector<2x6xf32>
    %862 = vector.multi_reduction <add>, %861, %cst_303 [2] : vector<2x6x32xf32> to vector<2x6xf32>
    %cst_304 = arith.constant dense<0xFF800000> : vector<2xf32>
    %863 = vector.multi_reduction <maximumf>, %862, %cst_304 [1] : vector<2x6xf32> to vector<2xf32>
    %864 = vector.shape_cast %863 : vector<2xf32> to vector<2x1xf32>
    %865 = vector.broadcast %864 : vector<2x1xf32> to vector<2x6xf32>
    %866 = arith.subf %862, %865 : vector<2x6xf32>
    %867 = math.exp %866 : vector<2x6xf32>
    %cst_305 = arith.constant dense<0.000000e+00> : vector<2xf32>
    %868 = vector.multi_reduction <add>, %867, %cst_305 [1] : vector<2x6xf32> to vector<2xf32>
    %869 = vector.shape_cast %868 : vector<2xf32> to vector<2x1xf32>
    %870 = vector.broadcast %869 : vector<2x1xf32> to vector<2x6xf32>
    %871 = arith.divf %867, %870 : vector<2x6xf32>
    %872 = vector.shape_cast %871 : vector<2x6xf32> to vector<2x6x1xf32>
    %c0_306 = arith.constant 0 : index
    %c0_307 = arith.constant 0 : index
    %c0_308 = arith.constant 0 : index
    %873 = vector.load %arg4[%c0_306, %c0_307, %c0_308] : memref<2x6x32xf32, #tpu.memory_space<vmem>>, vector<2x6x32xf32>
    %874 = vector.broadcast %872 : vector<2x6x1xf32> to vector<2x6x32xf32>
    %875 = arith.mulf %874, %873 : vector<2x6x32xf32>
    %cst_309 = arith.constant dense<0.000000e+00> : vector<2x32xf32>
    %876 = vector.multi_reduction <add>, %875, %cst_309 [1] : vector<2x6x32xf32> to vector<2x32xf32>
    %c6_310 = arith.constant 6 : index
    %877 = memref.load %arg1[%c6_310] : memref<14xi32, #tpu.memory_space<smem>>
    %878 = arith.index_cast %877 : i32 to index
    %c0_311 = arith.constant 0 : index
    %c0_312 = arith.constant 0 : index
    %879 = vector.load %arg2[%878, %c0_311, %c0_312] : memref<48x1x136xf32, #tpu.memory_space<vmem>>, vector<1x1x136xf32>
    %880 = vector.shape_cast %879 : vector<1x1x136xf32> to vector<1x136xf32>
    %c13 = arith.constant 13 : index
    %881 = memref.load %arg1[%c13] : memref<14xi32, #tpu.memory_space<smem>>
    %882 = arith.index_cast %881 : i32 to index
    %c0_313 = arith.constant 0 : index
    %c0_314 = arith.constant 0 : index
    %883 = vector.load %arg2[%882, %c0_313, %c0_314] : memref<48x1x136xf32, #tpu.memory_space<vmem>>, vector<1x1x136xf32>
    %884 = vector.shape_cast %883 : vector<1x1x136xf32> to vector<1x136xf32>
    %885 = tpu.concatenate %880, %884 in 0 : vector<1x136xf32>, vector<1x136xf32> -> vector<2x136xf32>
    %886 = arith.addf %885, %2 : vector<2x136xf32>
    %c0_315 = arith.constant 0 : index
    %c256_316 = arith.constant 256 : index
    %887 = vector.load %arg5[%c0_315, %c256_316] : memref<32x2048xf32, #tpu.memory_space<vmem>>, vector<32x136xf32>
    %cst_317 = arith.constant dense<0.000000e+00> : vector<2x136xf32>
    %888 = tpu.matmul %795, %887, %cst_317 {dimension_numbers = #tpu.dot_dimension_numbers<[1], [0], [0], [1], [0, 0, 1, 1], [], []>} : vector<2x32xf32>, vector<32x136xf32>, vector<2x136xf32> -> vector<2x136xf32>
    %889 = arith.addf %886, %888 : vector<2x136xf32>
    %c0_318 = arith.constant 0 : index
    %c512_319 = arith.constant 512 : index
    %890 = vector.load %arg5[%c0_318, %c512_319] : memref<32x2048xf32, #tpu.memory_space<vmem>>, vector<32x136xf32>
    %cst_320 = arith.constant dense<0.000000e+00> : vector<2x136xf32>
    %891 = tpu.matmul %876, %890, %cst_320 {dimension_numbers = #tpu.dot_dimension_numbers<[1], [0], [0], [1], [0, 0, 1, 1], [], []>} : vector<2x32xf32>, vector<32x136xf32>, vector<2x136xf32> -> vector<2x136xf32>
    %892 = arith.addf %889, %891 : vector<2x136xf32>
    %893 = vector.extract_strided_slice %892 {offsets = [0, 0], sizes = [2, 96], strides = [1, 1]} : vector<2x136xf32> to vector<2x96xf32>
    %894 = arith.negf %893 : vector<2x96xf32>
    %895 = math.exp %894 : vector<2x96xf32>
    %cst_321 = arith.constant 1.000000e+00 : f32
    %896 = vector.broadcast %cst_321 : f32 to vector<2x96xf32>
    %897 = arith.addf %896, %895 : vector<2x96xf32>
    %898 = arith.divf %896, %897 : vector<2x96xf32>
    %899 = vector.extract_strided_slice %898 {offsets = [0, 0], sizes = [2, 32], strides = [1, 1]} : vector<2x96xf32> to vector<2x32xf32>
    %900 = vector.extract_strided_slice %898 {offsets = [0, 32], sizes = [2, 32], strides = [1, 1]} : vector<2x96xf32> to vector<2x32xf32>
    %901 = vector.extract_strided_slice %898 {offsets = [0, 64], sizes = [2, 32], strides = [1, 1]} : vector<2x96xf32> to vector<2x32xf32>
    %902 = vector.extract_strided_slice %892 {offsets = [0, 96], sizes = [2, 32], strides = [1, 1]} : vector<2x136xf32> to vector<2x32xf32>
    %903 = math.tanh %902 : vector<2x32xf32>
    %904 = vector.extract_strided_slice %892 {offsets = [0, 128], sizes = [2, 8], strides = [1, 1]} : vector<2x136xf32> to vector<2x8xf32>
    %905 = vector.extract_strided_slice %904 {offsets = [0, 0], sizes = [2, 4], strides = [1, 1]} : vector<2x8xf32> to vector<2x4xf32>
    %906 = vector.extract_strided_slice %904 {offsets = [0, 4], sizes = [2, 4], strides = [1, 1]} : vector<2x8xf32> to vector<2x4xf32>
    %907 = tpu.concatenate %905, %906 in 0 : vector<2x4xf32>, vector<2x4xf32> -> vector<4x4xf32>
    %cst_322 = arith.constant dense<0xFF800000> : vector<4xf32>
    %908 = vector.multi_reduction <maximumf>, %907, %cst_322 [1] : vector<4x4xf32> to vector<4xf32>
    %909 = vector.shape_cast %908 : vector<4xf32> to vector<4x1xf32>
    %910 = vector.broadcast %909 : vector<4x1xf32> to vector<4x4xf32>
    %911 = arith.subf %907, %910 : vector<4x4xf32>
    %912 = math.exp %911 : vector<4x4xf32>
    %c0_323 = arith.constant 0 : index
    %c0_324 = arith.constant 0 : index
    %913 = vector.load %arg6[%c0_323, %c0_324] : memref<8x256xf32, #tpu.memory_space<vmem>>, vector<4x33xf32>
    %cst_325 = arith.constant dense<0.000000e+00> : vector<4x33xf32>
    %914 = tpu.matmul %912, %913, %cst_325 {dimension_numbers = #tpu.dot_dimension_numbers<[1], [0], [0], [1], [0, 0, 1, 1], [], []>} : vector<4x4xf32>, vector<4x33xf32>, vector<4x33xf32> -> vector<4x33xf32>
    %915 = vector.extract_strided_slice %914 {offsets = [0, 0], sizes = [4, 32], strides = [1, 1]} : vector<4x33xf32> to vector<4x32xf32>
    %916 = vector.extract_strided_slice %914 {offsets = [0, 32], sizes = [4, 1], strides = [1, 1]} : vector<4x33xf32> to vector<4x1xf32>
    %917 = vector.broadcast %916 : vector<4x1xf32> to vector<4x32xf32>
    %918 = arith.divf %915, %917 : vector<4x32xf32>
    %919 = vector.extract_strided_slice %918 {offsets = [0, 0], sizes = [2, 32], strides = [1, 1]} : vector<4x32xf32> to vector<2x32xf32>
    %cst_326 = arith.constant 1.000000e+00 : f32
    %920 = vector.broadcast %cst_326 : f32 to vector<2x32xf32>
    %921 = arith.subf %920, %919 : vector<2x32xf32>
    %922 = vector.extract_strided_slice %918 {offsets = [2, 0], sizes = [2, 32], strides = [1, 1]} : vector<4x32xf32> to vector<2x32xf32>
    %923 = arith.mulf %922, %921 : vector<2x32xf32>
    %924 = arith.mulf %901, %923 : vector<2x32xf32>
    %925 = arith.subf %922, %923 : vector<2x32xf32>
    %926 = arith.addf %924, %925 : vector<2x32xf32>
    %927 = arith.mulf %900, %923 : vector<2x32xf32>
    %928 = arith.subf %921, %923 : vector<2x32xf32>
    %929 = arith.addf %927, %928 : vector<2x32xf32>
    %930 = arith.mulf %926, %793 : vector<2x32xf32>
    %931 = arith.mulf %929, %903 : vector<2x32xf32>
    %932 = arith.addf %930, %931 : vector<2x32xf32>
    %933 = math.tanh %932 : vector<2x32xf32>
    %934 = arith.mulf %899, %933 : vector<2x32xf32>
    %c4_327 = arith.constant 4 : index
    %c0_328 = arith.constant 0 : index
    %935 = vector.load %arg6[%c4_327, %c0_328] : memref<8x256xf32, #tpu.memory_space<vmem>>, vector<1x136xf32>
    %c0_329 = arith.constant 0 : index
    %c768_330 = arith.constant 768 : index
    %936 = vector.load %arg5[%c0_329, %c768_330] : memref<32x2048xf32, #tpu.memory_space<vmem>>, vector<32x136xf32>
    %cst_331 = arith.constant dense<0.000000e+00> : vector<2x136xf32>
    %937 = tpu.matmul %934, %936, %cst_331 {dimension_numbers = #tpu.dot_dimension_numbers<[1], [0], [0], [1], [0, 0, 1, 1], [], []>} : vector<2x32xf32>, vector<32x136xf32>, vector<2x136xf32> -> vector<2x136xf32>
    %938 = vector.broadcast %935 : vector<1x136xf32> to vector<2x136xf32>
    %939 = arith.addf %938, %937 : vector<2x136xf32>
    %c0_332 = arith.constant 0 : index
    %c1024_333 = arith.constant 1024 : index
    %940 = vector.load %arg5[%c0_332, %c1024_333] : memref<32x2048xf32, #tpu.memory_space<vmem>>, vector<32x136xf32>
    %cst_334 = arith.constant dense<0.000000e+00> : vector<2x136xf32>
    %941 = tpu.matmul %848, %940, %cst_334 {dimension_numbers = #tpu.dot_dimension_numbers<[1], [0], [0], [1], [0, 0, 1, 1], [], []>} : vector<2x32xf32>, vector<32x136xf32>, vector<2x136xf32> -> vector<2x136xf32>
    %942 = arith.addf %939, %941 : vector<2x136xf32>
    %c0_335 = arith.constant 0 : index
    %c1280_336 = arith.constant 1280 : index
    %943 = vector.load %arg5[%c0_335, %c1280_336] : memref<32x2048xf32, #tpu.memory_space<vmem>>, vector<32x136xf32>
    %cst_337 = arith.constant dense<0.000000e+00> : vector<2x136xf32>
    %944 = tpu.matmul %876, %943, %cst_337 {dimension_numbers = #tpu.dot_dimension_numbers<[1], [0], [0], [1], [0, 0, 1, 1], [], []>} : vector<2x32xf32>, vector<32x136xf32>, vector<2x136xf32> -> vector<2x136xf32>
    %945 = arith.addf %942, %944 : vector<2x136xf32>
    %946 = vector.extract_strided_slice %945 {offsets = [0, 0], sizes = [2, 96], strides = [1, 1]} : vector<2x136xf32> to vector<2x96xf32>
    %947 = arith.negf %946 : vector<2x96xf32>
    %948 = math.exp %947 : vector<2x96xf32>
    %cst_338 = arith.constant 1.000000e+00 : f32
    %949 = vector.broadcast %cst_338 : f32 to vector<2x96xf32>
    %950 = arith.addf %949, %948 : vector<2x96xf32>
    %951 = arith.divf %949, %950 : vector<2x96xf32>
    %952 = vector.extract_strided_slice %951 {offsets = [0, 0], sizes = [2, 32], strides = [1, 1]} : vector<2x96xf32> to vector<2x32xf32>
    %953 = vector.extract_strided_slice %951 {offsets = [0, 32], sizes = [2, 32], strides = [1, 1]} : vector<2x96xf32> to vector<2x32xf32>
    %954 = vector.extract_strided_slice %951 {offsets = [0, 64], sizes = [2, 32], strides = [1, 1]} : vector<2x96xf32> to vector<2x32xf32>
    %955 = vector.extract_strided_slice %945 {offsets = [0, 96], sizes = [2, 32], strides = [1, 1]} : vector<2x136xf32> to vector<2x32xf32>
    %956 = math.tanh %955 : vector<2x32xf32>
    %957 = vector.extract_strided_slice %945 {offsets = [0, 128], sizes = [2, 8], strides = [1, 1]} : vector<2x136xf32> to vector<2x8xf32>
    %958 = vector.extract_strided_slice %957 {offsets = [0, 0], sizes = [2, 4], strides = [1, 1]} : vector<2x8xf32> to vector<2x4xf32>
    %959 = vector.extract_strided_slice %957 {offsets = [0, 4], sizes = [2, 4], strides = [1, 1]} : vector<2x8xf32> to vector<2x4xf32>
    %960 = tpu.concatenate %958, %959 in 0 : vector<2x4xf32>, vector<2x4xf32> -> vector<4x4xf32>
    %cst_339 = arith.constant dense<0xFF800000> : vector<4xf32>
    %961 = vector.multi_reduction <maximumf>, %960, %cst_339 [1] : vector<4x4xf32> to vector<4xf32>
    %962 = vector.shape_cast %961 : vector<4xf32> to vector<4x1xf32>
    %963 = vector.broadcast %962 : vector<4x1xf32> to vector<4x4xf32>
    %964 = arith.subf %960, %963 : vector<4x4xf32>
    %965 = math.exp %964 : vector<4x4xf32>
    %c0_340 = arith.constant 0 : index
    %c0_341 = arith.constant 0 : index
    %966 = vector.load %arg6[%c0_340, %c0_341] : memref<8x256xf32, #tpu.memory_space<vmem>>, vector<4x33xf32>
    %cst_342 = arith.constant dense<0.000000e+00> : vector<4x33xf32>
    %967 = tpu.matmul %965, %966, %cst_342 {dimension_numbers = #tpu.dot_dimension_numbers<[1], [0], [0], [1], [0, 0, 1, 1], [], []>} : vector<4x4xf32>, vector<4x33xf32>, vector<4x33xf32> -> vector<4x33xf32>
    %968 = vector.extract_strided_slice %967 {offsets = [0, 0], sizes = [4, 32], strides = [1, 1]} : vector<4x33xf32> to vector<4x32xf32>
    %969 = vector.extract_strided_slice %967 {offsets = [0, 32], sizes = [4, 1], strides = [1, 1]} : vector<4x33xf32> to vector<4x1xf32>
    %970 = vector.broadcast %969 : vector<4x1xf32> to vector<4x32xf32>
    %971 = arith.divf %968, %970 : vector<4x32xf32>
    %972 = vector.extract_strided_slice %971 {offsets = [0, 0], sizes = [2, 32], strides = [1, 1]} : vector<4x32xf32> to vector<2x32xf32>
    %cst_343 = arith.constant 1.000000e+00 : f32
    %973 = vector.broadcast %cst_343 : f32 to vector<2x32xf32>
    %974 = arith.subf %973, %972 : vector<2x32xf32>
    %975 = vector.extract_strided_slice %971 {offsets = [2, 0], sizes = [2, 32], strides = [1, 1]} : vector<4x32xf32> to vector<2x32xf32>
    %976 = arith.mulf %975, %974 : vector<2x32xf32>
    %977 = arith.mulf %954, %976 : vector<2x32xf32>
    %978 = arith.subf %975, %976 : vector<2x32xf32>
    %979 = arith.addf %977, %978 : vector<2x32xf32>
    %980 = arith.mulf %953, %976 : vector<2x32xf32>
    %981 = arith.subf %974, %976 : vector<2x32xf32>
    %982 = arith.addf %980, %981 : vector<2x32xf32>
    %983 = arith.mulf %979, %846 : vector<2x32xf32>
    %984 = arith.mulf %982, %956 : vector<2x32xf32>
    %985 = arith.addf %983, %984 : vector<2x32xf32>
    %986 = math.tanh %985 : vector<2x32xf32>
    %987 = arith.mulf %952, %986 : vector<2x32xf32>
    %988 = vector.extract_strided_slice %153 {offsets = [0, 0], sizes = [1, 32], strides = [1, 1]} : vector<2x32xf32> to vector<1x32xf32>
    %989 = vector.extract_strided_slice %292 {offsets = [0, 0], sizes = [1, 32], strides = [1, 1]} : vector<2x32xf32> to vector<1x32xf32>
    %990 = vector.extract_strided_slice %431 {offsets = [0, 0], sizes = [1, 32], strides = [1, 1]} : vector<2x32xf32> to vector<1x32xf32>
    %991 = vector.extract_strided_slice %570 {offsets = [0, 0], sizes = [1, 32], strides = [1, 1]} : vector<2x32xf32> to vector<1x32xf32>
    %992 = vector.extract_strided_slice %709 {offsets = [0, 0], sizes = [1, 32], strides = [1, 1]} : vector<2x32xf32> to vector<1x32xf32>
    %993 = vector.extract_strided_slice %848 {offsets = [0, 0], sizes = [1, 32], strides = [1, 1]} : vector<2x32xf32> to vector<1x32xf32>
    %994 = vector.extract_strided_slice %987 {offsets = [0, 0], sizes = [1, 32], strides = [1, 1]} : vector<2x32xf32> to vector<1x32xf32>
    %995 = vector.extract_strided_slice %153 {offsets = [1, 0], sizes = [1, 32], strides = [1, 1]} : vector<2x32xf32> to vector<1x32xf32>
    %996 = vector.extract_strided_slice %292 {offsets = [1, 0], sizes = [1, 32], strides = [1, 1]} : vector<2x32xf32> to vector<1x32xf32>
    %997 = vector.extract_strided_slice %431 {offsets = [1, 0], sizes = [1, 32], strides = [1, 1]} : vector<2x32xf32> to vector<1x32xf32>
    %998 = vector.extract_strided_slice %570 {offsets = [1, 0], sizes = [1, 32], strides = [1, 1]} : vector<2x32xf32> to vector<1x32xf32>
    %999 = vector.extract_strided_slice %709 {offsets = [1, 0], sizes = [1, 32], strides = [1, 1]} : vector<2x32xf32> to vector<1x32xf32>
    %1000 = vector.extract_strided_slice %848 {offsets = [1, 0], sizes = [1, 32], strides = [1, 1]} : vector<2x32xf32> to vector<1x32xf32>
    %1001 = vector.extract_strided_slice %987 {offsets = [1, 0], sizes = [1, 32], strides = [1, 1]} : vector<2x32xf32> to vector<1x32xf32>
    %1002 = tpu.concatenate %988, %989, %990, %991, %992, %993, %994, %995, %996, %997, %998, %999, %1000, %1001 in 0 : vector<1x32xf32>, vector<1x32xf32>, vector<1x32xf32>, vector<1x32xf32>, vector<1x32xf32>, vector<1x32xf32>, vector<1x32xf32>, vector<1x32xf32>, vector<1x32xf32>, vector<1x32xf32>, vector<1x32xf32>, vector<1x32xf32>, vector<1x32xf32>, vector<1x32xf32> -> vector<14x32xf32>
    %c0_344 = arith.constant 0 : index
    %c1920 = arith.constant 1920 : index
    %1003 = vector.load %arg5[%c0_344, %c1920] : memref<32x2048xf32, #tpu.memory_space<vmem>>, vector<32x128xf32>
    %cst_345 = arith.constant dense<0.000000e+00> : vector<14x128xf32>
    %1004 = tpu.matmul %1002, %1003, %cst_345 {dimension_numbers = #tpu.dot_dimension_numbers<[1], [0], [0], [1], [0, 0, 1, 1], [], []>} : vector<14x32xf32>, vector<32x128xf32>, vector<14x128xf32> -> vector<14x128xf32>
    %c7_346 = arith.constant 7 : index
    %c0_347 = arith.constant 0 : index
    %1005 = vector.load %arg6[%c7_346, %c0_347] : memref<8x256xf32, #tpu.memory_space<vmem>>, vector<1x128xf32>
    %1006 = vector.broadcast %1005 : vector<1x128xf32> to vector<14x128xf32>
    %1007 = arith.addf %1004, %1006 : vector<14x128xf32>
    %cst_348 = arith.constant dense<0xFF800000> : vector<14xf32>
    %1008 = vector.multi_reduction <maximumf>, %1007, %cst_348 [1] : vector<14x128xf32> to vector<14xf32>
    %1009 = vector.shape_cast %1008 : vector<14xf32> to vector<14x1xf32>
    %1010 = vector.broadcast %1009 : vector<14x1xf32> to vector<14x128xf32>
    %1011 = arith.subf %1007, %1010 : vector<14x128xf32>
    %1012 = math.exp %1011 : vector<14x128xf32>
    %cst_349 = arith.constant dense<0.000000e+00> : vector<14xf32>
    %1013 = vector.multi_reduction <add>, %1012, %cst_349 [1] : vector<14x128xf32> to vector<14xf32>
    %1014 = vector.shape_cast %1013 : vector<14xf32> to vector<14x1xf32>
    %1015 = math.log %1014 : vector<14x1xf32>
    %1016 = vector.broadcast %1015 : vector<14x1xf32> to vector<14x128xf32>
    %1017 = arith.subf %1011, %1016 : vector<14x128xf32>
    %c0_350 = arith.constant 0 : index
    %c0_351 = arith.constant 0 : index
    %1018 = vector.load %arg7[%c0_350, %c0_351] : memref<14x128xf32, #tpu.memory_space<vmem>>, vector<14x128xf32>
    tpu.vector_store %arg7[%c0_350, %c0_351], %1017 {strides = array<i32>} : memref<14x128xf32, #tpu.memory_space<vmem>>, vector<14x128xf32>,
    return
  }
  func.func @transform_0(%arg0: i32, %arg1: memref<14xi32, #tpu.memory_space<smem>>) -> (i32, i32, i32) {
    %c0_i32 = arith.constant 0 : i32
    %c0_i32_0 = arith.constant 0 : i32
    %c0_i32_1 = arith.constant 0 : i32
    %c0_i32_2 = arith.constant 0 : i32
    return %c0_i32, %c0_i32_0, %c0_i32_1 : i32, i32, i32
  }
  func.func @transform_1(%arg0: i32, %arg1: memref<14xi32, #tpu.memory_space<smem>>) -> (i32, i32) {
    %c0_i32 = arith.constant 0 : i32
    %c0_i32_0 = arith.constant 0 : i32
    %c0_i32_1 = arith.constant 0 : i32
    return %c0_i32, %c0_i32_0 : i32, i32
  }
  func.func @transform_2(%arg0: i32, %arg1: memref<14xi32, #tpu.memory_space<smem>>) -> (i32, i32, i32) {
    %c0_i32 = arith.constant 0 : i32
    %c0_i32_0 = arith.constant 0 : i32
    %c0_i32_1 = arith.constant 0 : i32
    %c0_i32_2 = arith.constant 0 : i32
    return %c0_i32, %c0_i32_0, %c0_i32_1 : i32, i32, i32
  }
  func.func @transform_3(%arg0: i32, %arg1: memref<14xi32, #tpu.memory_space<smem>>) -> (i32, i32) {
    %c0_i32 = arith.constant 0 : i32
    %c0_i32_0 = arith.constant 0 : i32
    %c0_i32_1 = arith.constant 0 : i32
    return %c0_i32, %c0_i32_0 : i32, i32
  }
  func.func @transform_4(%arg0: i32, %arg1: memref<14xi32, #tpu.memory_space<smem>>) -> (i32, i32) {
    %c0_i32 = arith.constant 0 : i32
    %c0_i32_0 = arith.constant 0 : i32
    %c0_i32_1 = arith.constant 0 : i32
    return %c0_i32, %c0_i32_0 : i32, i32
  }
  func.func @transform_5(%arg0: i32, %arg1: memref<14xi32, #tpu.memory_space<smem>>) -> (i32, i32) {
    %c0_i32 = arith.constant 0 : i32
    %c0_i32_0 = arith.constant 0 : i32
    %c0_i32_1 = arith.constant 0 : i32
    return %c0_i32, %c0_i32_0 : i32, i32
  }
}

</mosaic_0001>

<bundles_post_ra>
// kernel: decoder_sentence_rnn_forward.1
= control target key start
LH: loop header
LB: loop body
LE: loop exit
PB: predicated region body
PF: predicated region fallthrough
CT: control target
= control target key end

     0   :  { %s10975_s0 = inlined_call_operand.vmem [shape: s32[14], index: 0, kind: input, shape index: {}]   ;;  %s10976_s1 = inlined_call_operand.hbm [shape: f32[48,1,136], index: 1, kind: input, shape index: {}]   ;;  %s10977_s2 = inlined_call_operand.vmem [shape: f32[2,32], index: 2, kind: input, shape index: {}]   ;;  %s10978_s3 = inlined_call_operand.vmem [shape: f32[2,6,32], index: 3, kind: input, shape index: {}]   ;;  %s10979_s4 = inlined_call_operand.hbm [shape: f32[32,2048], index: 4, kind: input, shape index: {}]   ;;  %s10980_s5 = inlined_call_operand.vmem [shape: f32[8,256], index: 5, kind: input, shape index: {}]   ;;  %s10981_s6 = inlined_call_operand.vmem [shape: f32[14,128], index: 6, kind: output, shape index: {}]  }
   0x1   :  { %s11_s23 = sshll.u32 %s10975_s0, 4  ;;  %s12_s23 = int_to_ptr.vmem [resolvable:$true] %s11_s23 }
   0x2   :  { %s9065_s24 = scalar_lea.vmem %s12_s23, 16  ;;  %p9070_p1 = scmp.lt.s32.totalorder %s12_s23, %s12_s23 }
   0x3   :  { %p9066_p0 = scmp.ne.s32.totalorder %s12_s23, %s9065_s24  ;;  %p9071_p2 = scmp.lt.s32.totalorder %s9065_s24, %s9065_s24 }
   0x5   :  { %p9072_p3 = por %p9071_p2, %p9070_p1 }
   0x7   :  { %p9073_p4 = pnand %p9072_p3, %p9066_p0 }
   0x9   :  { %9076 = shalt.err (!%p9073_p4)  }
   0xa   :  { %s9123_s25 = smov [#allocation3]  }
   0xb   :  { %14 = dma.vmem_to_smem %s12_s23, 16, %s9123_s25, [#allocation2] }
   0xc   :  { %9117 = dma.done.wait [#allocation2], 16 }
   0xd   :  { %9118 = vsyncadd [#allocation2], 4294967280 }
   0xe   :  { %16 = sfence }
   0xf   :  { %17 = vsyncpa [#allocation5], 0 }
  0x10   :  { %18 = vsyncpa [#allocation7], 0  ;;  %s9124_s26 = smov [#allocation4]  }
  0x11   :  { %s24_s27 = sshll.u32 %s9124_s26, 4  ;;  %s25_s27 = int_to_ptr.vmem [resolvable:$true] %s24_s27 }
  0x12   :  { %s9085_s28 = scalar_lea.vmem %s25_s27, 1536  ;;  %p9090_p6 = scmp.lt.s32.totalorder %s25_s27, %s25_s27 }
  0x13   :  { %p9086_p5 = scmp.ne.s32.totalorder %s25_s27, %s9085_s28  ;;  %p9091_p7 = scmp.lt.s32.totalorder %s9085_s28, %s9085_s28 }
  0x15   :  { %p9092_p8 = por %p9091_p7, %p9090_p6 }
  0x17   :  { %p9093_p9 = pnand %p9092_p8, %p9086_p5 }
  0x19   :  { %9096 = shalt.err (!%p9093_p9)
}
  0x1a   :  { %s9125_s0 = smov 32   ;;  %s9126_s29 = smov 2  }
  0x1b   :  { %30 = dma.hbm_to_vmem [thread:$0]  %s10976_s1, 1536, %s25_s27, [#allocation5], %s9125_s0, %s9125_s0, %s9126_s29  }
  0x1c   :  { %s9127_s8 = smov [#allocation6]  }
  0x1d   :  { %s40_s9 = sshll.u32 %s9127_s8, 4  ;;  %s41_s9 = int_to_ptr.vmem [resolvable:$true] %s40_s9 }
  0x1e   :  { %s9105_s10 = scalar_lea.vmem %s41_s9, 8192  ;;  %p9110_p11 = scmp.lt.s32.totalorder %s41_s9, %s41_s9 }
  0x1f   :  { %p9106_p10 = scmp.ne.s32.totalorder %s41_s9, %s9105_s10  ;;  %p9111_p12 = scmp.lt.s32.totalorder %s9105_s10, %s9105_s10 }
  0x21   :  { %p9112_p13 = por %p9111_p12, %p9110_p11 }
  0x23   :  { %p9113_p0 = pnand %p9112_p13, %p9106_p10 }
  0x25   :  { %9116 = shalt.err (!%p9113_p0)
}
  0x26   :  { %s9128_s11 = smov 2048   ;;  %s9129_s12 = smov 128  }
  0x27   :  { %46 = dma.hbm_to_vmem [thread:$0]  %s10979_s4, 8192, %s41_s9, [#allocation7], %s9128_s11, %s9128_s11, %s9129_s12  }
  0x28   :  { %9119 = dma.done.wait [#allocation5], 1536  }
  0x29   :  { %9120 = vsyncadd [#allocation5], 4294965760 }
  0x2a   :  { %9121 = dma.done.wait [#allocation7], 8192  }
  0x2b   :  { %9122 = vsyncadd [#allocation7], 4294959104  ;;  %v147_v0 = vlaneseq  ;;  %v10986_v1 = vmov 0.0   ;;  %v9131_v2 = vmov 1983009808   ;;  %v63_v6 = vld [vmem:[#allocation6 + $0x188] sm:$0xff] }
  0x2c   :  { %132 = vmatprep.mubr.f32.mxu0 %v10986_v1  ;;  %v145_v3 = vunpack.c.l.s4 %v9131_v2  ;;  %v62_v7 = vld [vmem:[#allocation6 + $0x180] sm:$0xff]  ;;  %v61_v8 = vld [vmem:[#allocation6 + $0x108] sm:$0xff]  ;;  %92 = vmatprep.subr.mxu0 %v63_v6  ;;  %v178_v9 = vld [vmem:[#allocation6 + $0x1f0] sm:$0xff]  ;;  %vm64_vm0 = vcmask 261120   ;;  %vm9132_vm1 = vmmov 0   ;;  %s8071_s19 = sld [smem:[#allocation3 + $0x7]] }
  0x2d   :  { %v9186_v5 = vshrl.u32 %v147_v0, 7  ;;  %v60_v10 = vld [vmem:[#allocation6 + $0x100] sm:$0xff]  ;;  %93 = vmatpush1.msra.mxu0 %v62_v7  ;;  %8297 = vmatprep.subr.mxu1 %v178_v9  ;;  %v59_v12 = vld [vmem:[#allocation6 + $0x88] sm:$0xff]  ;;  %v177_v13 = vld [vmem:[#allocation6 + $0x170] sm:$0xff]  ;;  %s8085_s20 = sld [smem:[#allocation3 + $0x1]]  ;;  %vm751_vm2 = vcmask 1040384  }
  0x2e   :  { %v146_v4 = vunpack.c.0.s8 %v145_v3  ;;  %94 = vmatprep.subr.mxu0 %v61_v8  ;;  %8298 = vmatpush3.msra.mxu1 %v178_v9  ;;  %v58_v14 = vld [vmem:[#allocation6 + $0x80] sm:$0xff]  ;;  %v176_v15 = vld [vmem:[#allocation6 + $0xf0] sm:$0xff]  ;;  %v57_v16 = vld [vmem:[#allocation6 + $0x8] sm:$0xff]  ;;  %s8087_s21 = sld [smem:[#allocation3 + $0x8]]  ;;  %vm616_vm3 = vcmask 259072   ;;  %vm635_vm4 = vcmask 1041409  }
  0x2f   :  { %95 = vmatpush1.msra.mxu0 %v60_v10  ;;  %8299 = vmatprep.subr.mxu1 %v177_v13  ;;  %v9194_v17 = vld [vmem:[%s10978_s3] sm:$0x3f]  ;;  %v175_v19 = vld [vmem:[#allocation6 + $0x70] sm:$0xff]  ;;  %v9199_v20 = vld [vmem:[%s10978_s3 + $0x8] sm:$0x3f]  ;;  %v9269_v53 = vsub.s32 0, %v9186_v5 }
  0x30   :  { %v9189_v11 = vsub.s32 %v146_v4, %v9186_v5  ;;  %96 = vmatprep.subr.mxu0 %v59_v12  ;;  %8300 = vmatpush3.msra.mxu1 %v177_v13  ;;  %v56_v18 = vld [vmem:[#allocation6] sm:$0xff]  ;;  %v143_v21 = vcombine.high %v9194_v17, %v9194_v17  ;;  %v159_v25 = vcombine.high %v9199_v20, %v9199_v20  ;;  %v9212_v26 = vld [vmem:[#allocation6 + $0x1e8] sm:$0xff]  ;;  %v9239_v42 = vld [vmem:[#allocation6 + $0x198] sm:$0xff]  ;;  %s8102_s22 = sld [smem:[#allocation3 + $0x2]]  ;;  %vm638_vm5 = vcmask 41984  }
  0x31   :  { %97 = vmatpush1.msra.mxu0 %v58_v14  ;;  %8301 = vmatprep.subr.mxu1 %v176_v15  ;;  %v55_v23 = vld [vmem:[%s10977_s2] sm:$0x3]  ;;  %v9218_v33 = vld [vmem:[#allocation6 + $0x168] sm:$0xff]  ;;  %v762_v44 = vld [vmem:[#allocation6 + $0x190] sm:$0xff]  ;;  %s721_s2 = sld [smem:[#allocation3]]  ;;  %vm935_vm6 = vcmask 1041408  }
  0x32   :  { %v150_v22 = vrot.slane %v9194_v17, %v9189_v11  ;;  %v166_v24 = vrot.slane %v9199_v20, %v9189_v11  ;;  %98 = vmatprep.subr.mxu0 %v57_v16  ;;  %8302 = vmatpush3.msra.mxu1 %v176_v15  ;;  %v157_v27 = vrot.slane %v143_v21, %v9189_v11  ;;  %v9225_v37 = vld [vmem:[#allocation6 + $0xe8] sm:$0xff]  ;;  %v9234_v41 = vld [vmem:[#allocation6 + $0x1e0] sm:$0xff]  ;;  %v761_v46 = vld [vmem:[#allocation6 + $0x118] sm:$0xff]  ;;  %s8104_s24 = sld [smem:[#allocation3 + $0x9]]  ;;  %s8072_s25 = sshll.u32 %s8071_s19, 1  ;;  %vm937_vm7 = vcmask 27648  }
  0x33   :  { %99 = vmatpush1.msra.mxu0 %v56_v18  ;;  %8303 = vmatprep.subr.mxu1 %v175_v19  ;;  %v173_v30 = vrot.slane %v159_v25, %v9189_v11  ;;  %v9232_v40 = vld [vmem:[#allocation6 + $0x68] sm:$0xff]  ;;  %v9242_v43 = vld [vmem:[#allocation6 + $0x160] sm:$0xff]  ;;  %v760_v47 = vld [vmem:[#allocation6 + $0x110] sm:$0xff]  ;;  %s8086_s27 = sshll.u32 %s8085_s20, 1  ;;  %s727_s28 = scalar_lea.vmem [#allocation4], %s8072_s25  ;;  %vm949_vm8 = vcmask 1043456  }
  0x34   :  { %v158_v28 = vcombine.high %v150_v22, %v150_v22  ;;  %v174_v29 = vcombine.high %v166_v24, %v166_v24  ;;  %8308 = vmatprep.subr.mxu0 %v10986_v1  ;;  %8067 = vmatmul.mubr.msk.f32.vlgmr.msra.gmra.mxu0 %vm64_vm0, %v55_v23  ;;  %v181_v32 = vcombine.low %v157_v27, %v166_v24  ;;  %v9248_v45 = vld [vmem:[#allocation6 + $0xe0] sm:$0xff]  ;;  %v759_v49 = vld [vmem:[#allocation6 + $0x98] sm:$0xff]  ;;  %v758_v50 = vld [vmem:[#allocation6 + $0x90] sm:$0xff]  ;;  %s8088_s29 = sshll.u32 %s8087_s21, 1  ;;  %s9279_s30 = scalar_lea.vmem [#allocation4], %s8086_s27  ;;  %vm945_vm9 = vcmask 31744  }
  0x35   :  { %8304 = vmatpush3.msra.mxu1 %v175_v19  ;;  %8309 = vmatpush3.msra.mxu0 %v9212_v26  ;;  %v9255_v48 = vld [vmem:[#allocation6 + $0x60] sm:$0xff]  ;;  %v757_v51 = vld [vmem:[#allocation6 + $0x18] sm:$0xff]  ;;  %v9260_v52 = vld [vmem:[#allocation6 + $0x10] sm:$0xff]  ;;  %s8119_s7 = sld [smem:[#allocation3 + $0x3]]  ;;  %s9282_s8 = scalar_lea.vmem [#allocation4], %s8088_s29  ;;  %vm7909_vm10 = vcmask 1042432  }
  0x36   :  { %v180_v31 = vcombine.low %v150_v22, %v158_v28  ;;  %v197_v34 = vcombine.low %v174_v29, %v173_v30  ;;  %v195_v36 = vrot.slane %v181_v32, %v9189_v11  ;;  %8310 = vmatprep.subr.mxu0 %v10986_v1  ;;  %8319 = vmatprep.subr.mxu1 %v10986_v1  ;;  %v9273_v55 = vld [vmem:[%s727_s28] sm:$0x3]  ;;  %s8103_s9 = sshll.u32 %s8102_s22, 1  ;;  %s8121_s10 = sld [smem:[#allocation3 + $0xa]]  ;;  %vm7912_vm11 = vcmask 1044480  }
  0x37   :  { %8311 = vmatpush3.msra.mxu0 %v9218_v33  ;;  %8316 = vmatprep.mubr.msk.f32.mxu0 %vm9132_vm1, %v10986_v1  ;;  %s8070_s23 = sshll.u32 %s721_s2, 1  ;;  %v744_v57 = vrot.slane %v9273_v55, %v9269_v53  ;;  %v1853_v58 = vld [vmem:[%s9279_s30] sm:$0x3]  ;;  %s9288_s12 = scalar_lea.vmem [#allocation4], %s8103_s9  ;;  %vm7914_vm12 = vcmask 1045504   ;;  %vm7916_vm13 = vcmask 1046528  }
  0x38   :  { %v188_v35 = vrot.slane %v180_v31, %v9189_v11  ;;  %v204_v38 = vrot.slane %v197_v34, %v9189_v11  ;;  %8312 = vmatprep.subr.mxu0 %v10986_v1  ;;  %s723_s26 = scalar_lea.vmem [#allocation4], %s8070_s23  ;;  %v1857_v59 = vld [vmem:[%s9282_s8] sm:$0x3]  ;;  %v1862_v60 = vrot.slane %v1853_v58, %v9269_v53  ;;  %s8105_s11 = sshll.u32 %s8104_s24, 1 }
  0x39   :  { %8313 = vmatpush3.msra.mxu0 %v9225_v37  ;;  %v9271_v54 = vld [vmem:[%s723_s26] sm:$0x3]  ;;  %v1873_v62 = vrot.slane %v1857_v59, %v9269_v53  ;;  %s8136_s13 = sld [smem:[#allocation3 + $0x4]]  ;;  %s9292_s14 = scalar_lea.vmem [#allocation4], %s8105_s11 }
  0x3a   :  { %v196_v39 = vcombine.low %v188_v35, %v195_v36  ;;  %8314 = vmatprep.subr.mxu0 %v10986_v1  ;;  %v733_v56 = vrot.slane %v9271_v54, %v9269_v53  ;;  %v2920_v63 = vld [vmem:[%s9288_s12] sm:$0x3]  ;;  %s8138_s1 = sld [smem:[#allocation3 + $0xb]] }
  0x3b   :  { %8315 = vmatpush3.msra.mxu0 %v9232_v40  ;;  %v1880_v2 = vsel %vm751_vm2, %v1862_v60, %v1873_v62  ;;  %v2924_v3 = vld [vmem:[%s9292_s14] sm:$0x3]  ;;  %v2929_v4 = vrot.slane %v2920_v63, %v9269_v53  ;;  %s8153_s4 = sld [smem:[#allocation3 + $0x5]]  ;;  %s8120_s15 = sshll.u32 %s8119_s7, 1  ;;  %v179_v60 = vld [vmem:[%s10980_s5 + $0x5] ss:$0 sm:$0xff] }
  0x3c   :  { %8305 = vmatprep.mubr.msk.f32.mxu1 %vm64_vm0, %v196_v39  ;;  %8317 = vmatmul.mubr.f32.vlgmr.msra.gmra.mxu0 %v10986_v1  ;;  %v752_v61 = vsel %vm751_vm2, %v733_v56, %v744_v57  ;;  %v2940_v6 = vrot.slane %v2924_v3, %v9269_v53  ;;  %s8155_s16 = sld [smem:[#allocation3 + $0xc]]  ;;  %s8122_s17 = sshll.u32 %s8121_s10, 1 }
  0x3d   :  { %8306 = vmatmul.mubr.msk.f32.vlgmr.msra.gmra.mxu1 %vm64_vm0, %v204_v38  ;;  %788 = vmatprep.subr.mxu0 %v9239_v42  ;;  %s9298_s18 = scalar_lea.vmem [#allocation4], %s8120_s15  ;;  %s8170_s2 = sld [smem:[#allocation3 + $0x6]] }
  0x3e   :  { %8320 = vmatpush3.msra.mxu1 %v9234_v41  ;;  %8327 = vmatprep.mubr.msk.f32.mxu1 %vm9132_vm1, %v10986_v1  ;;  %v2947_v7 = vsel %vm751_vm2, %v2929_v4, %v2940_v6  ;;  %v3987_v8 = vld [vmem:[%s9298_s18] sm:$0x3]  ;;  %s9301_s19 = scalar_lea.vmem [#allocation4], %s8122_s17  ;;  %s8172_s21 = sld [smem:[#allocation3 + $0xd]] }
  0x3f   :  { %8321 = vmatprep.subr.mxu1 %v10986_v1  ;;  %789 = vmatpush1.msra.mxu0 %v762_v44  ;;  %v3991_v9 = vld [vmem:[%s9301_s19] sm:$0x3]  ;;  %v3996_v10 = vrot.slane %v3987_v8, %v9269_v53  ;;  %s8137_s20 = sshll.u32 %s8136_s13, 1  ;;  %s9135_s15 = smov 124  }
  0x40   :  { %8322 = vmatpush3.msra.mxu1 %v9242_v43  ;;  %790 = vmatprep.subr.mxu0 %v761_v46  ;;  %v4007_v12 = vrot.slane %v3991_v9, %v9269_v53  ;;  %s8139_s22 = sshll.u32 %s8138_s1, 1  ;;  %s9306_s23 = scalar_lea.vmem [#allocation4], %s8137_s20 }
  0x41   :  { %8323 = vmatprep.subr.mxu1 %v10986_v1  ;;  %791 = vmatpush1.msra.mxu0 %v760_v47  ;;  %v5054_v13 = vld [vmem:[%s9306_s23] sm:$0x3]  ;;  %s8154_s24 = sshll.u32 %s8153_s4, 1  ;;  %s9310_s25 = scalar_lea.vmem [#allocation4], %s8139_s22 }
  0x42   :  { %8324 = vmatpush3.msra.mxu1 %v9248_v45  ;;  %792 = vmatprep.subr.mxu0 %v759_v49  ;;  %v4014_v14 = vsel %vm751_vm2, %v3996_v10, %v4007_v12  ;;  %v5058_v15 = vld [vmem:[%s9310_s25] sm:$0x3]  ;;  %v5063_v16 = vrot.slane %v5054_v13, %v9269_v53  ;;  %s8156_s26 = sshll.u32 %s8155_s16, 1  ;;  %s9315_s27 = scalar_lea.vmem [#allocation4], %s8154_s24  ;;  %v9133_v49 = vmov 1966171168  }
  0x43   :  { %8325 = vmatprep.subr.mxu1 %v10986_v1  ;;  %793 = vmatpush1.msra.mxu0 %v758_v50  ;;  %v5074_v18 = vrot.slane %v5058_v15, %v9269_v53  ;;  %v6121_v19 = vld [vmem:[%s9315_s27] sm:$0x3]  ;;  %s9318_s28 = scalar_lea.vmem [#allocation4], %s8156_s26  ;;  %s8171_s29 = sshll.u32 %s8170_s2, 1  ;;  %v470_v50 = vunpack.c.l.s4 %v9133_v49 }
  0x44   :  { %8326 = vmatpush3.msra.mxu1 %v9255_v48  ;;  %794 = vmatprep.subr.mxu0 %v757_v51  ;;  %v6125_v21 = vld [vmem:[%s9318_s28] sm:$0x3]  ;;  %v6130_v22 = vrot.slane %v6121_v19, %v9269_v53  ;;  %s8173_s7 = sshll.u32 %s8172_s21, 1  ;;  %s9324_s9 = scalar_lea.vmem [#allocation4], %s8171_s29 }
  0x45   :  { %8328 = vmatmul.mubr.f32.vlgmr.msra.gmra.mxu1 %v10986_v1  ;;  %828 = vmatprep.mubr.f32.mxu0 %v10986_v1  ;;  %v5081_v23 = vsel %vm751_vm2, %v5063_v16, %v5074_v18  ;;  %v6141_v24 = vrot.slane %v6125_v21, %v9269_v53  ;;  %v7188_v25 = vld [vmem:[%s9324_s9] sm:$0x3]  ;;  %s9328_s10 = scalar_lea.vmem [#allocation4], %s8173_s7  ;;  %v471_v58 = vunpack.c.0.s8 %v470_v50  ;;  %s9137_s2 = smov 64  }
  0x46   :  { %795 = vmatpush1.msra.mxu0 %v9260_v52  ;;  %914 = vmatprep.mubr.f32.mxu1 %v10986_v1  ;;  %v7192_v28 = vld [vmem:[%s9328_s10] sm:$0x3]  ;;  %v7197_v29 = vrot.slane %v7188_v25, %v9269_v53 }
  0x47   :  { %829 = vmatmul.mubr.f32.vlgmr.msra.gmra.mxu0 %v10986_v1  ;;  %v6148_v27 = vsel %vm751_vm2, %v6130_v22, %v6141_v24  ;;  %v7208_v30 = vrot.slane %v7192_v28, %v9269_v53 }
  0x48   :  { %1245 = vmatprep.mubr.f32.mxu0 %v10986_v1 }
  0x49   :  { %v7215_v31 = vsel %vm751_vm2, %v7197_v29, %v7208_v30 }
  0xf4   :  { %v134_v32 = vpop.f32.mrf.mxu0 }
  0xf5   :  { %v754_v34 = vadd.f32 %v752_v61, %v134_v32  ;;  %v9334_v35 = vadd.f32 %v1880_v2, %v134_v32  ;;  %v9336_v36 = vadd.f32 %v2947_v7, %v134_v32  ;;  %v9338_v38 = vadd.f32 %v4014_v14, %v134_v32 }
  0xf6   :  { %v9340_v39 = vadd.f32 %v5081_v23, %v134_v32  ;;  %v9342_v44 = vadd.f32 %v6148_v27, %v134_v32  ;;  %v9344_v46 = vadd.f32 %v7215_v31, %v134_v32  ;;  %v9346_v47 = vpop.f32.mrf.mxu0  ;;  %v9352_v61 = vsub.s32 %v471_v58, %v9186_v5  ;;  %v549_v58 = vld [vmem:[%s10980_s5 + $0x6] ss:$0 sm:$0xff] }
  0xf7   :  { %11029 = vst [vmem:[#allocation11_spill] sm:$0xff] %v9336_v36  ;;  %11030 = vst [vmem:[#allocation12_spill] sm:$0xff] %v9338_v38  ;;  %v9575_v38 = vld [vmem:[#allocation6 + $0xd8] sm:$0xff] }
  0xf8   :  { %11031 = vst [vmem:[#allocation13_spill] sm:$0xff] %v9340_v39  ;;  %11032 = vst [vmem:[#allocation14_spill] sm:$0xff] %v9342_v44  ;;  %v9568_v44 = vld [vmem:[#allocation6 + $0x158] sm:$0xff]  ;;  %v9572_v39 = vld [vmem:[#allocation6 + $0x150] sm:$0xff] }
  0xf9   :  { %11033 = vst [vmem:[#allocation15_spill] sm:$0xff] %v9344_v46  ;;  %v9566_v46 = vld [vmem:[#allocation6 + $0x1d0] sm:$0xff]  ;;  %11037 = vst [vmem:[#allocation18_spill] sm:$0xff] %v9575_v38 }
  0xfc   :  { %v394_v56 = vpop.f32.mrf.mxu0 }
  0xfd   :  { %v8307_v51 = vpop.f32.mrf.mxu1 }
  0xfe   :  { %v8318_v57 = vpop.f32.mrf.mxu0  ;;  %v281_v7 = vadd.f32 %v8307_v51, %v179_v60 }
  0xff   :  { %v275_v59 = vpop.f32.mrf.mxu1 }
 0x100   :  { %v276_v62 = vadd.f32 %v275_v59, %v179_v60  ;;  %v9364_v16 = vrot.slane %v281_v7, %v9189_v11  ;;  %v9396_v59 = vrot.slane %v549_v58, %v9189_v11  ;;  %v551_v60 = vcombine.high %v549_v58, %v549_v58 }
 0x102   :  { %v286_v8 = vcombine.high %v276_v62, %v276_v62  ;;  %v9359_v13 = vrot.slane %v276_v62, %v9189_v11  ;;  %v9379_v29 = vcombine.high %v9364_v16, %v9364_v16  ;;  %v9400_v62 = vcombine.high %v9396_v59, %v9396_v59 }
 0x104   :  { %v9367_v18 = vrot.slane %v286_v8, %v9189_v11  ;;  %v9373_v23 = vcombine.high %v9359_v13, %v9359_v13 }
 0x105   :  { %v464_v63 = vpop.f32.mrf.mxu1 }
 0x106   :  { %v465_v2 = vadd.f32 %v464_v63, %v394_v56  ;;  %v9383_v30 = vcombine.high %v9367_v18, %v9367_v18  ;;  %v9403_v63 = vrot.slane %v551_v60, %v9189_v11 }
 0x107   :  { %v8329_v3 = vpop.f32.mrf.mxu1  ;;  %v830_v6 = vpop.f32.mrf.mxu0 }
 0x108   :  { %v475_v4 = vrot.slane %v465_v2, %v9352_v61  ;;  %v9355_v9 = vadd.f32 %v830_v6, %v754_v34 }
 0x10a   :  { %v476_v10 = vcombine.high %v475_v4, %v475_v4  ;;  %v483_v12 = vrot.slane %v475_v4, %v9352_v61 }
 0x10c   :  { %v490_v14 = vrot.slane %v476_v10, %v9352_v61  ;;  %v494_v15 = vrot.slane %v483_v12, %v9269_v53 }
 0x10e   :  { %v498_v19 = vrot.slane %v490_v14, %v9269_v53  ;;  %v499_v21 = vcombine.high %v494_v15, %v494_v15  ;;  %v506_v22 = vrot.slane %v494_v15, %v9189_v11 }
 0x110   :  { %v513_v24 = vrot.slane %v499_v21, %v9189_v11  ;;  %v514_v25 = vcombine.high %v506_v22, %v506_v22  ;;  %v515_v27 = vcombine.high %v498_v19, %v498_v19  ;;  %v522_v28 = vrot.slane %v498_v19, %v9189_v11 }
 0x111   :  { %v537_v31 = vadd.f32 %v506_v22, %v9359_v13 }
 0x112   :  { %v529_v32 = vrot.slane %v515_v27, %v9189_v11  ;;  %v530_v34 = vcombine.high %v522_v28, %v522_v28  ;;  %v538_v49 = vadd.f32 %v514_v25, %v9373_v23  ;;  %v539_v50 = vadd.f32 %v513_v24, %v9367_v18 }
 0x113   :  { %v540_v51 = vadd.f32 %v522_v28, %v9383_v30  ;;  %8585 = vtanh.f32 %v537_v31 }
 0x114   :  { %v541_v56 = vadd.f32 %v530_v34, %v9364_v16  ;;  %v542_v57 = vadd.f32 %v529_v32, %v9379_v29  ;;  %8587 = vtanh.f32 %v538_v49 }
 0x115   :  { %8589 = vtanh.f32 %v539_v50 }
 0x116   :  { %8591 = vtanh.f32 %v540_v51  ;;  %v626_v51 = vand.u32 127, %v147_v0  ;;  %v9428_v0 = vsub.s32 1, %v9186_v5 }
 0x117   :  { %8593 = vtanh.f32 %v541_v56 }
 0x118   :  { %8595 = vtanh.f32 %v542_v57  ;;  %v9419_v57 = vsub.s32 %v626_v51, %v9186_v5 }
 0x11a   :  { %11034 = vst [vmem:[#allocation16_spill] sm:$0xff] %v9419_v57 }
 0x120   :  { %v8586_v2 = vpop.eup %8585 }
 0x121   :  { %v8588_v3 = vpop.eup %8587  ;;  %v570_v6 = vmul.f32 %v8586_v2, %v9396_v59 }
 0x122   :  { %v8590_v4 = vpop.eup %8589  ;;  %v571_v7 = vmul.f32 %v8588_v3, %v9400_v62 }
 0x123   :  { %v8592_v8 = vpop.eup %8591  ;;  %v572_v10 = vmul.f32 %v8590_v4, %v9403_v63 }
 0x124   :  { %v8594_v12 = vpop.eup %8593  ;;  %v582_v14 = vcombine.low %v570_v6, %v571_v7  ;;  %v573_v19 = vmul.f32 %v8592_v8, %v9396_v59  ;;  %v10984_v6 = vmov 0  }
 0x125   :  { %v8596_v15 = vpop.eup %8595  ;;  %v574_v21 = vmul.f32 %v8594_v12, %v9400_v62  ;;  %v596_v24 = vrot.slane %v572_v10, %v9189_v11  ;;  %8559 = vset.pattern.permute.xlu0 %v10984_v6  ;;  %8558 = vset.pattern.permute.xlu1 %v10984_v6 }
 0x126   :  { %v589_v22 = vrot.slane %v582_v14, %v9189_v11  ;;  %v575_v25 = vmul.f32 %v8596_v15, %v9403_v63 }
 0x127   :  { %v598_v27 = vcombine.low %v573_v19, %v574_v21 }
 0x128   :  { %v597_v28 = vcombine.low %v589_v22, %v596_v24  ;;  %v612_v32 = vrot.slane %v575_v25, %v9189_v11 }
 0x129   :  { %v605_v31 = vrot.slane %v598_v27, %v9189_v11 }
 0x12a   :  { %v617_v34 = vsel %vm616_vm3, %v597_v28, 0.0 }
 0x12b   :  { %618 = vadd.xlane.f32.xlu0 %v617_v34  ;;  %v613_v49 = vcombine.low %v605_v31, %v612_v32 }
 0x12d   :  { %v620_v50 = vsel %vm616_vm3, %v613_v49, 0.0 }
 0x12f   :  { %621 = vadd.xlane.f32.xlu0 %v620_v50 }
 0x1b4   :  { %v619_v56 = vpop.xlane.xlu0 %618 }
 0x1b5   :  { %v630_v60 = vrot.slane %v619_v56, %v9419_v57 }
 0x1b8   :  { %v622_v58 = vpop.xlane.xlu0 %621 }
 0x1b9   :  { %v634_v2 = vrot.slane %v622_v58, %v9419_v57 }
 0x1bb   :  { %v636_v3 = vsel %vm635_vm4, %v634_v2, %v630_v60  ;;  %v9438_v60 = vld [vmem:[#allocation6 + $0x1a8] sm:$0xff]  ;;  %v9441_v2 = vld [vmem:[#allocation6 + $0x1a0] sm:$0xff] }
 0x1bc   :  { %v639_v4 = vsel %vm638_vm5, %v636_v3, -inf  ;;  %874 = vmatprep.subr.mxu1 %v9438_v60  ;;  %v9444_v3 = vld [vmem:[#allocation6 + $0x128] sm:$0xff] }
 0x1bd   :  { %640 = vmax.xlane.f32.xlu1 %v639_v4  ;;  %875 = vmatpush1.msra.mxu1 %v9441_v2  ;;  %v9447_v4 = vld [vmem:[#allocation6 + $0x120] sm:$0xff] }
 0x1be   :  { %876 = vmatprep.subr.mxu1 %v9444_v3 }
 0x1bf   :  { %877 = vmatpush1.msra.mxu1 %v9447_v4 }
 0x246   :  { %v641_v7 = vpop.xlane.xlu1 %640 }
 0x247   :  { %v646_v8 = vrot.slane %v641_v7, %v9269_v53  ;;  %v650_v10 = vrot.slane %v641_v7, %v9428_v0  ;;  %v9450_v7 = vld [vmem:[#allocation6 + $0xa8] sm:$0xff] }
 0x248   :  { %878 = vmatprep.subr.mxu1 %v9450_v7 }
 0x249   :  { %v653_v12 = vsub.f32 %v619_v56, %v646_v8  ;;  %v654_v14 = vsub.f32 %v622_v58, %v650_v10  ;;  %v9453_v8 = vld [vmem:[#allocation6 + $0xa0] sm:$0xff]  ;;  %v9455_v10 = vld [vmem:[#allocation6 + $0x28] sm:$0xff] }
 0x24a   :  { %879 = vmatpush1.msra.mxu1 %v9453_v8 }
 0x24b   :  { %v655_v15 = vmul.f32 1.442695, %v653_v12  ;;  %v657_v19 = vmul.f32 1.442695, %v654_v14  ;;  %v9457_v12 = vld [vmem:[#allocation6 + $0x20] sm:$0xff]  ;;  %880 = vmatprep.subr.mxu1 %v9455_v10 }
 0x24c   :  { %881 = vmatpush1.msra.mxu1 %v9457_v12 }
 0x24d   :  { %8597 = vpow2.f32 %v655_v15  ;;  %8330 = vmatprep.subr.mxu1 %v10986_v1 }
 0x24e   :  { %8599 = vpow2.f32 %v657_v19 }
 0x25a   :  { %v8598_v21 = vpop.eup %8597 }
 0x25b   :  { %v8600_v22 = vpop.eup %8599  ;;  %662 = vperm.xlu1 %8558, %v8598_v21  }
 0x25c   :  { %665 = vperm.xlu0 %8559, %v8600_v22  }
 0x2d6   :  { %v663_v24 = vpop.permute.xlu1 %662 }
 0x2d7   :  { %v666_v25 = vpop.permute.xlu0 %665  ;;  %v670_v5 = vrot.slane %v663_v24, %v9419_v57 }
 0x2d8   :  { %v674_v27 = vrot.slane %v666_v25, %v9419_v57 }
 0x2da   :  { %v675_v28 = vsel %vm635_vm4, %v674_v27, %v670_v5 }
 0x2db   :  { %v677_v31 = vsel %vm638_vm5, %v675_v28, 0.0 }
 0x2dc   :  { %678 = vadd.xlane.f32.xlu1 %v677_v31 }
 0x365   :  { %v679_v32 = vpop.xlane.xlu1 %678 }
 0x366   :  { %v684_v34 = vrot.slane %v679_v32, %v9269_v53  ;;  %v688_v49 = vrot.slane %v679_v32, %v9428_v0 }
 0x368   :  { %8601 = vrcp.f32 %v684_v34 }
 0x369   :  { %8603 = vrcp.f32 %v688_v49 }
 0x375   :  { %v8602_v50 = vpop.eup %8601 }
 0x376   :  { %v692_v51 = vmul.f32 %v8602_v50, %v8598_v21  ;;  %v8604_v56 = vpop.eup %8603 }
 0x377   :  { %v694_v58 = vmul.f32 %v8604_v56, %v8600_v22 }
 0x378   :  { %697 = vperm.xlu0 %8559, %v692_v51  }
 0x37c   :  { %702 = vperm.xlu0 %8559, %v694_v58  }
 0x3f3   :  { %v698_v14 = vpop.permute.xlu0 %697 }
 0x3f4   :  { %v705_v15 = vmul.f32 %v698_v14, %v9194_v17  ;;  %v748_v14 = vrot.slane %v9273_v55, %v9428_v0 }
 0x3f6   :  { %v707_v19 = vsel %vm616_vm3, %v705_v15, 0.0 }
 0x3f7   :  { %v708_v21 = vrot.slane %v707_v19, 4  ;;  %v703_v22 = vpop.permute.xlu0 %702 }
 0x3f8   :  { %v706_v24 = vmul.f32 %v703_v22, %v9199_v20  ;;  %v737_v20 = vrot.slane %v9271_v54, %v9428_v0 }
 0x3f9   :  { %v709_v25 = vadd.f32 %v708_v21, %v707_v19  ;;  %v832_v19 = vpop.f32.mrf.mxu0 }
 0x3fa   :  { %v714_v5 = vsel %vm616_vm3, %v706_v24, 0.0  ;;  %v753_v15 = vsel %vm751_vm2, %v737_v20, %v748_v14 }
 0x3fb   :  { %v710_v27 = vrot.slane %v709_v25, 2  ;;  %v715_v28 = vrot.slane %v714_v5, 4  ;;  %v755_v21 = vadd.f32 %v753_v15, %v9346_v47 }
 0x3fd   :  { %v711_v31 = vadd.f32 %v710_v27, %v709_v25  ;;  %v716_v32 = vadd.f32 %v715_v28, %v714_v5  ;;  %v836_v24 = vadd.f32 %v832_v19, %v755_v21 }
 0x3ff   :  { %v717_v34 = vrot.slane %v716_v32, 2  ;;  %v712_v49 = vrot.slane %v711_v31, 1 }
 0x401   :  { %v718_v50 = vadd.f32 %v717_v34, %v716_v32  ;;  %v713_v56 = vadd.f32 %v712_v49, %v711_v31  ;;  %v9487_v32 = vld [vmem:[%s10980_s5] sm:$0xf] }
 0x403   :  { %v719_v51 = vrot.slane %v718_v50, 1 }
 0x405   :  { %v720_v58 = vadd.f32 %v719_v51, %v718_v50 }
 0x407   :  { %v9468_v17 = vsel %vm635_vm4, %v720_v58, %v713_v56 }
 0x408   :  { %8073 = vmatmul.mubr.msk.f32.vlgmr.msra.gmra.mxu1 %vm64_vm0, %v9468_v17 }
 0x409   :  { %8332 = vmatprep.mubr.msk.f32.mxu1 %vm9132_vm1, %v10986_v1  ;;  %8331 = vmatpush3.msk.msra.mxu1 %vm949_vm8, %v9487_v32 }
 0x4c8   :  { %v916_v22 = vpop.f32.mrf.mxu1 }
 0x4c9   :  { %v921_v25 = vadd.f32 %v916_v22, %v9355_v9  ;;  %v10982_v9 = vmov 32  }
 0x4ca   :  { %v918_v5 = vpop.f32.mrf.mxu1  ;;  %8560 = vset.pattern.permute.xlu1 %v10982_v9  ;;  %8561 = vset.pattern.permute.xlu0 %v10982_v9  ;;  %v9540_v9 = vld [vmem:[#allocation6 + $0xc8] sm:$0xff] }
 0x4cb   :  { %v922_v27 = vadd.f32 %v918_v5, %v836_v24 }
 0x4cd   :  { %v931_v28 = vrot.slane %v922_v27, 6 }
 0x4cf   :  { %932 = vrot.lane.b32.xlu1 %v931_v28, %s9135_s15 }
 0x541   :  { %v933_v54 = vpop.permute.xlu1 %932 }
 0x542   :  { %v936_v55 = vsel %vm935_vm6, %v922_v27, %v933_v54 }
 0x543   :  { %v938_v31 = vsel %vm937_vm7, %v936_v55, -inf }
 0x544   :  { %939 = vmax.xlane.f32.xlu0 %v938_v31 }
 0x5cd   :  { %v940_v34 = vpop.xlane.xlu0 %939 }
 0x5ce   :  { %v941_v49 = vsub.f32 %v936_v55, %v940_v34  ;;  %v8074_v55 = vmul.f32 -1.442695, %v921_v25 }
 0x5d0   :  { %v942_v50 = vmul.f32 1.442695, %v941_v49 }
 0x5d2   :  { %8605 = vpow2.f32 %v942_v50 }
 0x5df   :  { %v8606_v51 = vpop.eup %8605 }
 0x5e0   :  { %8333 = vmatmul.mubr.msk.f32.vlgmr.msra.gmra.mxu1 %vm945_vm9, %v8606_v51 }
 0x5e1   :  { %1153 = vmatprep.mubr.f32.mxu1 %v10986_v1  ;;  %v9546_v1 = vld [vmem:[#allocation6 + $0x1d8] sm:$0xff] }
 0x6a0   :  { %v1019_v56 = vpop.f32.mrf.mxu1 }
 0x6a1   :  { %1025 = vperm.xlu1 %8560, %v1019_v56  }
 0x6a2   :  { %v8334_v58 = vpop.f32.mrf.mxu1 }
 0x6a5   :  { %8563 = vset.pattern.permute.xlu1 %v10984_v6  ;;  %v9542_v6 = vld [vmem:[#allocation6 + $0xc0] sm:$0xff] }
 0x71c   :  { %v1026_v20 = vpop.permute.xlu1 %1025 }
 0x71d   :  { %8607 = vrcp.f32 %v1026_v20 }
 0x71e   :  { %8609 = vtanh.f32 %v921_v25  ;;  %v9509_v25 = vld [vmem:[#allocation6 + $0x130] sm:$0xff] }
 0x71f   :  { %8611 = vpow2.f32 %v8074_v55  ;;  %v9529_v55 = vld [vmem:[#allocation6 + $0x38] sm:$0xff] }
 0x72a   :  { %v8608_v14 = vpop.eup %8607 }
 0x72b   :  { %v1029_v15 = vmul.f32 %v8608_v14, %v1019_v56  ;;  %v8610_v54 = vpop.eup %8609 }
 0x72c   :  { %v8612_v31 = vpop.eup %8611 }
 0x72d   :  { %v1030_v19 = vsub.f32 1.0, %v1029_v15  ;;  %v926_v34 = vadd.f32 1.0, %v8612_v31 }
 0x72f   :  { %v1032_v21 = vrot.slane %v1030_v19, 6  ;;  %8613 = vrcp.f32 %v926_v34 }
 0x731   :  { %v1034_v22 = vmul.f32 %v1032_v21, %v1029_v15  ;;  %v9506_v21 = vld [vmem:[#allocation6 + $0x138] sm:$0xff] }
 0x733   :  { %v1036_v24 = vrot.slane %v1034_v22, 2  ;;  %v1041_v5 = vsub.f32 %v1029_v15, %v1034_v22  ;;  %v9502_v15 = vld [vmem:[#allocation6 + $0x1b8] sm:$0xff]  ;;  %v9511_v22 = vld [vmem:[#allocation6 + $0x1c8] sm:$0xff] }
 0x734   :  { %11035 = vst [vmem:[#allocation17_spill] sm:$0xff] %v9502_v15  ;;  %1113 = vmatprep.subr.mxu1 %v9502_v15  ;;  %1205 = vmatprep.subr.mxu0 %v9511_v22 }
 0x735   :  { %1048 = vrot.lane.b32.xlu1 %v1036_v24, %s9125_s0  ;;  %v1043_v27 = vrot.slane %v1041_v5, 2  ;;  %v1053_v28 = vsub.f32 %v1030_v19, %v1036_v24  ;;  %v9504_v19 = vld [vmem:[#allocation6 + $0x1b0] sm:$0xff]  ;;  %v9517_v5 = vld [vmem:[#allocation6 + $0x1c0] sm:$0xff] }
 0x736   :  { %1114 = vmatpush1.msra.mxu1 %v9504_v19  ;;  %1206 = vmatpush1.msra.mxu0 %v9517_v5 }
 0x737   :  { %1044 = vrot.lane.b32.xlu0 %v1043_v27, %s9137_s2  ;;  %v9519_v27 = vld [vmem:[#allocation6 + $0x148] sm:$0xff]  ;;  %1115 = vmatprep.subr.mxu1 %v9506_v21 }
 0x738   :  { %1116 = vmatpush1.msra.mxu1 %v9509_v25  ;;  %1207 = vmatprep.subr.mxu0 %v9519_v27 }
 0x739   :  { %1055 = vrot.lane.b32.xlu1 %v1053_v28, %s9125_s0  ;;  %v9523_v28 = vld [vmem:[#allocation6 + $0xb0] sm:$0xff] }
 0x73c   :  { %v8614_v50 = vpop.eup %8613 }
 0x73d   :  { %1061 = vrot.lane.b32.xlu1 %v8610_v54, %s9137_s2  ;;  %v9525_v54 = vld [vmem:[#allocation6 + $0x140] sm:$0xff] }
 0x73e   :  { %1208 = vmatpush1.msra.mxu0 %v9525_v54 }
 0x73f   :  { %1209 = vmatprep.subr.mxu0 %v9540_v9 }
 0x740   :  { %1210 = vmatpush1.msra.mxu0 %v9542_v6 }
 0x741   :  { %1037 = vrot.lane.b32.xlu1 %v1036_v24, %s9137_s2  ;;  %v9515_v24 = vld [vmem:[#allocation6 + $0xb8] sm:$0xff] }
 0x742   :  { %1117 = vmatprep.subr.mxu1 %v9515_v24 }
 0x743   :  { %1118 = vmatpush1.msra.mxu1 %v9523_v28 }
 0x744   :  { %1119 = vmatprep.subr.mxu1 %v9529_v55 }
 0x7a7   :  { %v1049_v49 = vpop.permute.xlu1 %1048 }
 0x7a8   :  { %v1051_v56 = vmul.f32 %v8614_v50, %v1049_v49 }
 0x7a9   :  { %v1045_v49 = vpop.permute.xlu0 %1044 }
 0x7ab   :  { %v1056_v51 = vpop.permute.xlu1 %1055 }
 0x7ac   :  { %v1058_v58 = vadd.f32 %v1056_v51, %v1051_v56 }
 0x7af   :  { %v1062_v20 = vpop.permute.xlu1 %1061 }
 0x7b0   :  { %v1064_v14 = vmul.f32 %v1062_v20, %v1058_v58 }
 0x7b2   :  { %1066 = vrot.lane.b32.xlu1 %v1064_v14, %s9125_s0  ;;  %v9538_v14 = vld [vmem:[#allocation6 + $0x30] sm:$0xff] }
 0x7b3   :  { %v1038_v31 = vpop.permute.xlu1 %1037  ;;  %1120 = vmatpush1.msra.mxu1 %v9538_v14 }
 0x7b4   :  { %v1040_v34 = vmul.f32 %v8614_v50, %v1038_v31  ;;  %1286 = vmatprep.subr.mxu1 %v9546_v1  ;;  %v9550_v31 = vld [vmem:[#allocation6 + $0x48] sm:$0xff] }
 0x7b5   :  { %1211 = vmatprep.subr.mxu0 %v9550_v31 }
 0x7b6   :  { %v1047_v51 = vadd.f32 %v1045_v49, %v1040_v34  ;;  %v9553_v34 = vld [vmem:[#allocation6 + $0x40] sm:$0xff]  ;;  %v11036_v49 = vmov 0.0  }
 0x7b7   :  { %1212 = vmatpush1.msra.mxu0 %v9553_v34 }
 0x7b8   :  { %v1059_v56 = vmul.f32 0.0, %v1047_v51  ;;  %1246 = vmatmul.mubr.f32.vlgmr.msra.gmra.mxu0 %v11036_v49  ;;  %8335 = vmatprep.subr.mxu0 %v11036_v49 }
 0x7b9   :  { %8336 = vmatpush3.msk.msra.mxu0 %vm949_vm8, %v9487_v32  ;;  %8337 = vmatprep.mubr.msk.f32.mxu0 %vm9132_vm1, %v11036_v49 }
 0x7ba   :  { %8340 = vmatprep.subr.mxu0 %v11036_v49 }
 0x824   :  { %v1067_v58 = vpop.permute.xlu1 %1066 }
 0x825   :  { %v9535_v20 = vadd.f32 %v1067_v58, %v1059_v56 }
 0x827   :  { %8615 = vtanh.f32 %v9535_v20 }
 0x834   :  { %v8616_v51 = vpop.eup %8615 }
 0x835   :  { %1072 = vrot.lane.b32.xlu1 %v8616_v51, %s9137_s2  ;;  %v9579_v51 = vld [vmem:[#allocation6 + $0xd0] sm:$0xff] }
 0x836   :  { %11038 = vst [vmem:[#allocation19_spill] sm:$0xff] %v9579_v51 }
 0x8a7   :  { %v1073_v56 = vpop.permute.xlu1 %1072 }
 0x8a8   :  { %v9564_v58 = vmul.f32 %v8614_v50, %v1073_v56  ;;  %v9582_v50 = vld [vmem:[#allocation6 + $0x58] sm:$0xff]  ;;  %v9585_v56 = vld [vmem:[#allocation6 + $0x50] sm:$0xff] }
 0x8a9   :  { %11039 = vst [vmem:[#allocation20_spill] sm:$0xff] %v9582_v50  ;;  %11040 = vst [vmem:[#allocation21_spill] sm:$0xff] %v9585_v56 }
 0x8aa   :  { %8078 = vmatmul.mubr.msk.f32.vlgmr.msra.gmra.mxu1 %vm64_vm0, %v9564_v58 }
 0x8ab   :  { %1287 = vmatpush1.msra.mxu1 %v9566_v46  ;;  %1326 = vmatprep.mubr.f32.mxu1 %v11036_v49 }
 0x8ac   :  { %1288 = vmatprep.subr.mxu1 %v9568_v44 }
 0x8ad   :  { %1289 = vmatpush1.msra.mxu1 %v9572_v39 }
 0x8ae   :  { %1290 = vmatprep.subr.mxu1 %v9575_v38 }
 0x8af   :  { %1291 = vmatpush1.msra.mxu1 %v9579_v51 }
 0x8b0   :  { %1292 = vmatprep.subr.mxu1 %v9582_v50 }
 0x8b1   :  { %1293 = vmatpush1.msra.mxu1 %v9585_v56 }
 0x8b2   :  { %8079 = vmatmul.mubr.msk.f32.vlgmr.msra.gmra.mxu1 %vm64_vm0, %v9468_v17  ;;  %8351 = vmatprep.subr.mxu1 %v11036_v49 }
 0x8b3   :  { %8352 = vmatpush3.msra.mxu1 %v9234_v41  ;;  %8359 = vmatprep.mubr.msk.f32.mxu1 %vm9132_vm1, %v11036_v49  ;;  %v8077_v41 = vld [vmem:[%s10980_s5 + $0x4] ss:$8 sm:$0x3] }
 0x8b4   :  { %8353 = vmatprep.subr.mxu1 %v11036_v49 }
 0x8b5   :  { %8354 = vmatpush3.msra.mxu1 %v9242_v43  ;;  %v9618_v43 = vrot.slane %v8077_v41, %v9269_v53 }
 0x8b6   :  { %8355 = vmatprep.subr.mxu1 %v11036_v49 }
 0x8b7   :  { %8356 = vmatpush3.msra.mxu1 %v9248_v45 }
 0x8b8   :  { %8357 = vmatprep.subr.mxu1 %v11036_v49 }
 0x8b9   :  { %8358 = vmatpush3.msra.mxu1 %v9255_v48  ;;  %v9621_v48 = vrot.slane %v8077_v41, %v9428_v0 }
 0x8ba   :  { %8360 = vmatmul.mubr.msk.f32.vlgmr.msra.gmra.mxu1 %vm64_vm0, %v9564_v58  ;;  %1986 = vmatprep.subr.mxu1 %v9438_v60 }
 0x8bb   :  { %1987 = vmatpush1.msra.mxu1 %v9441_v2  ;;  %2026 = vmatprep.mubr.f32.mxu1 %v11036_v49  ;;  %11041 = vst [vmem:[#allocation22_spill] sm:$0xff] %v9621_v48  ;;  %v1247_v2 = vpop.f32.mrf.mxu0 }
 0x8bc   :  { %1988 = vmatprep.subr.mxu1 %v9444_v3 }
 0x8bd   :  { %1989 = vmatpush1.msra.mxu1 %v9447_v4 }
 0x8be   :  { %1990 = vmatprep.subr.mxu1 %v9450_v7  ;;  %v1249_v7 = vpop.f32.mrf.mxu0 }
 0x8bf   :  { %1991 = vmatpush1.msra.mxu1 %v9453_v8 }
 0x8c0   :  { %1992 = vmatprep.subr.mxu1 %v9455_v10 }
 0x8c1   :  { %1993 = vmatpush1.msra.mxu1 %v9457_v12 }
 0x8c2   :  { %2207 = vmatprep.subr.mxu1 %v9502_v15 }
 0x96a   :  { %v1155_v45 = vpop.f32.mrf.mxu1 }
 0x96b   :  { %v1171_v3 = vadd.f32 %v9618_v43, %v1155_v45 }
 0x96c   :  { %v1157_v60 = vpop.f32.mrf.mxu1 }
 0x96d   :  { %v1172_v4 = vadd.f32 %v9621_v48, %v1157_v60  ;;  %v1252_v8 = vadd.f32 %v1247_v2, %v1171_v3 }
 0x96f   :  { %v1253_v12 = vadd.f32 %v1249_v7, %v1172_v4 }
 0x972   :  { %v1328_v10 = vpop.f32.mrf.mxu1 }
 0x973   :  { %v1333_v17 = vadd.f32 %v1328_v10, %v1252_v8 }
 0x974   :  { %v1330_v36 = vpop.f32.mrf.mxu1 }
 0x975   :  { %v1334_v15 = vadd.f32 %v1330_v36, %v1253_v12  ;;  %v8080_v10 = vmul.f32 -1.442695, %v1333_v17 }
 0x977   :  { %v1343_v56 = vrot.slane %v1334_v15, 6 }
 0x979   :  { %1344 = vrot.lane.b32.xlu1 %v1343_v56, %s9135_s15 }
 0x97a   :  { %v9626_v50 = vpop.f32.mrf.mxu1 }
 0x97c   :  { %v8361_v41 = vpop.f32.mrf.mxu1 }
 0x9eb   :  { %v1345_v51 = vpop.permute.xlu1 %1344 }
 0x9ec   :  { %v1347_v38 = vsel %vm935_vm6, %v1334_v15, %v1345_v51 }
 0x9ed   :  { %v1348_v45 = vsel %vm937_vm7, %v1347_v38, -inf }
 0x9ee   :  { %1349 = vmax.xlane.f32.xlu1 %v1348_v45 }
 0xa77   :  { %v1350_v60 = vpop.xlane.xlu1 %1349 }
 0xa78   :  { %v1351_v48 = vsub.f32 %v1347_v38, %v1350_v60  ;;  %v11042_v38 = vmov 0  }
 0xa7a   :  { %v1352_v2 = vmul.f32 1.442695, %v1351_v48 }
 0xa7c   :  { %8617 = vpow2.f32 %v1352_v2 }
 0xa89   :  { %v8618_v3 = vpop.eup %8617 }
 0xa8a   :  { %8338 = vmatmul.mubr.msk.f32.vlgmr.msra.gmra.mxu0 %vm945_vm9, %v8618_v3 }
 0xa8b   :  { %8341 = vmatpush3.msra.mxu0 %v9212_v26  ;;  %8348 = vmatprep.mubr.msk.f32.mxu0 %vm9132_vm1, %v11036_v49 }
 0xa8c   :  { %8342 = vmatprep.subr.mxu0 %v11036_v49 }
 0xa8d   :  { %8343 = vmatpush3.msra.mxu0 %v9218_v33 }
 0xa8e   :  { %8344 = vmatprep.subr.mxu0 %v11036_v49 }
 0xa8f   :  { %8345 = vmatpush3.msra.mxu0 %v9225_v37 }
 0xa90   :  { %8346 = vmatprep.subr.mxu0 %v11036_v49 }
 0xa91   :  { %8347 = vmatpush3.msra.mxu0 %v9232_v40 }
 0xa92   :  { %1908 = vmatprep.subr.mxu0 %v9239_v42 }
 0xb4a   :  { %v1423_v36 = vpop.f32.mrf.mxu0 }
 0xb4b   :  { %1429 = vperm.xlu0 %8561, %v1423_v36  }
 0xb4c   :  { %v8339_v26 = vpop.f32.mrf.mxu0 }
 0xb4f   :  { %8562 = vset.pattern.permute.xlu0 %v11042_v38 }
 0xbc6   :  { %v1430_v15 = vpop.permute.xlu0 %1429 }
 0xbc7   :  { %8619 = vrcp.f32 %v1430_v15 }
 0xbc8   :  { %8621 = vtanh.f32 %v1333_v17 }
 0xbc9   :  { %8623 = vpow2.f32 %v8080_v10  ;;  %v9660_v10 = vld [vmem:[#allocation6 + $0x118] sm:$0xff] }
 0xbd4   :  { %v8620_v51 = vpop.eup %8619 }
 0xbd5   :  { %v1433_v56 = vmul.f32 %v8620_v51, %v1423_v36  ;;  %v8622_v40 = vpop.eup %8621 }
 0xbd6   :  { %v8624_v12 = vpop.eup %8623 }
 0xbd7   :  { %v1434_v33 = vsub.f32 1.0, %v1433_v56  ;;  %v1338_v41 = vadd.f32 1.0, %v8624_v12  ;;  %v9663_v12 = vld [vmem:[#allocation6 + $0x110] sm:$0xff] }
 0xbd9   :  { %v1436_v48 = vrot.slane %v1434_v33, 6  ;;  %8625 = vrcp.f32 %v1338_v41  ;;  %v9666_v41 = vld [vmem:[#allocation6 + $0x98] sm:$0xff] }
 0xbdb   :  { %v1438_v4 = vmul.f32 %v1436_v48, %v1433_v56 }
 0xbdd   :  { %v1440_v37 = vrot.slane %v1438_v4, 2  ;;  %v1445_v42 = vsub.f32 %v1433_v56, %v1438_v4 }
 0xbdf   :  { %1452 = vrot.lane.b32.xlu0 %v1440_v37, %s9125_s0  ;;  %v1457_v7 = vsub.f32 %v1434_v33, %v1440_v37  ;;  %v1447_v8 = vrot.slane %v1445_v42, 2 }
 0xbe3   :  { %1459 = vrot.lane.b32.xlu0 %v1457_v7, %s9125_s0 }
 0xbe6   :  { %v8626_v60 = vpop.eup %8625 }
 0xbe7   :  { %1465 = vrot.lane.b32.xlu0 %v8622_v40, %s9137_s2 }
 0xbeb   :  { %1441 = vrot.lane.b32.xlu0 %v1440_v37, %s9137_s2 }
 0xbef   :  { %1448 = vrot.lane.b32.xlu0 %v1447_v8, %s9137_s2  ;;  %v9656_v8 = vld [vmem:[#allocation6 + $0x190] sm:$0xff] }
 0xc51   :  { %v1453_v45 = vpop.permute.xlu0 %1452 }
 0xc52   :  { %v1455_v3 = vmul.f32 %v8626_v60, %v1453_v45  ;;  %v9669_v45 = vld [vmem:[#allocation6 + $0x90] sm:$0xff] }
 0xc55   :  { %v1460_v2 = vpop.permute.xlu0 %1459 }
 0xc56   :  { %v1462_v36 = vadd.f32 %v1460_v2, %v1455_v3 }
 0xc59   :  { %v1466_v26 = vpop.permute.xlu0 %1465 }
 0xc5a   :  { %v1468_v15 = vmul.f32 %v1466_v26, %v1462_v36 }
 0xc5c   :  { %1470 = vrot.lane.b32.xlu0 %v1468_v15, %s9125_s0 }
 0xc5d   :  { %v1442_v51 = vpop.permute.xlu0 %1441 }
 0xc5e   :  { %v1444_v33 = vmul.f32 %v8626_v60, %v1442_v51 }
 0xc61   :  { %v1449_v56 = vpop.permute.xlu0 %1448 }
 0xc62   :  { %v1451_v48 = vadd.f32 %v1449_v56, %v1444_v33 }
 0xc64   :  { %v1463_v4 = vmul.f32 0.0, %v1451_v48 }
 0xcce   :  { %v1471_v37 = vpop.permute.xlu0 %1470 }
 0xccf   :  { %v9648_v17 = vadd.f32 %v1471_v37, %v1463_v4 }
 0xcd1   :  { %8627 = vtanh.f32 %v9648_v17 }
 0xcde   :  { %v8628_v7 = vpop.eup %8627 }
 0xcdf   :  { %1476 = vrot.lane.b32.xlu1 %v8628_v7, %s9137_s2 }
 0xd51   :  { %v1477_v40 = vpop.permute.xlu1 %1476 }
 0xd52   :  { %v9652_v42 = vmul.f32 %v8626_v60, %v1477_v40  ;;  %v9672_v60 = vld [vmem:[#allocation6 + $0x18] sm:$0xff] }
 0xd54   :  { %11043 = vst [vmem:[#allocation23_spill] sm:$0xff] %v9652_v42  ;;  %8349 = vmatmul.mubr.msk.f32.vlgmr.msra.gmra.mxu0 %vm64_vm0, %v9652_v42 }
 0xd55   :  { %1909 = vmatpush1.msra.mxu0 %v9656_v8  ;;  %1948 = vmatprep.mubr.f32.mxu0 %v11036_v49 }
 0xd56   :  { %1910 = vmatprep.subr.mxu0 %v9660_v10 }
 0xd57   :  { %1911 = vmatpush1.msra.mxu0 %v9663_v12 }
 0xd58   :  { %1912 = vmatprep.subr.mxu0 %v9666_v41 }
 0xd59   :  { %1913 = vmatpush1.msra.mxu0 %v9669_v45 }
 0xd5a   :  { %1914 = vmatprep.subr.mxu0 %v9672_v60 }
 0xd5b   :  { %1915 = vmatpush1.msra.mxu0 %v9260_v52 }
 0xd5c   :  { %8089 = vmatmul.mubr.msk.f32.vlgmr.msra.gmra.mxu0 %vm64_vm0, %v9564_v58  ;;  %8362 = vmatprep.subr.mxu0 %v11036_v49 }
 0xd5d   :  { %8363 = vmatpush3.msk.msra.mxu0 %vm949_vm8, %v9487_v32  ;;  %8364 = vmatprep.mubr.msk.f32.mxu0 %vm9132_vm1, %v11036_v49 }
 0xd5e   :  { %2280 = vmatprep.subr.mxu0 %v9511_v22 }
 0xe14   :  { %v1549_v2 = vpop.f32.mrf.mxu0 }
 0xe15   :  { %v1620_v3 = vadd.f32 %v9626_v50, %v1549_v2 }
 0xe16   :  { %v8350_v36 = vpop.f32.mrf.mxu0 }
 0xe17   :  { %v1630_v26 = vrot.slane %v1620_v3, %v9352_v61 }
 0xe19   :  { %v1631_v52 = vcombine.high %v1630_v26, %v1630_v26  ;;  %v1638_v15 = vrot.slane %v1630_v26, %v9352_v61 }
 0xe1b   :  { %v1645_v58 = vrot.slane %v1631_v52, %v9352_v61  ;;  %v1649_v51 = vrot.slane %v1638_v15, %v9269_v53 }
 0xe1c   :  { %v1950_v56 = vpop.f32.mrf.mxu0 }
 0xe1d   :  { %v1653_v33 = vrot.slane %v1645_v58, %v9269_v53  ;;  %v1654_v48 = vcombine.high %v1649_v51, %v1649_v51  ;;  %v1661_v4 = vrot.slane %v1649_v51, %v9189_v11  ;;  %v9692_v22 = vadd.f32 %v1950_v56, %v9334_v35 }
 0xe1f   :  { %v1668_v50 = vrot.slane %v1654_v48, %v9189_v11  ;;  %v1669_v37 = vcombine.high %v1661_v4, %v1661_v4  ;;  %v1670_v7 = vcombine.high %v1653_v33, %v1653_v33  ;;  %v1677_v40 = vrot.slane %v1653_v33, %v9189_v11 }
 0xe20   :  { %v1692_v2 = vadd.f32 %v1661_v4, %v9359_v13 }
 0xe21   :  { %v1684_v3 = vrot.slane %v1670_v7, %v9189_v11  ;;  %v1685_v36 = vcombine.high %v1677_v40, %v1677_v40  ;;  %v1693_v26 = vadd.f32 %v1669_v37, %v9373_v23  ;;  %v1694_v52 = vadd.f32 %v1668_v50, %v9367_v18 }
 0xe22   :  { %v1695_v15 = vadd.f32 %v1677_v40, %v9383_v30  ;;  %8629 = vtanh.f32 %v1692_v2 }
 0xe23   :  { %v1696_v35 = vadd.f32 %v1685_v36, %v9364_v16  ;;  %v1697_v58 = vadd.f32 %v1684_v3, %v9379_v29  ;;  %8631 = vtanh.f32 %v1693_v26 }
 0xe24   :  { %8633 = vtanh.f32 %v1694_v52 }
 0xe25   :  { %8635 = vtanh.f32 %v1695_v15 }
 0xe26   :  { %8637 = vtanh.f32 %v1696_v35 }
 0xe27   :  { %8639 = vtanh.f32 %v1697_v58 }
 0xe2f   :  { %v8630_v51 = vpop.eup %8629 }
 0xe30   :  { %v8632_v56 = vpop.eup %8631  ;;  %v1704_v48 = vmul.f32 %v8630_v51, %v9396_v59 }
 0xe31   :  { %v8634_v33 = vpop.eup %8633  ;;  %v1705_v4 = vmul.f32 %v8632_v56, %v9400_v62 }
 0xe32   :  { %v8636_v50 = vpop.eup %8635  ;;  %v1706_v37 = vmul.f32 %v8634_v33, %v9403_v63 }
 0xe33   :  { %v8638_v7 = vpop.eup %8637  ;;  %v1716_v40 = vcombine.low %v1704_v48, %v1705_v4  ;;  %v1707_v3 = vmul.f32 %v8636_v50, %v9396_v59 }
 0xe34   :  { %v8640_v2 = vpop.eup %8639  ;;  %v1708_v36 = vmul.f32 %v8638_v7, %v9400_v62  ;;  %v1730_v52 = vrot.slane %v1706_v37, %v9189_v11 }
 0xe35   :  { %v1723_v26 = vrot.slane %v1716_v40, %v9189_v11  ;;  %v1709_v15 = vmul.f32 %v8640_v2, %v9403_v63 }
 0xe36   :  { %v1732_v35 = vcombine.low %v1707_v3, %v1708_v36 }
 0xe37   :  { %v1731_v58 = vcombine.low %v1723_v26, %v1730_v52  ;;  %v1746_v56 = vrot.slane %v1709_v15, %v9189_v11 }
 0xe38   :  { %v1739_v51 = vrot.slane %v1732_v35, %v9189_v11 }
 0xe39   :  { %v1750_v33 = vsel %vm616_vm3, %v1731_v58, 0.0 }
 0xe3a   :  { %1751 = vadd.xlane.f32.xlu0 %v1750_v33  ;;  %v1747_v48 = vcombine.low %v1739_v51, %v1746_v56 }
 0xe3c   :  { %v1753_v4 = vsel %vm616_vm3, %v1747_v48, 0.0  ;;  %v11044_v48 = vmov 32  }
 0xe3d   :  { %1754 = vadd.xlane.f32.xlu1 %v1753_v4 }
 0xec3   :  { %v1752_v50 = vpop.xlane.xlu0 %1751 }
 0xec4   :  { %v1761_v40 = vrot.slane %v1752_v50, %v9419_v57 }
 0xec6   :  { %v1755_v7 = vpop.xlane.xlu1 %1754 }
 0xec7   :  { %v1765_v37 = vrot.slane %v1755_v7, %v9419_v57 }
 0xec9   :  { %v1766_v2 = vsel %vm635_vm4, %v1765_v37, %v1761_v40 }
 0xeca   :  { %v1768_v3 = vsel %vm638_vm5, %v1766_v2, -inf }
 0xecb   :  { %1769 = vmax.xlane.f32.xlu0 %v1768_v3 }
 0xf54   :  { %v1770_v36 = vpop.xlane.xlu0 %1769 }
 0xf55   :  { %v1775_v26 = vrot.slane %v1770_v36, %v9269_v53  ;;  %v1779_v52 = vrot.slane %v1770_v36, %v9428_v0 }
 0xf57   :  { %v1782_v15 = vsub.f32 %v1752_v50, %v1775_v26  ;;  %v1783_v35 = vsub.f32 %v1755_v7, %v1779_v52 }
 0xf59   :  { %v1784_v58 = vmul.f32 1.442695, %v1782_v15  ;;  %v1786_v51 = vmul.f32 1.442695, %v1783_v35 }
 0xf5b   :  { %8641 = vpow2.f32 %v1784_v58 }
 0xf5c   :  { %8643 = vpow2.f32 %v1786_v51 }
 0xf68   :  { %v8642_v56 = vpop.eup %8641 }
 0xf69   :  { %v8644_v33 = vpop.eup %8643  ;;  %1791 = vperm.xlu0 %8562, %v8642_v56  }
 0xf6a   :  { %1794 = vperm.xlu1 %8563, %v8644_v33  }
 0xf6e   :  { %8564 = vset.pattern.permute.xlu1 %v11044_v48 }
 0xfe4   :  { %v1792_v4 = vpop.permute.xlu0 %1791 }
 0xfe5   :  { %v1795_v40 = vpop.permute.xlu1 %1794  ;;  %v1799_v37 = vrot.slane %v1792_v4, %v9419_v57  ;;  %v9732_v4 = vld [vmem:[%s10978_s3] sm:$0x3f] }
 0xfe6   :  { %v1803_v2 = vrot.slane %v1795_v40, %v9419_v57  ;;  %11045 = vst [vmem:[#allocation24_spill] sm:$0xff] %v9732_v4 }
 0xfe8   :  { %v1804_v3 = vsel %vm635_vm4, %v1803_v2, %v1799_v37 }
 0xfe9   :  { %v1806_v50 = vsel %vm638_vm5, %v1804_v3, 0.0 }
 0xfea   :  { %1807 = vadd.xlane.f32.xlu1 %v1806_v50 }
0x1073   :  { %v1808_v7 = vpop.xlane.xlu1 %1807 }
0x1074   :  { %v1813_v36 = vrot.slane %v1808_v7, %v9269_v53  ;;  %v1817_v26 = vrot.slane %v1808_v7, %v9428_v0 }
0x1076   :  { %8645 = vrcp.f32 %v1813_v36 }
0x1077   :  { %8647 = vrcp.f32 %v1817_v26 }
0x1083   :  { %v8646_v52 = vpop.eup %8645 }
0x1084   :  { %v1821_v15 = vmul.f32 %v8646_v52, %v8642_v56  ;;  %v8648_v35 = vpop.eup %8647  ;;  %v9739_v56 = vld [vmem:[%s10978_s3 + $0x8] sm:$0x3f] }
0x1085   :  { %v1823_v58 = vmul.f32 %v8648_v35, %v8644_v33 }
0x1086   :  { %1826 = vperm.xlu0 %8562, %v1821_v15  }
0x108a   :  { %1831 = vperm.xlu0 %8562, %v1823_v58  }
0x108e   :  { %8565 = vset.pattern.permute.xlu0 %v11044_v48 }
0x1101   :  { %v1827_v51 = vpop.permute.xlu0 %1826 }
0x1102   :  { %v1834_v40 = vmul.f32 %v9732_v4, %v1827_v51 }
0x1104   :  { %v1836_v37 = vsel %vm616_vm3, %v1834_v40, 0.0 }
0x1105   :  { %v1837_v2 = vrot.slane %v1836_v37, 4  ;;  %v1832_v3 = vpop.permute.xlu0 %1831 }
0x1106   :  { %v1835_v33 = vmul.f32 %v9739_v56, %v1832_v3 }
0x1107   :  { %v1838_v50 = vadd.f32 %v1837_v2, %v1836_v37  ;;  %v1952_v2 = vpop.f32.mrf.mxu0 }
0x1108   :  { %v1843_v7 = vsel %vm616_vm3, %v1835_v33, 0.0 }
0x1109   :  { %v1839_v36 = vrot.slane %v1838_v50, 2  ;;  %v1844_v26 = vrot.slane %v1843_v7, 4 }
0x110b   :  { %v1840_v52 = vadd.f32 %v1839_v36, %v1838_v50  ;;  %v1845_v15 = vadd.f32 %v1844_v26, %v1843_v7 }
0x110d   :  { %v1846_v35 = vrot.slane %v1845_v15, 2  ;;  %v1841_v58 = vrot.slane %v1840_v52, 1 }
0x110f   :  { %v1847_v51 = vadd.f32 %v1846_v35, %v1845_v15  ;;  %v1842_v4 = vadd.f32 %v1841_v58, %v1840_v52 }
0x1111   :  { %v1848_v40 = vrot.slane %v1847_v51, 1 }
0x1113   :  { %v1849_v48 = vadd.f32 %v1848_v40, %v1847_v51 }
0x1115   :  { %v9744_v57 = vsel %vm635_vm4, %v1849_v48, %v1842_v4  ;;  %v8909_v48 = vld [vmem:[%s9279_s30] sm:$0x3] }
0x1116   :  { %8090 = vmatmul.mubr.msk.f32.vlgmr.msra.gmra.mxu1 %vm64_vm0, %v9744_v57  ;;  %v1866_v4 = vrot.slane %v8909_v48, %v9428_v0 }
0x1117   :  { %2208 = vmatpush1.msra.mxu1 %v9504_v19  ;;  %2247 = vmatprep.mubr.f32.mxu1 %v11036_v49  ;;  %v8910_v19 = vld [vmem:[%s9282_s8] sm:$0x3] }
0x1118   :  { %2209 = vmatprep.subr.mxu1 %v9506_v21  ;;  %v1877_v37 = vrot.slane %v8910_v19, %v9428_v0 }
0x1119   :  { %2210 = vmatpush1.msra.mxu1 %v9509_v25 }
0x111a   :  { %2211 = vmatprep.subr.mxu1 %v9515_v24  ;;  %v1881_v21 = vsel %vm751_vm2, %v1866_v4, %v1877_v37 }
0x111b   :  { %2212 = vmatpush1.msra.mxu1 %v9523_v28  ;;  %v1883_v25 = vadd.f32 %v1881_v21, %v9346_v47 }
0x111c   :  { %2213 = vmatprep.subr.mxu1 %v9529_v55 }
0x111d   :  { %2214 = vmatpush1.msra.mxu1 %v9538_v14  ;;  %v1956_v3 = vadd.f32 %v1952_v2, %v1883_v25 }
0x111e   :  { %2353 = vmatprep.subr.mxu1 %v9546_v1 }
0x11d6   :  { %v2028_v24 = vpop.f32.mrf.mxu1 }
0x11d7   :  { %v2033_v28 = vadd.f32 %v2028_v24, %v9692_v22 }
0x11d8   :  { %v2030_v55 = vpop.f32.mrf.mxu1 }
0x11d9   :  { %v2034_v33 = vadd.f32 %v2030_v55, %v1956_v3  ;;  %v8091_v48 = vmul.f32 -1.442695, %v2033_v28 }
0x11db   :  { %v2043_v14 = vrot.slane %v2034_v33, 6 }
0x11dd   :  { %2044 = vrot.lane.b32.xlu0 %v2043_v14, %s9135_s15 }
0x124f   :  { %v2045_v1 = vpop.permute.xlu0 %2044 }
0x1250   :  { %v2047_v50 = vsel %vm935_vm6, %v2034_v33, %v2045_v1 }
0x1251   :  { %v2048_v7 = vsel %vm937_vm7, %v2047_v50, -inf }
0x1252   :  { %2049 = vmax.xlane.f32.xlu0 %v2048_v7 }
0x12db   :  { %v2050_v36 = vpop.xlane.xlu0 %2049 }
0x12dc   :  { %v2051_v26 = vsub.f32 %v2047_v50, %v2050_v36 }
0x12de   :  { %v2052_v52 = vmul.f32 1.442695, %v2051_v26 }
0x12e0   :  { %8649 = vpow2.f32 %v2052_v52 }
0x12ed   :  { %v8650_v15 = vpop.eup %8649 }
0x12ee   :  { %8365 = vmatmul.mubr.msk.f32.vlgmr.msra.gmra.mxu0 %vm945_vm9, %v8650_v15 }
0x12ef   :  { %2281 = vmatpush1.msra.mxu0 %v9517_v5  ;;  %2320 = vmatprep.mubr.f32.mxu0 %v11036_v49 }
0x12f0   :  { %2282 = vmatprep.subr.mxu0 %v9519_v27 }
0x12f1   :  { %2283 = vmatpush1.msra.mxu0 %v9525_v54 }
0x12f2   :  { %2284 = vmatprep.subr.mxu0 %v9540_v9 }
0x12f3   :  { %2285 = vmatpush1.msra.mxu0 %v9542_v6 }
0x12f4   :  { %2286 = vmatprep.subr.mxu0 %v9550_v31 }
0x12f5   :  { %2287 = vmatpush1.msra.mxu0 %v9553_v34 }
0x12f6   :  { %8095 = vmatmul.mubr.msk.f32.vlgmr.msra.gmra.mxu0 %vm64_vm0, %v9652_v42  ;;  %8367 = vmatprep.subr.mxu0 %v11036_v49 }
0x12f7   :  { %8368 = vmatpush3.msk.msra.mxu0 %vm949_vm8, %v9487_v32  ;;  %8369 = vmatprep.mubr.msk.f32.mxu0 %vm9132_vm1, %v11036_v49 }
0x12f8   :  { %8372 = vmatprep.subr.mxu0 %v11036_v49 }
0x13ae   :  { %v2123_v9 = vpop.f32.mrf.mxu0 }
0x13af   :  { %2129 = vperm.xlu1 %8564, %v2123_v9  }
0x13b0   :  { %v8366_v6 = vpop.f32.mrf.mxu0 }
0x13b1   :  { %v11048_v6 = vld [vmem:[#allocation20_spill] sm:$0xff] }
0x13b3   :  { %8566 = vset.pattern.permute.xlu1 %v11042_v38 }
0x142a   :  { %v2130_v5 = vpop.permute.xlu1 %2129 }
0x142b   :  { %8651 = vrcp.f32 %v2130_v5  ;;  %v11049_v5 = vld [vmem:[#allocation21_spill] sm:$0xff] }
0x142c   :  { %8653 = vtanh.f32 %v2033_v28 }
0x142d   :  { %8655 = vpow2.f32 %v8091_v48 }
0x1438   :  { %v8652_v27 = vpop.eup %8651 }
0x1439   :  { %v2133_v54 = vmul.f32 %v8652_v27, %v2123_v9  ;;  %v8654_v58 = vpop.eup %8653  ;;  %v11047_v9 = vld [vmem:[#allocation19_spill] sm:$0xff]  ;;  %v9830_v27 = vld [vmem:[#allocation6 + $0x1a8] sm:$0xff] }
0x143a   :  { %v8656_v4 = vpop.eup %8655 }
0x143b   :  { %v2134_v31 = vsub.f32 1.0, %v2133_v54  ;;  %v2038_v19 = vadd.f32 1.0, %v8656_v4 }
0x143d   :  { %v2136_v34 = vrot.slane %v2134_v31, 6  ;;  %8657 = vrcp.f32 %v2038_v19  ;;  %v2322_v19 = vpop.f32.mrf.mxu0 }
0x143f   :  { %v2138_v22 = vmul.f32 %v2136_v34, %v2133_v54  ;;  %v9840_v34 = vld [vmem:[#allocation6 + $0x120] sm:$0xff] }
0x1441   :  { %v2140_v35 = vrot.slane %v2138_v22, 2  ;;  %v2145_v51 = vsub.f32 %v2133_v54, %v2138_v22  ;;  %v9833_v54 = vld [vmem:[#allocation6 + $0x1a0] sm:$0xff]  ;;  %v9843_v22 = vld [vmem:[#allocation6 + $0xa8] sm:$0xff] }
0x1443   :  { %2152 = vrot.lane.b32.xlu1 %v2140_v35, %s9125_s0  ;;  %v2157_v32 = vsub.f32 %v2134_v31, %v2140_v35  ;;  %v2147_v40 = vrot.slane %v2145_v51, 2  ;;  %v9837_v31 = vld [vmem:[#allocation6 + $0x128] sm:$0xff]  ;;  %v11050_v51 = vld [vmem:[#allocation17_spill] sm:$0xff] }
0x1445   :  { %2159 = vrot.lane.b32.xlu0 %v2157_v32, %s9125_s0  ;;  %v9849_v32 = vld [vmem:[#allocation6 + $0x28] sm:$0xff] }
0x1447   :  { %2165 = vrot.lane.b32.xlu1 %v8654_v58, %s9137_s2  ;;  %v9852_v58 = vld [vmem:[#allocation6 + $0x20] sm:$0xff] }
0x144a   :  { %v8658_v37 = vpop.eup %8657 }
0x144b   :  { %2141 = vrot.lane.b32.xlu1 %v2140_v35, %s9137_s2  ;;  %v9846_v35 = vld [vmem:[#allocation6 + $0xa0] sm:$0xff] }
0x144f   :  { %2148 = vrot.lane.b32.xlu1 %v2147_v40, %s9137_s2 }
0x14b5   :  { %v2153_v21 = vpop.permute.xlu1 %2152 }
0x14b6   :  { %v2155_v2 = vmul.f32 %v8658_v37, %v2153_v21 }
0x14b7   :  { %v2160_v25 = vpop.permute.xlu0 %2159 }
0x14b8   :  { %v2162_v24 = vadd.f32 %v2160_v25, %v2155_v2  ;;  %v2324_v25 = vpop.f32.mrf.mxu0 }
0x14b9   :  { %v2166_v3 = vpop.permute.xlu1 %2165 }
0x14ba   :  { %v2168_v55 = vmul.f32 %v2166_v3, %v2162_v24 }
0x14bc   :  { %2170 = vrot.lane.b32.xlu1 %v2168_v55, %s9125_s0 }
0x14bd   :  { %v2142_v33 = vpop.permute.xlu1 %2141 }
0x14be   :  { %v2144_v1 = vmul.f32 %v8658_v37, %v2142_v33 }
0x14c1   :  { %v2149_v14 = vpop.permute.xlu1 %2148 }
0x14c2   :  { %v2151_v50 = vadd.f32 %v2149_v14, %v2144_v1 }
0x14c4   :  { %v2163_v7 = vmul.f32 %v2151_v50, %v9535_v20  ;;  %v11046_v20 = vld [vmem:[#allocation18_spill] sm:$0xff] }
0x152e   :  { %v2171_v28 = vpop.permute.xlu1 %2170 }
0x152f   :  { %v9792_v36 = vadd.f32 %v2171_v28, %v2163_v7 }
0x1531   :  { %8659 = vtanh.f32 %v9792_v36 }
0x153e   :  { %v8660_v26 = vpop.eup %8659 }
0x153f   :  { %2176 = vrot.lane.b32.xlu1 %v8660_v26, %s9137_s2 }
0x15b1   :  { %v2177_v52 = vpop.permute.xlu1 %2176 }
0x15b2   :  { %v9796_v15 = vmul.f32 %v8658_v37, %v2177_v52  ;;  %v11051_v37 = vld [vmem:[#allocation22_spill] sm:$0xff] }
0x15b4   :  { %8094 = vmatmul.mubr.msk.f32.vlgmr.msra.gmra.mxu1 %vm64_vm0, %v9796_v15 }
0x15b5   :  { %2354 = vmatpush1.msra.mxu1 %v9566_v46  ;;  %2393 = vmatprep.mubr.f32.mxu1 %v11036_v49  ;;  %v9811_v46 = vld [vmem:[#allocation6 + $0x1e0] sm:$0xff] }
0x15b6   :  { %2355 = vmatprep.subr.mxu1 %v9568_v44  ;;  %v9821_v44 = vld [vmem:[#allocation6 + $0xe0] sm:$0xff] }
0x15b7   :  { %2356 = vmatpush1.msra.mxu1 %v9572_v39  ;;  %v9817_v39 = vld [vmem:[#allocation6 + $0x160] sm:$0xff] }
0x15b8   :  { %2357 = vmatprep.subr.mxu1 %v11046_v20 }
0x15b9   :  { %2358 = vmatpush1.msra.mxu1 %v11047_v9 }
0x15ba   :  { %2359 = vmatprep.subr.mxu1 %v11048_v6 }
0x15bb   :  { %2360 = vmatpush1.msra.mxu1 %v11049_v5 }
0x15bc   :  { %8096 = vmatmul.mubr.msk.f32.vlgmr.msra.gmra.mxu1 %vm64_vm0, %v9744_v57  ;;  %8383 = vmatprep.subr.mxu1 %v11036_v49  ;;  %v9825_v57 = vld [vmem:[#allocation6 + $0x60] sm:$0xff] }
0x15bd   :  { %8384 = vmatpush3.msra.mxu1 %v9811_v46  ;;  %8391 = vmatprep.mubr.msk.f32.mxu1 %vm9132_vm1, %v11036_v49 }
0x15be   :  { %8385 = vmatprep.subr.mxu1 %v11036_v49 }
0x15bf   :  { %8386 = vmatpush3.msra.mxu1 %v9817_v39 }
0x15c0   :  { %8387 = vmatprep.subr.mxu1 %v11036_v49 }
0x15c1   :  { %8388 = vmatpush3.msra.mxu1 %v9821_v44 }
0x15c2   :  { %8389 = vmatprep.subr.mxu1 %v11036_v49 }
0x15c3   :  { %8390 = vmatpush3.msra.mxu1 %v9825_v57 }
0x15c4   :  { %8392 = vmatmul.mubr.msk.f32.vlgmr.msra.gmra.mxu1 %vm64_vm0, %v9796_v15  ;;  %3053 = vmatprep.subr.mxu1 %v9830_v27 }
0x15c5   :  { %3054 = vmatpush1.msra.mxu1 %v9833_v54  ;;  %3093 = vmatprep.mubr.f32.mxu1 %v11036_v49 }
0x15c6   :  { %3055 = vmatprep.subr.mxu1 %v9837_v31 }
0x15c7   :  { %3056 = vmatpush1.msra.mxu1 %v9840_v34 }
0x15c8   :  { %3057 = vmatprep.subr.mxu1 %v9843_v22 }
0x15c9   :  { %3058 = vmatpush1.msra.mxu1 %v9846_v35 }
0x15ca   :  { %3059 = vmatprep.subr.mxu1 %v9849_v32 }
0x15cb   :  { %3060 = vmatpush1.msra.mxu1 %v9852_v58 }
0x15cc   :  { %3274 = vmatprep.subr.mxu1 %v11050_v51  ;;  %v9864_v51 = vld [vmem:[#allocation6 + $0x1e8] sm:$0xff] }
0x1674   :  { %v2249_v40 = vpop.f32.mrf.mxu1 }
0x1675   :  { %v2254_v4 = vadd.f32 %v2249_v40, %v9618_v43  ;;  %v9870_v40 = vld [vmem:[#allocation6 + $0x168] sm:$0xff] }
0x1676   :  { %v2251_v48 = vpop.f32.mrf.mxu1 }
0x1677   :  { %v2255_v21 = vadd.f32 %v2251_v48, %v11051_v37  ;;  %v2327_v2 = vadd.f32 %v2322_v19, %v2254_v4  ;;  %v9874_v48 = vld [vmem:[#allocation6 + $0xe8] sm:$0xff]  ;;  %v9881_v19 = vld [vmem:[#allocation6 + $0x198] sm:$0xff] }
0x1678   :  { %v9878_v4 = vld [vmem:[#allocation6 + $0x68] sm:$0xff] }
0x1679   :  { %v2328_v55 = vadd.f32 %v2324_v25, %v2255_v21 }
0x167c   :  { %v2395_v24 = vpop.f32.mrf.mxu1 }
0x167d   :  { %v2400_v3 = vadd.f32 %v2395_v24, %v2327_v2 }
0x167e   :  { %v2397_v33 = vpop.f32.mrf.mxu1 }
0x167f   :  { %v2401_v14 = vadd.f32 %v2397_v33, %v2328_v55 }
0x1681   :  { %v2410_v1 = vrot.slane %v2401_v14, 6 }
0x1683   :  { %2411 = vrot.lane.b32.xlu0 %v2410_v1, %s9135_s15 }
0x1684   :  { %v9859_v50 = vpop.f32.mrf.mxu1 }
0x1686   :  { %v8393_v7 = vpop.f32.mrf.mxu1 }
0x16f5   :  { %v2412_v28 = vpop.permute.xlu0 %2411 }
0x16f6   :  { %v2414_v26 = vsel %vm935_vm6, %v2401_v14, %v2412_v28 }
0x16f7   :  { %v2415_v52 = vsel %vm937_vm7, %v2414_v26, -inf }
0x16f8   :  { %2416 = vmax.xlane.f32.xlu1 %v2415_v52 }
0x1781   :  { %v2417_v20 = vpop.xlane.xlu1 %2416 }
0x1782   :  { %v2418_v9 = vsub.f32 %v2414_v26, %v2417_v20 }
0x1784   :  { %v2419_v6 = vmul.f32 1.442695, %v2418_v9  ;;  %v8097_v9 = vmul.f32 -1.442695, %v2400_v3 }
0x1786   :  { %8661 = vpow2.f32 %v2419_v6 }
0x1793   :  { %v8662_v5 = vpop.eup %8661 }
0x1794   :  { %8370 = vmatmul.mubr.msk.f32.vlgmr.msra.gmra.mxu0 %vm945_vm9, %v8662_v5 }
0x1795   :  { %8373 = vmatpush3.msra.mxu0 %v9864_v51  ;;  %8380 = vmatprep.mubr.msk.f32.mxu0 %vm9132_vm1, %v11036_v49 }
0x1796   :  { %8374 = vmatprep.subr.mxu0 %v11036_v49 }
0x1797   :  { %8375 = vmatpush3.msra.mxu0 %v9870_v40 }
0x1798   :  { %8376 = vmatprep.subr.mxu0 %v11036_v49 }
0x1799   :  { %8377 = vmatpush3.msra.mxu0 %v9874_v48 }
0x179a   :  { %8378 = vmatprep.subr.mxu0 %v11036_v49 }
0x179b   :  { %8379 = vmatpush3.msra.mxu0 %v9878_v4 }
0x179c   :  { %2975 = vmatprep.subr.mxu0 %v9881_v19 }
0x1854   :  { %v2490_v21 = vpop.f32.mrf.mxu0 }
0x1855   :  { %2496 = vperm.xlu0 %8565, %v2490_v21  }
0x1856   :  { %v8371_v2 = vpop.f32.mrf.mxu0 }
0x1859   :  { %8567 = vset.pattern.permute.xlu0 %v11042_v38 }
0x18d0   :  { %v2497_v25 = vpop.permute.xlu0 %2496 }
0x18d1   :  { %8663 = vrcp.f32 %v2497_v25 }
0x18d2   :  { %8665 = vtanh.f32 %v2400_v3 }
0x18d3   :  { %8667 = vpow2.f32 %v8097_v9 }
0x18de   :  { %v8664_v24 = vpop.eup %8663 }
0x18df   :  { %v2500_v55 = vmul.f32 %v8664_v24, %v2490_v21  ;;  %v8666_v26 = vpop.eup %8665 }
0x18e0   :  { %v8668_v6 = vpop.eup %8667 }
0x18e1   :  { %v2501_v33 = vsub.f32 1.0, %v2500_v55  ;;  %v2405_v5 = vadd.f32 1.0, %v8668_v6 }
0x18e3   :  { %v2503_v14 = vrot.slane %v2501_v33, 6  ;;  %8669 = vrcp.f32 %v2405_v5 }
0x18e5   :  { %v2505_v1 = vmul.f32 %v2503_v14, %v2500_v55 }
0x18e7   :  { %v2507_v7 = vrot.slane %v2505_v1, 2  ;;  %v2512_v52 = vsub.f32 %v2500_v55, %v2505_v1 }
0x18e9   :  { %2519 = vrot.lane.b32.xlu0 %v2507_v7, %s9125_s0  ;;  %v2524_v28 = vsub.f32 %v2501_v33, %v2507_v7  ;;  %v2514_v20 = vrot.slane %v2512_v52, 2 }
0x18ed   :  { %2526 = vrot.lane.b32.xlu0 %v2524_v28, %s9125_s0 }
0x18f0   :  { %v8670_v2 = vpop.eup %8669 }
0x18f1   :  { %2532 = vrot.lane.b32.xlu0 %v8666_v26, %s9137_s2 }
0x18f5   :  { %2508 = vrot.lane.b32.xlu0 %v2507_v7, %s9137_s2 }
0x18f9   :  { %2515 = vrot.lane.b32.xlu0 %v2514_v20, %s9137_s2 }
0x195b   :  { %v2520_v21 = vpop.permute.xlu0 %2519 }
0x195c   :  { %v2522_v24 = vmul.f32 %v8670_v2, %v2520_v21 }
0x195f   :  { %v2527_v25 = vpop.permute.xlu0 %2526 }
0x1960   :  { %v2529_v33 = vadd.f32 %v2527_v25, %v2522_v24 }
0x1963   :  { %v2533_v14 = vpop.permute.xlu0 %2532 }
0x1964   :  { %v2535_v28 = vmul.f32 %v2533_v14, %v2529_v33 }
0x1966   :  { %2537 = vrot.lane.b32.xlu0 %v2535_v28, %s9125_s0 }
0x1967   :  { %v2509_v55 = vpop.permute.xlu0 %2508 }
0x1968   :  { %v2511_v7 = vmul.f32 %v8670_v2, %v2509_v55  ;;  %v11053_v55 = vld [vmem:[#allocation11_spill] sm:$0xff] }
0x196b   :  { %v2516_v1 = vpop.permute.xlu0 %2515 }
0x196c   :  { %v2518_v26 = vadd.f32 %v2516_v1, %v2511_v7 }
0x196e   :  { %v2530_v52 = vmul.f32 %v2518_v26, %v9648_v17  ;;  %v9907_v17 = vld [vmem:[#allocation6 + $0x10] sm:$0xff] }
0x19d8   :  { %v2538_v3 = vpop.permute.xlu0 %2537 }
0x19d9   :  { %v9892_v20 = vadd.f32 %v2538_v3, %v2530_v52 }
0x19db   :  { %8671 = vtanh.f32 %v9892_v20 }
0x19e8   :  { %v8672_v9 = vpop.eup %8671 }
0x19e9   :  { %2543 = vrot.lane.b32.xlu0 %v8672_v9, %s9137_s2 }
0x1a5b   :  { %v2544_v6 = vpop.permute.xlu0 %2543 }
0x1a5c   :  { %v9896_v5 = vmul.f32 %v8670_v2, %v2544_v6 }
0x1a5e   :  { %11052 = vst [vmem:[#allocation18_spill] sm:$0xff] %v9896_v5  ;;  %8381 = vmatmul.mubr.msk.f32.vlgmr.msra.gmra.mxu0 %vm64_vm0, %v9896_v5 }
0x1a5f   :  { %2976 = vmatpush1.msra.mxu0 %v9656_v8  ;;  %3015 = vmatprep.mubr.f32.mxu0 %v11036_v49  ;;  %v9916_v8 = vld [vmem:[%s10980_s5] sm:$0xf] }
0x1a60   :  { %2977 = vmatprep.subr.mxu0 %v9660_v10  ;;  %v9922_v10 = vld [vmem:[#allocation6 + $0x1c8] sm:$0xff] }
0x1a61   :  { %2978 = vmatpush1.msra.mxu0 %v9663_v12 }
0x1a62   :  { %2979 = vmatprep.subr.mxu0 %v9666_v41 }
0x1a63   :  { %2980 = vmatpush1.msra.mxu0 %v9669_v45 }
0x1a64   :  { %2981 = vmatprep.subr.mxu0 %v9672_v60 }
0x1a65   :  { %2982 = vmatpush1.msra.mxu0 %v9907_v17 }
0x1a66   :  { %8106 = vmatmul.mubr.msk.f32.vlgmr.msra.gmra.mxu0 %vm64_vm0, %v9796_v15  ;;  %8394 = vmatprep.subr.mxu0 %v11036_v49 }
0x1a67   :  { %8395 = vmatpush3.msk.msra.mxu0 %vm949_vm8, %v9916_v8  ;;  %8396 = vmatprep.mubr.msk.f32.mxu0 %vm9132_vm1, %v11036_v49 }
0x1a68   :  { %3347 = vmatprep.subr.mxu0 %v9922_v10 }
0x1b1e   :  { %v2616_v12 = vpop.f32.mrf.mxu0 }
0x1b1f   :  { %v2687_v41 = vadd.f32 %v9859_v50, %v2616_v12 }
0x1b20   :  { %v8382_v45 = vpop.f32.mrf.mxu0 }
0x1b21   :  { %v2697_v60 = vrot.slane %v2687_v41, %v9352_v61 }
0x1b23   :  { %v2698_v15 = vcombine.high %v2697_v60, %v2697_v60  ;;  %v2705_v21 = vrot.slane %v2697_v60, %v9352_v61 }
0x1b25   :  { %v2712_v2 = vrot.slane %v2698_v15, %v9352_v61  ;;  %v2716_v25 = vrot.slane %v2705_v21, %v9269_v53 }
0x1b26   :  { %v3017_v24 = vpop.f32.mrf.mxu0 }
0x1b27   :  { %v2720_v33 = vrot.slane %v2712_v2, %v9269_v53  ;;  %v2721_v14 = vcombine.high %v2716_v25, %v2716_v25  ;;  %v2728_v28 = vrot.slane %v2716_v25, %v9189_v11  ;;  %v9933_v1 = vadd.f32 %v3017_v24, %v11053_v55 }
0x1b29   :  { %v2735_v50 = vrot.slane %v2721_v14, %v9189_v11  ;;  %v2736_v7 = vcombine.high %v2728_v28, %v2728_v28  ;;  %v2737_v26 = vcombine.high %v2720_v33, %v2720_v33  ;;  %v2744_v52 = vrot.slane %v2720_v33, %v9189_v11 }
0x1b2a   :  { %v2759_v3 = vadd.f32 %v2728_v28, %v9359_v13 }
0x1b2b   :  { %v2751_v9 = vrot.slane %v2737_v26, %v9189_v11  ;;  %v2752_v6 = vcombine.high %v2744_v52, %v2744_v52  ;;  %v2760_v12 = vadd.f32 %v2736_v7, %v9373_v23  ;;  %v2761_v41 = vadd.f32 %v2735_v50, %v9367_v18 }
0x1b2c   :  { %v2762_v45 = vadd.f32 %v2744_v52, %v9383_v30  ;;  %8673 = vtanh.f32 %v2759_v3 }
0x1b2d   :  { %v2763_v60 = vadd.f32 %v2752_v6, %v9364_v16  ;;  %v2764_v15 = vadd.f32 %v2751_v9, %v9379_v29  ;;  %8675 = vtanh.f32 %v2760_v12 }
0x1b2e   :  { %8677 = vtanh.f32 %v2761_v41 }
0x1b2f   :  { %8679 = vtanh.f32 %v2762_v45 }
0x1b30   :  { %8681 = vtanh.f32 %v2763_v60 }
0x1b31   :  { %8683 = vtanh.f32 %v2764_v15 }
0x1b39   :  { %v8674_v21 = vpop.eup %8673 }
0x1b3a   :  { %v8676_v2 = vpop.eup %8675  ;;  %v2771_v24 = vmul.f32 %v8674_v21, %v9396_v59 }
0x1b3b   :  { %v8678_v25 = vpop.eup %8677  ;;  %v2772_v33 = vmul.f32 %v8676_v2, %v9400_v62 }
0x1b3c   :  { %v8680_v14 = vpop.eup %8679  ;;  %v2773_v28 = vmul.f32 %v8678_v25, %v9403_v63 }
0x1b3d   :  { %v8682_v55 = vpop.eup %8681  ;;  %v2783_v50 = vcombine.low %v2771_v24, %v2772_v33  ;;  %v2774_v26 = vmul.f32 %v8680_v14, %v9396_v59  ;;  %v11054_v33 = vld [vmem:[#allocation16_spill] sm:$0xff] }
0x1b3e   :  { %v8684_v7 = vpop.eup %8683  ;;  %v2775_v52 = vmul.f32 %v8682_v55, %v9400_v62  ;;  %v2797_v9 = vrot.slane %v2773_v28, %v9189_v11 }
0x1b3f   :  { %v2790_v3 = vrot.slane %v2783_v50, %v9189_v11  ;;  %v2776_v6 = vmul.f32 %v8684_v7, %v9403_v63 }
0x1b40   :  { %v2799_v12 = vcombine.low %v2774_v26, %v2775_v52 }
0x1b41   :  { %v2798_v41 = vcombine.low %v2790_v3, %v2797_v9  ;;  %v2813_v60 = vrot.slane %v2776_v6, %v9189_v11 }
0x1b42   :  { %v2806_v45 = vrot.slane %v2799_v12, %v9189_v11 }
0x1b43   :  { %v2817_v15 = vsel %vm616_vm3, %v2798_v41, 0.0 }
0x1b44   :  { %2818 = vadd.xlane.f32.xlu1 %v2817_v15  ;;  %v2814_v21 = vcombine.low %v2806_v45, %v2813_v60 }
0x1b46   :  { %v2820_v2 = vsel %vm616_vm3, %v2814_v21, 0.0 }
0x1b47   :  { %2821 = vadd.xlane.f32.xlu0 %v2820_v2 }
0x1bcd   :  { %v2819_v25 = vpop.xlane.xlu1 %2818 }
0x1bce   :  { %v2828_v14 = vrot.slane %v2819_v25, %v11054_v33 }
0x1bd0   :  { %v2822_v24 = vpop.xlane.xlu0 %2821 }
0x1bd1   :  { %v2832_v28 = vrot.slane %v2822_v24, %v11054_v33 }
0x1bd3   :  { %v2833_v55 = vsel %vm635_vm4, %v2832_v28, %v2828_v14 }
0x1bd4   :  { %v2835_v50 = vsel %vm638_vm5, %v2833_v55, -inf }
0x1bd5   :  { %2836 = vmax.xlane.f32.xlu1 %v2835_v50 }
0x1c5e   :  { %v2837_v7 = vpop.xlane.xlu1 %2836 }
0x1c5f   :  { %v2842_v26 = vrot.slane %v2837_v7, %v9269_v53  ;;  %v2846_v52 = vrot.slane %v2837_v7, %v9428_v0 }
0x1c61   :  { %v2849_v3 = vsub.f32 %v2819_v25, %v2842_v26  ;;  %v2850_v9 = vsub.f32 %v2822_v24, %v2846_v52 }
0x1c63   :  { %v2851_v6 = vmul.f32 1.442695, %v2849_v3  ;;  %v2853_v12 = vmul.f32 1.442695, %v2850_v9  ;;  %v11055_v3 = vmov 32  }
0x1c65   :  { %8685 = vpow2.f32 %v2851_v6 }
0x1c66   :  { %8687 = vpow2.f32 %v2853_v12  ;;  %v11056_v12 = vld [vmem:[#allocation24_spill] sm:$0xff] }
0x1c72   :  { %v8686_v41 = vpop.eup %8685 }
0x1c73   :  { %2858 = vperm.xlu1 %8566, %v8686_v41   ;;  %v8688_v45 = vpop.eup %8687 }
0x1c77   :  { %2861 = vperm.xlu1 %8566, %v8688_v45  }
0x1cee   :  { %v2859_v60 = vpop.permute.xlu1 %2858 }
0x1cef   :  { %v2866_v21 = vrot.slane %v2859_v60, %v11054_v33 }
0x1cf2   :  { %v2862_v15 = vpop.permute.xlu1 %2861 }
0x1cf3   :  { %v2870_v2 = vrot.slane %v2862_v15, %v11054_v33 }
0x1cf5   :  { %v2871_v14 = vsel %vm635_vm4, %v2870_v2, %v2866_v21 }
0x1cf6   :  { %v2873_v28 = vsel %vm638_vm5, %v2871_v14, 0.0 }
0x1cf7   :  { %2874 = vadd.xlane.f32.xlu1 %v2873_v28 }
0x1d80   :  { %v2875_v25 = vpop.xlane.xlu1 %2874 }
0x1d81   :  { %v2880_v24 = vrot.slane %v2875_v25, %v9269_v53  ;;  %v2884_v55 = vrot.slane %v2875_v25, %v9428_v0 }
0x1d83   :  { %8689 = vrcp.f32 %v2880_v24 }
0x1d84   :  { %8691 = vrcp.f32 %v2884_v55 }
0x1d90   :  { %v8690_v50 = vpop.eup %8689 }
0x1d91   :  { %v8692_v7 = vpop.eup %8691  ;;  %v2888_v26 = vmul.f32 %v8690_v50, %v8686_v41 }
0x1d92   :  { %v2890_v52 = vmul.f32 %v8692_v7, %v8688_v45 }
0x1d93   :  { %2893 = vperm.xlu0 %8567, %v2888_v26  }
0x1d94   :  { %2898 = vperm.xlu1 %8566, %v2890_v52  }
0x1d97   :  { %8568 = vset.pattern.permute.xlu0 %v11055_v3 }
0x1d98   :  { %8569 = vset.pattern.permute.xlu1 %v11055_v3 }
0x1e0e   :  { %v2894_v9 = vpop.permute.xlu0 %2893 }
0x1e0f   :  { %v2899_v6 = vpop.permute.xlu1 %2898  ;;  %v2901_v60 = vmul.f32 %v11056_v12, %v2894_v9  ;;  %v9986_v12 = vld [vmem:[#allocation6 + $0x130] sm:$0xff] }
0x1e10   :  { %v2902_v15 = vmul.f32 %v9739_v56, %v2899_v6  ;;  %v9979_v56 = vld [vmem:[#allocation6 + $0x1b0] sm:$0xff]  ;;  %v9983_v6 = vld [vmem:[#allocation6 + $0x138] sm:$0xff] }
0x1e11   :  { %v2903_v21 = vsel %vm616_vm3, %v2901_v60, 0.0  ;;  %v9992_v60 = vld [vmem:[#allocation6 + $0xb0] sm:$0xff] }
0x1e12   :  { %v2910_v2 = vsel %vm616_vm3, %v2902_v15, 0.0  ;;  %v2904_v14 = vrot.slane %v2903_v21, 4  ;;  %11057 = vst [vmem:[#allocation19_spill] sm:$0xff] %v9992_v60  ;;  %v9995_v15 = vld [vmem:[#allocation6 + $0x38] sm:$0xff] }
0x1e13   :  { %v2911_v28 = vrot.slane %v2910_v2, 4  ;;  %11058 = vst [vmem:[#allocation20_spill] sm:$0xff] %v9995_v15 }
0x1e14   :  { %v2905_v41 = vadd.f32 %v2904_v14, %v2903_v21  ;;  %v9998_v21 = vld [vmem:[#allocation6 + $0x30] sm:$0xff]  ;;  %v8939_v14 = vld [vmem:[%s9288_s12] sm:$0x3] }
0x1e15   :  { %v2912_v45 = vadd.f32 %v2911_v28, %v2910_v2  ;;  %11059 = vst [vmem:[#allocation21_spill] sm:$0xff] %v9998_v21  ;;  %v10001_v2 = vld [vmem:[#allocation6 + $0x1d8] sm:$0xff]  ;;  %v2933_v28 = vrot.slane %v8939_v14, %v9428_v0 }
0x1e16   :  { %v2906_v25 = vrot.slane %v2905_v41, 2  ;;  %11060 = vst [vmem:[#allocation17_spill] sm:$0xff] %v10001_v2 }
0x1e17   :  { %v2913_v24 = vrot.slane %v2912_v45, 2 }
0x1e18   :  { %v2907_v55 = vadd.f32 %v2906_v25, %v2905_v41  ;;  %v8940_v41 = vld [vmem:[%s9292_s14] sm:$0x3] }
0x1e19   :  { %v2914_v50 = vadd.f32 %v2913_v24, %v2912_v45  ;;  %v2944_v45 = vrot.slane %v8940_v41, %v9428_v0  ;;  %v3019_v24 = vpop.f32.mrf.mxu0 }
0x1e1a   :  { %v2908_v7 = vrot.slane %v2907_v55, 1 }
0x1e1b   :  { %v2915_v26 = vrot.slane %v2914_v50, 1  ;;  %v2948_v25 = vsel %vm751_vm2, %v2933_v28, %v2944_v45 }
0x1e1c   :  { %v2909_v52 = vadd.f32 %v2908_v7, %v2907_v55  ;;  %v2950_v55 = vadd.f32 %v2948_v25, %v9346_v47 }
0x1e1d   :  { %v2916_v42 = vadd.f32 %v2915_v26, %v2914_v50 }
0x1e1e   :  { %v3023_v7 = vadd.f32 %v3019_v24, %v2950_v55  ;;  %v10015_v24 = vld [vmem:[#allocation6 + $0x1c0] sm:$0xff] }
0x1e1f   :  { %v9975_v9 = vsel %vm635_vm4, %v2916_v42, %v2909_v52  ;;  %v9989_v42 = vld [vmem:[#allocation6 + $0xb8] sm:$0xff]  ;;  %11061 = vst [vmem:[#allocation22_spill] sm:$0xff] %v10015_v24  ;;  %v10034_v55 = vld [vmem:[#allocation6 + $0x40] sm:$0xff] }
0x1e20   :  { %8107 = vmatmul.mubr.msk.f32.vlgmr.msra.gmra.mxu1 %vm64_vm0, %v9975_v9  ;;  %11067 = vst [vmem:[#allocation27_spill] sm:$0xff] %v10034_v55 }
0x1e21   :  { %3275 = vmatpush1.msra.mxu1 %v9979_v56  ;;  %3314 = vmatprep.mubr.f32.mxu1 %v11036_v49 }
0x1e22   :  { %3276 = vmatprep.subr.mxu1 %v9983_v6 }
0x1e23   :  { %3277 = vmatpush1.msra.mxu1 %v9986_v12 }
0x1e24   :  { %3278 = vmatprep.subr.mxu1 %v9989_v42 }
0x1e25   :  { %3279 = vmatpush1.msra.mxu1 %v9992_v60 }
0x1e26   :  { %3280 = vmatprep.subr.mxu1 %v9995_v15 }
0x1e27   :  { %3281 = vmatpush1.msra.mxu1 %v9998_v21 }
0x1e28   :  { %3420 = vmatprep.subr.mxu1 %v10001_v2 }
0x1ee0   :  { %v3095_v50 = vpop.f32.mrf.mxu1 }
0x1ee1   :  { %v3100_v26 = vadd.f32 %v3095_v50, %v9933_v1  ;;  %v10019_v1 = vld [vmem:[#allocation6 + $0x148] sm:$0xff] }
0x1ee2   :  { %v3097_v52 = vpop.f32.mrf.mxu1  ;;  %11062 = vst [vmem:[#allocation11_spill] sm:$0xff] %v10019_v1 }
0x1ee3   :  { %v3101_v21 = vadd.f32 %v3097_v52, %v3023_v7 }
0x1ee5   :  { %v3110_v15 = vrot.slane %v3101_v21, 6 }
0x1ee7   :  { %3111 = vrot.lane.b32.xlu0 %v3110_v15, %s9135_s15  ;;  %v10022_v15 = vld [vmem:[#allocation6 + $0x140] sm:$0xff] }
0x1ee8   :  { %11063 = vst [vmem:[#allocation16_spill] sm:$0xff] %v10022_v15 }
0x1f59   :  { %v3112_v2 = vpop.permute.xlu0 %3111 }
0x1f5a   :  { %v3114_v14 = vsel %vm935_vm6, %v3101_v21, %v3112_v2  ;;  %v10028_v21 = vld [vmem:[#allocation6 + $0xc0] sm:$0xff]  ;;  %v10031_v2 = vld [vmem:[#allocation6 + $0x48] sm:$0xff] }
0x1f5b   :  { %v3115_v60 = vsel %vm937_vm7, %v3114_v14, -inf  ;;  %11065 = vst [vmem:[#allocation25_spill] sm:$0xff] %v10028_v21  ;;  %11066 = vst [vmem:[#allocation26_spill] sm:$0xff] %v10031_v2 }
0x1f5c   :  { %3116 = vmax.xlane.f32.xlu1 %v3115_v60  ;;  %v10025_v60 = vld [vmem:[#allocation6 + $0xc8] sm:$0xff] }
0x1f5d   :  { %11064 = vst [vmem:[#allocation24_spill] sm:$0xff] %v10025_v60 }
0x1fe5   :  { %v3117_v41 = vpop.xlane.xlu1 %3116 }
0x1fe6   :  { %v3118_v28 = vsub.f32 %v3114_v14, %v3117_v41 }
0x1fe8   :  { %v3119_v45 = vmul.f32 1.442695, %v3118_v28 }
0x1fea   :  { %8693 = vpow2.f32 %v3119_v45 }
0x1ff7   :  { %v8694_v25 = vpop.eup %8693 }
0x1ff8   :  { %8397 = vmatmul.mubr.msk.f32.vlgmr.msra.gmra.mxu0 %vm945_vm9, %v8694_v25 }
0x1ff9   :  { %3348 = vmatpush1.msra.mxu0 %v10015_v24  ;;  %3387 = vmatprep.mubr.f32.mxu0 %v11036_v49 }
0x1ffa   :  { %3349 = vmatprep.subr.mxu0 %v10019_v1 }
0x1ffb   :  { %3350 = vmatpush1.msra.mxu0 %v10022_v15 }
0x1ffc   :  { %3351 = vmatprep.subr.mxu0 %v10025_v60 }
0x1ffd   :  { %3352 = vmatpush1.msra.mxu0 %v10028_v21 }
0x1ffe   :  { %3353 = vmatprep.subr.mxu0 %v10031_v2 }
0x1fff   :  { %3354 = vmatpush1.msra.mxu0 %v10034_v55 }
0x2000   :  { %8112 = vmatmul.mubr.msk.f32.vlgmr.msra.gmra.mxu0 %vm64_vm0, %v9896_v5  ;;  %8399 = vmatprep.subr.mxu0 %v11036_v49 }
0x2001   :  { %8400 = vmatpush3.msk.msra.mxu0 %vm949_vm8, %v9916_v8  ;;  %8401 = vmatprep.mubr.msk.f32.mxu0 %vm9132_vm1, %v11036_v49 }
0x2002   :  { %8404 = vmatprep.subr.mxu0 %v11036_v49 }
0x20b8   :  { %v3190_v50 = vpop.f32.mrf.mxu0 }
0x20b9   :  { %3196 = vperm.xlu0 %8568, %v3190_v50  }
0x20ba   :  { %v8398_v7 = vpop.f32.mrf.mxu0 }
0x20bd   :  { %8570 = vset.pattern.permute.xlu0 %v11042_v38 }
0x2134   :  { %v3197_v52 = vpop.permute.xlu0 %3196 }
0x2135   :  { %8695 = vrcp.f32 %v3197_v52 }
0x2136   :  { %8697 = vtanh.f32 %v3100_v26 }
0x2142   :  { %v8696_v14 = vpop.eup %8695 }
0x2143   :  { %v3200_v41 = vmul.f32 %v8696_v14, %v3190_v50  ;;  %v8698_v2 = vpop.eup %8697  ;;  %v8108_v50 = vmul.f32 -1.442695, %v3100_v26 }
0x2145   :  { %v3201_v28 = vsub.f32 1.0, %v3200_v41  ;;  %8699 = vpow2.f32 %v8108_v50 }
0x2147   :  { %v3203_v45 = vrot.slane %v3201_v28, 6 }
0x2149   :  { %v3205_v25 = vmul.f32 %v3203_v45, %v3200_v41 }
0x214b   :  { %v3207_v5 = vrot.slane %v3205_v25, 2  ;;  %v3212_v7 = vsub.f32 %v3200_v41, %v3205_v25 }
0x214d   :  { %3219 = vrot.lane.b32.xlu0 %v3207_v5, %s9125_s0  ;;  %v3224_v55 = vsub.f32 %v3201_v28, %v3207_v5  ;;  %v3214_v21 = vrot.slane %v3212_v7, 2 }
0x2151   :  { %3226 = vrot.lane.b32.xlu0 %v3224_v55, %s9125_s0 }
0x2152   :  { %v8700_v52 = vpop.eup %8699 }
0x2153   :  { %v3105_v14 = vadd.f32 1.0, %v8700_v52 }
0x2155   :  { %3232 = vrot.lane.b32.xlu0 %v8698_v2, %s9137_s2  ;;  %8701 = vrcp.f32 %v3105_v14  ;;  %v10071_v14 = vld [vmem:[#allocation6 + $0xd8] sm:$0xff] }
0x2159   :  { %3208 = vrot.lane.b32.xlu0 %v3207_v5, %s9137_s2 }
0x215d   :  { %3215 = vrot.lane.b32.xlu0 %v3214_v21, %s9137_s2 }
0x2162   :  { %v8702_v60 = vpop.eup %8701 }
0x21bf   :  { %v3220_v45 = vpop.permute.xlu0 %3219 }
0x21c0   :  { %v3222_v28 = vmul.f32 %v8702_v60, %v3220_v45  ;;  %v10077_v45 = vld [vmem:[#allocation6 + $0x58] sm:$0xff] }
0x21c3   :  { %v3227_v15 = vpop.permute.xlu0 %3226 }
0x21c4   :  { %v3229_v1 = vadd.f32 %v3227_v15, %v3222_v28  ;;  %v10080_v28 = vld [vmem:[#allocation6 + $0x50] sm:$0xff] }
0x21c7   :  { %v3233_v55 = vpop.permute.xlu0 %3232 }
0x21c8   :  { %v3235_v24 = vmul.f32 %v3233_v55, %v3229_v1  ;;  %v10068_v1 = vld [vmem:[#allocation6 + $0x150] sm:$0xff] }
0x21ca   :  { %3237 = vrot.lane.b32.xlu0 %v3235_v24, %s9125_s0  ;;  %v10061_v24 = vld [vmem:[#allocation6 + $0x1d0] sm:$0xff] }
0x21cb   :  { %v3209_v2 = vpop.permute.xlu0 %3208 }
0x21cc   :  { %v3211_v5 = vmul.f32 %v8702_v60, %v3209_v2 }
0x21cf   :  { %v3216_v41 = vpop.permute.xlu0 %3215 }
0x21d0   :  { %v3218_v25 = vadd.f32 %v3216_v41, %v3211_v5 }
0x21d2   :  { %v3230_v21 = vmul.f32 %v3218_v25, %v9792_v36  ;;  %v10065_v36 = vld [vmem:[#allocation6 + $0x158] sm:$0xff] }
0x223c   :  { %v3238_v26 = vpop.permute.xlu0 %3237 }
0x223d   :  { %v10053_v7 = vadd.f32 %v3238_v26, %v3230_v21 }
0x223f   :  { %8703 = vtanh.f32 %v10053_v7 }
0x224c   :  { %v8704_v50 = vpop.eup %8703 }
0x224d   :  { %3243 = vrot.lane.b32.xlu0 %v8704_v50, %s9137_s2 }
0x22bf   :  { %v3244_v52 = vpop.permute.xlu0 %3243 }
0x22c0   :  { %v10057_v15 = vmul.f32 %v8702_v60, %v3244_v52  ;;  %v10074_v60 = vld [vmem:[#allocation6 + $0xd0] sm:$0xff] }
0x22c2   :  { %8111 = vmatmul.mubr.msk.f32.vlgmr.msra.gmra.mxu1 %vm64_vm0, %v10057_v15 }
0x22c3   :  { %3421 = vmatpush1.msra.mxu1 %v10061_v24  ;;  %3460 = vmatprep.mubr.f32.mxu1 %v11036_v49 }
0x22c4   :  { %3422 = vmatprep.subr.mxu1 %v10065_v36 }
0x22c5   :  { %3423 = vmatpush1.msra.mxu1 %v10068_v1 }
0x22c6   :  { %3424 = vmatprep.subr.mxu1 %v10071_v14 }
0x22c7   :  { %3425 = vmatpush1.msra.mxu1 %v10074_v60 }
0x22c8   :  { %3426 = vmatprep.subr.mxu1 %v10077_v45 }
0x22c9   :  { %3427 = vmatpush1.msra.mxu1 %v10080_v28 }
0x22ca   :  { %8113 = vmatmul.mubr.msk.f32.vlgmr.msra.gmra.mxu1 %vm64_vm0, %v9975_v9  ;;  %8415 = vmatprep.subr.mxu1 %v11036_v49 }
0x22cb   :  { %8416 = vmatpush3.msra.mxu1 %v9811_v46  ;;  %8423 = vmatprep.mubr.msk.f32.mxu1 %vm9132_vm1, %v11036_v49  ;;  %v10106_v46 = vld [vmem:[#allocation6 + $0x1b8] sm:$0xff] }
0x22cc   :  { %8417 = vmatprep.subr.mxu1 %v11036_v49 }
0x22cd   :  { %8418 = vmatpush3.msra.mxu1 %v9817_v39 }
0x22ce   :  { %8419 = vmatprep.subr.mxu1 %v11036_v49 }
0x22cf   :  { %8420 = vmatpush3.msra.mxu1 %v9821_v44 }
0x22d0   :  { %8421 = vmatprep.subr.mxu1 %v11036_v49 }
0x22d1   :  { %8422 = vmatpush3.msra.mxu1 %v9825_v57 }
0x22d2   :  { %8424 = vmatmul.mubr.msk.f32.vlgmr.msra.gmra.mxu1 %vm64_vm0, %v10057_v15  ;;  %4120 = vmatprep.subr.mxu1 %v9830_v27  ;;  %v3389_v27 = vpop.f32.mrf.mxu0 }
0x22d3   :  { %4121 = vmatpush1.msra.mxu1 %v9833_v54  ;;  %4160 = vmatprep.mubr.f32.mxu1 %v11036_v49 }
0x22d4   :  { %4122 = vmatprep.subr.mxu1 %v9837_v31 }
0x22d5   :  { %4123 = vmatpush1.msra.mxu1 %v9840_v34  ;;  %v3391_v34 = vpop.f32.mrf.mxu0 }
0x22d6   :  { %4124 = vmatprep.subr.mxu1 %v9843_v22 }
0x22d7   :  { %4125 = vmatpush1.msra.mxu1 %v9846_v35 }
0x22d8   :  { %4126 = vmatprep.subr.mxu1 %v9849_v32 }
0x22d9   :  { %4127 = vmatpush1.msra.mxu1 %v9852_v58 }
0x22da   :  { %4341 = vmatprep.subr.mxu1 %v10106_v46 }
0x2382   :  { %v3316_v39 = vpop.f32.mrf.mxu1 }
0x2383   :  { %v3321_v57 = vadd.f32 %v3316_v39, %v9618_v43 }
0x2384   :  { %v3318_v44 = vpop.f32.mrf.mxu1 }
0x2385   :  { %v3322_v54 = vadd.f32 %v3318_v44, %v11051_v37  ;;  %v3394_v31 = vadd.f32 %v3389_v27, %v3321_v57 }
0x2387   :  { %v3395_v35 = vadd.f32 %v3391_v34, %v3322_v54 }
0x238a   :  { %v3462_v22 = vpop.f32.mrf.mxu1 }
0x238b   :  { %v3467_v9 = vadd.f32 %v3462_v22, %v3394_v31 }
0x238c   :  { %v3464_v55 = vpop.f32.mrf.mxu1 }
0x238d   :  { %v3468_v32 = vadd.f32 %v3464_v55, %v3395_v35  ;;  %v8114_v55 = vmul.f32 -1.442695, %v3467_v9 }
0x238f   :  { %v3477_v2 = vrot.slane %v3468_v32, 6 }
0x2391   :  { %3478 = vrot.lane.b32.xlu1 %v3477_v2, %s9135_s15 }
0x2392   :  { %v10112_v58 = vpop.f32.mrf.mxu1 }
0x2394   :  { %v8425_v41 = vpop.f32.mrf.mxu1 }
0x2403   :  { %v3479_v5 = vpop.permute.xlu1 %3478 }
0x2404   :  { %v3481_v25 = vsel %vm935_vm6, %v3468_v32, %v3479_v5 }
0x2405   :  { %v3482_v21 = vsel %vm937_vm7, %v3481_v25, -inf }
0x2406   :  { %3483 = vmax.xlane.f32.xlu0 %v3482_v21 }
0x248f   :  { %v3484_v26 = vpop.xlane.xlu0 %3483 }
0x2490   :  { %v3485_v50 = vsub.f32 %v3481_v25, %v3484_v26 }
0x2492   :  { %v3486_v52 = vmul.f32 1.442695, %v3485_v50 }
0x2494   :  { %8705 = vpow2.f32 %v3486_v52 }
0x24a1   :  { %v8706_v39 = vpop.eup %8705 }
0x24a2   :  { %8402 = vmatmul.mubr.msk.f32.vlgmr.msra.gmra.mxu0 %vm945_vm9, %v8706_v39 }
0x24a3   :  { %8405 = vmatpush3.msra.mxu0 %v9864_v51  ;;  %8412 = vmatprep.mubr.msk.f32.mxu0 %vm9132_vm1, %v11036_v49 }
0x24a4   :  { %8406 = vmatprep.subr.mxu0 %v11036_v49 }
0x24a5   :  { %8407 = vmatpush3.msra.mxu0 %v9870_v40 }
0x24a6   :  { %8408 = vmatprep.subr.mxu0 %v11036_v49 }
0x24a7   :  { %8409 = vmatpush3.msra.mxu0 %v9874_v48 }
0x24a8   :  { %8410 = vmatprep.subr.mxu0 %v11036_v49 }
0x24a9   :  { %8411 = vmatpush3.msra.mxu0 %v9878_v4 }
0x24aa   :  { %4042 = vmatprep.subr.mxu0 %v9881_v19 }
0x2562   :  { %v3557_v44 = vpop.f32.mrf.mxu0 }
0x2563   :  { %3563 = vperm.xlu1 %8569, %v3557_v44  }
0x2564   :  { %v8403_v51 = vpop.f32.mrf.mxu0 }
0x2567   :  { %8571 = vset.pattern.permute.xlu1 %v11042_v38 }
0x25de   :  { %v3564_v57 = vpop.permute.xlu1 %3563 }
0x25df   :  { %8707 = vrcp.f32 %v3564_v57 }
0x25e0   :  { %8709 = vtanh.f32 %v3467_v9 }
0x25e1   :  { %8711 = vpow2.f32 %v8114_v55 }
0x25ec   :  { %v8708_v27 = vpop.eup %8707 }
0x25ed   :  { %v3567_v54 = vmul.f32 %v8708_v27, %v3557_v44  ;;  %v8710_v22 = vpop.eup %8709 }
0x25ee   :  { %v8712_v32 = vpop.eup %8711 }
0x25ef   :  { %v3568_v40 = vsub.f32 1.0, %v3567_v54  ;;  %v3472_v2 = vadd.f32 1.0, %v8712_v32 }
0x25f1   :  { %v3570_v31 = vrot.slane %v3568_v40, 6  ;;  %8713 = vrcp.f32 %v3472_v2 }
0x25f3   :  { %v3572_v34 = vmul.f32 %v3570_v31, %v3567_v54 }
0x25f5   :  { %v3574_v48 = vrot.slane %v3572_v34, 2  ;;  %v3579_v19 = vsub.f32 %v3567_v54, %v3572_v34 }
0x25f7   :  { %3575 = vrot.lane.b32.xlu0 %v3574_v48, %s9137_s2  ;;  %3586 = vrot.lane.b32.xlu1 %v3574_v48, %s9125_s0  ;;  %v3591_v4 = vsub.f32 %v3568_v40, %v3574_v48  ;;  %v3581_v35 = vrot.slane %v3579_v19, 2  ;;  %v10143_v48 = vld [vmem:[#allocation6 + $0x190] sm:$0xff]  ;;  %v10153_v19 = vld [vmem:[#allocation6 + $0x98] sm:$0xff] }
0x25fb   :  { %3593 = vrot.lane.b32.xlu1 %v3591_v4, %s9125_s0  ;;  %v10150_v4 = vld [vmem:[#allocation6 + $0x110] sm:$0xff] }
0x25fe   :  { %v8714_v5 = vpop.eup %8713 }
0x25ff   :  { %3599 = vrot.lane.b32.xlu1 %v8710_v22, %s9137_s2  ;;  %v10156_v22 = vld [vmem:[#allocation6 + $0x90] sm:$0xff] }
0x2603   :  { %3582 = vrot.lane.b32.xlu1 %v3581_v35, %s9137_s2  ;;  %v10159_v35 = vld [vmem:[#allocation6 + $0x18] sm:$0xff] }
0x2669   :  { %v3587_v41 = vpop.permute.xlu1 %3586  ;;  %v3576_v39 = vpop.permute.xlu0 %3575 }
0x266a   :  { %v3589_v21 = vmul.f32 %v8714_v5, %v3587_v41  ;;  %v3578_v51 = vmul.f32 %v8714_v5, %v3576_v39 }
0x266d   :  { %v3594_v25 = vpop.permute.xlu1 %3593 }
0x266e   :  { %v3596_v26 = vadd.f32 %v3594_v25, %v3589_v21 }
0x2671   :  { %v3600_v50 = vpop.permute.xlu1 %3599 }
0x2672   :  { %v3602_v52 = vmul.f32 %v3600_v50, %v3596_v26 }
0x2674   :  { %3604 = vrot.lane.b32.xlu1 %v3602_v52, %s9125_s0 }
0x2675   :  { %v3583_v44 = vpop.permute.xlu1 %3582 }
0x2676   :  { %v3585_v57 = vadd.f32 %v3583_v44, %v3578_v51 }
0x2678   :  { %v3597_v27 = vmul.f32 %v3585_v57, %v9892_v20  ;;  %v10147_v20 = vld [vmem:[#allocation6 + $0x118] sm:$0xff] }
0x26e6   :  { %v3605_v9 = vpop.permute.xlu1 %3604 }
0x26e7   :  { %v10135_v54 = vadd.f32 %v3605_v9, %v3597_v27 }
0x26e9   :  { %8715 = vtanh.f32 %v10135_v54 }
0x26f6   :  { %v8716_v40 = vpop.eup %8715 }
0x26f7   :  { %3610 = vrot.lane.b32.xlu1 %v8716_v40, %s9137_s2 }
0x2769   :  { %v3611_v31 = vpop.permute.xlu1 %3610 }
0x276a   :  { %v10139_v34 = vmul.f32 %v8714_v5, %v3611_v31 }
0x276c   :  { %11068 = vst [vmem:[#allocation28_spill] sm:$0xff] %v10139_v34  ;;  %8413 = vmatmul.mubr.msk.f32.vlgmr.msra.gmra.mxu0 %vm64_vm0, %v10139_v34 }
0x276d   :  { %4043 = vmatpush1.msra.mxu0 %v10143_v48  ;;  %4082 = vmatprep.mubr.f32.mxu0 %v11036_v49 }
0x276e   :  { %4044 = vmatprep.subr.mxu0 %v10147_v20 }
0x276f   :  { %4045 = vmatpush1.msra.mxu0 %v10150_v4 }
0x2770   :  { %4046 = vmatprep.subr.mxu0 %v10153_v19 }
0x2771   :  { %4047 = vmatpush1.msra.mxu0 %v10156_v22 }
0x2772   :  { %4048 = vmatprep.subr.mxu0 %v10159_v35 }
0x2773   :  { %4049 = vmatpush1.msra.mxu0 %v9907_v17 }
0x2774   :  { %8123 = vmatmul.mubr.msk.f32.vlgmr.msra.gmra.mxu0 %vm64_vm0, %v10057_v15  ;;  %8426 = vmatprep.subr.mxu0 %v11036_v49 }
0x2775   :  { %8427 = vmatpush3.msk.msra.mxu0 %vm949_vm8, %v9916_v8  ;;  %8428 = vmatprep.mubr.msk.f32.mxu0 %vm9132_vm1, %v11036_v49 }
0x2776   :  { %4414 = vmatprep.subr.mxu0 %v9922_v10  ;;  %v11069_v10 = vld [vmem:[#allocation12_spill] sm:$0xff] }
0x282c   :  { %v3683_v55 = vpop.f32.mrf.mxu0 }
0x282d   :  { %v3754_v32 = vadd.f32 %v10112_v58, %v3683_v55 }
0x282e   :  { %v8414_v2 = vpop.f32.mrf.mxu0 }
0x282f   :  { %v3764_v41 = vrot.slane %v3754_v32, %v9352_v61 }
0x2831   :  { %v3765_v17 = vcombine.high %v3764_v41, %v3764_v41  ;;  %v3772_v5 = vrot.slane %v3764_v41, %v9352_v61 }
0x2833   :  { %v3779_v15 = vrot.slane %v3765_v17, %v9352_v61  ;;  %v3783_v25 = vrot.slane %v3772_v5, %v9269_v53 }
0x2834   :  { %v4084_v21 = vpop.f32.mrf.mxu0 }
0x2835   :  { %v3787_v26 = vrot.slane %v3779_v15, %v9269_v53  ;;  %v3788_v50 = vcombine.high %v3783_v25, %v3783_v25  ;;  %v3795_v52 = vrot.slane %v3783_v25, %v9189_v11  ;;  %v10179_v39 = vadd.f32 %v4084_v21, %v11069_v10 }
0x2837   :  { %v3802_v58 = vrot.slane %v3788_v50, %v9189_v11  ;;  %v3803_v44 = vcombine.high %v3795_v52, %v3795_v52  ;;  %v3804_v51 = vcombine.high %v3787_v26, %v3787_v26  ;;  %v3811_v57 = vrot.slane %v3787_v26, %v9189_v11 }
0x2838   :  { %v3826_v27 = vadd.f32 %v3795_v52, %v9359_v13 }
0x2839   :  { %v3818_v9 = vrot.slane %v3804_v51, %v9189_v11  ;;  %v3819_v40 = vcombine.high %v3811_v57, %v3811_v57  ;;  %v3827_v31 = vadd.f32 %v3803_v44, %v9373_v23  ;;  %v3828_v55 = vadd.f32 %v3802_v58, %v9367_v18 }
0x283a   :  { %v3829_v32 = vadd.f32 %v3811_v57, %v9383_v30  ;;  %8717 = vtanh.f32 %v3826_v27 }
0x283b   :  { %v3830_v2 = vadd.f32 %v3819_v40, %v9364_v16  ;;  %v3831_v41 = vadd.f32 %v3818_v9, %v9379_v29  ;;  %8719 = vtanh.f32 %v3827_v31 }
0x283c   :  { %8721 = vtanh.f32 %v3828_v55 }
0x283d   :  { %8723 = vtanh.f32 %v3829_v32 }
0x283e   :  { %8725 = vtanh.f32 %v3830_v2 }
0x283f   :  { %8727 = vtanh.f32 %v3831_v41 }
0x2847   :  { %v8718_v17 = vpop.eup %8717 }
0x2848   :  { %v8720_v5 = vpop.eup %8719  ;;  %v3838_v25 = vmul.f32 %v8718_v17, %v9396_v59 }
0x2849   :  { %v8722_v15 = vpop.eup %8721  ;;  %v3839_v21 = vmul.f32 %v8720_v5, %v9400_v62 }
0x284a   :  { %v8724_v26 = vpop.eup %8723  ;;  %v3840_v50 = vmul.f32 %v8722_v15, %v9403_v63 }
0x284b   :  { %v8726_v52 = vpop.eup %8725  ;;  %v3850_v10 = vcombine.low %v3838_v25, %v3839_v21  ;;  %v3841_v44 = vmul.f32 %v8724_v26, %v9396_v59 }
0x284c   :  { %v8728_v58 = vpop.eup %8727  ;;  %v3842_v51 = vmul.f32 %v8726_v52, %v9400_v62  ;;  %v3864_v27 = vrot.slane %v3840_v50, %v9189_v11 }
0x284d   :  { %v3857_v57 = vrot.slane %v3850_v10, %v9189_v11  ;;  %v3843_v9 = vmul.f32 %v8728_v58, %v9403_v63 }
0x284e   :  { %v3866_v40 = vcombine.low %v3841_v44, %v3842_v51 }
0x284f   :  { %v3865_v31 = vcombine.low %v3857_v57, %v3864_v27  ;;  %v3880_v32 = vrot.slane %v3843_v9, %v9189_v11 }
0x2850   :  { %v3873_v55 = vrot.slane %v3866_v40, %v9189_v11 }
0x2851   :  { %v3884_v2 = vsel %vm616_vm3, %v3865_v31, 0.0 }
0x2852   :  { %3885 = vadd.xlane.f32.xlu1 %v3884_v2  ;;  %v3881_v41 = vcombine.low %v3873_v55, %v3880_v32 }
0x2854   :  { %v3887_v17 = vsel %vm616_vm3, %v3881_v41, 0.0 }
0x2855   :  { %3888 = vadd.xlane.f32.xlu0 %v3887_v17 }
0x28db   :  { %v3886_v5 = vpop.xlane.xlu1 %3885 }
0x28dc   :  { %v3895_v25 = vrot.slane %v3886_v5, %v11054_v33 }
0x28de   :  { %v3889_v15 = vpop.xlane.xlu0 %3888 }
0x28df   :  { %v3899_v21 = vrot.slane %v3889_v15, %v11054_v33 }
0x28e1   :  { %v3900_v26 = vsel %vm635_vm4, %v3899_v21, %v3895_v25 }
0x28e2   :  { %v3902_v50 = vsel %vm638_vm5, %v3900_v26, -inf }
0x28e3   :  { %3903 = vmax.xlane.f32.xlu1 %v3902_v50 }
0x296c   :  { %v3904_v52 = vpop.xlane.xlu1 %3903 }
0x296d   :  { %v3909_v10 = vrot.slane %v3904_v52, %v9269_v53  ;;  %v3913_v58 = vrot.slane %v3904_v52, %v9428_v0 }
0x296f   :  { %v3916_v44 = vsub.f32 %v3886_v5, %v3909_v10  ;;  %v3917_v51 = vsub.f32 %v3889_v15, %v3913_v58  ;;  %v10218_v58 = vld [vmem:[%s10978_s3] sm:$0x3f] }
0x2971   :  { %v3918_v57 = vmul.f32 1.442695, %v3916_v44  ;;  %v3920_v27 = vmul.f32 1.442695, %v3917_v51 }
0x2973   :  { %8729 = vpow2.f32 %v3918_v57 }
0x2974   :  { %8731 = vpow2.f32 %v3920_v27 }
0x2980   :  { %v8730_v9 = vpop.eup %8729 }
0x2981   :  { %v8732_v40 = vpop.eup %8731  ;;  %3925 = vperm.xlu0 %8570, %v8730_v9  }
0x2982   :  { %3928 = vperm.xlu1 %8571, %v8732_v40  }
0x29fc   :  { %v3926_v31 = vpop.permute.xlu0 %3925 }
0x29fd   :  { %v3929_v55 = vpop.permute.xlu1 %3928  ;;  %v3933_v32 = vrot.slane %v3926_v31, %v11054_v33 }
0x29fe   :  { %v3937_v2 = vrot.slane %v3929_v55, %v11054_v33 }
0x2a00   :  { %v3938_v41 = vsel %vm635_vm4, %v3937_v2, %v3933_v32 }
0x2a01   :  { %v3940_v17 = vsel %vm638_vm5, %v3938_v41, 0.0 }
0x2a02   :  { %3941 = vadd.xlane.f32.xlu1 %v3940_v17 }
0x2a8b   :  { %v3942_v5 = vpop.xlane.xlu1 %3941 }
0x2a8c   :  { %v3947_v15 = vrot.slane %v3942_v5, %v9269_v53  ;;  %v3951_v25 = vrot.slane %v3942_v5, %v9428_v0 }
0x2a8e   :  { %8733 = vrcp.f32 %v3947_v15 }
0x2a8f   :  { %8735 = vrcp.f32 %v3951_v25 }
0x2a9b   :  { %v8734_v21 = vpop.eup %8733 }
0x2a9c   :  { %v3955_v26 = vmul.f32 %v8734_v21, %v8730_v9  ;;  %v8736_v50 = vpop.eup %8735  ;;  %v10225_v9 = vld [vmem:[%s10978_s3 + $0x8] sm:$0x3f] }
0x2a9d   :  { %v3957_v52 = vmul.f32 %v8736_v50, %v8732_v40 }
0x2a9e   :  { %3960 = vperm.xlu0 %8570, %v3955_v26  }
0x2aa2   :  { %3965 = vperm.xlu0 %8570, %v3957_v52  }
0x2aa6   :  { %8572 = vset.pattern.permute.xlu0 %v11055_v3 }
0x2b19   :  { %v3961_v10 = vpop.permute.xlu0 %3960 }
0x2b1a   :  { %v3968_v44 = vmul.f32 %v10218_v58, %v3961_v10  ;;  %v11070_v10 = vld [vmem:[#allocation19_spill] sm:$0xff] }
0x2b1c   :  { %v3970_v51 = vsel %vm616_vm3, %v3968_v44, 0.0  ;;  %v11071_v44 = vld [vmem:[#allocation20_spill] sm:$0xff] }
0x2b1d   :  { %v3971_v57 = vrot.slane %v3970_v51, 4  ;;  %v3966_v27 = vpop.permute.xlu0 %3965 }
0x2b1e   :  { %v3969_v40 = vmul.f32 %v10225_v9, %v3966_v27  ;;  %v8964_v27 = vld [vmem:[%s9298_s18] sm:$0x3] }
0x2b1f   :  { %v3972_v31 = vadd.f32 %v3971_v57, %v3970_v51  ;;  %v11072_v51 = vld [vmem:[#allocation21_spill] sm:$0xff] }
0x2b20   :  { %v3977_v55 = vsel %vm616_vm3, %v3969_v40, 0.0  ;;  %v11073_v57 = vld [vmem:[#allocation17_spill] sm:$0xff]  ;;  %v4000_v40 = vrot.slane %v8964_v27, %v9428_v0  ;;  %v11077_v27 = vld [vmem:[#allocation24_spill] sm:$0xff] }
0x2b21   :  { %v3973_v32 = vrot.slane %v3972_v31, 2  ;;  %v3978_v2 = vrot.slane %v3977_v55, 4 }
0x2b23   :  { %v3974_v41 = vadd.f32 %v3973_v32, %v3972_v31  ;;  %v3979_v17 = vadd.f32 %v3978_v2, %v3977_v55  ;;  %v4086_v55 = vpop.f32.mrf.mxu0 }
0x2b25   :  { %v3980_v5 = vrot.slane %v3979_v17, 2  ;;  %v3975_v15 = vrot.slane %v3974_v41, 1 }
0x2b27   :  { %v3981_v25 = vadd.f32 %v3980_v5, %v3979_v17  ;;  %v3976_v26 = vadd.f32 %v3975_v15, %v3974_v41 }
0x2b29   :  { %v3982_v21 = vrot.slane %v3981_v25, 1 }
0x2b2b   :  { %v3983_v50 = vadd.f32 %v3982_v21, %v3981_v25 }
0x2b2d   :  { %v10230_v52 = vsel %vm635_vm4, %v3983_v50, %v3976_v26 }
0x2b2e   :  { %8124 = vmatmul.mubr.msk.f32.vlgmr.msra.gmra.mxu1 %vm64_vm0, %v10230_v52 }
0x2b2f   :  { %4342 = vmatpush1.msra.mxu1 %v9979_v56  ;;  %4381 = vmatprep.mubr.f32.mxu1 %v11036_v49  ;;  %v8965_v56 = vld [vmem:[%s9301_s19] sm:$0x3] }
0x2b30   :  { %4343 = vmatprep.subr.mxu1 %v9983_v6  ;;  %v4011_v31 = vrot.slane %v8965_v56, %v9428_v0  ;;  %v11079_v56 = vld [vmem:[#allocation26_spill] sm:$0xff] }
0x2b31   :  { %4344 = vmatpush1.msra.mxu1 %v9986_v12 }
0x2b32   :  { %4345 = vmatprep.subr.mxu1 %v9989_v42  ;;  %v4015_v6 = vsel %vm751_vm2, %v4000_v40, %v4011_v31  ;;  %v11078_v40 = vld [vmem:[#allocation25_spill] sm:$0xff]  ;;  %v11080_v31 = vld [vmem:[#allocation27_spill] sm:$0xff] }
0x2b33   :  { %4346 = vmatpush1.msra.mxu1 %v11070_v10  ;;  %v4017_v12 = vadd.f32 %v4015_v6, %v9346_v47 }
0x2b34   :  { %4347 = vmatprep.subr.mxu1 %v11071_v44 }
0x2b35   :  { %4348 = vmatpush1.msra.mxu1 %v11072_v51  ;;  %v4090_v32 = vadd.f32 %v4086_v55, %v4017_v12  ;;  %v11074_v51 = vld [vmem:[#allocation22_spill] sm:$0xff] }
0x2b36   :  { %4487 = vmatprep.subr.mxu1 %v11073_v57  ;;  %v11076_v57 = vld [vmem:[#allocation16_spill] sm:$0xff] }
0x2bee   :  { %v4162_v42 = vpop.f32.mrf.mxu1 }
0x2bef   :  { %v4167_v2 = vadd.f32 %v4162_v42, %v10179_v39  ;;  %v11075_v39 = vld [vmem:[#allocation11_spill] sm:$0xff] }
0x2bf0   :  { %v4164_v41 = vpop.f32.mrf.mxu1 }
0x2bf1   :  { %v4168_v17 = vadd.f32 %v4164_v41, %v4090_v32 }
0x2bf3   :  { %v4177_v5 = vrot.slane %v4168_v17, 6 }
0x2bf5   :  { %4178 = vrot.lane.b32.xlu0 %v4177_v5, %s9135_s15 }
0x2c67   :  { %v4179_v15 = vpop.permute.xlu0 %4178 }
0x2c68   :  { %v4181_v25 = vsel %vm935_vm6, %v4168_v17, %v4179_v15 }
0x2c69   :  { %v4182_v21 = vsel %vm937_vm7, %v4181_v25, -inf }
0x2c6a   :  { %4183 = vmax.xlane.f32.xlu1 %v4182_v21 }
0x2cf3   :  { %v4184_v26 = vpop.xlane.xlu1 %4183 }
0x2cf4   :  { %v4185_v50 = vsub.f32 %v4181_v25, %v4184_v26 }
0x2cf6   :  { %v4186_v10 = vmul.f32 1.442695, %v4185_v50  ;;  %v8125_v50 = vmul.f32 -1.442695, %v4167_v2 }
0x2cf8   :  { %8737 = vpow2.f32 %v4186_v10 }
0x2d05   :  { %v8738_v44 = vpop.eup %8737 }
0x2d06   :  { %8429 = vmatmul.mubr.msk.f32.vlgmr.msra.gmra.mxu0 %vm945_vm9, %v8738_v44 }
0x2d07   :  { %4415 = vmatpush1.msra.mxu0 %v11074_v51  ;;  %4454 = vmatprep.mubr.f32.mxu0 %v11036_v49 }
0x2d08   :  { %4416 = vmatprep.subr.mxu0 %v11075_v39 }
0x2d09   :  { %4417 = vmatpush1.msra.mxu0 %v11076_v57 }
0x2d0a   :  { %4418 = vmatprep.subr.mxu0 %v11077_v27 }
0x2d0b   :  { %4419 = vmatpush1.msra.mxu0 %v11078_v40 }
0x2d0c   :  { %4420 = vmatprep.subr.mxu0 %v11079_v56 }
0x2d0d   :  { %4421 = vmatpush1.msra.mxu0 %v11080_v31 }
0x2d0e   :  { %8129 = vmatmul.mubr.msk.f32.vlgmr.msra.gmra.mxu0 %vm64_vm0, %v10139_v34  ;;  %8431 = vmatprep.subr.mxu0 %v11036_v49 }
0x2d0f   :  { %8432 = vmatpush3.msk.msra.mxu0 %vm949_vm8, %v9916_v8  ;;  %8433 = vmatprep.mubr.msk.f32.mxu0 %vm9132_vm1, %v11036_v49 }
0x2d10   :  { %8436 = vmatprep.subr.mxu0 %v11036_v49 }
0x2dc6   :  { %v4257_v6 = vpop.f32.mrf.mxu0 }
0x2dc7   :  { %4263 = vperm.xlu0 %8572, %v4257_v6  }
0x2dc8   :  { %v8430_v55 = vpop.f32.mrf.mxu0 }
0x2e42   :  { %v4264_v12 = vpop.permute.xlu0 %4263 }
0x2e43   :  { %8739 = vrcp.f32 %v4264_v12 }
0x2e44   :  { %8741 = vtanh.f32 %v4167_v2 }
0x2e45   :  { %8743 = vpow2.f32 %v8125_v50 }
0x2e50   :  { %v8740_v42 = vpop.eup %8739 }
0x2e51   :  { %v4267_v32 = vmul.f32 %v8740_v42, %v4257_v6  ;;  %v8742_v26 = vpop.eup %8741 }
0x2e52   :  { %v8744_v10 = vpop.eup %8743 }
0x2e53   :  { %v4268_v41 = vsub.f32 1.0, %v4267_v32  ;;  %v4172_v44 = vadd.f32 1.0, %v8744_v10 }
0x2e55   :  { %v4270_v17 = vrot.slane %v4268_v41, 6  ;;  %8745 = vrcp.f32 %v4172_v44  ;;  %v4456_v44 = vpop.f32.mrf.mxu0 }
0x2e57   :  { %v4272_v5 = vmul.f32 %v4270_v17, %v4267_v32 }
0x2e59   :  { %v4274_v15 = vrot.slane %v4272_v5, 2  ;;  %v4279_v25 = vsub.f32 %v4267_v32, %v4272_v5 }
0x2e5b   :  { %4286 = vrot.lane.b32.xlu1 %v4274_v15, %s9125_s0  ;;  %v4291_v8 = vsub.f32 %v4268_v41, %v4274_v15  ;;  %v4281_v21 = vrot.slane %v4279_v25, 2  ;;  %v10331_v25 = vld [vmem:[#allocation6 + $0xa0] sm:$0xff] }
0x2e5d   :  { %4293 = vrot.lane.b32.xlu0 %v4291_v8, %s9125_s0  ;;  %v10334_v8 = vld [vmem:[#allocation6 + $0x28] sm:$0xff] }
0x2e5f   :  { %4282 = vrot.lane.b32.xlu1 %v4281_v21, %s9137_s2  ;;  %v10337_v21 = vld [vmem:[#allocation6 + $0x20] sm:$0xff] }
0x2e61   :  { %4299 = vrot.lane.b32.xlu0 %v8742_v26, %s9137_s2 }
0x2e62   :  { %v8746_v51 = vpop.eup %8745 }
0x2e65   :  { %4275 = vrot.lane.b32.xlu0 %v4274_v15, %s9137_s2 }
0x2ecd   :  { %v4287_v39 = vpop.permute.xlu1 %4286 }
0x2ece   :  { %v4289_v57 = vmul.f32 %v8746_v51, %v4287_v39 }
0x2ecf   :  { %v4294_v27 = vpop.permute.xlu0 %4293 }
0x2ed0   :  { %v4296_v40 = vadd.f32 %v4294_v27, %v4289_v57  ;;  %v4458_v57 = vpop.f32.mrf.mxu0 }
0x2ed1   :  { %v4283_v12 = vpop.permute.xlu1 %4282 }
0x2ed3   :  { %v4300_v56 = vpop.permute.xlu0 %4299 }
0x2ed4   :  { %v4302_v31 = vmul.f32 %v4300_v56, %v4296_v40 }
0x2ed6   :  { %4304 = vrot.lane.b32.xlu0 %v4302_v31, %s9125_s0 }
0x2ed7   :  { %v4276_v6 = vpop.permute.xlu0 %4275 }
0x2ed8   :  { %v4278_v55 = vmul.f32 %v8746_v51, %v4276_v6 }
0x2eda   :  { %v4285_v42 = vadd.f32 %v4283_v12, %v4278_v55 }
0x2edc   :  { %v4297_v32 = vmul.f32 %v4285_v42, %v10053_v7  ;;  %v10296_v7 = vld [vmem:[#allocation6 + $0x1e0] sm:$0xff] }
0x2f48   :  { %v4305_v2 = vpop.permute.xlu0 %4304 }
0x2f49   :  { %v10277_v41 = vadd.f32 %v4305_v2, %v4297_v32 }
0x2f4b   :  { %8747 = vtanh.f32 %v10277_v41 }
0x2f58   :  { %v8748_v17 = vpop.eup %8747 }
0x2f59   :  { %4310 = vrot.lane.b32.xlu1 %v8748_v17, %s9137_s2 }
0x2fcb   :  { %v4311_v5 = vpop.permute.xlu1 %4310 }
0x2fcc   :  { %v10281_v15 = vmul.f32 %v8746_v51, %v4311_v5 }
0x2fce   :  { %8128 = vmatmul.mubr.msk.f32.vlgmr.msra.gmra.mxu1 %vm64_vm0, %v10281_v15 }
0x2fcf   :  { %4488 = vmatpush1.msra.mxu1 %v10061_v24  ;;  %4527 = vmatprep.mubr.f32.mxu1 %v11036_v49  ;;  %v10302_v24 = vld [vmem:[#allocation6 + $0x160] sm:$0xff] }
0x2fd0   :  { %4489 = vmatprep.subr.mxu1 %v10065_v36  ;;  %v10306_v36 = vld [vmem:[#allocation6 + $0xe0] sm:$0xff] }
0x2fd1   :  { %4490 = vmatpush1.msra.mxu1 %v10068_v1  ;;  %v10310_v1 = vld [vmem:[#allocation6 + $0x60] sm:$0xff] }
0x2fd2   :  { %4491 = vmatprep.subr.mxu1 %v10071_v14  ;;  %v10315_v14 = vld [vmem:[#allocation6 + $0x1a8] sm:$0xff] }
0x2fd3   :  { %4492 = vmatpush1.msra.mxu1 %v10074_v60  ;;  %v10318_v60 = vld [vmem:[#allocation6 + $0x1a0] sm:$0xff] }
0x2fd4   :  { %4493 = vmatprep.subr.mxu1 %v10077_v45  ;;  %v10322_v45 = vld [vmem:[#allocation6 + $0x128] sm:$0xff] }
0x2fd5   :  { %4494 = vmatpush1.msra.mxu1 %v10080_v28  ;;  %v10325_v28 = vld [vmem:[#allocation6 + $0x120] sm:$0xff] }
0x2fd6   :  { %8130 = vmatmul.mubr.msk.f32.vlgmr.msra.gmra.mxu1 %vm64_vm0, %v10230_v52  ;;  %8447 = vmatprep.subr.mxu1 %v11036_v49  ;;  %v10328_v52 = vld [vmem:[#allocation6 + $0xa8] sm:$0xff] }
0x2fd7   :  { %8448 = vmatpush3.msra.mxu1 %v10296_v7  ;;  %8455 = vmatprep.mubr.msk.f32.mxu1 %vm9132_vm1, %v11036_v49 }
0x2fd8   :  { %8449 = vmatprep.subr.mxu1 %v11036_v49 }
0x2fd9   :  { %8450 = vmatpush3.msra.mxu1 %v10302_v24 }
0x2fda   :  { %8451 = vmatprep.subr.mxu1 %v11036_v49 }
0x2fdb   :  { %8452 = vmatpush3.msra.mxu1 %v10306_v36 }
0x2fdc   :  { %8453 = vmatprep.subr.mxu1 %v11036_v49 }
0x2fdd   :  { %8454 = vmatpush3.msra.mxu1 %v10310_v1 }
0x2fde   :  { %8456 = vmatmul.mubr.msk.f32.vlgmr.msra.gmra.mxu1 %vm64_vm0, %v10281_v15  ;;  %5187 = vmatprep.subr.mxu1 %v10315_v14 }
0x2fdf   :  { %5188 = vmatpush1.msra.mxu1 %v10318_v60  ;;  %5227 = vmatprep.mubr.f32.mxu1 %v11036_v49 }
0x2fe0   :  { %5189 = vmatprep.subr.mxu1 %v10322_v45 }
0x2fe1   :  { %5190 = vmatpush1.msra.mxu1 %v10325_v28 }
0x2fe2   :  { %5191 = vmatprep.subr.mxu1 %v10328_v52 }
0x2fe3   :  { %5192 = vmatpush1.msra.mxu1 %v10331_v25 }
0x2fe4   :  { %5193 = vmatprep.subr.mxu1 %v10334_v8 }
0x2fe5   :  { %5194 = vmatpush1.msra.mxu1 %v10337_v21 }
0x2fe6   :  { %5408 = vmatprep.subr.mxu1 %v10106_v46 }
0x308e   :  { %v4383_v26 = vpop.f32.mrf.mxu1 }
0x308f   :  { %v4388_v10 = vadd.f32 %v4383_v26, %v9618_v43 }
0x3090   :  { %v4385_v50 = vpop.f32.mrf.mxu1 }
0x3091   :  { %v4389_v51 = vadd.f32 %v4385_v50, %v11051_v37  ;;  %v4461_v39 = vadd.f32 %v4456_v44, %v4388_v10  ;;  %v10349_v10 = vld [vmem:[#allocation6 + $0x1e8] sm:$0xff] }
0x3092   :  { %v10355_v44 = vld [vmem:[#allocation6 + $0x168] sm:$0xff] }
0x3093   :  { %v4462_v56 = vadd.f32 %v4458_v57, %v4389_v51  ;;  %v10359_v51 = vld [vmem:[#allocation6 + $0xe8] sm:$0xff]  ;;  %v10366_v57 = vld [vmem:[#allocation6 + $0x198] sm:$0xff] }
0x3094   :  { %11082 = vst [vmem:[#allocation19_spill] sm:$0xff] %v10366_v57 }
0x3096   :  { %v4529_v27 = vpop.f32.mrf.mxu1 }
0x3097   :  { %v4534_v40 = vadd.f32 %v4529_v27, %v4461_v39  ;;  %v10363_v39 = vld [vmem:[#allocation6 + $0x68] sm:$0xff] }
0x3098   :  { %v4531_v31 = vpop.f32.mrf.mxu1  ;;  %11081 = vst [vmem:[#allocation12_spill] sm:$0xff] %v10363_v39 }
0x3099   :  { %v4535_v6 = vadd.f32 %v4531_v31, %v4462_v56 }
0x309b   :  { %v4544_v55 = vrot.slane %v4535_v6, 6 }
0x309d   :  { %4545 = vrot.lane.b32.xlu0 %v4544_v55, %s9135_s15 }
0x309e   :  { %v10344_v12 = vpop.f32.mrf.mxu1 }
0x30a0   :  { %v8457_v46 = vpop.f32.mrf.mxu1 }
0x310f   :  { %v4546_v42 = vpop.permute.xlu0 %4545 }
0x3110   :  { %v4548_v32 = vsel %vm935_vm6, %v4535_v6, %v4546_v42 }
0x3111   :  { %v4549_v2 = vsel %vm937_vm7, %v4548_v32, -inf }
0x3112   :  { %4550 = vmax.xlane.f32.xlu1 %v4549_v2 }
0x319b   :  { %v4551_v17 = vpop.xlane.xlu1 %4550 }
0x319c   :  { %v4552_v5 = vsub.f32 %v4548_v32, %v4551_v17 }
0x319e   :  { %v4553_v26 = vmul.f32 1.442695, %v4552_v5 }
0x31a0   :  { %8749 = vpow2.f32 %v4553_v26 }
0x31ad   :  { %v8750_v50 = vpop.eup %8749 }
0x31ae   :  { %8434 = vmatmul.mubr.msk.f32.vlgmr.msra.gmra.mxu0 %vm945_vm9, %v8750_v50 }
0x31af   :  { %8437 = vmatpush3.msra.mxu0 %v10349_v10  ;;  %8444 = vmatprep.mubr.msk.f32.mxu0 %vm9132_vm1, %v11036_v49 }
0x31b0   :  { %8438 = vmatprep.subr.mxu0 %v11036_v49 }
0x31b1   :  { %8439 = vmatpush3.msra.mxu0 %v10355_v44 }
0x31b2   :  { %8440 = vmatprep.subr.mxu0 %v11036_v49 }
0x31b3   :  { %8441 = vmatpush3.msra.mxu0 %v10359_v51 }
0x31b4   :  { %8442 = vmatprep.subr.mxu0 %v11036_v49 }
0x31b5   :  { %8443 = vmatpush3.msra.mxu0 %v10363_v39 }
0x31b6   :  { %5109 = vmatprep.subr.mxu0 %v10366_v57 }
0x326e   :  { %v4624_v27 = vpop.f32.mrf.mxu0 }
0x326f   :  { %4630 = vperm.xlu0 %8572, %v4624_v27  }
0x3270   :  { %v8435_v56 = vpop.f32.mrf.mxu0 }
0x3273   :  { %8573 = vset.pattern.permute.xlu0 %v11042_v38 }
0x32ea   :  { %v4631_v31 = vpop.permute.xlu0 %4630 }
0x32eb   :  { %8751 = vrcp.f32 %v4631_v31 }
0x32ec   :  { %8753 = vtanh.f32 %v4534_v40 }
0x32f8   :  { %v8752_v6 = vpop.eup %8751 }
0x32f9   :  { %v4634_v55 = vmul.f32 %v8752_v6, %v4624_v27  ;;  %v8754_v5 = vpop.eup %8753  ;;  %v8131_v27 = vmul.f32 -1.442695, %v4534_v40 }
0x32fb   :  { %v4635_v46 = vsub.f32 1.0, %v4634_v55  ;;  %8755 = vpow2.f32 %v8131_v27 }
0x32fd   :  { %v4637_v42 = vrot.slane %v4635_v46, 6 }
0x32ff   :  { %v4639_v32 = vmul.f32 %v4637_v42, %v4634_v55 }
0x3301   :  { %v4641_v2 = vrot.slane %v4639_v32, 2  ;;  %v4646_v26 = vsub.f32 %v4634_v55, %v4639_v32 }
0x3303   :  { %4653 = vrot.lane.b32.xlu0 %v4641_v2, %s9125_s0  ;;  %v4658_v17 = vsub.f32 %v4635_v46, %v4641_v2  ;;  %v4648_v50 = vrot.slane %v4646_v26, 2 }
0x3307   :  { %4660 = vrot.lane.b32.xlu0 %v4658_v17, %s9125_s0 }
0x3308   :  { %v8756_v56 = vpop.eup %8755 }
0x3309   :  { %v4539_v31 = vadd.f32 1.0, %v8756_v56 }
0x330b   :  { %4666 = vrot.lane.b32.xlu0 %v8754_v5, %s9137_s2  ;;  %8757 = vrcp.f32 %v4539_v31 }
0x330f   :  { %4642 = vrot.lane.b32.xlu0 %v4641_v2, %s9137_s2 }
0x3313   :  { %4649 = vrot.lane.b32.xlu0 %v4648_v50, %s9137_s2 }
0x3318   :  { %v8758_v42 = vpop.eup %8757 }
0x3375   :  { %v4654_v6 = vpop.permute.xlu0 %4653 }
0x3376   :  { %v4656_v46 = vmul.f32 %v8758_v42, %v4654_v6 }
0x3379   :  { %v4661_v34 = vpop.permute.xlu0 %4660 }
0x337a   :  { %v4663_v57 = vadd.f32 %v4661_v34, %v4656_v46 }
0x337d   :  { %v4667_v17 = vpop.permute.xlu0 %4666 }
0x337e   :  { %v4669_v39 = vmul.f32 %v4667_v17, %v4663_v57 }
0x3380   :  { %4671 = vrot.lane.b32.xlu0 %v4669_v39, %s9125_s0 }
0x3381   :  { %v4643_v55 = vpop.permute.xlu0 %4642 }
0x3382   :  { %v4645_v2 = vmul.f32 %v8758_v42, %v4643_v55  ;;  %v11084_v55 = vld [vmem:[#allocation13_spill] sm:$0xff] }
0x3385   :  { %v4650_v32 = vpop.permute.xlu0 %4649 }
0x3386   :  { %v4652_v5 = vadd.f32 %v4650_v32, %v4645_v2 }
0x3388   :  { %v4664_v26 = vmul.f32 %v4652_v5, %v10135_v54  ;;  %v10392_v54 = vld [vmem:[#allocation6 + $0x10] sm:$0xff] }
0x33f2   :  { %v4672_v40 = vpop.permute.xlu0 %4671 }
0x33f3   :  { %v10377_v50 = vadd.f32 %v4672_v40, %v4664_v26 }
0x33f5   :  { %8759 = vtanh.f32 %v10377_v50 }
0x3402   :  { %v8760_v27 = vpop.eup %8759 }
0x3403   :  { %4677 = vrot.lane.b32.xlu0 %v8760_v27, %s9137_s2 }
0x3475   :  { %v4678_v56 = vpop.permute.xlu0 %4677 }
0x3476   :  { %v10381_v34 = vmul.f32 %v8758_v42, %v4678_v56 }
0x3478   :  { %11083 = vst [vmem:[#allocation20_spill] sm:$0xff] %v10381_v34  ;;  %8445 = vmatmul.mubr.msk.f32.vlgmr.msra.gmra.mxu0 %vm64_vm0, %v10381_v34 }
0x3479   :  { %5110 = vmatpush1.msra.mxu0 %v10143_v48  ;;  %5149 = vmatprep.mubr.f32.mxu0 %v11036_v49  ;;  %v10401_v48 = vld [vmem:[%s10980_s5] sm:$0xf] }
0x347a   :  { %5111 = vmatprep.subr.mxu0 %v10147_v20  ;;  %v10407_v20 = vld [vmem:[#allocation6 + $0x1c8] sm:$0xff] }
0x347b   :  { %5112 = vmatpush1.msra.mxu0 %v10150_v4 }
0x347c   :  { %5113 = vmatprep.subr.mxu0 %v10153_v19 }
0x347d   :  { %5114 = vmatpush1.msra.mxu0 %v10156_v22 }
0x347e   :  { %5115 = vmatprep.subr.mxu0 %v10159_v35 }
0x347f   :  { %5116 = vmatpush1.msra.mxu0 %v10392_v54 }
0x3480   :  { %8140 = vmatmul.mubr.msk.f32.vlgmr.msra.gmra.mxu0 %vm64_vm0, %v10281_v15  ;;  %8458 = vmatprep.subr.mxu0 %v11036_v49 }
0x3481   :  { %8459 = vmatpush3.msk.msra.mxu0 %vm949_vm8, %v10401_v48  ;;  %8460 = vmatprep.mubr.msk.f32.mxu0 %vm9132_vm1, %v11036_v49 }
0x3482   :  { %5481 = vmatprep.subr.mxu0 %v10407_v20 }
0x3538   :  { %v4750_v4 = vpop.f32.mrf.mxu0 }
0x3539   :  { %v4821_v19 = vadd.f32 %v10344_v12, %v4750_v4 }
0x353a   :  { %v8446_v22 = vpop.f32.mrf.mxu0 }
0x353b   :  { %v4831_v35 = vrot.slane %v4821_v19, %v9352_v61 }
0x353d   :  { %v4832_v15 = vcombine.high %v4831_v35, %v4831_v35  ;;  %v4839_v39 = vrot.slane %v4831_v35, %v9352_v61 }
0x353f   :  { %v4846_v57 = vrot.slane %v4832_v15, %v9352_v61  ;;  %v4850_v31 = vrot.slane %v4839_v39, %v9269_v53 }
0x3540   :  { %v5151_v6 = vpop.f32.mrf.mxu0 }
0x3541   :  { %v4854_v42 = vrot.slane %v4846_v57, %v9269_v53  ;;  %v4855_v46 = vcombine.high %v4850_v31, %v4850_v31  ;;  %v4862_v17 = vrot.slane %v4850_v31, %v9189_v11  ;;  %v10418_v32 = vadd.f32 %v5151_v6, %v11084_v55 }
0x3543   :  { %v4869_v12 = vrot.slane %v4855_v46, %v9189_v11  ;;  %v4870_v2 = vcombine.high %v4862_v17, %v4862_v17  ;;  %v4871_v5 = vcombine.high %v4854_v42, %v4854_v42  ;;  %v4878_v26 = vrot.slane %v4854_v42, %v9189_v11 }
0x3544   :  { %v4893_v40 = vadd.f32 %v4862_v17, %v9359_v13 }
0x3545   :  { %v4885_v27 = vrot.slane %v4871_v5, %v9189_v11  ;;  %v4886_v56 = vcombine.high %v4878_v26, %v4878_v26  ;;  %v4894_v4 = vadd.f32 %v4870_v2, %v9373_v23  ;;  %v4895_v19 = vadd.f32 %v4869_v12, %v9367_v18 }
0x3546   :  { %v4896_v22 = vadd.f32 %v4878_v26, %v9383_v30  ;;  %8761 = vtanh.f32 %v4893_v40 }
0x3547   :  { %v4897_v35 = vadd.f32 %v4886_v56, %v9364_v16  ;;  %v4898_v15 = vadd.f32 %v4885_v27, %v9379_v29  ;;  %8763 = vtanh.f32 %v4894_v4 }
0x3548   :  { %8765 = vtanh.f32 %v4895_v19 }
0x3549   :  { %8767 = vtanh.f32 %v4896_v22 }
0x354a   :  { %8769 = vtanh.f32 %v4897_v35 }
0x354b   :  { %8771 = vtanh.f32 %v4898_v15 }
0x3553   :  { %v8762_v39 = vpop.eup %8761 }
0x3554   :  { %v8764_v57 = vpop.eup %8763  ;;  %v4905_v6 = vmul.f32 %v8762_v39, %v9396_v59 }
0x3555   :  { %v8766_v31 = vpop.eup %8765  ;;  %v4906_v42 = vmul.f32 %v8764_v57, %v9400_v62 }
0x3556   :  { %v8768_v46 = vpop.eup %8767  ;;  %v4907_v17 = vmul.f32 %v8766_v31, %v9403_v63 }
0x3557   :  { %v8770_v55 = vpop.eup %8769  ;;  %v4917_v12 = vcombine.low %v4905_v6, %v4906_v42  ;;  %v4908_v5 = vmul.f32 %v8768_v46, %v9396_v59 }
0x3558   :  { %v8772_v2 = vpop.eup %8771  ;;  %v4909_v26 = vmul.f32 %v8770_v55, %v9400_v62  ;;  %v4931_v27 = vrot.slane %v4907_v17, %v9189_v11 }
0x3559   :  { %v4924_v40 = vrot.slane %v4917_v12, %v9189_v11  ;;  %v4910_v56 = vmul.f32 %v8772_v2, %v9403_v63 }
0x355a   :  { %v4933_v4 = vcombine.low %v4908_v5, %v4909_v26 }
0x355b   :  { %v4932_v19 = vcombine.low %v4924_v40, %v4931_v27  ;;  %v4947_v35 = vrot.slane %v4910_v56, %v9189_v11 }
0x355c   :  { %v4940_v22 = vrot.slane %v4933_v4, %v9189_v11 }
0x355d   :  { %v4951_v15 = vsel %vm616_vm3, %v4932_v19, 0.0 }
0x355e   :  { %4952 = vadd.xlane.f32.xlu0 %v4951_v15  ;;  %v4948_v39 = vcombine.low %v4940_v22, %v4947_v35 }
0x3560   :  { %v4954_v57 = vsel %vm616_vm3, %v4948_v39, 0.0 }
0x3561   :  { %4955 = vadd.xlane.f32.xlu1 %v4954_v57 }
0x35e7   :  { %v4953_v31 = vpop.xlane.xlu0 %4952 }
0x35e8   :  { %v4962_v42 = vrot.slane %v4953_v31, %v11054_v33 }
0x35ea   :  { %v4956_v6 = vpop.xlane.xlu1 %4955 }
0x35eb   :  { %v4966_v46 = vrot.slane %v4956_v6, %v11054_v33 }
0x35ed   :  { %v4967_v17 = vsel %vm635_vm4, %v4966_v46, %v4962_v42 }
0x35ee   :  { %v4969_v55 = vsel %vm638_vm5, %v4967_v17, -inf }
0x35ef   :  { %4970 = vmax.xlane.f32.xlu1 %v4969_v55 }
0x3678   :  { %v4971_v12 = vpop.xlane.xlu1 %4970 }
0x3679   :  { %v4976_v2 = vrot.slane %v4971_v12, %v9269_v53  ;;  %v4980_v5 = vrot.slane %v4971_v12, %v9428_v0 }
0x367b   :  { %v4983_v26 = vsub.f32 %v4953_v31, %v4976_v2  ;;  %v4984_v40 = vsub.f32 %v4956_v6, %v4980_v5 }
0x367d   :  { %v4985_v27 = vmul.f32 1.442695, %v4983_v26  ;;  %v4987_v56 = vmul.f32 1.442695, %v4984_v40 }
0x367f   :  { %8773 = vpow2.f32 %v4985_v27 }
0x3680   :  { %8775 = vpow2.f32 %v4987_v56 }
0x368c   :  { %v8774_v4 = vpop.eup %8773 }
0x368d   :  { %4992 = vperm.xlu1 %8571, %v8774_v4   ;;  %v8776_v19 = vpop.eup %8775 }
0x3691   :  { %4995 = vperm.xlu1 %8571, %v8776_v19  }
0x3708   :  { %v4993_v22 = vpop.permute.xlu1 %4992 }
0x3709   :  { %v5000_v15 = vrot.slane %v4993_v22, %v11054_v33 }
0x370c   :  { %v4996_v35 = vpop.permute.xlu1 %4995 }
0x370d   :  { %v5004_v39 = vrot.slane %v4996_v35, %v11054_v33 }
0x370f   :  { %v5005_v57 = vsel %vm635_vm4, %v5004_v39, %v5000_v15 }
0x3710   :  { %v5007_v42 = vsel %vm638_vm5, %v5005_v57, 0.0 }
0x3711   :  { %5008 = vadd.xlane.f32.xlu0 %v5007_v42 }
0x379a   :  { %v5009_v31 = vpop.xlane.xlu0 %5008 }
0x379b   :  { %v5014_v6 = vrot.slane %v5009_v31, %v9269_v53  ;;  %v5018_v46 = vrot.slane %v5009_v31, %v9428_v0 }
0x379d   :  { %8777 = vrcp.f32 %v5014_v6 }
0x379e   :  { %8779 = vrcp.f32 %v5018_v46 }
0x37aa   :  { %v8778_v17 = vpop.eup %8777 }
0x37ab   :  { %v8780_v55 = vpop.eup %8779  ;;  %v5022_v12 = vmul.f32 %v8778_v17, %v8774_v4 }
0x37ac   :  { %v5024_v2 = vmul.f32 %v8780_v55, %v8776_v19 }
0x37ad   :  { %5027 = vperm.xlu1 %8571, %v5022_v12   ;;  %v10468_v12 = vld [vmem:[#allocation6 + $0x138] sm:$0xff] }
0x37ae   :  { %5032 = vperm.xlu0 %8573, %v5024_v2   ;;  %v10471_v2 = vld [vmem:[#allocation6 + $0x130] sm:$0xff] }
0x37b1   :  { %8574 = vset.pattern.permute.xlu1 %v11055_v3 }
0x37b2   :  { %8575 = vset.pattern.permute.xlu0 %v11055_v3 }
0x3828   :  { %v5028_v5 = vpop.permute.xlu1 %5027 }
0x3829   :  { %v5033_v26 = vpop.permute.xlu0 %5032  ;;  %v5035_v40 = vmul.f32 %v10218_v58, %v5028_v5  ;;  %v10474_v5 = vld [vmem:[#allocation6 + $0xb8] sm:$0xff] }
0x382a   :  { %v5036_v27 = vmul.f32 %v10225_v9, %v5033_v26  ;;  %v10464_v9 = vld [vmem:[#allocation6 + $0x1b0] sm:$0xff] }
0x382b   :  { %v5037_v56 = vsel %vm616_vm3, %v5035_v40, 0.0  ;;  %v10477_v26 = vld [vmem:[#allocation6 + $0xb0] sm:$0xff]  ;;  %v10480_v40 = vld [vmem:[#allocation6 + $0x38] sm:$0xff] }
0x382c   :  { %v5044_v22 = vsel %vm616_vm3, %v5036_v27, 0.0  ;;  %v5038_v35 = vrot.slane %v5037_v56, 4  ;;  %v10483_v27 = vld [vmem:[#allocation6 + $0x30] sm:$0xff] }
0x382d   :  { %v5045_v15 = vrot.slane %v5044_v22, 4  ;;  %11085 = vst [vmem:[#allocation21_spill] sm:$0xff] %v10483_v27 }
0x382e   :  { %v5039_v4 = vadd.f32 %v5038_v35, %v5037_v56  ;;  %v10486_v56 = vld [vmem:[#allocation6 + $0x1d8] sm:$0xff] }
0x382f   :  { %v5046_v19 = vadd.f32 %v5045_v15, %v5044_v22  ;;  %11086 = vst [vmem:[#allocation17_spill] sm:$0xff] %v10486_v56  ;;  %v8994_v22 = vld [vmem:[%s9306_s23] sm:$0x3] }
0x3830   :  { %v5040_v39 = vrot.slane %v5039_v4, 2  ;;  %v5067_v35 = vrot.slane %v8994_v22, %v9428_v0  ;;  %v8995_v15 = vld [vmem:[%s9310_s25] sm:$0x3] }
0x3831   :  { %v5047_v57 = vrot.slane %v5046_v19, 2 }
0x3832   :  { %v5041_v42 = vadd.f32 %v5040_v39, %v5039_v4  ;;  %v5078_v4 = vrot.slane %v8995_v15, %v9428_v0  ;;  %v5153_v39 = vpop.f32.mrf.mxu0 }
0x3833   :  { %v5048_v31 = vadd.f32 %v5047_v57, %v5046_v19 }
0x3834   :  { %v5042_v6 = vrot.slane %v5041_v42, 1  ;;  %v5082_v19 = vsel %vm751_vm2, %v5067_v35, %v5078_v4 }
0x3835   :  { %v5049_v46 = vrot.slane %v5048_v31, 1  ;;  %v5084_v57 = vadd.f32 %v5082_v19, %v9346_v47 }
0x3836   :  { %v5043_v17 = vadd.f32 %v5042_v6, %v5041_v42 }
0x3837   :  { %v5050_v55 = vadd.f32 %v5049_v46, %v5048_v31  ;;  %v5157_v31 = vadd.f32 %v5153_v39, %v5084_v57  ;;  %v10500_v39 = vld [vmem:[#allocation6 + $0x1c0] sm:$0xff] }
0x3838   :  { %v10513_v57 = vld [vmem:[#allocation6 + $0xc0] sm:$0xff] }
0x3839   :  { %v10460_v58 = vsel %vm635_vm4, %v5050_v55, %v5043_v17  ;;  %11090 = vst [vmem:[#allocation24_spill] sm:$0xff] %v10513_v57 }
0x383a   :  { %8141 = vmatmul.mubr.msk.f32.vlgmr.msra.gmra.mxu1 %vm64_vm0, %v10460_v58 }
0x383b   :  { %5409 = vmatpush1.msra.mxu1 %v10464_v9  ;;  %5448 = vmatprep.mubr.f32.mxu1 %v11036_v49 }
0x383c   :  { %5410 = vmatprep.subr.mxu1 %v10468_v12 }
0x383d   :  { %5411 = vmatpush1.msra.mxu1 %v10471_v2 }
0x383e   :  { %5412 = vmatprep.subr.mxu1 %v10474_v5 }
0x383f   :  { %5413 = vmatpush1.msra.mxu1 %v10477_v26 }
0x3840   :  { %5414 = vmatprep.subr.mxu1 %v10480_v40 }
0x3841   :  { %5415 = vmatpush1.msra.mxu1 %v10483_v27 }
0x3842   :  { %5554 = vmatprep.subr.mxu1 %v10486_v56 }
0x38fa   :  { %v5229_v42 = vpop.f32.mrf.mxu1 }
0x38fb   :  { %v5234_v6 = vadd.f32 %v5229_v42, %v10418_v32  ;;  %v10504_v32 = vld [vmem:[#allocation6 + $0x148] sm:$0xff] }
0x38fc   :  { %v5231_v46 = vpop.f32.mrf.mxu1  ;;  %11087 = vst [vmem:[#allocation22_spill] sm:$0xff] %v10504_v32  ;;  %v10516_v42 = vld [vmem:[#allocation6 + $0x48] sm:$0xff] }
0x38fd   :  { %v5235_v17 = vadd.f32 %v5231_v46, %v5157_v31  ;;  %11091 = vst [vmem:[#allocation25_spill] sm:$0xff] %v10516_v42  ;;  %v10519_v31 = vld [vmem:[#allocation6 + $0x40] sm:$0xff] }
0x38fe   :  { %11092 = vst [vmem:[#allocation26_spill] sm:$0xff] %v10519_v31 }
0x38ff   :  { %v5244_v55 = vrot.slane %v5235_v17, 6 }
0x3901   :  { %5245 = vrot.lane.b32.xlu1 %v5244_v55, %s9135_s15 }
0x3973   :  { %v5246_v56 = vpop.permute.xlu1 %5245 }
0x3974   :  { %v5248_v22 = vsel %vm935_vm6, %v5235_v17, %v5246_v56  ;;  %v10507_v56 = vld [vmem:[#allocation6 + $0x140] sm:$0xff] }
0x3975   :  { %v5249_v27 = vsel %vm937_vm7, %v5248_v22, -inf  ;;  %11088 = vst [vmem:[#allocation11_spill] sm:$0xff] %v10507_v56 }
0x3976   :  { %5250 = vmax.xlane.f32.xlu1 %v5249_v27  ;;  %v10510_v27 = vld [vmem:[#allocation6 + $0xc8] sm:$0xff] }
0x3977   :  { %11089 = vst [vmem:[#allocation16_spill] sm:$0xff] %v10510_v27 }
0x39ff   :  { %v5251_v15 = vpop.xlane.xlu1 %5250 }
0x3a00   :  { %v5252_v35 = vsub.f32 %v5248_v22, %v5251_v15 }
0x3a02   :  { %v5253_v4 = vmul.f32 1.442695, %v5252_v35 }
0x3a04   :  { %8781 = vpow2.f32 %v5253_v4 }
0x3a11   :  { %v8782_v19 = vpop.eup %8781 }
0x3a12   :  { %8461 = vmatmul.mubr.msk.f32.vlgmr.msra.gmra.mxu0 %vm945_vm9, %v8782_v19 }
0x3a13   :  { %5482 = vmatpush1.msra.mxu0 %v10500_v39  ;;  %5521 = vmatprep.mubr.f32.mxu0 %v11036_v49 }
0x3a14   :  { %5483 = vmatprep.subr.mxu0 %v10504_v32 }
0x3a15   :  { %5484 = vmatpush1.msra.mxu0 %v10507_v56 }
0x3a16   :  { %5485 = vmatprep.subr.mxu0 %v10510_v27 }
0x3a17   :  { %5486 = vmatpush1.msra.mxu0 %v10513_v57 }
0x3a18   :  { %5487 = vmatprep.subr.mxu0 %v10516_v42 }
0x3a19   :  { %5488 = vmatpush1.msra.mxu0 %v10519_v31 }
0x3a1a   :  { %8146 = vmatmul.mubr.msk.f32.vlgmr.msra.gmra.mxu0 %vm64_vm0, %v10381_v34  ;;  %8463 = vmatprep.subr.mxu0 %v11036_v49 }
0x3a1b   :  { %8464 = vmatpush3.msk.msra.mxu0 %vm949_vm8, %v10401_v48  ;;  %8465 = vmatprep.mubr.msk.f32.mxu0 %vm9132_vm1, %v11036_v49 }
0x3a1c   :  { %8468 = vmatprep.subr.mxu0 %v11036_v49 }
0x3ad2   :  { %v5324_v46 = vpop.f32.mrf.mxu0 }
0x3ad3   :  { %5330 = vperm.xlu1 %8574, %v5324_v46  }
0x3ad4   :  { %v8462_v17 = vpop.f32.mrf.mxu0 }
0x3ad7   :  { %8576 = vset.pattern.permute.xlu1 %v11042_v38 }
0x3b4e   :  { %v5331_v55 = vpop.permute.xlu1 %5330 }
0x3b4f   :  { %8783 = vrcp.f32 %v5331_v55 }
0x3b50   :  { %8785 = vtanh.f32 %v5234_v6 }
0x3b5c   :  { %v8784_v22 = vpop.eup %8783 }
0x3b5d   :  { %v5334_v15 = vmul.f32 %v8784_v22, %v5324_v46  ;;  %v8786_v17 = vpop.eup %8785  ;;  %v8142_v46 = vmul.f32 -1.442695, %v5234_v6 }
0x3b5f   :  { %v5335_v35 = vsub.f32 1.0, %v5334_v15  ;;  %8787 = vpow2.f32 %v8142_v46 }
0x3b61   :  { %v5337_v4 = vrot.slane %v5335_v35, 6 }
0x3b63   :  { %v5339_v19 = vmul.f32 %v5337_v4, %v5334_v15 }
0x3b65   :  { %v5341_v34 = vrot.slane %v5339_v19, 2  ;;  %v5346_v31 = vsub.f32 %v5334_v15, %v5339_v19 }
0x3b67   :  { %5353 = vrot.lane.b32.xlu0 %v5341_v34, %s9125_s0  ;;  %v5348_v42 = vrot.slane %v5346_v31, 2  ;;  %v5358_v57 = vsub.f32 %v5335_v35, %v5341_v34 }
0x3b69   :  { %5349 = vrot.lane.b32.xlu1 %v5348_v42, %s9137_s2 }
0x3b6b   :  { %5360 = vrot.lane.b32.xlu0 %v5358_v57, %s9125_s0 }
0x3b6c   :  { %v8788_v55 = vpop.eup %8787 }
0x3b6d   :  { %v5239_v22 = vadd.f32 1.0, %v8788_v55 }
0x3b6f   :  { %5366 = vrot.lane.b32.xlu0 %v8786_v17, %s9137_s2  ;;  %8789 = vrcp.f32 %v5239_v22 }
0x3b73   :  { %5342 = vrot.lane.b32.xlu0 %v5341_v34, %s9137_s2 }
0x3b7c   :  { %v8790_v15 = vpop.eup %8789 }
0x3bd9   :  { %v5354_v4 = vpop.permute.xlu0 %5353 }
0x3bda   :  { %v5356_v27 = vmul.f32 %v8790_v15, %v5354_v4  ;;  %v10556_v4 = vld [vmem:[#allocation6 + $0xd8] sm:$0xff] }
0x3bdb   :  { %v5350_v32 = vpop.permute.xlu1 %5349 }
0x3bdd   :  { %v5361_v19 = vpop.permute.xlu0 %5360 }
0x3bde   :  { %v5363_v31 = vadd.f32 %v5361_v19, %v5356_v27  ;;  %v10562_v19 = vld [vmem:[#allocation6 + $0x58] sm:$0xff] }
0x3be1   :  { %v5367_v56 = vpop.permute.xlu0 %5366 }
0x3be2   :  { %v5369_v42 = vmul.f32 %v5367_v56, %v5363_v31  ;;  %v10546_v56 = vld [vmem:[#allocation6 + $0x1d0] sm:$0xff] }
0x3be3   :  { %v10565_v31 = vld [vmem:[#allocation6 + $0x50] sm:$0xff] }
0x3be4   :  { %5371 = vrot.lane.b32.xlu0 %v5369_v42, %s9125_s0 }
0x3be5   :  { %v5343_v57 = vpop.permute.xlu0 %5342 }
0x3be6   :  { %v5345_v35 = vmul.f32 %v8790_v15, %v5343_v57 }
0x3be8   :  { %v5352_v17 = vadd.f32 %v5350_v32, %v5345_v35  ;;  %v10553_v32 = vld [vmem:[#allocation6 + $0x150] sm:$0xff] }
0x3bea   :  { %v5364_v34 = vmul.f32 %v5352_v17, %v10277_v41  ;;  %v10550_v41 = vld [vmem:[#allocation6 + $0x158] sm:$0xff] }
0x3c56   :  { %v5372_v6 = vpop.permute.xlu0 %5371 }
0x3c57   :  { %v10538_v46 = vadd.f32 %v5372_v6, %v5364_v34 }
0x3c59   :  { %8791 = vtanh.f32 %v10538_v46 }
0x3c66   :  { %v8792_v55 = vpop.eup %8791 }
0x3c67   :  { %5377 = vrot.lane.b32.xlu1 %v8792_v55, %s9137_s2 }
0x3cd9   :  { %v5378_v22 = vpop.permute.xlu1 %5377 }
0x3cda   :  { %v10542_v27 = vmul.f32 %v8790_v15, %v5378_v22  ;;  %v10559_v15 = vld [vmem:[#allocation6 + $0xd0] sm:$0xff] }
0x3cdc   :  { %8145 = vmatmul.mubr.msk.f32.vlgmr.msra.gmra.mxu1 %vm64_vm0, %v10542_v27 }
0x3cdd   :  { %5555 = vmatpush1.msra.mxu1 %v10546_v56  ;;  %5594 = vmatprep.mubr.f32.mxu1 %v11036_v49 }
0x3cde   :  { %5556 = vmatprep.subr.mxu1 %v10550_v41 }
0x3cdf   :  { %5557 = vmatpush1.msra.mxu1 %v10553_v32 }
0x3ce0   :  { %5558 = vmatprep.subr.mxu1 %v10556_v4 }
0x3ce1   :  { %5559 = vmatpush1.msra.mxu1 %v10559_v15 }
0x3ce2   :  { %5560 = vmatprep.subr.mxu1 %v10562_v19 }
0x3ce3   :  { %5561 = vmatpush1.msra.mxu1 %v10565_v31 }
0x3ce4   :  { %8147 = vmatmul.mubr.msk.f32.vlgmr.msra.gmra.mxu1 %vm64_vm0, %v10460_v58  ;;  %8479 = vmatprep.subr.mxu1 %v11036_v49 }
0x3ce5   :  { %8480 = vmatpush3.msra.mxu1 %v10296_v7  ;;  %8487 = vmatprep.mubr.msk.f32.mxu1 %vm9132_vm1, %v11036_v49  ;;  %v10591_v7 = vld [vmem:[#allocation6 + $0x1b8] sm:$0xff] }
0x3ce6   :  { %8481 = vmatprep.subr.mxu1 %v11036_v49 }
0x3ce7   :  { %8482 = vmatpush3.msra.mxu1 %v10302_v24 }
0x3ce8   :  { %8483 = vmatprep.subr.mxu1 %v11036_v49 }
0x3ce9   :  { %8484 = vmatpush3.msra.mxu1 %v10306_v36 }
0x3cea   :  { %8485 = vmatprep.subr.mxu1 %v11036_v49 }
0x3ceb   :  { %8486 = vmatpush3.msra.mxu1 %v10310_v1 }
0x3cec   :  { %8488 = vmatmul.mubr.msk.f32.vlgmr.msra.gmra.mxu1 %vm64_vm0, %v10542_v27  ;;  %6254 = vmatprep.subr.mxu1 %v10315_v14  ;;  %v5523_v14 = vpop.f32.mrf.mxu0 }
0x3ced   :  { %6255 = vmatpush1.msra.mxu1 %v10318_v60  ;;  %6294 = vmatprep.mubr.f32.mxu1 %v11036_v49 }
0x3cee   :  { %6256 = vmatprep.subr.mxu1 %v10322_v45 }
0x3cef   :  { %6257 = vmatpush1.msra.mxu1 %v10325_v28  ;;  %v5525_v28 = vpop.f32.mrf.mxu0 }
0x3cf0   :  { %6258 = vmatprep.subr.mxu1 %v10328_v52 }
0x3cf1   :  { %6259 = vmatpush1.msra.mxu1 %v10331_v25 }
0x3cf2   :  { %6260 = vmatprep.subr.mxu1 %v10334_v8 }
0x3cf3   :  { %6261 = vmatpush1.msra.mxu1 %v10337_v21 }
0x3cf4   :  { %6475 = vmatprep.subr.mxu1 %v10591_v7 }
0x3d9c   :  { %v5450_v24 = vpop.f32.mrf.mxu1 }
0x3d9d   :  { %v5455_v1 = vadd.f32 %v5450_v24, %v9618_v43 }
0x3d9e   :  { %v5452_v36 = vpop.f32.mrf.mxu1 }
0x3d9f   :  { %v5456_v60 = vadd.f32 %v5452_v36, %v11051_v37  ;;  %v5528_v45 = vadd.f32 %v5523_v14, %v5455_v1  ;;  %v11093_v1 = vld [vmem:[#allocation12_spill] sm:$0xff]  ;;  %v11094_v14 = vld [vmem:[#allocation19_spill] sm:$0xff] }
0x3da1   :  { %v5529_v25 = vadd.f32 %v5525_v28, %v5456_v60 }
0x3da4   :  { %v5596_v52 = vpop.f32.mrf.mxu1 }
0x3da5   :  { %v5601_v58 = vadd.f32 %v5596_v52, %v5528_v45 }
0x3da6   :  { %v5598_v42 = vpop.f32.mrf.mxu1 }
0x3da7   :  { %v5602_v8 = vadd.f32 %v5598_v42, %v5529_v25 }
0x3da9   :  { %v5611_v57 = vrot.slane %v5602_v8, 6 }
0x3dab   :  { %5612 = vrot.lane.b32.xlu0 %v5611_v57, %s9135_s15 }
0x3dac   :  { %v10597_v21 = vpop.f32.mrf.mxu1 }
0x3dae   :  { %v8489_v35 = vpop.f32.mrf.mxu1 }
0x3e1d   :  { %v5613_v17 = vpop.permute.xlu0 %5612 }
0x3e1e   :  { %v5615_v34 = vsel %vm935_vm6, %v5602_v8, %v5613_v17 }
0x3e1f   :  { %v5616_v6 = vsel %vm937_vm7, %v5615_v34, -inf }
0x3e20   :  { %5617 = vmax.xlane.f32.xlu1 %v5616_v6 }
0x3ea9   :  { %v5618_v55 = vpop.xlane.xlu1 %5617 }
0x3eaa   :  { %v5619_v22 = vsub.f32 %v5615_v34, %v5618_v55  ;;  %v8148_v34 = vmul.f32 -1.442695, %v5601_v58 }
0x3eac   :  { %v5620_v24 = vmul.f32 1.442695, %v5619_v22 }
0x3eae   :  { %8793 = vpow2.f32 %v5620_v24 }
0x3ebb   :  { %v8794_v36 = vpop.eup %8793 }
0x3ebc   :  { %8466 = vmatmul.mubr.msk.f32.vlgmr.msra.gmra.mxu0 %vm945_vm9, %v8794_v36 }
0x3ebd   :  { %8469 = vmatpush3.msra.mxu0 %v10349_v10  ;;  %8476 = vmatprep.mubr.msk.f32.mxu0 %vm9132_vm1, %v11036_v49 }
0x3ebe   :  { %8470 = vmatprep.subr.mxu0 %v11036_v49 }
0x3ebf   :  { %8471 = vmatpush3.msra.mxu0 %v10355_v44 }
0x3ec0   :  { %8472 = vmatprep.subr.mxu0 %v11036_v49 }
0x3ec1   :  { %8473 = vmatpush3.msra.mxu0 %v10359_v51 }
0x3ec2   :  { %8474 = vmatprep.subr.mxu0 %v11036_v49 }
0x3ec3   :  { %8475 = vmatpush3.msra.mxu0 %v11093_v1 }
0x3ec4   :  { %6176 = vmatprep.subr.mxu0 %v11094_v14 }
0x3f7c   :  { %v5691_v60 = vpop.f32.mrf.mxu0 }
0x3f7d   :  { %5697 = vperm.xlu0 %8575, %v5691_v60  }
0x3f7e   :  { %v8467_v10 = vpop.f32.mrf.mxu0 }
0x3f81   :  { %8577 = vset.pattern.permute.xlu0 %v11042_v38 }
0x3ff8   :  { %v5698_v45 = vpop.permute.xlu0 %5697 }
0x3ff9   :  { %8795 = vrcp.f32 %v5698_v45 }
0x3ffa   :  { %8797 = vtanh.f32 %v5601_v58 }
0x3ffb   :  { %8799 = vpow2.f32 %v8148_v34  ;;  %v10638_v34 = vld [vmem:[#allocation6 + $0x98] sm:$0xff] }
0x4006   :  { %v8796_v28 = vpop.eup %8795 }
0x4007   :  { %v5701_v52 = vmul.f32 %v8796_v28, %v5691_v60  ;;  %v8798_v57 = vpop.eup %8797 }
0x4008   :  { %v8800_v6 = vpop.eup %8799 }
0x4009   :  { %v5702_v44 = vsub.f32 1.0, %v5701_v52  ;;  %v5606_v55 = vadd.f32 1.0, %v8800_v6  ;;  %v10641_v6 = vld [vmem:[#allocation6 + $0x90] sm:$0xff] }
0x400b   :  { %v5704_v25 = vrot.slane %v5702_v44, 6  ;;  %8801 = vrcp.f32 %v5606_v55  ;;  %v10644_v55 = vld [vmem:[#allocation6 + $0x18] sm:$0xff] }
0x400d   :  { %v5706_v42 = vmul.f32 %v5704_v25, %v5701_v52 }
0x400f   :  { %v5708_v51 = vrot.slane %v5706_v42, 2  ;;  %v5713_v35 = vsub.f32 %v5701_v52, %v5706_v42 }
0x4011   :  { %5720 = vrot.lane.b32.xlu0 %v5708_v51, %s9125_s0  ;;  %v5725_v8 = vsub.f32 %v5702_v44, %v5708_v51  ;;  %v5715_v17 = vrot.slane %v5713_v35, 2  ;;  %v10628_v35 = vld [vmem:[#allocation6 + $0x190] sm:$0xff] }
0x4015   :  { %5727 = vrot.lane.b32.xlu0 %v5725_v8, %s9125_s0 }
0x4018   :  { %v8802_v24 = vpop.eup %8801 }
0x4019   :  { %5733 = vrot.lane.b32.xlu0 %v8798_v57, %s9137_s2 }
0x401d   :  { %5709 = vrot.lane.b32.xlu0 %v5708_v51, %s9137_s2 }
0x4021   :  { %5716 = vrot.lane.b32.xlu0 %v5715_v17, %s9137_s2  ;;  %v10635_v17 = vld [vmem:[#allocation6 + $0x110] sm:$0xff] }
0x4083   :  { %v5721_v22 = vpop.permute.xlu0 %5720 }
0x4084   :  { %v5723_v1 = vmul.f32 %v8802_v24, %v5721_v22 }
0x4087   :  { %v5728_v36 = vpop.permute.xlu0 %5727 }
0x4088   :  { %v5730_v14 = vadd.f32 %v5728_v36, %v5723_v1 }
0x408b   :  { %v5734_v60 = vpop.permute.xlu0 %5733 }
0x408c   :  { %v5736_v10 = vmul.f32 %v5734_v60, %v5730_v14 }
0x408e   :  { %5738 = vrot.lane.b32.xlu0 %v5736_v10, %s9125_s0 }
0x408f   :  { %v5710_v45 = vpop.permute.xlu0 %5709 }
0x4090   :  { %v5712_v52 = vmul.f32 %v8802_v24, %v5710_v45 }
0x4093   :  { %v5717_v28 = vpop.permute.xlu0 %5716 }
0x4094   :  { %v5719_v44 = vadd.f32 %v5717_v28, %v5712_v52 }
0x4096   :  { %v5731_v25 = vmul.f32 %v5719_v44, %v10377_v50  ;;  %v10632_v50 = vld [vmem:[#allocation6 + $0x118] sm:$0xff] }
0x4100   :  { %v5739_v58 = vpop.permute.xlu0 %5738 }
0x4101   :  { %v10620_v42 = vadd.f32 %v5739_v58, %v5731_v25 }
0x4103   :  { %8803 = vtanh.f32 %v10620_v42 }
0x4110   :  { %v8804_v51 = vpop.eup %8803 }
0x4111   :  { %5744 = vrot.lane.b32.xlu0 %v8804_v51, %s9137_s2 }
0x4183   :  { %v5745_v8 = vpop.permute.xlu0 %5744 }
0x4184   :  { %v10624_v57 = vmul.f32 %v8802_v24, %v5745_v8 }
0x4186   :  { %8477 = vmatmul.mubr.msk.f32.vlgmr.msra.gmra.mxu0 %vm64_vm0, %v10624_v57 }
0x4187   :  { %6177 = vmatpush1.msra.mxu0 %v10628_v35  ;;  %6216 = vmatprep.mubr.f32.mxu0 %v11036_v49 }
0x4188   :  { %6178 = vmatprep.subr.mxu0 %v10632_v50 }
0x4189   :  { %6179 = vmatpush1.msra.mxu0 %v10635_v17 }
0x418a   :  { %6180 = vmatprep.subr.mxu0 %v10638_v34 }
0x418b   :  { %6181 = vmatpush1.msra.mxu0 %v10641_v6 }
0x418c   :  { %6182 = vmatprep.subr.mxu0 %v10644_v55 }
0x418d   :  { %6183 = vmatpush1.msra.mxu0 %v10392_v54 }
0x418e   :  { %8157 = vmatmul.mubr.msk.f32.vlgmr.msra.gmra.mxu0 %vm64_vm0, %v10542_v27  ;;  %8490 = vmatprep.subr.mxu0 %v11036_v49 }
0x418f   :  { %8491 = vmatpush3.msk.msra.mxu0 %vm949_vm8, %v10401_v48  ;;  %8492 = vmatprep.mubr.msk.f32.mxu0 %vm9132_vm1, %v11036_v49 }
0x4190   :  { %6548 = vmatprep.subr.mxu0 %v10407_v20  ;;  %v11095_v20 = vld [vmem:[#allocation14_spill] sm:$0xff] }
0x4246   :  { %v5817_v22 = vpop.f32.mrf.mxu0 }
0x4247   :  { %v5888_v24 = vadd.f32 %v10597_v21, %v5817_v22 }
0x4248   :  { %v8478_v36 = vpop.f32.mrf.mxu0 }
0x4249   :  { %v5898_v1 = vrot.slane %v5888_v24, %v9352_v61 }
0x424b   :  { %v5899_v54 = vcombine.high %v5898_v1, %v5898_v1  ;;  %v5906_v14 = vrot.slane %v5898_v1, %v9352_v61 }
0x424d   :  { %v5913_v27 = vrot.slane %v5899_v54, %v9352_v61  ;;  %v5917_v60 = vrot.slane %v5906_v14, %v9269_v53 }
0x424e   :  { %v6218_v10 = vpop.f32.mrf.mxu0 }
0x424f   :  { %v5921_v45 = vrot.slane %v5913_v27, %v9269_v53  ;;  %v5922_v28 = vcombine.high %v5917_v60, %v5917_v60  ;;  %v5929_v52 = vrot.slane %v5917_v60, %v9189_v11  ;;  %v10664_v44 = vadd.f32 %v6218_v10, %v11095_v20 }
0x4251   :  { %v5936_v21 = vrot.slane %v5922_v28, %v9189_v11  ;;  %v5937_v25 = vcombine.high %v5929_v52, %v5929_v52  ;;  %v5938_v58 = vcombine.high %v5921_v45, %v5921_v45  ;;  %v5945_v51 = vrot.slane %v5921_v45, %v9189_v11 }
0x4252   :  { %v5960_v8 = vadd.f32 %v5929_v52, %v9359_v13 }
0x4253   :  { %v5952_v22 = vrot.slane %v5938_v58, %v9189_v11  ;;  %v5953_v24 = vcombine.high %v5945_v51, %v5945_v51  ;;  %v5961_v36 = vadd.f32 %v5937_v25, %v9373_v23  ;;  %v5962_v1 = vadd.f32 %v5936_v21, %v9367_v18 }
0x4254   :  { %v5963_v54 = vadd.f32 %v5945_v51, %v9383_v30  ;;  %8805 = vtanh.f32 %v5960_v8 }
0x4255   :  { %v5964_v14 = vadd.f32 %v5953_v24, %v9364_v16  ;;  %v5965_v27 = vadd.f32 %v5952_v22, %v9379_v29  ;;  %8807 = vtanh.f32 %v5961_v36 }
0x4256   :  { %8809 = vtanh.f32 %v5962_v1 }
0x4257   :  { %8811 = vtanh.f32 %v5963_v54 }
0x4258   :  { %8813 = vtanh.f32 %v5964_v14 }
0x4259   :  { %8815 = vtanh.f32 %v5965_v27 }
0x4261   :  { %v8806_v60 = vpop.eup %8805 }
0x4262   :  { %v8808_v10 = vpop.eup %8807  ;;  %v5972_v28 = vmul.f32 %v8806_v60, %v9396_v59 }
0x4263   :  { %v8810_v45 = vpop.eup %8809  ;;  %v5973_v52 = vmul.f32 %v8808_v10, %v9400_v62 }
0x4264   :  { %v8812_v20 = vpop.eup %8811  ;;  %v5974_v21 = vmul.f32 %v8810_v45, %v9403_v63 }
0x4265   :  { %v8814_v25 = vpop.eup %8813  ;;  %v5984_v58 = vcombine.low %v5972_v28, %v5973_v52  ;;  %v5975_v8 = vmul.f32 %v8812_v20, %v9396_v59 }
0x4266   :  { %v8816_v51 = vpop.eup %8815  ;;  %v5976_v22 = vmul.f32 %v8814_v25, %v9400_v62  ;;  %v5998_v36 = vrot.slane %v5974_v21, %v9189_v11 }
0x4267   :  { %v5991_v24 = vrot.slane %v5984_v58, %v9189_v11  ;;  %v5977_v1 = vmul.f32 %v8816_v51, %v9403_v63 }
0x4268   :  { %v6000_v54 = vcombine.low %v5975_v8, %v5976_v22 }
0x4269   :  { %v5999_v14 = vcombine.low %v5991_v24, %v5998_v36  ;;  %v6014_v60 = vrot.slane %v5977_v1, %v9189_v11 }
0x426a   :  { %v6007_v27 = vrot.slane %v6000_v54, %v9189_v11 }
0x426b   :  { %v6018_v10 = vsel %vm616_vm3, %v5999_v14, 0.0 }
0x426c   :  { %6019 = vadd.xlane.f32.xlu1 %v6018_v10  ;;  %v6015_v45 = vcombine.low %v6007_v27, %v6014_v60 }
0x426e   :  { %v6021_v28 = vsel %vm616_vm3, %v6015_v45, 0.0 }
0x426f   :  { %6022 = vadd.xlane.f32.xlu0 %v6021_v28 }
0x42f5   :  { %v6020_v52 = vpop.xlane.xlu1 %6019 }
0x42f6   :  { %v6029_v25 = vrot.slane %v6020_v52, %v11054_v33 }
0x42f8   :  { %v6023_v20 = vpop.xlane.xlu0 %6022 }
0x42f9   :  { %v6033_v21 = vrot.slane %v6023_v20, %v11054_v33 }
0x42fb   :  { %v6034_v58 = vsel %vm635_vm4, %v6033_v21, %v6029_v25 }
0x42fc   :  { %v6036_v51 = vsel %vm638_vm5, %v6034_v58, -inf }
0x42fd   :  { %6037 = vmax.xlane.f32.xlu1 %v6036_v51 }
0x4386   :  { %v6038_v8 = vpop.xlane.xlu1 %6037 }
0x4387   :  { %v6043_v22 = vrot.slane %v6038_v8, %v9269_v53  ;;  %v6047_v24 = vrot.slane %v6038_v8, %v9428_v0 }
0x4389   :  { %v6050_v36 = vsub.f32 %v6020_v52, %v6043_v22  ;;  %v6051_v1 = vsub.f32 %v6023_v20, %v6047_v24 }
0x438b   :  { %v6052_v54 = vmul.f32 1.442695, %v6050_v36  ;;  %v6054_v14 = vmul.f32 1.442695, %v6051_v1 }
0x438d   :  { %8817 = vpow2.f32 %v6052_v54 }
0x438e   :  { %8819 = vpow2.f32 %v6054_v14  ;;  %v10704_v14 = vld [vmem:[%s10978_s3] sm:$0x3f] }
0x438f   :  { %11096 = vst [vmem:[#allocation27_spill] sm:$0xff] %v10704_v14 }
0x439a   :  { %v8818_v27 = vpop.eup %8817 }
0x439b   :  { %6059 = vperm.xlu1 %8576, %v8818_v27   ;;  %v8820_v60 = vpop.eup %8819 }
0x439f   :  { %6062 = vperm.xlu1 %8576, %v8820_v60  }
0x4416   :  { %v6060_v10 = vpop.permute.xlu1 %6059 }
0x4417   :  { %v6067_v28 = vrot.slane %v6060_v10, %v11054_v33 }
0x441a   :  { %v6063_v45 = vpop.permute.xlu1 %6062 }
0x441b   :  { %v6071_v25 = vrot.slane %v6063_v45, %v11054_v33 }
0x441d   :  { %v6072_v21 = vsel %vm635_vm4, %v6071_v25, %v6067_v28 }
0x441e   :  { %v6074_v58 = vsel %vm638_vm5, %v6072_v21, 0.0 }
0x441f   :  { %6075 = vadd.xlane.f32.xlu1 %v6074_v58 }
0x44a8   :  { %v6076_v52 = vpop.xlane.xlu1 %6075 }
0x44a9   :  { %v6081_v20 = vrot.slane %v6076_v52, %v9269_v53  ;;  %v6085_v51 = vrot.slane %v6076_v52, %v9428_v0 }
0x44ab   :  { %8821 = vrcp.f32 %v6081_v20 }
0x44ac   :  { %8823 = vrcp.f32 %v6085_v51 }
0x44b8   :  { %v8822_v8 = vpop.eup %8821 }
0x44b9   :  { %v8824_v22 = vpop.eup %8823  ;;  %v6089_v24 = vmul.f32 %v8822_v8, %v8818_v27  ;;  %v10710_v27 = vld [vmem:[%s10978_s3 + $0x8] sm:$0x3f] }
0x44ba   :  { %v6091_v36 = vmul.f32 %v8824_v22, %v8820_v60 }
0x44bb   :  { %6094 = vperm.xlu0 %8577, %v6089_v24  }
0x44bc   :  { %6099 = vperm.xlu1 %8576, %v6091_v36  }
0x44bf   :  { %8579 = vset.pattern.permute.xlu0 %v11055_v3 }
0x44c0   :  { %8578 = vset.pattern.permute.xlu1 %v11055_v3 }
0x4536   :  { %v6095_v1 = vpop.permute.xlu0 %6094 }
0x4537   :  { %v6100_v54 = vpop.permute.xlu1 %6099  ;;  %v6102_v10 = vmul.f32 %v10704_v14, %v6095_v1 }
0x4538   :  { %v6103_v60 = vmul.f32 %v10710_v27, %v6100_v54 }
0x4539   :  { %v6104_v45 = vsel %vm616_vm3, %v6102_v10, 0.0  ;;  %v11097_v10 = vld [vmem:[#allocation21_spill] sm:$0xff] }
0x453a   :  { %v6111_v28 = vsel %vm616_vm3, %v6103_v60, 0.0  ;;  %v6105_v25 = vrot.slane %v6104_v45, 4  ;;  %v9019_v60 = vld [vmem:[%s9315_s27] sm:$0x3] }
0x453b   :  { %v6112_v21 = vrot.slane %v6111_v28, 4 }
0x453c   :  { %v6106_v58 = vadd.f32 %v6105_v25, %v6104_v45  ;;  %v6134_v45 = vrot.slane %v9019_v60, %v9428_v0  ;;  %v6220_v25 = vpop.f32.mrf.mxu0  ;;  %v11102_v60 = vld [vmem:[#allocation24_spill] sm:$0xff] }
0x453d   :  { %v6113_v52 = vadd.f32 %v6112_v21, %v6111_v28 }
0x453e   :  { %v6107_v20 = vrot.slane %v6106_v58, 2 }
0x453f   :  { %v6114_v51 = vrot.slane %v6113_v52, 2 }
0x4540   :  { %v6108_v8 = vadd.f32 %v6107_v20, %v6106_v58 }
0x4541   :  { %v6115_v22 = vadd.f32 %v6114_v51, %v6113_v52 }
0x4542   :  { %v6109_v24 = vrot.slane %v6108_v8, 1 }
0x4543   :  { %v6116_v36 = vrot.slane %v6115_v22, 1 }
0x4544   :  { %v6110_v1 = vadd.f32 %v6109_v24, %v6108_v8 }
0x4545   :  { %v6117_v14 = vadd.f32 %v6116_v36, %v6115_v22 }
0x4547   :  { %v10716_v54 = vsel %vm635_vm4, %v6117_v14, %v6110_v1  ;;  %v11098_v14 = vld [vmem:[#allocation17_spill] sm:$0xff] }
0x4548   :  { %8158 = vmatmul.mubr.msk.f32.vlgmr.msra.gmra.mxu1 %vm64_vm0, %v10716_v54 }
0x4549   :  { %6476 = vmatpush1.msra.mxu1 %v10464_v9  ;;  %6515 = vmatprep.mubr.f32.mxu1 %v11036_v49  ;;  %v9020_v9 = vld [vmem:[%s9318_s28] sm:$0x3] }
0x454a   :  { %6477 = vmatprep.subr.mxu1 %v10468_v12  ;;  %v6145_v28 = vrot.slane %v9020_v9, %v9428_v0  ;;  %v11104_v9 = vld [vmem:[#allocation26_spill] sm:$0xff] }
0x454b   :  { %6478 = vmatpush1.msra.mxu1 %v10471_v2 }
0x454c   :  { %6479 = vmatprep.subr.mxu1 %v10474_v5  ;;  %v6149_v12 = vsel %vm751_vm2, %v6134_v45, %v6145_v28  ;;  %v11103_v45 = vld [vmem:[#allocation25_spill] sm:$0xff] }
0x454d   :  { %6480 = vmatpush1.msra.mxu1 %v10477_v26  ;;  %v6151_v2 = vadd.f32 %v6149_v12, %v9346_v47 }
0x454e   :  { %6481 = vmatprep.subr.mxu1 %v10480_v40 }
0x454f   :  { %6482 = vmatpush1.msra.mxu1 %v11097_v10  ;;  %v6224_v21 = vadd.f32 %v6220_v25, %v6151_v2  ;;  %v11100_v10 = vld [vmem:[#allocation11_spill] sm:$0xff] }
0x4550   :  { %6621 = vmatprep.subr.mxu1 %v11098_v14  ;;  %v11101_v14 = vld [vmem:[#allocation16_spill] sm:$0xff] }
0x4608   :  { %v6296_v5 = vpop.f32.mrf.mxu1 }
0x4609   :  { %v6301_v26 = vadd.f32 %v6296_v5, %v10664_v44  ;;  %v11099_v44 = vld [vmem:[#allocation22_spill] sm:$0xff] }
0x460a   :  { %v6298_v40 = vpop.f32.mrf.mxu1 }
0x460b   :  { %v6302_v58 = vadd.f32 %v6298_v40, %v6224_v21 }
0x460d   :  { %v6311_v52 = vrot.slane %v6302_v58, 6 }
0x460f   :  { %6312 = vrot.lane.b32.xlu0 %v6311_v52, %s9135_s15 }
0x4681   :  { %v6313_v20 = vpop.permute.xlu0 %6312 }
0x4682   :  { %v6315_v51 = vsel %vm935_vm6, %v6302_v58, %v6313_v20 }
0x4683   :  { %v6316_v8 = vsel %vm937_vm7, %v6315_v51, -inf }
0x4684   :  { %6317 = vmax.xlane.f32.xlu0 %v6316_v8  ;;  %v8159_v8 = vmul.f32 -1.442695, %v6301_v26 }
0x470d   :  { %v6318_v22 = vpop.xlane.xlu0 %6317 }
0x470e   :  { %v6319_v24 = vsub.f32 %v6315_v51, %v6318_v22 }
0x4710   :  { %v6320_v36 = vmul.f32 1.442695, %v6319_v24 }
0x4712   :  { %8825 = vpow2.f32 %v6320_v36 }
0x471f   :  { %v8826_v1 = vpop.eup %8825 }
0x4720   :  { %8493 = vmatmul.mubr.msk.f32.vlgmr.msra.gmra.mxu0 %vm945_vm9, %v8826_v1 }
0x4721   :  { %6549 = vmatpush1.msra.mxu0 %v10500_v39  ;;  %6588 = vmatprep.mubr.f32.mxu0 %v11036_v49 }
0x4722   :  { %6550 = vmatprep.subr.mxu0 %v11099_v44 }
0x4723   :  { %6551 = vmatpush1.msra.mxu0 %v11100_v10 }
0x4724   :  { %6552 = vmatprep.subr.mxu0 %v11101_v14 }
0x4725   :  { %6553 = vmatpush1.msra.mxu0 %v11102_v60 }
0x4726   :  { %6554 = vmatprep.subr.mxu0 %v11103_v45 }
0x4727   :  { %6555 = vmatpush1.msra.mxu0 %v11104_v9 }
0x4728   :  { %8163 = vmatmul.mubr.msk.f32.vlgmr.msra.gmra.mxu0 %vm64_vm0, %v10624_v57  ;;  %8495 = vmatprep.subr.mxu0 %v11036_v49 }
0x4729   :  { %8496 = vmatpush3.msk.msra.mxu0 %vm949_vm8, %v10401_v48  ;;  %8497 = vmatprep.mubr.msk.f32.mxu0 %vm9132_vm1, %v11036_v49 }
0x472a   :  { %8500 = vmatprep.subr.mxu0 %v11036_v49 }
0x47e0   :  { %v6391_v39 = vpop.f32.mrf.mxu0 }
0x47e1   :  { %6397 = vperm.xlu1 %8578, %v6391_v39  }
0x47e2   :  { %v8494_v28 = vpop.f32.mrf.mxu0 }
0x47e5   :  { %8581 = vset.pattern.permute.xlu1 %v11042_v38 }
0x485c   :  { %v6398_v12 = vpop.permute.xlu1 %6397 }
0x485d   :  { %8827 = vrcp.f32 %v6398_v12 }
0x485e   :  { %8829 = vtanh.f32 %v6301_v26 }
0x485f   :  { %8831 = vpow2.f32 %v8159_v8 }
0x486a   :  { %v8828_v25 = vpop.eup %8827 }
0x486b   :  { %v6401_v2 = vmul.f32 %v8828_v25, %v6391_v39  ;;  %v8830_v52 = vpop.eup %8829 }
0x486c   :  { %v8832_v22 = vpop.eup %8831 }
0x486d   :  { %v6402_v5 = vsub.f32 1.0, %v6401_v2  ;;  %v6306_v24 = vadd.f32 1.0, %v8832_v22  ;;  %v6590_v22 = vpop.f32.mrf.mxu0 }
0x486f   :  { %v6404_v21 = vrot.slane %v6402_v5, 6  ;;  %8833 = vrcp.f32 %v6306_v24 }
0x4871   :  { %v6406_v40 = vmul.f32 %v6404_v21, %v6401_v2 }
0x4873   :  { %v6408_v58 = vrot.slane %v6406_v40, 2  ;;  %v6413_v20 = vsub.f32 %v6401_v2, %v6406_v40 }
0x4875   :  { %6420 = vrot.lane.b32.xlu1 %v6408_v58, %s9125_s0  ;;  %v6425_v48 = vsub.f32 %v6402_v5, %v6408_v58  ;;  %v6415_v51 = vrot.slane %v6413_v20, 2 }
0x4879   :  { %6427 = vrot.lane.b32.xlu1 %v6425_v48, %s9125_s0  ;;  %v9031_v48 = vld [vmem:[#allocation6 + $0x28] sm:$0xff] }
0x487c   :  { %v8834_v1 = vpop.eup %8833 }
0x487d   :  { %6433 = vrot.lane.b32.xlu1 %v8830_v52, %s9137_s2  ;;  %v9032_v52 = vld [vmem:[#allocation6 + $0x20] sm:$0xff] }
0x4881   :  { %6409 = vrot.lane.b32.xlu1 %v6408_v58, %s9137_s2  ;;  %v9030_v58 = vld [vmem:[#allocation6 + $0xa0] sm:$0xff] }
0x4885   :  { %6416 = vrot.lane.b32.xlu1 %v6415_v51, %s9137_s2 }
0x48e7   :  { %v6421_v36 = vpop.permute.xlu1 %6420 }
0x48e8   :  { %v6423_v10 = vmul.f32 %v8834_v1, %v6421_v36 }
0x48eb   :  { %v6428_v44 = vpop.permute.xlu1 %6427 }
0x48ec   :  { %v6430_v14 = vadd.f32 %v6428_v44, %v6423_v10 }
0x48ef   :  { %v6434_v60 = vpop.permute.xlu1 %6433 }
0x48f0   :  { %v6436_v45 = vmul.f32 %v6434_v60, %v6430_v14 }
0x48f2   :  { %6438 = vrot.lane.b32.xlu1 %v6436_v45, %s9125_s0 }
0x48f3   :  { %v6410_v9 = vpop.permute.xlu1 %6409 }
0x48f4   :  { %v6412_v28 = vmul.f32 %v8834_v1, %v6410_v9 }
0x48f7   :  { %v6417_v39 = vpop.permute.xlu1 %6416 }
0x48f8   :  { %v6419_v12 = vadd.f32 %v6417_v39, %v6412_v28 }
0x48fa   :  { %v6431_v25 = vmul.f32 %v6419_v12, %v10538_v46  ;;  %v9021_v46 = vld [vmem:[#allocation6 + $0x1e0] sm:$0xff] }
0x4964   :  { %v6439_v26 = vpop.permute.xlu1 %6438 }
0x4965   :  { %v10764_v2 = vadd.f32 %v6439_v26, %v6431_v25 }
0x4967   :  { %8835 = vtanh.f32 %v10764_v2 }
0x4974   :  { %v8836_v5 = vpop.eup %8835 }
0x4975   :  { %6444 = vrot.lane.b32.xlu1 %v8836_v5, %s9137_s2 }
0x49e7   :  { %v6445_v21 = vpop.permute.xlu1 %6444 }
0x49e8   :  { %v10768_v40 = vmul.f32 %v8834_v1, %v6445_v21  ;;  %v6592_v1 = vpop.f32.mrf.mxu0 }
0x49ea   :  { %8162 = vmatmul.mubr.msk.f32.vlgmr.msra.gmra.mxu1 %vm64_vm0, %v10768_v40 }
0x49eb   :  { %6622 = vmatpush1.msra.mxu1 %v10546_v56  ;;  %6661 = vmatprep.mubr.f32.mxu1 %v11036_v49  ;;  %v9022_v56 = vld [vmem:[#allocation6 + $0x160] sm:$0xff] }
0x49ec   :  { %6623 = vmatprep.subr.mxu1 %v10550_v41  ;;  %v9023_v41 = vld [vmem:[#allocation6 + $0xe0] sm:$0xff] }
0x49ed   :  { %6624 = vmatpush1.msra.mxu1 %v10553_v32  ;;  %v9024_v32 = vld [vmem:[#allocation6 + $0x60] sm:$0xff] }
0x49ee   :  { %6625 = vmatprep.subr.mxu1 %v10556_v4  ;;  %v9025_v4 = vld [vmem:[#allocation6 + $0x1a8] sm:$0xff] }
0x49ef   :  { %6626 = vmatpush1.msra.mxu1 %v10559_v15  ;;  %v9026_v15 = vld [vmem:[#allocation6 + $0x1a0] sm:$0xff] }
0x49f0   :  { %6627 = vmatprep.subr.mxu1 %v10562_v19  ;;  %v9027_v19 = vld [vmem:[#allocation6 + $0x128] sm:$0xff] }
0x49f1   :  { %6628 = vmatpush1.msra.mxu1 %v10565_v31  ;;  %v9028_v31 = vld [vmem:[#allocation6 + $0x120] sm:$0xff] }
0x49f2   :  { %8164 = vmatmul.mubr.msk.f32.vlgmr.msra.gmra.mxu1 %vm64_vm0, %v10716_v54  ;;  %8511 = vmatprep.subr.mxu1 %v11036_v49  ;;  %v9029_v54 = vld [vmem:[#allocation6 + $0xa8] sm:$0xff] }
0x49f3   :  { %8512 = vmatpush3.msra.mxu1 %v9021_v46  ;;  %8519 = vmatprep.mubr.msk.f32.mxu1 %vm9132_vm1, %v11036_v49 }
0x49f4   :  { %8513 = vmatprep.subr.mxu1 %v11036_v49 }
0x49f5   :  { %8514 = vmatpush3.msra.mxu1 %v9022_v56 }
0x49f6   :  { %8515 = vmatprep.subr.mxu1 %v11036_v49 }
0x49f7   :  { %8516 = vmatpush3.msra.mxu1 %v9023_v41  ;;  %v9033_v41 = vld [vmem:[#allocation6 + $0x1e8] sm:$0xff] }
0x49f8   :  { %8517 = vmatprep.subr.mxu1 %v11036_v49 }
0x49f9   :  { %8518 = vmatpush3.msra.mxu1 %v9024_v32  ;;  %v9034_v32 = vld [vmem:[#allocation6 + $0x168] sm:$0xff] }
0x49fa   :  { %8520 = vmatmul.mubr.msk.f32.vlgmr.msra.gmra.mxu1 %vm64_vm0, %v10768_v40  ;;  %7321 = vmatprep.subr.mxu1 %v9025_v4  ;;  %v9035_v4 = vld [vmem:[#allocation6 + $0xe8] sm:$0xff] }
0x49fb   :  { %7322 = vmatpush1.msra.mxu1 %v9026_v15  ;;  %7361 = vmatprep.mubr.f32.mxu1 %v11036_v49  ;;  %v9036_v15 = vld [vmem:[#allocation6 + $0x68] sm:$0xff] }
0x49fc   :  { %7323 = vmatprep.subr.mxu1 %v9027_v19  ;;  %v9037_v19 = vld [vmem:[#allocation6 + $0x198] sm:$0xff] }
0x49fd   :  { %7324 = vmatpush1.msra.mxu1 %v9028_v31 }
0x49fe   :  { %7325 = vmatprep.subr.mxu1 %v9029_v54 }
0x49ff   :  { %7326 = vmatpush1.msra.mxu1 %v9030_v58 }
0x4a00   :  { %7327 = vmatprep.subr.mxu1 %v9031_v48 }
0x4a01   :  { %7328 = vmatpush1.msra.mxu1 %v9032_v52 }
0x4a02   :  { %7542 = vmatprep.subr.mxu1 %v10591_v7 }
0x4aaa   :  { %v6517_v20 = vpop.f32.mrf.mxu1 }
0x4aab   :  { %v6522_v8 = vadd.f32 %v6517_v20, %v9618_v43 }
0x4aac   :  { %v6519_v51 = vpop.f32.mrf.mxu1 }
0x4aad   :  { %v6523_v24 = vadd.f32 %v6519_v51, %v11051_v37  ;;  %v6595_v36 = vadd.f32 %v6590_v22, %v6522_v8 }
0x4aaf   :  { %v6596_v14 = vadd.f32 %v6592_v1, %v6523_v24 }
0x4ab2   :  { %v6663_v44 = vpop.f32.mrf.mxu1 }
0x4ab3   :  { %v6668_v10 = vadd.f32 %v6663_v44, %v6595_v36 }
0x4ab4   :  { %v6665_v60 = vpop.f32.mrf.mxu1 }
0x4ab5   :  { %v6669_v45 = vadd.f32 %v6665_v60, %v6596_v14  ;;  %8837 = vtanh.f32 %v6668_v10 }
0x4ab7   :  { %v6678_v9 = vrot.slane %v6669_v45, 6 }
0x4ab9   :  { %6679 = vrot.lane.b32.xlu0 %v6678_v9, %s9135_s15 }
0x4aba   :  { %v10795_v39 = vpop.f32.mrf.mxu1 }
0x4abc   :  { %v8521_v7 = vpop.f32.mrf.mxu1 }
0x4ac2   :  { %v8838_v26 = vpop.eup %8837 }
0x4b2b   :  { %v6680_v28 = vpop.permute.xlu0 %6679 }
0x4b2c   :  { %v6682_v12 = vsel %vm935_vm6, %v6669_v45, %v6680_v28 }
0x4b2d   :  { %v6683_v25 = vsel %vm937_vm7, %v6682_v12, -inf }
0x4b2e   :  { %6684 = vmax.xlane.f32.xlu1 %v6683_v25 }
0x4b3f   :  { %6800 = vrot.lane.b32.xlu1 %v8838_v26, %s9137_s2 }
0x4bb7   :  { %v6685_v5 = vpop.xlane.xlu1 %6684 }
0x4bb8   :  { %v6686_v21 = vsub.f32 %v6682_v12, %v6685_v5 }
0x4bba   :  { %v6687_v46 = vmul.f32 1.442695, %v6686_v21 }
0x4bbb   :  { %v6801_v12 = vpop.permute.xlu1 %6800 }
0x4bbc   :  { %8839 = vpow2.f32 %v6687_v46 }
0x4bc9   :  { %v8840_v56 = vpop.eup %8839 }
0x4bca   :  { %8498 = vmatmul.mubr.msk.f32.vlgmr.msra.gmra.mxu0 %vm945_vm9, %v8840_v56 }
0x4bcb   :  { %8501 = vmatpush3.msra.mxu0 %v9033_v41  ;;  %8508 = vmatprep.mubr.msk.f32.mxu0 %vm9132_vm1, %v11036_v49 }
0x4bcc   :  { %8502 = vmatprep.subr.mxu0 %v11036_v49 }
0x4bcd   :  { %8503 = vmatpush3.msra.mxu0 %v9034_v32 }
0x4bce   :  { %8504 = vmatprep.subr.mxu0 %v11036_v49 }
0x4bcf   :  { %8505 = vmatpush3.msra.mxu0 %v9035_v4 }
0x4bd0   :  { %8506 = vmatprep.subr.mxu0 %v11036_v49 }
0x4bd1   :  { %8507 = vmatpush3.msra.mxu0 %v9036_v15 }
0x4bd2   :  { %7243 = vmatprep.subr.mxu0 %v9037_v19 }
0x4c8a   :  { %v6758_v31 = vpop.f32.mrf.mxu0 }
0x4c8b   :  { %6764 = vperm.xlu0 %8579, %v6758_v31  }
0x4c8c   :  { %v8499_v54 = vpop.f32.mrf.mxu0 }
0x4c8f   :  { %8580 = vset.pattern.permute.xlu0 %v11042_v38  ;;  %v8165_v38 = vmul.f32 -1.442695, %v6668_v10 }
0x4d06   :  { %v6765_v58 = vpop.permute.xlu0 %6764 }
0x4d07   :  { %8841 = vrcp.f32 %v6765_v58 }
0x4d08   :  { %8843 = vpow2.f32 %v8165_v38 }
0x4d14   :  { %v8842_v48 = vpop.eup %8841 }
0x4d15   :  { %v6768_v52 = vmul.f32 %v8842_v48, %v6758_v31  ;;  %v8844_v44 = vpop.eup %8843 }
0x4d16   :  { %v6673_v14 = vadd.f32 1.0, %v8844_v44 }
0x4d17   :  { %v6769_v20 = vsub.f32 1.0, %v6768_v52 }
0x4d18   :  { %8845 = vrcp.f32 %v6673_v14 }
0x4d19   :  { %v6771_v51 = vrot.slane %v6769_v20, 6 }
0x4d1b   :  { %v6773_v8 = vmul.f32 %v6771_v51, %v6768_v52  ;;  %v11105_v51 = vld [vmem:[#allocation15_spill] sm:$0xff] }
0x4d1d   :  { %v6775_v22 = vrot.slane %v6773_v8, 2  ;;  %v6780_v36 = vsub.f32 %v6768_v52, %v6773_v8 }
0x4d1f   :  { %6787 = vrot.lane.b32.xlu0 %v6775_v22, %s9125_s0  ;;  %v6792_v24 = vsub.f32 %v6769_v20, %v6775_v22  ;;  %v6782_v1 = vrot.slane %v6780_v36, 2 }
0x4d23   :  { %6794 = vrot.lane.b32.xlu0 %v6792_v24, %s9125_s0 }
0x4d25   :  { %v8846_v45 = vpop.eup %8845 }
0x4d27   :  { %6776 = vrot.lane.b32.xlu0 %v6775_v22, %s9137_s2 }
0x4d2b   :  { %6783 = vrot.lane.b32.xlu0 %v6782_v1, %s9137_s2 }
0x4d91   :  { %v6788_v60 = vpop.permute.xlu0 %6787 }
0x4d92   :  { %v6790_v9 = vmul.f32 %v8846_v45, %v6788_v60 }
0x4d95   :  { %v6795_v7 = vpop.permute.xlu0 %6794 }
0x4d96   :  { %v6797_v28 = vadd.f32 %v6795_v7, %v6790_v9 }
0x4d98   :  { %v6803_v25 = vmul.f32 %v6801_v12, %v6797_v28 }
0x4d99   :  { %v6777_v26 = vpop.permute.xlu0 %6776 }
0x4d9a   :  { %6805 = vrot.lane.b32.xlu0 %v6803_v25, %s9125_s0  ;;  %v6779_v21 = vmul.f32 %v8846_v45, %v6777_v26 }
0x4d9d   :  { %v6784_v5 = vpop.permute.xlu0 %6783 }
0x4d9e   :  { %v6786_v46 = vadd.f32 %v6784_v5, %v6779_v21 }
0x4da0   :  { %v6798_v56 = vmul.f32 %v6786_v46, %v10620_v42  ;;  %v9038_v42 = vld [vmem:[#allocation6 + $0x10] sm:$0xff] }
0x4e0c   :  { %v6806_v10 = vpop.permute.xlu0 %6805 }
0x4e0d   :  { %v10813_v41 = vadd.f32 %v6806_v10, %v6798_v56 }
0x4e0f   :  { %8847 = vtanh.f32 %v10813_v41 }
0x4e1c   :  { %v8848_v32 = vpop.eup %8847 }
0x4e1d   :  { %6811 = vrot.lane.b32.xlu0 %v8848_v32, %s9137_s2 }
0x4e8f   :  { %v6812_v4 = vpop.permute.xlu0 %6811 }
0x4e90   :  { %v10817_v15 = vmul.f32 %v8846_v45, %v6812_v4 }
0x4e92   :  { %8509 = vmatmul.mubr.msk.f32.vlgmr.msra.gmra.mxu0 %vm64_vm0, %v10817_v15 }
0x4e93   :  { %7244 = vmatpush1.msra.mxu0 %v10628_v35  ;;  %7283 = vmatprep.mubr.f32.mxu0 %v11036_v49  ;;  %v10834_v35 = vld [vmem:[%s10980_s5] sm:$0xf] }
0x4e94   :  { %7245 = vmatprep.subr.mxu0 %v10632_v50  ;;  %v9040_v50 = vld [vmem:[#allocation6 + $0x1c8] sm:$0xff] }
0x4e95   :  { %7246 = vmatpush1.msra.mxu0 %v10635_v17 }
0x4e96   :  { %7247 = vmatprep.subr.mxu0 %v10638_v34 }
0x4e97   :  { %7248 = vmatpush1.msra.mxu0 %v10641_v6 }
0x4e98   :  { %7249 = vmatprep.subr.mxu0 %v10644_v55 }
0x4e99   :  { %7250 = vmatpush1.msra.mxu0 %v9038_v42 }
0x4e9a   :  { %8174 = vmatmul.mubr.msk.f32.vlgmr.msra.gmra.mxu0 %vm64_vm0, %v10768_v40  ;;  %8522 = vmatprep.subr.mxu0 %v11036_v49 }
0x4e9b   :  { %8523 = vmatpush3.msk.msra.mxu0 %vm949_vm8, %v10834_v35  ;;  %8524 = vmatprep.mubr.msk.f32.mxu0 %vm9132_vm1, %v11036_v49 }
0x4e9c   :  { %7615 = vmatprep.subr.mxu0 %v9040_v50 }
0x4f52   :  { %v6884_v17 = vpop.f32.mrf.mxu0 }
0x4f53   :  { %v6955_v34 = vadd.f32 %v10795_v39, %v6884_v17 }
0x4f54   :  { %v8510_v6 = vpop.f32.mrf.mxu0 }
0x4f55   :  { %v6965_v55 = vrot.slane %v6955_v34, %v9352_v61 }
0x4f57   :  { %v6966_v40 = vcombine.high %v6965_v55, %v6965_v55  ;;  %v6973_v19 = vrot.slane %v6965_v55, %v9352_v61 }
0x4f59   :  { %v6980_v31 = vrot.slane %v6966_v40, %v9352_v61  ;;  %v6984_v54 = vrot.slane %v6973_v19, %v9269_v53 }
0x4f5a   :  { %v7285_v58 = vpop.f32.mrf.mxu0 }
0x4f5b   :  { %v6988_v48 = vrot.slane %v6980_v31, %v9269_v53  ;;  %v6989_v52 = vcombine.high %v6984_v54, %v6984_v54  ;;  %v6996_v20 = vrot.slane %v6984_v54, %v9189_v11  ;;  %v10848_v8 = vadd.f32 %v7285_v58, %v11105_v51 }
0x4f5d   :  { %v7003_v39 = vrot.slane %v6989_v52, %v9189_v11  ;;  %v7004_v22 = vcombine.high %v6996_v20, %v6996_v20  ;;  %v7005_v24 = vcombine.high %v6988_v48, %v6988_v48  ;;  %v7012_v36 = vrot.slane %v6988_v48, %v9189_v11 }
0x4f5e   :  { %v7027_v1 = vadd.f32 %v6996_v20, %v9359_v13 }
0x4f5f   :  { %v7019_v61 = vrot.slane %v7005_v24, %v9189_v11  ;;  %v7020_v38 = vcombine.high %v7012_v36, %v7012_v36  ;;  %v7028_v44 = vadd.f32 %v7004_v22, %v9373_v23  ;;  %v7029_v14 = vadd.f32 %v7003_v39, %v9367_v18 }
0x4f60   :  { %v7030_v60 = vadd.f32 %v7012_v36, %v9383_v30  ;;  %8849 = vtanh.f32 %v7027_v1 }
0x4f61   :  { %v7031_v45 = vadd.f32 %v7020_v38, %v9364_v16  ;;  %v7032_v9 = vadd.f32 %v7019_v61, %v9379_v29  ;;  %8851 = vtanh.f32 %v7028_v44 }
0x4f62   :  { %8853 = vtanh.f32 %v7029_v14 }
0x4f63   :  { %8855 = vtanh.f32 %v7030_v60 }
0x4f64   :  { %8857 = vtanh.f32 %v7031_v45 }
0x4f65   :  { %8859 = vtanh.f32 %v7032_v9 }
0x4f6d   :  { %v8850_v13 = vpop.eup %8849 }
0x4f6e   :  { %v8852_v7 = vpop.eup %8851  ;;  %v7039_v12 = vmul.f32 %v8850_v13, %v9396_v59 }
0x4f6f   :  { %v8854_v28 = vpop.eup %8853  ;;  %v7040_v23 = vmul.f32 %v8852_v7, %v9400_v62  ;;  %v11106_v7 = vld [vmem:[#allocation27_spill] sm:$0xff] }
0x4f70   :  { %v8856_v18 = vpop.eup %8855  ;;  %v7041_v30 = vmul.f32 %v8854_v28, %v9403_v63 }
0x4f71   :  { %v8858_v25 = vpop.eup %8857  ;;  %v7051_v26 = vcombine.low %v7039_v12, %v7040_v23  ;;  %v7042_v29 = vmul.f32 %v8856_v18, %v9396_v59 }
0x4f72   :  { %v8860_v16 = vpop.eup %8859  ;;  %v7043_v5 = vmul.f32 %v8858_v25, %v9400_v62  ;;  %v7065_v46 = vrot.slane %v7041_v30, %v9189_v11 }
0x4f73   :  { %v7058_v21 = vrot.slane %v7051_v26, %v9189_v11  ;;  %v7044_v56 = vmul.f32 %v8860_v16, %v9403_v63 }
0x4f74   :  { %v7067_v10 = vcombine.low %v7042_v29, %v7043_v5 }
0x4f75   :  { %v7066_v32 = vcombine.low %v7058_v21, %v7065_v46  ;;  %v7081_v42 = vrot.slane %v7044_v56, %v9189_v11 }
0x4f76   :  { %v7074_v4 = vrot.slane %v7067_v10, %v9189_v11 }
0x4f77   :  { %v7085_v50 = vsel %vm616_vm3, %v7066_v32, 0.0 }
0x4f78   :  { %7086 = vadd.xlane.f32.xlu0 %v7085_v50  ;;  %v7082_v17 = vcombine.low %v7074_v4, %v7081_v42  ;;  %v9042_v42 = vld [vmem:[#allocation6 + $0x138] sm:$0xff]  ;;  %v9043_v50 = vld [vmem:[#allocation6 + $0x130] sm:$0xff] }
0x4f7a   :  { %v7088_v59 = vsel %vm616_vm3, %v7082_v17, 0.0  ;;  %v9044_v17 = vld [vmem:[#allocation6 + $0xb8] sm:$0xff] }
0x4f7b   :  { %7089 = vadd.xlane.f32.xlu1 %v7088_v59  ;;  %v9045_v59 = vld [vmem:[#allocation6 + $0xb0] sm:$0xff] }
0x5001   :  { %v7087_v62 = vpop.xlane.xlu0 %7086 }
0x5002   :  { %v7096_v6 = vrot.slane %v7087_v62, %v11054_v33 }
0x5004   :  { %v7090_v34 = vpop.xlane.xlu1 %7089 }
0x5005   :  { %v7100_v55 = vrot.slane %v7090_v34, %v11054_v33 }
0x5007   :  { %v7101_v63 = vsel %vm635_vm4, %v7100_v55, %v7096_v6  ;;  %v9048_v6 = vld [vmem:[#allocation6 + $0x1d8] sm:$0xff]  ;;  %v9049_v55 = vld [vmem:[%s9324_s9] sm:$0x3] }
0x5008   :  { %v7103_v40 = vsel %vm638_vm5, %v7101_v63, -inf  ;;  %v7201_v63 = vrot.slane %v9049_v55, %v9428_v0 }
0x5009   :  { %7104 = vmax.xlane.f32.xlu0 %v7103_v40  ;;  %v9050_v40 = vld [vmem:[%s9328_s10] sm:$0x3] }
0x5092   :  { %v7105_v19 = vpop.xlane.xlu0 %7104 }
0x5093   :  { %v7110_v11 = vrot.slane %v7105_v19, %v9269_v53  ;;  %v7114_v31 = vrot.slane %v7105_v19, %v9428_v0  ;;  %v7212_v19 = vrot.slane %v9050_v40, %v9428_v0 }
0x5095   :  { %v7117_v54 = vsub.f32 %v7087_v62, %v7110_v11  ;;  %v7118_v58 = vsub.f32 %v7090_v34, %v7114_v31  ;;  %v9046_v62 = vld [vmem:[#allocation6 + $0x38] sm:$0xff]  ;;  %v9047_v34 = vld [vmem:[#allocation6 + $0x30] sm:$0xff]  ;;  %v7216_v11 = vsel %vm751_vm2, %v7201_v63, %v7212_v19  ;;  %v7287_v31 = vpop.f32.mrf.mxu0 }
0x5097   :  { %v7119_v48 = vmul.f32 1.442695, %v7117_v54  ;;  %v7121_v52 = vmul.f32 1.442695, %v7118_v58  ;;  %v7218_v54 = vadd.f32 %v7216_v11, %v9346_v47  ;;  %v9058_v11 = vld [vmem:[#allocation6 + $0x1d0] sm:$0xff] }
0x5099   :  { %8861 = vpow2.f32 %v7119_v48  ;;  %v7291_v48 = vadd.f32 %v7287_v31, %v7218_v54  ;;  %v9059_v31 = vld [vmem:[#allocation6 + $0x158] sm:$0xff]  ;;  %v9060_v54 = vld [vmem:[#allocation6 + $0x150] sm:$0xff] }
0x509a   :  { %8863 = vpow2.f32 %v7121_v52 }
0x50a6   :  { %v8862_v20 = vpop.eup %8861 }
0x50a7   :  { %v8864_v51 = vpop.eup %8863  ;;  %7126 = vperm.xlu0 %8580, %v8862_v20  }
0x50a8   :  { %7129 = vperm.xlu1 %8581, %v8864_v51  }
0x5122   :  { %v7127_v39 = vpop.permute.xlu0 %7126 }
0x5123   :  { %v7130_v22 = vpop.permute.xlu1 %7129  ;;  %v7134_v24 = vrot.slane %v7127_v39, %v11054_v33 }
0x5124   :  { %v7138_v36 = vrot.slane %v7130_v22, %v11054_v33 }
0x5126   :  { %v7139_v1 = vsel %vm635_vm4, %v7138_v36, %v7134_v24 }
0x5127   :  { %v7141_v61 = vsel %vm638_vm5, %v7139_v1, 0.0 }
0x5128   :  { %7142 = vadd.xlane.f32.xlu1 %v7141_v61 }
0x51b1   :  { %v7143_v38 = vpop.xlane.xlu1 %7142 }
0x51b2   :  { %v7148_v44 = vrot.slane %v7143_v38, %v9269_v53  ;;  %v7152_v14 = vrot.slane %v7143_v38, %v9428_v0  ;;  %v9051_v38 = vld [vmem:[#allocation6 + $0x1c0] sm:$0xff] }
0x51b4   :  { %8865 = vrcp.f32 %v7148_v44  ;;  %v9053_v44 = vld [vmem:[#allocation6 + $0x140] sm:$0xff] }
0x51b5   :  { %8867 = vrcp.f32 %v7152_v14  ;;  %v9054_v14 = vld [vmem:[#allocation6 + $0xc8] sm:$0xff] }
0x51c1   :  { %v8866_v60 = vpop.eup %8865 }
0x51c2   :  { %v7156_v45 = vmul.f32 %v8866_v60, %v8862_v20  ;;  %v8868_v9 = vpop.eup %8867  ;;  %v9055_v60 = vld [vmem:[#allocation6 + $0xc0] sm:$0xff] }
0x51c3   :  { %v7158_v13 = vmul.f32 %v8868_v9, %v8864_v51  ;;  %v9057_v9 = vld [vmem:[#allocation6 + $0x40] sm:$0xff] }
0x51c4   :  { %7161 = vperm.xlu0 %8580, %v7156_v45   ;;  %v9056_v45 = vld [vmem:[#allocation6 + $0x48] sm:$0xff] }
0x51c8   :  { %7166 = vperm.xlu0 %8580, %v7158_v13  }
0x51cc   :  { %8582 = vset.pattern.permute.xlu0 %v11055_v3 }
0x523f   :  { %v7162_v33 = vpop.permute.xlu0 %7161 }
0x5240   :  { %v7169_v28 = vmul.f32 %v11106_v7, %v7162_v33 }
0x5242   :  { %v7171_v12 = vsel %vm616_vm3, %v7169_v28, 0.0 }
0x5243   :  { %v7172_v23 = vrot.slane %v7171_v12, 4  ;;  %v7167_v18 = vpop.permute.xlu0 %7166 }
0x5244   :  { %v7170_v53 = vmul.f32 %v10710_v27, %v7167_v18  ;;  %v9041_v27 = vld [vmem:[#allocation6 + $0x1b0] sm:$0xff] }
0x5245   :  { %v7173_v30 = vadd.f32 %v7172_v23, %v7171_v12 }
0x5246   :  { %v7178_v25 = vsel %vm616_vm3, %v7170_v53, 0.0 }
0x5247   :  { %v7174_v26 = vrot.slane %v7173_v30, 2  ;;  %v7179_v16 = vrot.slane %v7178_v25, 4 }
0x5249   :  { %v7175_v29 = vadd.f32 %v7174_v26, %v7173_v30  ;;  %v7180_v5 = vadd.f32 %v7179_v16, %v7178_v25 }
0x524b   :  { %v7181_v21 = vrot.slane %v7180_v5, 2  ;;  %v7176_v46 = vrot.slane %v7175_v29, 1 }
0x524d   :  { %v7182_v56 = vadd.f32 %v7181_v21, %v7180_v5  ;;  %v7177_v10 = vadd.f32 %v7176_v46, %v7175_v29 }
0x524f   :  { %v7183_v3 = vrot.slane %v7182_v56, 1 }
0x5251   :  { %v7184_v32 = vadd.f32 %v7183_v3, %v7182_v56 }
0x5253   :  { %v10889_v4 = vsel %vm635_vm4, %v7184_v32, %v7177_v10 }
0x5254   :  { %8175 = vmatmul.mubr.msk.f32.vlgmr.msra.gmra.mxu1 %vm64_vm0, %v10889_v4 }
0x5255   :  { %7543 = vmatpush1.msra.mxu1 %v9041_v27  ;;  %7582 = vmatprep.mubr.f32.mxu1 %v11036_v49 }
0x5256   :  { %7544 = vmatprep.subr.mxu1 %v9042_v42 }
0x5257   :  { %7545 = vmatpush1.msra.mxu1 %v9043_v50 }
0x5258   :  { %7546 = vmatprep.subr.mxu1 %v9044_v17 }
0x5259   :  { %7547 = vmatpush1.msra.mxu1 %v9045_v59 }
0x525a   :  { %7548 = vmatprep.subr.mxu1 %v9046_v62 }
0x525b   :  { %7549 = vmatpush1.msra.mxu1 %v9047_v34 }
0x525c   :  { %7688 = vmatprep.subr.mxu1 %v9048_v6 }
0x5314   :  { %v7363_v58 = vpop.f32.mrf.mxu1 }
0x5315   :  { %v7368_v52 = vadd.f32 %v7363_v58, %v10848_v8  ;;  %v9052_v8 = vld [vmem:[#allocation6 + $0x148] sm:$0xff]  ;;  %v9061_v58 = vld [vmem:[#allocation6 + $0xd8] sm:$0xff] }
0x5316   :  { %v7365_v20 = vpop.f32.mrf.mxu1 }
0x5317   :  { %v7369_v51 = vadd.f32 %v7365_v20, %v7291_v48  ;;  %v8176_v29 = vmul.f32 -1.442695, %v7368_v52  ;;  %v9063_v48 = vld [vmem:[#allocation6 + $0x58] sm:$0xff] }
0x5319   :  { %v7378_v39 = vrot.slane %v7369_v51, 6 }
0x531b   :  { %7379 = vrot.lane.b32.xlu0 %v7378_v39, %s9135_s15 }
0x538d   :  { %v7380_v22 = vpop.permute.xlu0 %7379 }
0x538e   :  { %v7382_v24 = vsel %vm935_vm6, %v7369_v51, %v7380_v22 }
0x538f   :  { %v7383_v36 = vsel %vm937_vm7, %v7382_v24, -inf }
0x5390   :  { %7384 = vmax.xlane.f32.xlu1 %v7383_v36 }
0x5419   :  { %v7385_v0 = vpop.xlane.xlu1 %7384 }
0x541a   :  { %v7386_v1 = vsub.f32 %v7382_v24, %v7385_v0 }
0x541c   :  { %v7387_v61 = vmul.f32 1.442695, %v7386_v1 }
0x541e   :  { %8869 = vpow2.f32 %v7387_v61 }
0x542b   :  { %v8870_v47 = vpop.eup %8869 }
0x542c   :  { %8525 = vmatmul.mubr.msk.f32.vlgmr.msra.gmra.mxu0 %vm945_vm9, %v8870_v47 }
0x542d   :  { %7616 = vmatpush1.msra.mxu0 %v9051_v38  ;;  %7655 = vmatprep.mubr.f32.mxu0 %v11036_v49 }
0x542e   :  { %7617 = vmatprep.subr.mxu0 %v9052_v8 }
0x542f   :  { %7618 = vmatpush1.msra.mxu0 %v9053_v44 }
0x5430   :  { %7619 = vmatprep.subr.mxu0 %v9054_v14 }
0x5431   :  { %7620 = vmatpush1.msra.mxu0 %v9055_v60 }
0x5432   :  { %7621 = vmatprep.subr.mxu0 %v9056_v45 }
0x5433   :  { %7622 = vmatpush1.msra.mxu0 %v9057_v9 }
0x5434   :  { %8180 = vmatmul.mubr.msk.f32.vlgmr.msra.gmra.mxu0 %vm64_vm0, %v10817_v15  ;;  %8527 = vmatprep.subr.mxu0 %v11036_v49 }
0x5435   :  { %8528 = vmatpush3.msk.msra.mxu0 %vm949_vm8, %v10834_v35  ;;  %8529 = vmatprep.mubr.msk.f32.mxu0 %vm9132_vm1, %v11036_v49 }
0x54ec   :  { %v7458_v13 = vpop.f32.mrf.mxu0 }
0x54ed   :  { %7464 = vperm.xlu0 %8582, %v7458_v13  }
0x54ee   :  { %v8526_v33 = vpop.f32.mrf.mxu0 }
0x5568   :  { %v7465_v7 = vpop.permute.xlu0 %7464 }
0x5569   :  { %8871 = vrcp.f32 %v7465_v7 }
0x556a   :  { %8873 = vtanh.f32 %v7368_v52  ;;  %v9064_v52 = vld [vmem:[#allocation6 + $0x50] sm:$0xff] }
0x556b   :  { %8875 = vpow2.f32 %v8176_v29 }
0x5576   :  { %v8872_v28 = vpop.eup %8871 }
0x5577   :  { %v7468_v12 = vmul.f32 %v8872_v28, %v7458_v13  ;;  %v8874_v16 = vpop.eup %8873 }
0x5578   :  { %v8876_v5 = vpop.eup %8875 }
0x5579   :  { %v7469_v23 = vsub.f32 1.0, %v7468_v12  ;;  %v7373_v21 = vadd.f32 1.0, %v8876_v5 }
0x557b   :  { %v7471_v18 = vrot.slane %v7469_v23, 6  ;;  %8877 = vrcp.f32 %v7373_v21 }
0x557d   :  { %v7473_v53 = vmul.f32 %v7471_v18, %v7468_v12 }
0x557f   :  { %v7475_v30 = vrot.slane %v7473_v53, 2  ;;  %v7480_v25 = vsub.f32 %v7468_v12, %v7473_v53 }
0x5581   :  { %7487 = vrot.lane.b32.xlu1 %v7475_v30, %s9125_s0  ;;  %v7492_v26 = vsub.f32 %v7469_v23, %v7475_v30  ;;  %v7482_v35 = vrot.slane %v7480_v25, 2 }
0x5583   :  { %7494 = vrot.lane.b32.xlu0 %v7492_v26, %s9125_s0 }
0x5585   :  { %7483 = vrot.lane.b32.xlu1 %v7482_v35, %s9137_s2 }
0x5587   :  { %7500 = vrot.lane.b32.xlu0 %v8874_v16, %s9137_s2 }
0x5588   :  { %v8878_v46 = vpop.eup %8877 }
0x558b   :  { %7476 = vrot.lane.b32.xlu0 %v7475_v30, %s9137_s2 }
0x55f3   :  { %v7488_v56 = vpop.permute.xlu1 %7487 }
0x55f4   :  { %v7490_v3 = vmul.f32 %v8878_v46, %v7488_v56 }
0x55f5   :  { %v7495_v10 = vpop.permute.xlu0 %7494 }
0x55f6   :  { %v7497_v32 = vadd.f32 %v7495_v10, %v7490_v3 }
0x55f7   :  { %v7484_v59 = vpop.permute.xlu1 %7483 }
0x55f9   :  { %v7501_v27 = vpop.permute.xlu0 %7500 }
0x55fa   :  { %v7503_v42 = vmul.f32 %v7501_v27, %v7497_v32 }
0x55fc   :  { %7505 = vrot.lane.b32.xlu0 %v7503_v42, %s9125_s0  ;;  %v7926_v42 = vld [vmem:[#allocation6 + $0x1f8] sm:$0xff] }
0x55fd   :  { %v7477_v50 = vpop.permute.xlu0 %7476  ;;  %8532 = vmatprep.subr.mxu0 %v7926_v42 }
0x55fe   :  { %v7479_v17 = vmul.f32 %v8878_v46, %v7477_v50 }
0x5600   :  { %v7486_v62 = vadd.f32 %v7484_v59, %v7479_v17 }
0x5602   :  { %v7498_v34 = vmul.f32 %v7486_v62, %v10764_v2  ;;  %v9062_v2 = vld [vmem:[#allocation6 + $0xd0] sm:$0xff] }
0x566e   :  { %v7506_v6 = vpop.permute.xlu0 %7505 }
0x566f   :  { %v7508_v55 = vadd.f32 %v7506_v6, %v7498_v34 }
0x5671   :  { %8879 = vtanh.f32 %v7508_v55 }
0x567e   :  { %v8880_v63 = vpop.eup %8879 }
0x567f   :  { %7511 = vrot.lane.b32.xlu1 %v8880_v63, %s9137_s2  ;;  %v7925_v63 = vld [vmem:[#allocation6 + $0x178] sm:$0xff] }
0x56f1   :  { %v7512_v40 = vpop.permute.xlu1 %7511 }
0x56f2   :  { %v7514_v19 = vmul.f32 %v8878_v46, %v7512_v40  ;;  %v7924_v40 = vld [vmem:[#allocation6 + $0xf8] sm:$0xff] }
0x56f4   :  { %8179 = vmatmul.mubr.msk.f32.vlgmr.msra.gmra.mxu1 %vm64_vm0, %v7514_v19  ;;  %v7923_v19 = vld [vmem:[#allocation6 + $0x78] sm:$0xff] }
0x56f5   :  { %7689 = vmatpush1.msra.mxu1 %v9058_v11  ;;  %7728 = vmatprep.mubr.f32.mxu1 %v11036_v49  ;;  %v7657_v49 = vpop.f32.mrf.mxu0 }
0x56f6   :  { %7690 = vmatprep.subr.mxu1 %v9059_v31  ;;  %v11107_v31 = vld [vmem:[#allocation18_spill] sm:$0xff] }
0x56f7   :  { %7691 = vmatpush1.msra.mxu1 %v9060_v54  ;;  %v7659_v36 = vpop.f32.mrf.mxu0  ;;  %v7882_v54 = vrot.slane %v11107_v31, 7 }
0x56f8   :  { %7692 = vmatprep.subr.mxu1 %v9061_v58  ;;  %v11108_v58 = vld [vmem:[#allocation28_spill] sm:$0xff] }
0x56f9   :  { %7693 = vmatpush1.msra.mxu1 %v9062_v2  ;;  %v7884_v2 = vrot.slane %v11108_v58, 6 }
0x56fa   :  { %7694 = vmatprep.subr.mxu1 %v9063_v48 }
0x56fb   :  { %7695 = vmatpush1.msra.mxu1 %v9064_v52  ;;  %v7888_v52 = vrot.slane %v10624_v57, 4 }
0x56fc   :  { %8181 = vmatmul.mubr.msk.f32.vlgmr.msra.gmra.mxu1 %vm64_vm0, %v10889_v4 }
0x57b4   :  { %v7584_v20 = vpop.f32.mrf.mxu1 }
0x57b5   :  { %v7589_v39 = vadd.f32 %v7584_v20, %v9618_v43  ;;  %v7897_v20 = vrot.slane %v11107_v31, 1 }
0x57b6   :  { %v7586_v51 = vpop.f32.mrf.mxu1 }
0x57b7   :  { %v7590_v22 = vadd.f32 %v7586_v51, %v11051_v37  ;;  %v7662_v24 = vadd.f32 %v7657_v49, %v7589_v39  ;;  %v11110_v51 = vld [vmem:[#allocation23_spill] sm:$0xff] }
0x57b8   :  { %v7907_v39 = vsel %vm751_vm2, %v11110_v51, %v7882_v54 }
0x57b9   :  { %v7663_v61 = vadd.f32 %v7659_v36, %v7590_v22  ;;  %v7890_v22 = vrot.slane %v10817_v15, 3  ;;  %v7908_v36 = vsel %vm935_vm6, %v7907_v39, %v7884_v2 }
0x57bc   :  { %v7730_v0 = vpop.f32.mrf.mxu1 }
0x57bd   :  { %v7735_v1 = vadd.f32 %v7730_v0, %v7662_v24  ;;  %v7901_v0 = vrot.slane %v10624_v57, 6 }
0x57be   :  { %v7732_v47 = vpop.f32.mrf.mxu1 }
0x57bf   :  { %v7736_v38 = vadd.f32 %v7732_v47, %v7663_v61  ;;  %v8182_v16 = vmul.f32 -1.442695, %v7735_v1  ;;  %v7918_v61 = vsel %vm751_vm2, %v7897_v20, %v11108_v58  ;;  %v7903_v47 = vrot.slane %v10817_v15, 5 }
0x57c1   :  { %v7745_v8 = vrot.slane %v7736_v38, 6 }
0x57c3   :  { %7746 = vrot.lane.b32.xlu0 %v7745_v8, %s9135_s15 }
0x5835   :  { %v7747_v44 = vpop.permute.xlu0 %7746 }
0x5836   :  { %v7749_v4 = vsel %vm935_vm6, %v7736_v38, %v7747_v44 }
0x5837   :  { %v7750_v14 = vsel %vm937_vm7, %v7749_v4, -inf }
0x5838   :  { %7751 = vmax.xlane.f32.xlu1 %v7750_v14  ;;  %v7895_v14 = vrot.slane %v11110_v51, 2 }
0x58c1   :  { %v7752_v43 = vpop.xlane.xlu1 %7751 }
0x58c2   :  { %v7753_v60 = vsub.f32 %v7749_v4, %v7752_v43 }
0x58c4   :  { %v7754_v45 = vmul.f32 1.442695, %v7753_v60 }
0x58c6   :  { %8881 = vpow2.f32 %v7754_v45 }
0x58d3   :  { %v8882_v37 = vpop.eup %8881 }
0x58d4   :  { %8530 = vmatmul.mubr.msk.f32.vlgmr.msra.gmra.mxu0 %vm945_vm9, %v8882_v37 }
0x58d5   :  { %8533 = vmatpush3.msra.mxu0 %v7926_v42 }
0x58d6   :  { %8534 = vmatprep.subr.mxu0 %v7925_v63 }
0x58d7   :  { %8535 = vmatpush3.msra.mxu0 %v7925_v63 }
0x58d8   :  { %8536 = vmatprep.subr.mxu0 %v7924_v40 }
0x58d9   :  { %8537 = vmatpush3.msra.mxu0 %v7924_v40 }
0x58da   :  { %8538 = vmatprep.subr.mxu0 %v7923_v19 }
0x58db   :  { %8539 = vmatpush3.msra.mxu0 %v7923_v19 }
0x5994   :  { %v7825_v9 = vpop.f32.mrf.mxu0 }
0x5995   :  { %7831 = vperm.xlu0 %8582, %v7825_v9  }
0x5996   :  { %v8531_v13 = vpop.f32.mrf.mxu0 }
0x5997   :  { %v7927_v13 = vld [vmem:[%s10980_s5 + $0x7] ss:$0 sm:$0xff] }
0x5a10   :  { %v7832_v33 = vpop.permute.xlu0 %7831 }
0x5a11   :  { %8883 = vrcp.f32 %v7832_v33 }
0x5a12   :  { %8885 = vtanh.f32 %v7735_v1 }
0x5a13   :  { %8887 = vpow2.f32 %v8182_v16 }
0x5a1e   :  { %v8884_v7 = vpop.eup %8883 }
0x5a1f   :  { %v7835_v28 = vmul.f32 %v8884_v7, %v7825_v9  ;;  %v8886_v25 = vpop.eup %8885 }
0x5a20   :  { %v8888_v29 = vpop.eup %8887 }
0x5a21   :  { %v7836_v12 = vsub.f32 1.0, %v7835_v28  ;;  %v7740_v5 = vadd.f32 1.0, %v8888_v29 }
0x5a23   :  { %v7838_v23 = vrot.slane %v7836_v12, 6  ;;  %8889 = vrcp.f32 %v7740_v5 }
0x5a25   :  { %v7840_v18 = vmul.f32 %v7838_v23, %v7835_v28 }
0x5a27   :  { %v7842_v53 = vrot.slane %v7840_v18, 2  ;;  %v7847_v26 = vsub.f32 %v7835_v28, %v7840_v18 }
0x5a29   :  { %7854 = vrot.lane.b32.xlu0 %v7842_v53, %s9125_s0  ;;  %v7859_v30 = vsub.f32 %v7836_v12, %v7842_v53  ;;  %v7849_v35 = vrot.slane %v7847_v26, 2 }
0x5a2d   :  { %7861 = vrot.lane.b32.xlu0 %v7859_v30, %s9125_s0 }
0x5a30   :  { %v8890_v46 = vpop.eup %8889 }
0x5a31   :  { %7867 = vrot.lane.b32.xlu0 %v8886_v25, %s9137_s2 }
0x5a35   :  { %7843 = vrot.lane.b32.xlu0 %v7842_v53, %s9137_s2 }
0x5a39   :  { %7850 = vrot.lane.b32.xlu0 %v7849_v35, %s9137_s2 }
0x5a9b   :  { %v7855_v21 = vpop.permute.xlu0 %7854 }
0x5a9c   :  { %v7857_v3 = vmul.f32 %v8890_v46, %v7855_v21 }
0x5a9f   :  { %v7862_v56 = vpop.permute.xlu0 %7861 }
0x5aa0   :  { %v7864_v10 = vadd.f32 %v7862_v56, %v7857_v3 }
0x5aa3   :  { %v7868_v32 = vpop.permute.xlu0 %7867 }
0x5aa4   :  { %v7870_v27 = vmul.f32 %v7868_v32, %v7864_v10 }
0x5aa6   :  { %7872 = vrot.lane.b32.xlu0 %v7870_v27, %s9125_s0 }
0x5aa7   :  { %v7844_v50 = vpop.permute.xlu0 %7843 }
0x5aa8   :  { %v7846_v59 = vmul.f32 %v8890_v46, %v7844_v50 }
0x5aab   :  { %v7851_v17 = vpop.permute.xlu0 %7850 }
0x5aac   :  { %v7853_v62 = vadd.f32 %v7851_v17, %v7846_v59 }
0x5aae   :  { %v7865_v34 = vmul.f32 %v7853_v62, %v10813_v41  ;;  %v11109_v41 = vld [vmem:[#allocation20_spill] sm:$0xff] }
0x5aaf   :  { %v7886_v48 = vrot.slane %v11109_v41, 5  ;;  %v7899_v49 = vrot.slane %v11109_v41, 7 }
0x5ab1   :  { %v7910_v38 = vsel %vm7909_vm10, %v7908_v36, %v7886_v48  ;;  %v7919_v57 = vsel %vm935_vm6, %v7918_v61, %v7899_v49 }
0x5ab2   :  { %v7911_v4 = vsel %vm949_vm8, %v7910_v38, %v7888_v52  ;;  %v7920_v45 = vsel %vm7909_vm10, %v7919_v57, %v7901_v0 }
0x5ab3   :  { %v7913_v43 = vsel %vm7912_vm11, %v7911_v4, %v7890_v22  ;;  %v7921_v15 = vsel %vm949_vm8, %v7920_v45, %v7903_v47 }
0x5b18   :  { %v7873_v6 = vpop.permute.xlu0 %7872 }
0x5b19   :  { %v7875_v55 = vadd.f32 %v7873_v6, %v7865_v34 }
0x5b1b   :  { %8891 = vtanh.f32 %v7875_v55 }
0x5b28   :  { %v8892_v11 = vpop.eup %8891 }
0x5b29   :  { %7878 = vrot.lane.b32.xlu0 %v8892_v11, %s9137_s2 }
0x5b9b   :  { %v7879_v24 = vpop.permute.xlu0 %7878 }
0x5b9c   :  { %v7881_v1 = vmul.f32 %v8890_v46, %v7879_v24 }
0x5b9e   :  { %v7893_v8 = vrot.slane %v7881_v1, 2  ;;  %v7905_v44 = vrot.slane %v7881_v1, 4 }
0x5ba0   :  { %v7915_v60 = vsel %vm7914_vm12, %v7913_v43, %v7893_v8  ;;  %v7922_v9 = vsel %vm7912_vm11, %v7921_v15, %v7905_v44 }
0x5ba1   :  { %v7917_v37 = vsel %vm7916_vm13, %v7915_v60, %v7895_v14 }
0x5ba2   :  { %8540 = vmatprep.mubr.msk.f32.mxu0 %vm64_vm0, %v7917_v37 }
0x5ba3   :  { %8541 = vmatmul.mubr.msk.f32.vlgmr.msra.gmra.mxu0 %vm64_vm0, %v7922_v9 }
0x5c63   :  { %v8542_v33 = vpop.f32.mrf.mxu0 }
0x5c64   :  { %v8006_v7 = vadd.f32 %v8542_v33, %v7927_v13 }
0x5c65   :  { %v8000_v28 = vpop.f32.mrf.mxu0 }
0x5c66   :  { %v8001_v12 = vadd.f32 %v8000_v28, %v7927_v13  ;;  %v8011_v23 = vsel %vm7914_vm12, %v8006_v7, -inf }
0x5c67   :  { %8012 = vmax.xlane.f32.xlu0 %v8011_v23 }
0x5c68   :  { %8009 = vmax.xlane.f32.xlu1 %v8001_v12 }
0x5cf0   :  { %v8013_v18 = vpop.xlane.xlu0 %8012 }
0x5cf1   :  { %v8015_v53 = vsub.f32 %v8006_v7, %v8013_v18  ;;  %v8010_v30 = vpop.xlane.xlu1 %8009 }
0x5cf2   :  { %v8014_v25 = vsub.f32 %v8001_v12, %v8010_v30 }
0x5cf3   :  { %v8018_v26 = vmul.f32 1.442695, %v8015_v53 }
0x5cf4   :  { %v8016_v35 = vmul.f32 1.442695, %v8014_v25 }
0x5cf6   :  { %8893 = vpow2.f32 %v8016_v35 }
0x5cf7   :  { %8895 = vpow2.f32 %v8018_v26 }
0x5d03   :  { %v8894_v16 = vpop.eup %8893 }
0x5d04   :  { %v8896_v29 = vpop.eup %8895  ;;  %8020 = vadd.xlane.f32.xlu1 %v8894_v16 }
0x5d05   :  { %v8022_v5 = vsel %vm7914_vm12, %v8896_v29, 0.0 }
0x5d08   :  { %8023 = vadd.xlane.f32.xlu1 %v8022_v5 }
0x5d8d   :  { %v8021_v21 = vpop.xlane.xlu1 %8020 }
0x5d8e   :  { %8897 = vlog2.f32 %v8021_v21 }
0x5d91   :  { %v8024_v46 = vpop.xlane.xlu1 %8023 }
0x5d92   :  { %8899 = vlog2.f32 %v8024_v46 }
0x5d9b   :  { %v8898_v56 = vpop.eup %8897 }
0x5d9c   :  { %v8026_v3 = vmul.f32 0.6931472, %v8898_v56 }
0x5d9e   :  { %v8029_v10 = vsub.f32 %v8014_v25, %v8026_v3 }
0x5d9f   :  { %v8900_v32 = vpop.eup %8899 }
0x5da0   :  { %8031 = vst [vmem:[%s10981_s6] sm:$0xff] %v8029_v10  ;;  %v8028_v27 = vmul.f32 0.6931472, %v8900_v32 }
0x5da2   :  { %v8030_v42 = vsub.f32 %v8015_v53, %v8028_v27 }
0x5da4   :  { %8032 = vst [vmem:[%s10981_s6 + $0x8] sm:$0x3f] %v8030_v42 }
0x5da5   :  { %8037 = vsyncpa [#allocation5], 1 }
0x5da6   :  { %8038 = vsyncpa [#allocation7], 1 }

</bundles_post_ra>
